<compile_context>
chip_gen: v6e
topology: v6e:2x2x1
jax: 0.10.0
libtpu: 0.0.40
codegen_flags: <defaults>
</compile_context>

<pallas_src>
import functools

import jax
import jax.numpy as jnp
from jax import lax
from jax.experimental import pallas as pl
from jax.experimental.pallas import tpu as pltpu

LEAKY_SLOPE = 0.01
BN_EPS = 1e-5
LANE = 128
VMEM_LIMIT = 48 * 1024 * 1024  # conservative: below physical VMEM on v5e/v6e/v7x

_TAPS = [(p, q) for p in range(3) for q in range(3)]


def _params(n_grid_axes):
    return pltpu.CompilerParams(
        dimension_semantics=("parallel",) * n_grid_axes,
        vmem_limit_bytes=VMEM_LIMIT)


def _round_up(x, m):
    return (x + m - 1) // m * m


def _leaky(v, slope):
    return jnp.where(v >= 0.0, v, slope * v)


# ----------------------------------------------------------------------------
# Kernel 1: dense 3x3 conv (pad=1) + folded ABN, concat-fused over input parts.
# The input is padded + flattened on the host (already bf16); the 9 taps are
# shifted lane-slices of the same VMEM block, each feeding one
# (tco, Cin) x (Cin, n_out) MXU matmul.  Grid = (batch, Cout tiles).
# ----------------------------------------------------------------------------
def _conv3x3_kernel(*refs, n_parts, Wp, n_out, slope):
    s_ref = refs[2 * n_parts]
    t_ref = refs[2 * n_parts + 1]
    o_ref = refs[2 * n_parts + 2]
    acc = None
    for part in range(n_parts):
        x = refs[2 * part][0]                  # (Cin, L) bf16 (cast hoisted to host)
        w_ref = refs[2 * part + 1]             # (9, tco, Cin) bf16
        for t_idx, (p, q) in enumerate(_TAPS):
            off = p * Wp + q
            c = jnp.dot(w_ref[t_idx], x[:, off:off + n_out],
                        preferred_element_type=jnp.float32)
            acc = c if acc is None else acc + c
    y = acc * s_ref[...] + t_ref[...]
    o_ref[0] = _leaky(y, slope).astype(o_ref.dtype)


def _prep_conv_input(x, L, Wp):
    """Pad spatially by 1, flatten, pad the flat axis so every 3x3 tap slice is
    in-range, and cast to bf16 (one host cast instead of 9 in-kernel casts)."""
    B, C, H, W = x.shape
    Hp = H + 2
    xf = jnp.pad(x.astype(jnp.bfloat16), ((0, 0), (0, 0), (1, 1), (1, 1)))
    xf = xf.reshape(B, C, Hp * Wp)
    return jnp.pad(xf, ((0, 0), (0, 0), (0, L - Hp * Wp)))


def conv3x3_abn(xs, ws, scale, shift, slope=LEAKY_SLOPE, out_dtype=jnp.bfloat16):
    """3x3 conv (stride 1, pad 1, no conv bias) over the channel-concat of `xs`,
    with folded eval-mode ABN (scale/shift + leaky) epilogue."""
    B, _, H, W = xs[0].shape
    Wp = W + 2
    n_out = _round_up(H * Wp, LANE)            # lane-dense output (unmasked stores)
    L = _round_up(n_out + 2 * Wp + 2, LANE)
    Cout = ws[0].shape[0]
    tco = 128 if Cout % 128 == 0 else Cout      # Cout tiling -> multiple grid steps / core
    n_co = Cout // tco

    args, in_specs = [], []
    cin_total = 0
    for x, w in zip(xs, ws):
        C = x.shape[1]
        cin_total += C
        xf = _prep_conv_input(x, L, Wp)
        w9 = jnp.transpose(w.reshape(Cout, C, 9), (2, 0, 1)).astype(jnp.bfloat16)
        args += [xf, w9]
        in_specs += [pl.BlockSpec((1, C, L), lambda i, j: (i, 0, 0)),
                     pl.BlockSpec((9, tco, C), lambda i, j: (0, j, 0))]
    args += [scale.reshape(Cout, 1), shift.reshape(Cout, 1)]
    in_specs += [pl.BlockSpec((tco, 1), lambda i, j: (j, 0)),
                 pl.BlockSpec((tco, 1), lambda i, j: (j, 0))]

    flops = 2 * B * Cout * cin_total * 9 * n_out
    bytes_acc = (2 * B * cin_total * L + 2 * 9 * Cout * cin_total + 8 * Cout
                 + B * Cout * n_out * jnp.dtype(out_dtype).itemsize)

    y = pl.pallas_call(
        functools.partial(_conv3x3_kernel, n_parts=len(xs), Wp=Wp,
                          n_out=n_out, slope=slope),
        out_shape=jax.ShapeDtypeStruct((B, Cout, n_out), out_dtype),
        grid=(B, n_co),
        in_specs=in_specs,
        out_specs=pl.BlockSpec((1, tco, n_out), lambda i, j: (i, j, 0)),
        compiler_params=_params(2),
        cost_estimate=pl.CostEstimate(flops=int(flops), transcendentals=0,
                                      bytes_accessed=int(bytes_acc)),
    )(*args)
    # TODO(synk): eliminate this crop->re-pad round trip by keeping a padded,
    # masked slab as the canonical inter-conv activation layout.
    return y[:, :, :H * Wp].reshape(B, Cout, H, Wp)[:, :, :, :W]


# ----------------------------------------------------------------------------
# Kernel 2: depthwise 3x3 conv, stride 2, pad 1, groups=C, fused folded ABN.
# Input is a space-to-depth phase slab (B, C, 4, L) so each of the 9 stride-2
# taps is a shifted lane-slice; output is lane-dense (flattened spatial).
# ----------------------------------------------------------------------------
def _dw_kernel(x_ref, w_ref, s_ref, t_ref, o_ref, *, Wph, n_out, slope):
    x = x_ref[0].astype(jnp.float32)                        # (C, 4, L)
    acc = None
    for p in range(3):
        for q in range(3):
            off = (p // 2) * Wph + (q // 2)
            tap = x[:, (p % 2) * 2 + (q % 2), off:off + n_out]   # (C, n_out)
            c = tap * w_ref[p * 3 + q]                           # (C, 1) vreg bcast
            acc = c if acc is None else acc + c
    y = acc * s_ref[...] + t_ref[...]
    o_ref[0] = _leaky(y, slope).astype(o_ref.dtype)


def dwconv3x3_s2_abn(x, w, scale, shift, slope=LEAKY_SLOPE, out_dtype=jnp.bfloat16):
    B, C, H, W = x.shape
    assert H % 2 == 0 and W % 2 == 0
    Ho, Wo = H // 2, W // 2
    Hph, Wph = (H + 2) // 2, (W + 2) // 2
    n_out = _round_up(Ho * Wph, LANE)
    L = _round_up(n_out + Wph + 1, LANE)
    xp = jnp.pad(x, ((0, 0), (0, 0), (1, 1), (1, 1)))
    ph = xp.reshape(B, C, Hph, 2, Wph, 2).transpose(0, 1, 3, 5, 2, 4)
    ph = ph.reshape(B, C, 4, Hph * Wph)
    ph = jnp.pad(ph, ((0, 0), (0, 0), (0, 0), (0, L - Hph * Wph)))
    w9 = jnp.transpose(w.reshape(C, 9)).reshape(9, C, 1)     # compact; bcast in-kernel
    s2 = scale.reshape(C, 1)
    t2 = shift.reshape(C, 1)
    in_item = jnp.dtype(ph.dtype).itemsize
    bytes_acc = (B * C * 4 * L * in_item + 9 * C * 4 + 2 * C * 4
                 + B * C * n_out * jnp.dtype(out_dtype).itemsize)
    y = pl.pallas_call(
        functools.partial(_dw_kernel, Wph=Wph, n_out=n_out, slope=slope),
        out_shape=jax.ShapeDtypeStruct((B, C, n_out), out_dtype),
        grid=(B,),
        in_specs=[
            pl.BlockSpec((1, C, 4, L), lambda i: (i, 0, 0, 0)),
            pl.BlockSpec((9, C, 1), lambda i: (0, 0, 0)),
            pl.BlockSpec((C, 1), lambda i: (0, 0)),
            pl.BlockSpec((C, 1), lambda i: (0, 0)),
        ],
        out_specs=pl.BlockSpec((1, C, n_out), lambda i: (i, 0, 0)),
        compiler_params=_params(1),
        cost_estimate=pl.CostEstimate(flops=int(2 * 9 * B * C * n_out),
                                      transcendentals=0,
                                      bytes_accessed=int(bytes_acc)),
    )(ph, w9, s2, t2)
    return y[:, :, :Ho * Wph].reshape(B, C, Ho, Wph)[:, :, :, :Wo]


# ----------------------------------------------------------------------------
# Kernel 3: whole SpatialGCN (k/v/q projections, attention bmm's, softmax,
# conv_wg+bn_wg, out conv+ABN, gamma-residual) fused into one kernel per batch.
# All contractions are NT-form (no transposes); bf16 MXU feeds, f32 accumulate.
# ----------------------------------------------------------------------------
def _spatial_gcn_kernel(g_ref, x_ref, wk_ref, bk_ref, wv_ref, bv_ref,
                        wq_ref, bq_ref, wwg_ref, twg_ref, wout_ref, tout_ref,
                        o_ref, *, slope):
    bf = jnp.bfloat16
    xb = x_ref[0]                                                    # (P, HWl) bf16
    x32 = xb.astype(jnp.float32)
    k = jnp.dot(wk_ref[...], xb, preferred_element_type=jnp.float32) + bk_ref[...]
    v = jnp.dot(wv_ref[...], xb, preferred_element_type=jnp.float32) + bv_ref[...]
    q = jnp.dot(wq_ref[...], xb, preferred_element_type=jnp.float32) + bq_ref[...]
    # z[j, i] = sum_n v[j, n] q[i, n] == AV[i, j]  (AV = node_q @ node_v^T)
    z = lax.dot_general(v.astype(bf), q.astype(bf), (((1,), (1,)), ((), ())),
                        preferred_element_type=jnp.float32)           # (c, c)
    z = z - jnp.max(z, axis=0, keepdims=True)                         # softmax over j
    e = jnp.exp(z)
    st = e * pl.reciprocal(jnp.sum(e, axis=0, keepdims=True), approx=True)
    y = jnp.dot(st.astype(bf), k.astype(bf),
                preferred_element_type=jnp.float32)                   # (c, HWl)
    avw = jnp.dot(wwg_ref[...], y.astype(bf),
                  preferred_element_type=jnp.float32) + twg_ref[...]
    out = jnp.dot(wout_ref[...], avw.astype(bf),
                  preferred_element_type=jnp.float32) + tout_ref[...]
    out = _leaky(out, slope)
    o_ref[0] = (g_ref[0] * out + x32).astype(o_ref.dtype)


def spatial_gcn_fused(x_flat, p):
    B, P, HWl = x_flat.shape
    c = p['k_w'].shape[0]
    bf = jnp.bfloat16
    wwg_scaled = (p['wg_bn_s'][:, None] * p['wg_w']).astype(bf)       # fold bn_wg scale
    twg = p['wg_bn_t'].reshape(c, 1)
    wout_scaled = (p['out_bn_s'][:, None] * p['out_w']).astype(bf)    # fold out-ABN scale
    tout = (p['out_bn_s'] * p['out_b'] + p['out_bn_t']).reshape(P, 1)
    args = [p['gamma'], x_flat.astype(bf),
            p['k_w'].astype(bf), p['k_b'].reshape(c, 1),
            p['v_w'].astype(bf), p['v_b'].reshape(c, 1),
            p['q_w'].astype(bf), p['q_b'].reshape(c, 1),
            wwg_scaled, twg, wout_scaled, tout]
    in_specs = [pl.BlockSpec(memory_space=pltpu.MemorySpace.SMEM),
                pl.BlockSpec((1, P, HWl), lambda i: (i, 0, 0))]
    in_specs += [pl.BlockSpec(a.shape, lambda i, nd=a.ndim: (0,) * nd)
                 for a in args[2:]]
    flops = 2 * B * HWl * (3 * c * P + 3 * c * c + c * P)
    bytes_acc = 2 * B * P * HWl * 2 + 2 * (3 * c * P + 2 * c * c + P * c) + 4 * (3 * c + 2 * P)
    return pl.pallas_call(
        functools.partial(_spatial_gcn_kernel, slope=LEAKY_SLOPE),
        out_shape=jax.ShapeDtypeStruct((B, P, HWl), jnp.bfloat16),
        grid=(B,),
        in_specs=in_specs,
        out_specs=pl.BlockSpec((1, P, HWl), lambda i: (i, 0, 0)),
        compiler_params=_params(1),
        cost_estimate=pl.CostEstimate(flops=int(flops), transcendentals=int(B * c * c),
                                      bytes_accessed=int(bytes_acc)),
    )(*args)


# ----------------------------------------------------------------------------
# Kernel 4: DDualGCN trunk — feature-GCN chain (fused phi+theta projection, z/adj/
# wg/y/conv3 + gamma1 residual), bilinear upsample (small matmul), x*local+x, and
# the concat-free split-K final 1x1 conv + ABN, fused per batch element.
# TODO(synk): split into an HW-tiled z_idt reduction pass + HW-tiled map pass for
# production shapes (VMEM feasibility + pipelining).
# ----------------------------------------------------------------------------
def _ddualgcn_trunk_kernel(g_ref, x_ref, loc_ref, ut_ref,
                           wpt_ref, spt_ref, tpt_ref,
                           adj_ref, tadj_ref, wg_ref, twg_ref,
                           w3_ref, s3_ref, t3_ref,
                           wf1_ref, wf2_ref, sf_ref, tf_ref,
                           o_ref, *, r2, slope):
    bf = jnp.bfloat16
    xb = x_ref[0]                                                     # (P, HW) bf16
    x32 = xb.astype(jnp.float32)

    # graph branch: fused phi+theta projection
    pt = jnp.dot(wpt_ref[...], xb, preferred_element_type=jnp.float32)
    pt = _leaky(pt * spt_ref[...] + tpt_ref[...], slope)               # (r2+r, HW)
    phi = pt[:r2]                                                      # (r2, HW)
    th = pt[r2:]                                                       # (r, HW)
    z_idt = lax.dot_general(phi.astype(bf), th.astype(bf),
                            (((1,), (1,)), ((), ())),
                            preferred_element_type=jnp.float32)        # (r2, r)
    # conv_adj + bn_adj, applied in the transposed frame via a pre-scaled A:
    z = lax.dot_general(z_idt.astype(bf), adj_ref[...],
                        (((1,), (1,)), ((), ())),
                        preferred_element_type=jnp.float32) + tadj_ref[...]
    z = z + z_idt
    z = jnp.dot(wg_ref[...], z.astype(bf),
                preferred_element_type=jnp.float32) + twg_ref[...]
    y = jnp.dot(z.astype(bf), th.astype(bf),
                preferred_element_type=jnp.float32)                    # (r2, HW)
    y = jnp.dot(w3_ref[...], y.astype(bf),
                preferred_element_type=jnp.float32)
    y = _leaky(y * s3_ref[...] + t3_ref[...], slope)                    # (P, HW)
    g_out = g_ref[0] * y + x32

    # local branch: bilinear upsample (loc @ U^T), then x*local + x
    up = jnp.dot(loc_ref[0], ut_ref[...], preferred_element_type=jnp.float32)
    sl = x32 * up + x32

    # final 1x1 conv over concat(sl, g_out) as two K-partitions + ABN
    acc = jnp.dot(wf1_ref[...], sl.astype(bf), preferred_element_type=jnp.float32)
    acc = acc + jnp.dot(wf2_ref[...], g_out.astype(bf),
                        preferred_element_type=jnp.float32)
    acc = acc * sf_ref[...] + tf_ref[...]
    o_ref[0] = _leaky(acc, slope).astype(o_ref.dtype)


def _ddualgcn_trunk(x_flat, local_flat, ut, p):
    B, P, HW = x_flat.shape
    HWl = local_flat.shape[-1]
    r2 = p['phi_w'].shape[0]
    r = p['theta_w'].shape[0]
    bf = jnp.bfloat16
    # phi + theta fused into one projection (larger MXU M dim).
    wpt = jnp.concatenate([p['phi_w'], p['theta_w']], axis=0).astype(bf)
    spt = jnp.concatenate([p['phi_s'], p['theta_s']]).reshape(r2 + r, 1)
    tpt = jnp.concatenate([p['phi_t'], p['theta_t']]).reshape(r2 + r, 1)
    adj_scaled = (p['adj_s'][:, None] * p['adj_w']).astype(bf)         # fold bn_adj scale
    tadj = p['adj_t'].reshape(1, r)
    wg_scaled = (p['wg_s'][:, None] * p['wg_w']).astype(bf)            # fold bn_wg scale
    twg = p['wg_t'].reshape(r2, 1)
    w3 = p['c3_w'].astype(bf)
    wf1 = p['final_w'][:, :P].astype(bf)                               # concat part 1
    wf2 = p['final_w'][:, P:].astype(bf)                               # concat part 2
    args = [
        p['gamma1'], x_flat.astype(bf), local_flat.astype(bf), ut.astype(bf),
        wpt, spt, tpt,
        adj_scaled, tadj, wg_scaled, twg,
        w3, p['c3_s'].reshape(P, 1), p['c3_t'].reshape(P, 1),
        wf1, wf2, p['final_s'].reshape(P, 1), p['final_t'].reshape(P, 1),
    ]
    in_specs = [pl.BlockSpec(memory_space=pltpu.MemorySpace.SMEM),
                pl.BlockSpec((1, P, HW), lambda i: (i, 0, 0)),
                pl.BlockSpec((1, P, HWl), lambda i: (i, 0, 0))]
    in_specs += [pl.BlockSpec(a.shape, lambda i, nd=a.ndim: (0,) * nd)
                 for a in args[3:]]
    flops = 2 * B * HW * ((r2 + r) * P + 2 * r2 * r + P * r2 + P * HWl + 2 * P * P)
    bytes_acc = (2 * B * P * (2 * HW + HWl) + 2 * HWl * HW
                 + 2 * ((r2 + r) * P + r * r + r2 * r2 + P * r2 + 2 * P * P))
    return pl.pallas_call(
        functools.partial(_ddualgcn_trunk_kernel, r2=r2, slope=LEAKY_SLOPE),
        out_shape=jax.ShapeDtypeStruct((B, P, HW), jnp.bfloat16),
        grid=(B,),
        in_specs=in_specs,
        out_specs=pl.BlockSpec((1, P, HW), lambda i: (i, 0, 0)),
        compiler_params=_params(1),
        cost_estimate=pl.CostEstimate(flops=int(flops), transcendentals=0,
                                      bytes_accessed=int(bytes_acc)),
    )(*args)


# ----------------------------------------------------------------------------
# Glue: bilinear interpolation matrix, ABN folding, parameter setup
# ----------------------------------------------------------------------------
def interp_matrix(out_size, in_size):
    """1-D bilinear interpolation matrix, align_corners=True (as in the module)."""
    if in_size == 1:
        return jnp.ones((out_size, 1), jnp.float32)
    src = jnp.arange(out_size, dtype=jnp.float32) * (in_size - 1) / (out_size - 1)
    i0 = jnp.clip(jnp.floor(src).astype(jnp.int32), 0, in_size - 2)
    frac = src - i0.astype(jnp.float32)
    rows = jnp.arange(out_size)
    m = jnp.zeros((out_size, in_size), jnp.float32)
    m = m.at[rows, i0].add(1.0 - frac)
    m = m.at[rows, i0 + 1].add(frac)
    return m


def abn_fold(gamma, beta):
    """Eval-mode BN with running_mean=0, running_var=1 folded to scale/shift."""
    return gamma / jnp.sqrt(1.0 + BN_EPS), beta


def make_params(inplanes, planes):
    key = jax.random.PRNGKey(42)
    keys = iter(jax.random.split(key, 128))

    def nrm(shape, s=0.2):
        return s * jax.random.normal(next(keys), shape, jnp.float32)

    def bn(c):
        g = 1.0 + 0.1 * jax.random.normal(next(keys), (c,), jnp.float32)
        b = 0.05 * jax.random.normal(next(keys), (c,), jnp.float32)
        return abn_fold(g, b)

    P = planes
    r = P // 4
    r2 = 2 * r
    ip2 = P // 2

    params = {}
    params['conva_w'] = nrm((P, inplanes, 3, 3))
    params['conva_s'], params['conva_t'] = bn(P)

    gcn = {}
    for li in range(3):
        gcn[f'local{li}_w'] = nrm((P, 1, 3, 3))
        gcn[f'local{li}_s'], gcn[f'local{li}_t'] = bn(P)

    sg = {}
    for name in ('k', 'v', 'q'):
        sg[name + '_w'] = nrm((ip2, P))
        sg[name + '_b'] = nrm((ip2,), 0.05)
    sg['wg_w'] = nrm((ip2, ip2))
    sg['wg_bn_s'], sg['wg_bn_t'] = bn(ip2)
    sg['out_w'] = nrm((P, ip2))
    sg['out_b'] = nrm((P,), 0.05)
    sg['out_bn_s'], sg['out_bn_t'] = bn(P)
    # NOTE: module inits gamma=0; use 0.5 so the attention branch is exercised.
    sg['gamma'] = jnp.array([0.5], jnp.float32)
    gcn['sgcn'] = sg

    gcn['phi_w'] = nrm((r2, P))
    gcn['phi_s'], gcn['phi_t'] = bn(r2)
    gcn['theta_w'] = nrm((r, P))
    gcn['theta_s'], gcn['theta_t'] = bn(r)
    gcn['adj_w'] = nrm((r, r))
    gcn['adj_s'], gcn['adj_t'] = bn(r)
    gcn['wg_w'] = nrm((r2, r2))
    gcn['wg_s'], gcn['wg_t'] = bn(r2)
    gcn['c3_w'] = nrm((P, r2))
    gcn['c3_s'], gcn['c3_t'] = bn(P)
    gcn['final_w'] = nrm((P, 2 * P))
    gcn['final_s'], gcn['final_t'] = bn(P)
    gcn['gamma1'] = jnp.array([0.5], jnp.float32)
    params['gcn'] = gcn

    params['convb_w'] = nrm((P, P, 3, 3))
    params['convb_s'], params['convb_t'] = bn(P)
    params['bott_w'] = nrm((P, inplanes + P, 3, 3))
    params['bott_s'], params['bott_t'] = bn(P)
    return params


# ----------------------------------------------------------------------------
# Forward passes
# ----------------------------------------------------------------------------
def ddual_gcn(feat, p):
    B, C, H, W = feat.shape
    local = feat
    for li in range(3):
        local = dwconv3x3_s2_abn(local, p[f'local{li}_w'],
                                 p[f'local{li}_s'], p[f'local{li}_t'])
    _, _, Hl, Wl = local.shape
    local_att = spatial_gcn_fused(local.reshape(B, C, Hl * Wl), p['sgcn'])
    # Bilinear upsample matrix (align_corners=True), fed in bf16 to the trunk kernel.
    # TODO(synk): use a separable (H,Hl)+(W,Wl) upsample at production shapes.
    ut = jnp.kron(interp_matrix(H, Hl), interp_matrix(W, Wl)).T        # (Hl*Wl, H*W)
    out_flat = _ddualgcn_trunk(feat.reshape(B, C, H * W), local_att, ut, p)
    return out_flat.reshape(B, C, H, W)


def ddualgcn_head(x, params):
    out = conv3x3_abn([x], [params['conva_w']], params['conva_s'], params['conva_t'])
    out = ddual_gcn(out, params['gcn'])
    out = conv3x3_abn([out], [params['convb_w']], params['convb_s'], params['convb_t'])
    inplanes = x.shape[1]
    wb = params['bott_w']
    out = conv3x3_abn([x, out], [wb[:, :inplanes], wb[:, inplanes:]],
                      params['bott_s'], params['bott_t'], out_dtype=jnp.float32)
    return out


if __name__ == "__main__":
    INPLANES, INTERPLANES = 8, 8
    B, H, W = 2, 16, 16
    x = jax.random.normal(jax.random.PRNGKey(0), (B, INPLANES, H, W), jnp.float32)
    params = make_params(INPLANES, INTERPLANES)
    out = jax.jit(ddualgcn_head)(x, params)
    out = jax.block_until_ready(out)
    assert out.shape == (B, INTERPLANES, H, W)
    assert bool(jnp.all(jnp.isfinite(out)))
    print("KERNEL_OK")
</pallas_src>

<mosaic_0001>
module attributes {stable_mosaic.version = 11 : i64} {
  func.func private @main(%arg0: i32) attributes {dimension_semantics = [#tpu.dimension_semantics<core_parallel>], iteration_bounds = array<i64: 2>, tpu.core_type = #tpu.core_type<sc_scalar_subcore>, window_params = []} {
    return
  }
}

module attributes {stable_mosaic.version = 11 : i64} {
  func.func private @main(%arg0: i32) attributes {dimension_semantics = [#tpu.dimension_semantics<core_parallel>], iteration_bounds = array<i64: 2>, tpu.core_type = #tpu.core_type<sc_scalar_subcore>, window_params = []} {
    return
  }
}

module attributes {stable_mosaic.version = 11 : i64} {
  func.func @_conv3x3_kernel(%arg0: i32, %arg1: i32, %arg2: memref<1x8x512xbf16, #tpu.memory_space<vmem>>, %arg3: memref<9x8x8xbf16, #tpu.memory_space<vmem>>, %arg4: memref<8x1xf32, #tpu.memory_space<vmem>>, %arg5: memref<8x1xf32, #tpu.memory_space<vmem>>, %arg6: memref<1x8x384xbf16, #tpu.memory_space<vmem>>) attributes {dimension_semantics = [#tpu.dimension_semantics<parallel>, #tpu.dimension_semantics<parallel>], iteration_bounds = array<i64: 2, 1>, scalar_prefetch = 0 : i64, scratch_operands = 0 : i64, tpu.core_type = #tpu.core_type<tc>, window_params = [{transform_indices = @transform_0, window_bounds = array<i64: 1, 8, 512>}, {transform_indices = @transform_1, window_bounds = array<i64: 9, 8, 8>}, {transform_indices = @transform_2, window_bounds = array<i64: 8, 1>}, {transform_indices = @transform_3, window_bounds = array<i64: 8, 1>}, {transform_indices = @transform_4, window_bounds = array<i64: 1, 8, 384>}]} {
    %c0 = arith.constant 0 : index
    %c0_0 = arith.constant 0 : index
    %c0_1 = arith.constant 0 : index
    %0 = vector.load %arg2[%c0, %c0_0, %c0_1] : memref<1x8x512xbf16, #tpu.memory_space<vmem>>, vector<1x8x512xbf16>
    %1 = vector.shape_cast %0 : vector<1x8x512xbf16> to vector<8x512xbf16>
    %c0_2 = arith.constant 0 : index
    %c0_3 = arith.constant 0 : index
    %c0_4 = arith.constant 0 : index
    %2 = vector.load %arg3[%c0_2, %c0_3, %c0_4] : memref<9x8x8xbf16, #tpu.memory_space<vmem>>, vector<1x8x8xbf16>
    %3 = vector.shape_cast %2 : vector<1x8x8xbf16> to vector<8x8xbf16>
    %4 = vector.extract_strided_slice %1 {offsets = [0, 0], sizes = [8, 384], strides = [1, 1]} : vector<8x512xbf16> to vector<8x384xbf16>
    %cst = arith.constant dense<0.000000e+00> : vector<8x384xf32>
    %5 = tpu.matmul %3, %4, %cst {dimension_numbers = #tpu.dot_dimension_numbers<[1], [0], [0], [1], [0, 0, 1, 1], [], []>} : vector<8x8xbf16>, vector<8x384xbf16>, vector<8x384xf32> -> vector<8x384xf32>
    %c1 = arith.constant 1 : index
    %c0_5 = arith.constant 0 : index
    %c0_6 = arith.constant 0 : index
    %6 = vector.load %arg3[%c1, %c0_5, %c0_6] : memref<9x8x8xbf16, #tpu.memory_space<vmem>>, vector<1x8x8xbf16>
    %7 = vector.shape_cast %6 : vector<1x8x8xbf16> to vector<8x8xbf16>
    %8 = vector.extract_strided_slice %1 {offsets = [0, 1], sizes = [8, 384], strides = [1, 1]} : vector<8x512xbf16> to vector<8x384xbf16>
    %cst_7 = arith.constant dense<0.000000e+00> : vector<8x384xf32>
    %9 = tpu.matmul %7, %8, %cst_7 {dimension_numbers = #tpu.dot_dimension_numbers<[1], [0], [0], [1], [0, 0, 1, 1], [], []>} : vector<8x8xbf16>, vector<8x384xbf16>, vector<8x384xf32> -> vector<8x384xf32>
    %10 = arith.addf %5, %9 : vector<8x384xf32>
    %c2 = arith.constant 2 : index
    %c0_8 = arith.constant 0 : index
    %c0_9 = arith.constant 0 : index
    %11 = vector.load %arg3[%c2, %c0_8, %c0_9] : memref<9x8x8xbf16, #tpu.memory_space<vmem>>, vector<1x8x8xbf16>
    %12 = vector.shape_cast %11 : vector<1x8x8xbf16> to vector<8x8xbf16>
    %13 = vector.extract_strided_slice %1 {offsets = [0, 2], sizes = [8, 384], strides = [1, 1]} : vector<8x512xbf16> to vector<8x384xbf16>
    %cst_10 = arith.constant dense<0.000000e+00> : vector<8x384xf32>
    %14 = tpu.matmul %12, %13, %cst_10 {dimension_numbers = #tpu.dot_dimension_numbers<[1], [0], [0], [1], [0, 0, 1, 1], [], []>} : vector<8x8xbf16>, vector<8x384xbf16>, vector<8x384xf32> -> vector<8x384xf32>
    %15 = arith.addf %10, %14 : vector<8x384xf32>
    %c3 = arith.constant 3 : index
    %c0_11 = arith.constant 0 : index
    %c0_12 = arith.constant 0 : index
    %16 = vector.load %arg3[%c3, %c0_11, %c0_12] : memref<9x8x8xbf16, #tpu.memory_space<vmem>>, vector<1x8x8xbf16>
    %17 = vector.shape_cast %16 : vector<1x8x8xbf16> to vector<8x8xbf16>
    %18 = vector.extract_strided_slice %1 {offsets = [0, 18], sizes = [8, 384], strides = [1, 1]} : vector<8x512xbf16> to vector<8x384xbf16>
    %cst_13 = arith.constant dense<0.000000e+00> : vector<8x384xf32>
    %19 = tpu.matmul %17, %18, %cst_13 {dimension_numbers = #tpu.dot_dimension_numbers<[1], [0], [0], [1], [0, 0, 1, 1], [], []>} : vector<8x8xbf16>, vector<8x384xbf16>, vector<8x384xf32> -> vector<8x384xf32>
    %20 = arith.addf %15, %19 : vector<8x384xf32>
    %c4 = arith.constant 4 : index
    %c0_14 = arith.constant 0 : index
    %c0_15 = arith.constant 0 : index
    %21 = vector.load %arg3[%c4, %c0_14, %c0_15] : memref<9x8x8xbf16, #tpu.memory_space<vmem>>, vector<1x8x8xbf16>
    %22 = vector.shape_cast %21 : vector<1x8x8xbf16> to vector<8x8xbf16>
    %23 = vector.extract_strided_slice %1 {offsets = [0, 19], sizes = [8, 384], strides = [1, 1]} : vector<8x512xbf16> to vector<8x384xbf16>
    %cst_16 = arith.constant dense<0.000000e+00> : vector<8x384xf32>
    %24 = tpu.matmul %22, %23, %cst_16 {dimension_numbers = #tpu.dot_dimension_numbers<[1], [0], [0], [1], [0, 0, 1, 1], [], []>} : vector<8x8xbf16>, vector<8x384xbf16>, vector<8x384xf32> -> vector<8x384xf32>
    %25 = arith.addf %20, %24 : vector<8x384xf32>
    %c5 = arith.constant 5 : index
    %c0_17 = arith.constant 0 : index
    %c0_18 = arith.constant 0 : index
    %26 = vector.load %arg3[%c5, %c0_17, %c0_18] : memref<9x8x8xbf16, #tpu.memory_space<vmem>>, vector<1x8x8xbf16>
    %27 = vector.shape_cast %26 : vector<1x8x8xbf16> to vector<8x8xbf16>
    %28 = vector.extract_strided_slice %1 {offsets = [0, 20], sizes = [8, 384], strides = [1, 1]} : vector<8x512xbf16> to vector<8x384xbf16>
    %cst_19 = arith.constant dense<0.000000e+00> : vector<8x384xf32>
    %29 = tpu.matmul %27, %28, %cst_19 {dimension_numbers = #tpu.dot_dimension_numbers<[1], [0], [0], [1], [0, 0, 1, 1], [], []>} : vector<8x8xbf16>, vector<8x384xbf16>, vector<8x384xf32> -> vector<8x384xf32>
    %30 = arith.addf %25, %29 : vector<8x384xf32>
    %c6 = arith.constant 6 : index
    %c0_20 = arith.constant 0 : index
    %c0_21 = arith.constant 0 : index
    %31 = vector.load %arg3[%c6, %c0_20, %c0_21] : memref<9x8x8xbf16, #tpu.memory_space<vmem>>, vector<1x8x8xbf16>
    %32 = vector.shape_cast %31 : vector<1x8x8xbf16> to vector<8x8xbf16>
    %33 = vector.extract_strided_slice %1 {offsets = [0, 36], sizes = [8, 384], strides = [1, 1]} : vector<8x512xbf16> to vector<8x384xbf16>
    %cst_22 = arith.constant dense<0.000000e+00> : vector<8x384xf32>
    %34 = tpu.matmul %32, %33, %cst_22 {dimension_numbers = #tpu.dot_dimension_numbers<[1], [0], [0], [1], [0, 0, 1, 1], [], []>} : vector<8x8xbf16>, vector<8x384xbf16>, vector<8x384xf32> -> vector<8x384xf32>
    %35 = arith.addf %30, %34 : vector<8x384xf32>
    %c7 = arith.constant 7 : index
    %c0_23 = arith.constant 0 : index
    %c0_24 = arith.constant 0 : index
    %36 = vector.load %arg3[%c7, %c0_23, %c0_24] : memref<9x8x8xbf16, #tpu.memory_space<vmem>>, vector<1x8x8xbf16>
    %37 = vector.shape_cast %36 : vector<1x8x8xbf16> to vector<8x8xbf16>
    %38 = vector.extract_strided_slice %1 {offsets = [0, 37], sizes = [8, 384], strides = [1, 1]} : vector<8x512xbf16> to vector<8x384xbf16>
    %cst_25 = arith.constant dense<0.000000e+00> : vector<8x384xf32>
    %39 = tpu.matmul %37, %38, %cst_25 {dimension_numbers = #tpu.dot_dimension_numbers<[1], [0], [0], [1], [0, 0, 1, 1], [], []>} : vector<8x8xbf16>, vector<8x384xbf16>, vector<8x384xf32> -> vector<8x384xf32>
    %40 = arith.addf %35, %39 : vector<8x384xf32>
    %c8 = arith.constant 8 : index
    %c0_26 = arith.constant 0 : index
    %c0_27 = arith.constant 0 : index
    %41 = vector.load %arg3[%c8, %c0_26, %c0_27] : memref<9x8x8xbf16, #tpu.memory_space<vmem>>, vector<1x8x8xbf16>
    %42 = vector.shape_cast %41 : vector<1x8x8xbf16> to vector<8x8xbf16>
    %43 = vector.extract_strided_slice %1 {offsets = [0, 38], sizes = [8, 384], strides = [1, 1]} : vector<8x512xbf16> to vector<8x384xbf16>
    %cst_28 = arith.constant dense<0.000000e+00> : vector<8x384xf32>
    %44 = tpu.matmul %42, %43, %cst_28 {dimension_numbers = #tpu.dot_dimension_numbers<[1], [0], [0], [1], [0, 0, 1, 1], [], []>} : vector<8x8xbf16>, vector<8x384xbf16>, vector<8x384xf32> -> vector<8x384xf32>
    %45 = arith.addf %40, %44 : vector<8x384xf32>
    %c0_29 = arith.constant 0 : index
    %c0_30 = arith.constant 0 : index
    %46 = vector.load %arg4[%c0_29, %c0_30] : memref<8x1xf32, #tpu.memory_space<vmem>>, vector<8x1xf32>
    %47 = vector.broadcast %46 : vector<8x1xf32> to vector<8x384xf32>
    %48 = arith.mulf %45, %47 : vector<8x384xf32>
    %c0_31 = arith.constant 0 : index
    %c0_32 = arith.constant 0 : index
    %49 = vector.load %arg5[%c0_31, %c0_32] : memref<8x1xf32, #tpu.memory_space<vmem>>, vector<8x1xf32>
    %50 = vector.broadcast %49 : vector<8x1xf32> to vector<8x384xf32>
    %51 = arith.addf %48, %50 : vector<8x384xf32>
    %cst_33 = arith.constant 0.000000e+00 : f32
    %52 = vector.broadcast %cst_33 : f32 to vector<8x384xf32>
    %53 = arith.cmpf oge, %51, %52 : vector<8x384xf32>
    %cst_34 = arith.constant 0.00999999977 : f32
    %54 = vector.broadcast %cst_34 : f32 to vector<8x384xf32>
    %55 = arith.mulf %54, %51 : vector<8x384xf32>
    %56 = arith.select %53, %51, %55 : vector<8x384xi1>, vector<8x384xf32>
    %57 = arith.truncf %56 : vector<8x384xf32> to vector<8x384xbf16>
    %c0_35 = arith.constant 0 : index
    %c0_36 = arith.constant 0 : index
    %c0_37 = arith.constant 0 : index
    %58 = vector.load %arg6[%c0_35, %c0_36, %c0_37] : memref<1x8x384xbf16, #tpu.memory_space<vmem>>, vector<1x8x384xbf16>
    %59 = vector.shape_cast %58 : vector<1x8x384xbf16> to vector<8x384xbf16>
    %60 = vector.shape_cast %57 : vector<8x384xbf16> to vector<1x8x384xbf16>
    tpu.vector_store %arg6[%c0_35, %c0_36, %c0_37], %60 {strides = array<i32>} : memref<1x8x384xbf16, #tpu.memory_space<vmem>>, vector<1x8x384xbf16>,
    return
  }
  func.func @transform_0(%arg0: i32, %arg1: i32) -> (i32, i32, i32) {
    %c0_i32 = arith.constant 0 : i32
    %c0_i32_0 = arith.constant 0 : i32
    %c0_i32_1 = arith.constant 0 : i32
    return %arg0, %c0_i32, %c0_i32_0 : i32, i32, i32
  }
  func.func @transform_1(%arg0: i32, %arg1: i32) -> (i32, i32, i32) {
    %c0_i32 = arith.constant 0 : i32
    %c0_i32_0 = arith.constant 0 : i32
    %c0_i32_1 = arith.constant 0 : i32
    return %c0_i32, %arg1, %c0_i32_0 : i32, i32, i32
  }
  func.func @transform_2(%arg0: i32, %arg1: i32) -> (i32, i32) {
    %c0_i32 = arith.constant 0 : i32
    %c0_i32_0 = arith.constant 0 : i32
    return %arg1, %c0_i32 : i32, i32
  }
  func.func @transform_3(%arg0: i32, %arg1: i32) -> (i32, i32) {
    %c0_i32 = arith.constant 0 : i32
    %c0_i32_0 = arith.constant 0 : i32
    return %arg1, %c0_i32 : i32, i32
  }
  func.func @transform_4(%arg0: i32, %arg1: i32) -> (i32, i32, i32) {
    %c0_i32 = arith.constant 0 : i32
    %c0_i32_0 = arith.constant 0 : i32
    return %arg0, %arg1, %c0_i32 : i32, i32, i32
  }
}

module attributes {stable_mosaic.version = 11 : i64} {
  func.func @_dw_kernel(%arg0: i32, %arg1: memref<1x8x4x256xbf16, #tpu.memory_space<vmem>>, %arg2: memref<9x8x1xf32, #tpu.memory_space<vmem>>, %arg3: memref<8x1xf32, #tpu.memory_space<vmem>>, %arg4: memref<8x1xf32, #tpu.memory_space<vmem>>, %arg5: memref<1x8x128xbf16, #tpu.memory_space<vmem>>) attributes {dimension_semantics = [#tpu.dimension_semantics<parallel>], iteration_bounds = array<i64: 2>, scalar_prefetch = 0 : i64, scratch_operands = 0 : i64, tpu.core_type = #tpu.core_type<tc>, window_params = [{transform_indices = @transform_0, window_bounds = array<i64: 1, 8, 4, 256>}, {pipeline_mode = #tpu.pipeline_mode<synchronous>, transform_indices = @transform_1, window_bounds = array<i64: 9, 8, 1>}, {pipeline_mode = #tpu.pipeline_mode<synchronous>, transform_indices = @transform_2, window_bounds = array<i64: 8, 1>}, {pipeline_mode = #tpu.pipeline_mode<synchronous>, transform_indices = @transform_3, window_bounds = array<i64: 8, 1>}, {transform_indices = @transform_4, window_bounds = array<i64: 1, 8, 128>}]} {
    %c0 = arith.constant 0 : index
    %c0_0 = arith.constant 0 : index
    %c0_1 = arith.constant 0 : index
    %c0_2 = arith.constant 0 : index
    %0 = vector.load %arg1[%c0, %c0_0, %c0_1, %c0_2] : memref<1x8x4x256xbf16, #tpu.memory_space<vmem>>, vector<1x8x4x256xbf16>
    %1 = vector.shape_cast %0 : vector<1x8x4x256xbf16> to vector<8x4x256xbf16>
    %2 = arith.extf %1 : vector<8x4x256xbf16> to vector<8x4x256xf32>
    %3 = vector.extract_strided_slice %2 {offsets = [0, 0, 0], sizes = [8, 1, 128], strides = [1, 1, 1]} : vector<8x4x256xf32> to vector<8x1x128xf32>
    %4 = vector.shape_cast %3 : vector<8x1x128xf32> to vector<8x128xf32>
    %c0_3 = arith.constant 0 : index
    %c0_4 = arith.constant 0 : index
    %c0_5 = arith.constant 0 : index
    %5 = vector.load %arg2[%c0_3, %c0_4, %c0_5] : memref<9x8x1xf32, #tpu.memory_space<vmem>>, vector<1x8x1xf32>
    %6 = vector.shape_cast %5 : vector<1x8x1xf32> to vector<8x1xf32>
    %7 = vector.broadcast %6 : vector<8x1xf32> to vector<8x128xf32>
    %8 = arith.mulf %4, %7 : vector<8x128xf32>
    %9 = vector.extract_strided_slice %2 {offsets = [0, 1, 0], sizes = [8, 1, 128], strides = [1, 1, 1]} : vector<8x4x256xf32> to vector<8x1x128xf32>
    %10 = vector.shape_cast %9 : vector<8x1x128xf32> to vector<8x128xf32>
    %c1 = arith.constant 1 : index
    %c0_6 = arith.constant 0 : index
    %c0_7 = arith.constant 0 : index
    %11 = vector.load %arg2[%c1, %c0_6, %c0_7] : memref<9x8x1xf32, #tpu.memory_space<vmem>>, vector<1x8x1xf32>
    %12 = vector.shape_cast %11 : vector<1x8x1xf32> to vector<8x1xf32>
    %13 = vector.broadcast %12 : vector<8x1xf32> to vector<8x128xf32>
    %14 = arith.mulf %10, %13 : vector<8x128xf32>
    %15 = arith.addf %8, %14 : vector<8x128xf32>
    %16 = vector.extract_strided_slice %2 {offsets = [0, 0, 1], sizes = [8, 1, 128], strides = [1, 1, 1]} : vector<8x4x256xf32> to vector<8x1x128xf32>
    %17 = vector.shape_cast %16 : vector<8x1x128xf32> to vector<8x128xf32>
    %c2 = arith.constant 2 : index
    %c0_8 = arith.constant 0 : index
    %c0_9 = arith.constant 0 : index
    %18 = vector.load %arg2[%c2, %c0_8, %c0_9] : memref<9x8x1xf32, #tpu.memory_space<vmem>>, vector<1x8x1xf32>
    %19 = vector.shape_cast %18 : vector<1x8x1xf32> to vector<8x1xf32>
    %20 = vector.broadcast %19 : vector<8x1xf32> to vector<8x128xf32>
    %21 = arith.mulf %17, %20 : vector<8x128xf32>
    %22 = arith.addf %15, %21 : vector<8x128xf32>
    %23 = vector.extract_strided_slice %2 {offsets = [0, 2, 0], sizes = [8, 1, 128], strides = [1, 1, 1]} : vector<8x4x256xf32> to vector<8x1x128xf32>
    %24 = vector.shape_cast %23 : vector<8x1x128xf32> to vector<8x128xf32>
    %c3 = arith.constant 3 : index
    %c0_10 = arith.constant 0 : index
    %c0_11 = arith.constant 0 : index
    %25 = vector.load %arg2[%c3, %c0_10, %c0_11] : memref<9x8x1xf32, #tpu.memory_space<vmem>>, vector<1x8x1xf32>
    %26 = vector.shape_cast %25 : vector<1x8x1xf32> to vector<8x1xf32>
    %27 = vector.broadcast %26 : vector<8x1xf32> to vector<8x128xf32>
    %28 = arith.mulf %24, %27 : vector<8x128xf32>
    %29 = arith.addf %22, %28 : vector<8x128xf32>
    %30 = vector.extract_strided_slice %2 {offsets = [0, 3, 0], sizes = [8, 1, 128], strides = [1, 1, 1]} : vector<8x4x256xf32> to vector<8x1x128xf32>
    %31 = vector.shape_cast %30 : vector<8x1x128xf32> to vector<8x128xf32>
    %c4 = arith.constant 4 : index
    %c0_12 = arith.constant 0 : index
    %c0_13 = arith.constant 0 : index
    %32 = vector.load %arg2[%c4, %c0_12, %c0_13] : memref<9x8x1xf32, #tpu.memory_space<vmem>>, vector<1x8x1xf32>
    %33 = vector.shape_cast %32 : vector<1x8x1xf32> to vector<8x1xf32>
    %34 = vector.broadcast %33 : vector<8x1xf32> to vector<8x128xf32>
    %35 = arith.mulf %31, %34 : vector<8x128xf32>
    %36 = arith.addf %29, %35 : vector<8x128xf32>
    %37 = vector.extract_strided_slice %2 {offsets = [0, 2, 1], sizes = [8, 1, 128], strides = [1, 1, 1]} : vector<8x4x256xf32> to vector<8x1x128xf32>
    %38 = vector.shape_cast %37 : vector<8x1x128xf32> to vector<8x128xf32>
    %c5 = arith.constant 5 : index
    %c0_14 = arith.constant 0 : index
    %c0_15 = arith.constant 0 : index
    %39 = vector.load %arg2[%c5, %c0_14, %c0_15] : memref<9x8x1xf32, #tpu.memory_space<vmem>>, vector<1x8x1xf32>
    %40 = vector.shape_cast %39 : vector<1x8x1xf32> to vector<8x1xf32>
    %41 = vector.broadcast %40 : vector<8x1xf32> to vector<8x128xf32>
    %42 = arith.mulf %38, %41 : vector<8x128xf32>
    %43 = arith.addf %36, %42 : vector<8x128xf32>
    %44 = vector.extract_strided_slice %2 {offsets = [0, 0, 9], sizes = [8, 1, 128], strides = [1, 1, 1]} : vector<8x4x256xf32> to vector<8x1x128xf32>
    %45 = vector.shape_cast %44 : vector<8x1x128xf32> to vector<8x128xf32>
    %c6 = arith.constant 6 : index
    %c0_16 = arith.constant 0 : index
    %c0_17 = arith.constant 0 : index
    %46 = vector.load %arg2[%c6, %c0_16, %c0_17] : memref<9x8x1xf32, #tpu.memory_space<vmem>>, vector<1x8x1xf32>
    %47 = vector.shape_cast %46 : vector<1x8x1xf32> to vector<8x1xf32>
    %48 = vector.broadcast %47 : vector<8x1xf32> to vector<8x128xf32>
    %49 = arith.mulf %45, %48 : vector<8x128xf32>
    %50 = arith.addf %43, %49 : vector<8x128xf32>
    %51 = vector.extract_strided_slice %2 {offsets = [0, 1, 9], sizes = [8, 1, 128], strides = [1, 1, 1]} : vector<8x4x256xf32> to vector<8x1x128xf32>
    %52 = vector.shape_cast %51 : vector<8x1x128xf32> to vector<8x128xf32>
    %c7 = arith.constant 7 : index
    %c0_18 = arith.constant 0 : index
    %c0_19 = arith.constant 0 : index
    %53 = vector.load %arg2[%c7, %c0_18, %c0_19] : memref<9x8x1xf32, #tpu.memory_space<vmem>>, vector<1x8x1xf32>
    %54 = vector.shape_cast %53 : vector<1x8x1xf32> to vector<8x1xf32>
    %55 = vector.broadcast %54 : vector<8x1xf32> to vector<8x128xf32>
    %56 = arith.mulf %52, %55 : vector<8x128xf32>
    %57 = arith.addf %50, %56 : vector<8x128xf32>
    %58 = vector.extract_strided_slice %2 {offsets = [0, 0, 10], sizes = [8, 1, 128], strides = [1, 1, 1]} : vector<8x4x256xf32> to vector<8x1x128xf32>
    %59 = vector.shape_cast %58 : vector<8x1x128xf32> to vector<8x128xf32>
    %c8 = arith.constant 8 : index
    %c0_20 = arith.constant 0 : index
    %c0_21 = arith.constant 0 : index
    %60 = vector.load %arg2[%c8, %c0_20, %c0_21] : memref<9x8x1xf32, #tpu.memory_space<vmem>>, vector<1x8x1xf32>
    %61 = vector.shape_cast %60 : vector<1x8x1xf32> to vector<8x1xf32>
    %62 = vector.broadcast %61 : vector<8x1xf32> to vector<8x128xf32>
    %63 = arith.mulf %59, %62 : vector<8x128xf32>
    %64 = arith.addf %57, %63 : vector<8x128xf32>
    %c0_22 = arith.constant 0 : index
    %c0_23 = arith.constant 0 : index
    %65 = vector.load %arg3[%c0_22, %c0_23] : memref<8x1xf32, #tpu.memory_space<vmem>>, vector<8x1xf32>
    %66 = vector.broadcast %65 : vector<8x1xf32> to vector<8x128xf32>
    %67 = arith.mulf %64, %66 : vector<8x128xf32>
    %c0_24 = arith.constant 0 : index
    %c0_25 = arith.constant 0 : index
    %68 = vector.load %arg4[%c0_24, %c0_25] : memref<8x1xf32, #tpu.memory_space<vmem>>, vector<8x1xf32>
    %69 = vector.broadcast %68 : vector<8x1xf32> to vector<8x128xf32>
    %70 = arith.addf %67, %69 : vector<8x128xf32>
    %cst = arith.constant 0.000000e+00 : f32
    %71 = vector.broadcast %cst : f32 to vector<8x128xf32>
    %72 = arith.cmpf oge, %70, %71 : vector<8x128xf32>
    %cst_26 = arith.constant 0.00999999977 : f32
    %73 = vector.broadcast %cst_26 : f32 to vector<8x128xf32>
    %74 = arith.mulf %73, %70 : vector<8x128xf32>
    %75 = arith.select %72, %70, %74 : vector<8x128xi1>, vector<8x128xf32>
    %76 = arith.truncf %75 : vector<8x128xf32> to vector<8x128xbf16>
    %c0_27 = arith.constant 0 : index
    %c0_28 = arith.constant 0 : index
    %c0_29 = arith.constant 0 : index
    %77 = vector.load %arg5[%c0_27, %c0_28, %c0_29] : memref<1x8x128xbf16, #tpu.memory_space<vmem>>, vector<1x8x128xbf16>
    %78 = vector.shape_cast %77 : vector<1x8x128xbf16> to vector<8x128xbf16>
    %79 = vector.shape_cast %76 : vector<8x128xbf16> to vector<1x8x128xbf16>
    tpu.vector_store %arg5[%c0_27, %c0_28, %c0_29], %79 {strides = array<i32>} : memref<1x8x128xbf16, #tpu.memory_space<vmem>>, vector<1x8x128xbf16>,
    return
  }
  func.func @transform_0(%arg0: i32) -> (i32, i32, i32, i32) {
    %c0_i32 = arith.constant 0 : i32
    %c0_i32_0 = arith.constant 0 : i32
    %c0_i32_1 = arith.constant 0 : i32
    %c0_i32_2 = arith.constant 0 : i32
    return %arg0, %c0_i32, %c0_i32_0, %c0_i32_1 : i32, i32, i32, i32
  }
  func.func @transform_1(%arg0: i32) -> (i32, i32, i32) {
    %c0_i32 = arith.constant 0 : i32
    %c0_i32_0 = arith.constant 0 : i32
    %c0_i32_1 = arith.constant 0 : i32
    %c0_i32_2 = arith.constant 0 : i32
    return %c0_i32, %c0_i32_0, %c0_i32_1 : i32, i32, i32
  }
  func.func @transform_2(%arg0: i32) -> (i32, i32) {
    %c0_i32 = arith.constant 0 : i32
    %c0_i32_0 = arith.constant 0 : i32
    %c0_i32_1 = arith.constant 0 : i32
    return %c0_i32, %c0_i32_0 : i32, i32
  }
  func.func @transform_3(%arg0: i32) -> (i32, i32) {
    %c0_i32 = arith.constant 0 : i32
    %c0_i32_0 = arith.constant 0 : i32
    %c0_i32_1 = arith.constant 0 : i32
    return %c0_i32, %c0_i32_0 : i32, i32
  }
  func.func @transform_4(%arg0: i32) -> (i32, i32, i32) {
    %c0_i32 = arith.constant 0 : i32
    %c0_i32_0 = arith.constant 0 : i32
    %c0_i32_1 = arith.constant 0 : i32
    return %arg0, %c0_i32, %c0_i32_0 : i32, i32, i32
  }
}

module attributes {stable_mosaic.version = 11 : i64} {
  func.func @_dw_kernel(%arg0: i32, %arg1: memref<1x8x4x256xbf16, #tpu.memory_space<vmem>>, %arg2: memref<9x8x1xf32, #tpu.memory_space<vmem>>, %arg3: memref<8x1xf32, #tpu.memory_space<vmem>>, %arg4: memref<8x1xf32, #tpu.memory_space<vmem>>, %arg5: memref<1x8x128xbf16, #tpu.memory_space<vmem>>) attributes {dimension_semantics = [#tpu.dimension_semantics<parallel>], iteration_bounds = array<i64: 2>, scalar_prefetch = 0 : i64, scratch_operands = 0 : i64, tpu.core_type = #tpu.core_type<tc>, window_params = [{transform_indices = @transform_0, window_bounds = array<i64: 1, 8, 4, 256>}, {pipeline_mode = #tpu.pipeline_mode<synchronous>, transform_indices = @transform_1, window_bounds = array<i64: 9, 8, 1>}, {pipeline_mode = #tpu.pipeline_mode<synchronous>, transform_indices = @transform_2, window_bounds = array<i64: 8, 1>}, {pipeline_mode = #tpu.pipeline_mode<synchronous>, transform_indices = @transform_3, window_bounds = array<i64: 8, 1>}, {transform_indices = @transform_4, window_bounds = array<i64: 1, 8, 128>}]} {
    %c0 = arith.constant 0 : index
    %c0_0 = arith.constant 0 : index
    %c0_1 = arith.constant 0 : index
    %c0_2 = arith.constant 0 : index
    %0 = vector.load %arg1[%c0, %c0_0, %c0_1, %c0_2] : memref<1x8x4x256xbf16, #tpu.memory_space<vmem>>, vector<1x8x4x256xbf16>
    %1 = vector.shape_cast %0 : vector<1x8x4x256xbf16> to vector<8x4x256xbf16>
    %2 = arith.extf %1 : vector<8x4x256xbf16> to vector<8x4x256xf32>
    %3 = vector.extract_strided_slice %2 {offsets = [0, 0, 0], sizes = [8, 1, 128], strides = [1, 1, 1]} : vector<8x4x256xf32> to vector<8x1x128xf32>
    %4 = vector.shape_cast %3 : vector<8x1x128xf32> to vector<8x128xf32>
    %c0_3 = arith.constant 0 : index
    %c0_4 = arith.constant 0 : index
    %c0_5 = arith.constant 0 : index
    %5 = vector.load %arg2[%c0_3, %c0_4, %c0_5] : memref<9x8x1xf32, #tpu.memory_space<vmem>>, vector<1x8x1xf32>
    %6 = vector.shape_cast %5 : vector<1x8x1xf32> to vector<8x1xf32>
    %7 = vector.broadcast %6 : vector<8x1xf32> to vector<8x128xf32>
    %8 = arith.mulf %4, %7 : vector<8x128xf32>
    %9 = vector.extract_strided_slice %2 {offsets = [0, 1, 0], sizes = [8, 1, 128], strides = [1, 1, 1]} : vector<8x4x256xf32> to vector<8x1x128xf32>
    %10 = vector.shape_cast %9 : vector<8x1x128xf32> to vector<8x128xf32>
    %c1 = arith.constant 1 : index
    %c0_6 = arith.constant 0 : index
    %c0_7 = arith.constant 0 : index
    %11 = vector.load %arg2[%c1, %c0_6, %c0_7] : memref<9x8x1xf32, #tpu.memory_space<vmem>>, vector<1x8x1xf32>
    %12 = vector.shape_cast %11 : vector<1x8x1xf32> to vector<8x1xf32>
    %13 = vector.broadcast %12 : vector<8x1xf32> to vector<8x128xf32>
    %14 = arith.mulf %10, %13 : vector<8x128xf32>
    %15 = arith.addf %8, %14 : vector<8x128xf32>
    %16 = vector.extract_strided_slice %2 {offsets = [0, 0, 1], sizes = [8, 1, 128], strides = [1, 1, 1]} : vector<8x4x256xf32> to vector<8x1x128xf32>
    %17 = vector.shape_cast %16 : vector<8x1x128xf32> to vector<8x128xf32>
    %c2 = arith.constant 2 : index
    %c0_8 = arith.constant 0 : index
    %c0_9 = arith.constant 0 : index
    %18 = vector.load %arg2[%c2, %c0_8, %c0_9] : memref<9x8x1xf32, #tpu.memory_space<vmem>>, vector<1x8x1xf32>
    %19 = vector.shape_cast %18 : vector<1x8x1xf32> to vector<8x1xf32>
    %20 = vector.broadcast %19 : vector<8x1xf32> to vector<8x128xf32>
    %21 = arith.mulf %17, %20 : vector<8x128xf32>
    %22 = arith.addf %15, %21 : vector<8x128xf32>
    %23 = vector.extract_strided_slice %2 {offsets = [0, 2, 0], sizes = [8, 1, 128], strides = [1, 1, 1]} : vector<8x4x256xf32> to vector<8x1x128xf32>
    %24 = vector.shape_cast %23 : vector<8x1x128xf32> to vector<8x128xf32>
    %c3 = arith.constant 3 : index
    %c0_10 = arith.constant 0 : index
    %c0_11 = arith.constant 0 : index
    %25 = vector.load %arg2[%c3, %c0_10, %c0_11] : memref<9x8x1xf32, #tpu.memory_space<vmem>>, vector<1x8x1xf32>
    %26 = vector.shape_cast %25 : vector<1x8x1xf32> to vector<8x1xf32>
    %27 = vector.broadcast %26 : vector<8x1xf32> to vector<8x128xf32>
    %28 = arith.mulf %24, %27 : vector<8x128xf32>
    %29 = arith.addf %22, %28 : vector<8x128xf32>
    %30 = vector.extract_strided_slice %2 {offsets = [0, 3, 0], sizes = [8, 1, 128], strides = [1, 1, 1]} : vector<8x4x256xf32> to vector<8x1x128xf32>
    %31 = vector.shape_cast %30 : vector<8x1x128xf32> to vector<8x128xf32>
    %c4 = arith.constant 4 : index
    %c0_12 = arith.constant 0 : index
    %c0_13 = arith.constant 0 : index
    %32 = vector.load %arg2[%c4, %c0_12, %c0_13] : memref<9x8x1xf32, #tpu.memory_space<vmem>>, vector<1x8x1xf32>
    %33 = vector.shape_cast %32 : vector<1x8x1xf32> to vector<8x1xf32>
    %34 = vector.broadcast %33 : vector<8x1xf32> to vector<8x128xf32>
    %35 = arith.mulf %31, %34 : vector<8x128xf32>
    %36 = arith.addf %29, %35 : vector<8x128xf32>
    %37 = vector.extract_strided_slice %2 {offsets = [0, 2, 1], sizes = [8, 1, 128], strides = [1, 1, 1]} : vector<8x4x256xf32> to vector<8x1x128xf32>
    %38 = vector.shape_cast %37 : vector<8x1x128xf32> to vector<8x128xf32>
    %c5 = arith.constant 5 : index
    %c0_14 = arith.constant 0 : index
    %c0_15 = arith.constant 0 : index
    %39 = vector.load %arg2[%c5, %c0_14, %c0_15] : memref<9x8x1xf32, #tpu.memory_space<vmem>>, vector<1x8x1xf32>
    %40 = vector.shape_cast %39 : vector<1x8x1xf32> to vector<8x1xf32>
    %41 = vector.broadcast %40 : vector<8x1xf32> to vector<8x128xf32>
    %42 = arith.mulf %38, %41 : vector<8x128xf32>
    %43 = arith.addf %36, %42 : vector<8x128xf32>
    %44 = vector.extract_strided_slice %2 {offsets = [0, 0, 5], sizes = [8, 1, 128], strides = [1, 1, 1]} : vector<8x4x256xf32> to vector<8x1x128xf32>
    %45 = vector.shape_cast %44 : vector<8x1x128xf32> to vector<8x128xf32>
    %c6 = arith.constant 6 : index
    %c0_16 = arith.constant 0 : index
    %c0_17 = arith.constant 0 : index
    %46 = vector.load %arg2[%c6, %c0_16, %c0_17] : memref<9x8x1xf32, #tpu.memory_space<vmem>>, vector<1x8x1xf32>
    %47 = vector.shape_cast %46 : vector<1x8x1xf32> to vector<8x1xf32>
    %48 = vector.broadcast %47 : vector<8x1xf32> to vector<8x128xf32>
    %49 = arith.mulf %45, %48 : vector<8x128xf32>
    %50 = arith.addf %43, %49 : vector<8x128xf32>
    %51 = vector.extract_strided_slice %2 {offsets = [0, 1, 5], sizes = [8, 1, 128], strides = [1, 1, 1]} : vector<8x4x256xf32> to vector<8x1x128xf32>
    %52 = vector.shape_cast %51 : vector<8x1x128xf32> to vector<8x128xf32>
    %c7 = arith.constant 7 : index
    %c0_18 = arith.constant 0 : index
    %c0_19 = arith.constant 0 : index
    %53 = vector.load %arg2[%c7, %c0_18, %c0_19] : memref<9x8x1xf32, #tpu.memory_space<vmem>>, vector<1x8x1xf32>
    %54 = vector.shape_cast %53 : vector<1x8x1xf32> to vector<8x1xf32>
    %55 = vector.broadcast %54 : vector<8x1xf32> to vector<8x128xf32>
    %56 = arith.mulf %52, %55 : vector<8x128xf32>
    %57 = arith.addf %50, %56 : vector<8x128xf32>
    %58 = vector.extract_strided_slice %2 {offsets = [0, 0, 6], sizes = [8, 1, 128], strides = [1, 1, 1]} : vector<8x4x256xf32> to vector<8x1x128xf32>
    %59 = vector.shape_cast %58 : vector<8x1x128xf32> to vector<8x128xf32>
    %c8 = arith.constant 8 : index
    %c0_20 = arith.constant 0 : index
    %c0_21 = arith.constant 0 : index
    %60 = vector.load %arg2[%c8, %c0_20, %c0_21] : memref<9x8x1xf32, #tpu.memory_space<vmem>>, vector<1x8x1xf32>
    %61 = vector.shape_cast %60 : vector<1x8x1xf32> to vector<8x1xf32>
    %62 = vector.broadcast %61 : vector<8x1xf32> to vector<8x128xf32>
    %63 = arith.mulf %59, %62 : vector<8x128xf32>
    %64 = arith.addf %57, %63 : vector<8x128xf32>
    %c0_22 = arith.constant 0 : index
    %c0_23 = arith.constant 0 : index
    %65 = vector.load %arg3[%c0_22, %c0_23] : memref<8x1xf32, #tpu.memory_space<vmem>>, vector<8x1xf32>
    %66 = vector.broadcast %65 : vector<8x1xf32> to vector<8x128xf32>
    %67 = arith.mulf %64, %66 : vector<8x128xf32>
    %c0_24 = arith.constant 0 : index
    %c0_25 = arith.constant 0 : index
    %68 = vector.load %arg4[%c0_24, %c0_25] : memref<8x1xf32, #tpu.memory_space<vmem>>, vector<8x1xf32>
    %69 = vector.broadcast %68 : vector<8x1xf32> to vector<8x128xf32>
    %70 = arith.addf %67, %69 : vector<8x128xf32>
    %cst = arith.constant 0.000000e+00 : f32
    %71 = vector.broadcast %cst : f32 to vector<8x128xf32>
    %72 = arith.cmpf oge, %70, %71 : vector<8x128xf32>
    %cst_26 = arith.constant 0.00999999977 : f32
    %73 = vector.broadcast %cst_26 : f32 to vector<8x128xf32>
    %74 = arith.mulf %73, %70 : vector<8x128xf32>
    %75 = arith.select %72, %70, %74 : vector<8x128xi1>, vector<8x128xf32>
    %76 = arith.truncf %75 : vector<8x128xf32> to vector<8x128xbf16>
    %c0_27 = arith.constant 0 : index
    %c0_28 = arith.constant 0 : index
    %c0_29 = arith.constant 0 : index
    %77 = vector.load %arg5[%c0_27, %c0_28, %c0_29] : memref<1x8x128xbf16, #tpu.memory_space<vmem>>, vector<1x8x128xbf16>
    %78 = vector.shape_cast %77 : vector<1x8x128xbf16> to vector<8x128xbf16>
    %79 = vector.shape_cast %76 : vector<8x128xbf16> to vector<1x8x128xbf16>
    tpu.vector_store %arg5[%c0_27, %c0_28, %c0_29], %79 {strides = array<i32>} : memref<1x8x128xbf16, #tpu.memory_space<vmem>>, vector<1x8x128xbf16>,
    return
  }
  func.func @transform_0(%arg0: i32) -> (i32, i32, i32, i32) {
    %c0_i32 = arith.constant 0 : i32
    %c0_i32_0 = arith.constant 0 : i32
    %c0_i32_1 = arith.constant 0 : i32
    %c0_i32_2 = arith.constant 0 : i32
    return %arg0, %c0_i32, %c0_i32_0, %c0_i32_1 : i32, i32, i32, i32
  }
  func.func @transform_1(%arg0: i32) -> (i32, i32, i32) {
    %c0_i32 = arith.constant 0 : i32
    %c0_i32_0 = arith.constant 0 : i32
    %c0_i32_1 = arith.constant 0 : i32
    %c0_i32_2 = arith.constant 0 : i32
    return %c0_i32, %c0_i32_0, %c0_i32_1 : i32, i32, i32
  }
  func.func @transform_2(%arg0: i32) -> (i32, i32) {
    %c0_i32 = arith.constant 0 : i32
    %c0_i32_0 = arith.constant 0 : i32
    %c0_i32_1 = arith.constant 0 : i32
    return %c0_i32, %c0_i32_0 : i32, i32
  }
  func.func @transform_3(%arg0: i32) -> (i32, i32) {
    %c0_i32 = arith.constant 0 : i32
    %c0_i32_0 = arith.constant 0 : i32
    %c0_i32_1 = arith.constant 0 : i32
    return %c0_i32, %c0_i32_0 : i32, i32
  }
  func.func @transform_4(%arg0: i32) -> (i32, i32, i32) {
    %c0_i32 = arith.constant 0 : i32
    %c0_i32_0 = arith.constant 0 : i32
    %c0_i32_1 = arith.constant 0 : i32
    return %arg0, %c0_i32, %c0_i32_0 : i32, i32, i32
  }
}

module attributes {stable_mosaic.version = 11 : i64} {
  func.func @_dw_kernel(%arg0: i32, %arg1: memref<1x8x4x256xbf16, #tpu.memory_space<vmem>>, %arg2: memref<9x8x1xf32, #tpu.memory_space<vmem>>, %arg3: memref<8x1xf32, #tpu.memory_space<vmem>>, %arg4: memref<8x1xf32, #tpu.memory_space<vmem>>, %arg5: memref<1x8x128xbf16, #tpu.memory_space<vmem>>) attributes {dimension_semantics = [#tpu.dimension_semantics<parallel>], iteration_bounds = array<i64: 2>, scalar_prefetch = 0 : i64, scratch_operands = 0 : i64, tpu.core_type = #tpu.core_type<tc>, window_params = [{transform_indices = @transform_0, window_bounds = array<i64: 1, 8, 4, 256>}, {pipeline_mode = #tpu.pipeline_mode<synchronous>, transform_indices = @transform_1, window_bounds = array<i64: 9, 8, 1>}, {pipeline_mode = #tpu.pipeline_mode<synchronous>, transform_indices = @transform_2, window_bounds = array<i64: 8, 1>}, {pipeline_mode = #tpu.pipeline_mode<synchronous>, transform_indices = @transform_3, window_bounds = array<i64: 8, 1>}, {transform_indices = @transform_4, window_bounds = array<i64: 1, 8, 128>}]} {
    %c0 = arith.constant 0 : index
    %c0_0 = arith.constant 0 : index
    %c0_1 = arith.constant 0 : index
    %c0_2 = arith.constant 0 : index
    %0 = vector.load %arg1[%c0, %c0_0, %c0_1, %c0_2] : memref<1x8x4x256xbf16, #tpu.memory_space<vmem>>, vector<1x8x4x256xbf16>
    %1 = vector.shape_cast %0 : vector<1x8x4x256xbf16> to vector<8x4x256xbf16>
    %2 = arith.extf %1 : vector<8x4x256xbf16> to vector<8x4x256xf32>
    %3 = vector.extract_strided_slice %2 {offsets = [0, 0, 0], sizes = [8, 1, 128], strides = [1, 1, 1]} : vector<8x4x256xf32> to vector<8x1x128xf32>
    %4 = vector.shape_cast %3 : vector<8x1x128xf32> to vector<8x128xf32>
    %c0_3 = arith.constant 0 : index
    %c0_4 = arith.constant 0 : index
    %c0_5 = arith.constant 0 : index
    %5 = vector.load %arg2[%c0_3, %c0_4, %c0_5] : memref<9x8x1xf32, #tpu.memory_space<vmem>>, vector<1x8x1xf32>
    %6 = vector.shape_cast %5 : vector<1x8x1xf32> to vector<8x1xf32>
    %7 = vector.broadcast %6 : vector<8x1xf32> to vector<8x128xf32>
    %8 = arith.mulf %4, %7 : vector<8x128xf32>
    %9 = vector.extract_strided_slice %2 {offsets = [0, 1, 0], sizes = [8, 1, 128], strides = [1, 1, 1]} : vector<8x4x256xf32> to vector<8x1x128xf32>
    %10 = vector.shape_cast %9 : vector<8x1x128xf32> to vector<8x128xf32>
    %c1 = arith.constant 1 : index
    %c0_6 = arith.constant 0 : index
    %c0_7 = arith.constant 0 : index
    %11 = vector.load %arg2[%c1, %c0_6, %c0_7] : memref<9x8x1xf32, #tpu.memory_space<vmem>>, vector<1x8x1xf32>
    %12 = vector.shape_cast %11 : vector<1x8x1xf32> to vector<8x1xf32>
    %13 = vector.broadcast %12 : vector<8x1xf32> to vector<8x128xf32>
    %14 = arith.mulf %10, %13 : vector<8x128xf32>
    %15 = arith.addf %8, %14 : vector<8x128xf32>
    %16 = vector.extract_strided_slice %2 {offsets = [0, 0, 1], sizes = [8, 1, 128], strides = [1, 1, 1]} : vector<8x4x256xf32> to vector<8x1x128xf32>
    %17 = vector.shape_cast %16 : vector<8x1x128xf32> to vector<8x128xf32>
    %c2 = arith.constant 2 : index
    %c0_8 = arith.constant 0 : index
    %c0_9 = arith.constant 0 : index
    %18 = vector.load %arg2[%c2, %c0_8, %c0_9] : memref<9x8x1xf32, #tpu.memory_space<vmem>>, vector<1x8x1xf32>
    %19 = vector.shape_cast %18 : vector<1x8x1xf32> to vector<8x1xf32>
    %20 = vector.broadcast %19 : vector<8x1xf32> to vector<8x128xf32>
    %21 = arith.mulf %17, %20 : vector<8x128xf32>
    %22 = arith.addf %15, %21 : vector<8x128xf32>
    %23 = vector.extract_strided_slice %2 {offsets = [0, 2, 0], sizes = [8, 1, 128], strides = [1, 1, 1]} : vector<8x4x256xf32> to vector<8x1x128xf32>
    %24 = vector.shape_cast %23 : vector<8x1x128xf32> to vector<8x128xf32>
    %c3 = arith.constant 3 : index
    %c0_10 = arith.constant 0 : index
    %c0_11 = arith.constant 0 : index
    %25 = vector.load %arg2[%c3, %c0_10, %c0_11] : memref<9x8x1xf32, #tpu.memory_space<vmem>>, vector<1x8x1xf32>
    %26 = vector.shape_cast %25 : vector<1x8x1xf32> to vector<8x1xf32>
    %27 = vector.broadcast %26 : vector<8x1xf32> to vector<8x128xf32>
    %28 = arith.mulf %24, %27 : vector<8x128xf32>
    %29 = arith.addf %22, %28 : vector<8x128xf32>
    %30 = vector.extract_strided_slice %2 {offsets = [0, 3, 0], sizes = [8, 1, 128], strides = [1, 1, 1]} : vector<8x4x256xf32> to vector<8x1x128xf32>
    %31 = vector.shape_cast %30 : vector<8x1x128xf32> to vector<8x128xf32>
    %c4 = arith.constant 4 : index
    %c0_12 = arith.constant 0 : index
    %c0_13 = arith.constant 0 : index
    %32 = vector.load %arg2[%c4, %c0_12, %c0_13] : memref<9x8x1xf32, #tpu.memory_space<vmem>>, vector<1x8x1xf32>
    %33 = vector.shape_cast %32 : vector<1x8x1xf32> to vector<8x1xf32>
    %34 = vector.broadcast %33 : vector<8x1xf32> to vector<8x128xf32>
    %35 = arith.mulf %31, %34 : vector<8x128xf32>
    %36 = arith.addf %29, %35 : vector<8x128xf32>
    %37 = vector.extract_strided_slice %2 {offsets = [0, 2, 1], sizes = [8, 1, 128], strides = [1, 1, 1]} : vector<8x4x256xf32> to vector<8x1x128xf32>
    %38 = vector.shape_cast %37 : vector<8x1x128xf32> to vector<8x128xf32>
    %c5 = arith.constant 5 : index
    %c0_14 = arith.constant 0 : index
    %c0_15 = arith.constant 0 : index
    %39 = vector.load %arg2[%c5, %c0_14, %c0_15] : memref<9x8x1xf32, #tpu.memory_space<vmem>>, vector<1x8x1xf32>
    %40 = vector.shape_cast %39 : vector<1x8x1xf32> to vector<8x1xf32>
    %41 = vector.broadcast %40 : vector<8x1xf32> to vector<8x128xf32>
    %42 = arith.mulf %38, %41 : vector<8x128xf32>
    %43 = arith.addf %36, %42 : vector<8x128xf32>
    %44 = vector.extract_strided_slice %2 {offsets = [0, 0, 3], sizes = [8, 1, 128], strides = [1, 1, 1]} : vector<8x4x256xf32> to vector<8x1x128xf32>
    %45 = vector.shape_cast %44 : vector<8x1x128xf32> to vector<8x128xf32>
    %c6 = arith.constant 6 : index
    %c0_16 = arith.constant 0 : index
    %c0_17 = arith.constant 0 : index
    %46 = vector.load %arg2[%c6, %c0_16, %c0_17] : memref<9x8x1xf32, #tpu.memory_space<vmem>>, vector<1x8x1xf32>
    %47 = vector.shape_cast %46 : vector<1x8x1xf32> to vector<8x1xf32>
    %48 = vector.broadcast %47 : vector<8x1xf32> to vector<8x128xf32>
    %49 = arith.mulf %45, %48 : vector<8x128xf32>
    %50 = arith.addf %43, %49 : vector<8x128xf32>
    %51 = vector.extract_strided_slice %2 {offsets = [0, 1, 3], sizes = [8, 1, 128], strides = [1, 1, 1]} : vector<8x4x256xf32> to vector<8x1x128xf32>
    %52 = vector.shape_cast %51 : vector<8x1x128xf32> to vector<8x128xf32>
    %c7 = arith.constant 7 : index
    %c0_18 = arith.constant 0 : index
    %c0_19 = arith.constant 0 : index
    %53 = vector.load %arg2[%c7, %c0_18, %c0_19] : memref<9x8x1xf32, #tpu.memory_space<vmem>>, vector<1x8x1xf32>
    %54 = vector.shape_cast %53 : vector<1x8x1xf32> to vector<8x1xf32>
    %55 = vector.broadcast %54 : vector<8x1xf32> to vector<8x128xf32>
    %56 = arith.mulf %52, %55 : vector<8x128xf32>
    %57 = arith.addf %50, %56 : vector<8x128xf32>
    %58 = vector.extract_strided_slice %2 {offsets = [0, 0, 4], sizes = [8, 1, 128], strides = [1, 1, 1]} : vector<8x4x256xf32> to vector<8x1x128xf32>
    %59 = vector.shape_cast %58 : vector<8x1x128xf32> to vector<8x128xf32>
    %c8 = arith.constant 8 : index
    %c0_20 = arith.constant 0 : index
    %c0_21 = arith.constant 0 : index
    %60 = vector.load %arg2[%c8, %c0_20, %c0_21] : memref<9x8x1xf32, #tpu.memory_space<vmem>>, vector<1x8x1xf32>
    %61 = vector.shape_cast %60 : vector<1x8x1xf32> to vector<8x1xf32>
    %62 = vector.broadcast %61 : vector<8x1xf32> to vector<8x128xf32>
    %63 = arith.mulf %59, %62 : vector<8x128xf32>
    %64 = arith.addf %57, %63 : vector<8x128xf32>
    %c0_22 = arith.constant 0 : index
    %c0_23 = arith.constant 0 : index
    %65 = vector.load %arg3[%c0_22, %c0_23] : memref<8x1xf32, #tpu.memory_space<vmem>>, vector<8x1xf32>
    %66 = vector.broadcast %65 : vector<8x1xf32> to vector<8x128xf32>
    %67 = arith.mulf %64, %66 : vector<8x128xf32>
    %c0_24 = arith.constant 0 : index
    %c0_25 = arith.constant 0 : index
    %68 = vector.load %arg4[%c0_24, %c0_25] : memref<8x1xf32, #tpu.memory_space<vmem>>, vector<8x1xf32>
    %69 = vector.broadcast %68 : vector<8x1xf32> to vector<8x128xf32>
    %70 = arith.addf %67, %69 : vector<8x128xf32>
    %cst = arith.constant 0.000000e+00 : f32
    %71 = vector.broadcast %cst : f32 to vector<8x128xf32>
    %72 = arith.cmpf oge, %70, %71 : vector<8x128xf32>
    %cst_26 = arith.constant 0.00999999977 : f32
    %73 = vector.broadcast %cst_26 : f32 to vector<8x128xf32>
    %74 = arith.mulf %73, %70 : vector<8x128xf32>
    %75 = arith.select %72, %70, %74 : vector<8x128xi1>, vector<8x128xf32>
    %76 = arith.truncf %75 : vector<8x128xf32> to vector<8x128xbf16>
    %c0_27 = arith.constant 0 : index
    %c0_28 = arith.constant 0 : index
    %c0_29 = arith.constant 0 : index
    %77 = vector.load %arg5[%c0_27, %c0_28, %c0_29] : memref<1x8x128xbf16, #tpu.memory_space<vmem>>, vector<1x8x128xbf16>
    %78 = vector.shape_cast %77 : vector<1x8x128xbf16> to vector<8x128xbf16>
    %79 = vector.shape_cast %76 : vector<8x128xbf16> to vector<1x8x128xbf16>
    tpu.vector_store %arg5[%c0_27, %c0_28, %c0_29], %79 {strides = array<i32>} : memref<1x8x128xbf16, #tpu.memory_space<vmem>>, vector<1x8x128xbf16>,
    return
  }
  func.func @transform_0(%arg0: i32) -> (i32, i32, i32, i32) {
    %c0_i32 = arith.constant 0 : i32
    %c0_i32_0 = arith.constant 0 : i32
    %c0_i32_1 = arith.constant 0 : i32
    %c0_i32_2 = arith.constant 0 : i32
    return %arg0, %c0_i32, %c0_i32_0, %c0_i32_1 : i32, i32, i32, i32
  }
  func.func @transform_1(%arg0: i32) -> (i32, i32, i32) {
    %c0_i32 = arith.constant 0 : i32
    %c0_i32_0 = arith.constant 0 : i32
    %c0_i32_1 = arith.constant 0 : i32
    %c0_i32_2 = arith.constant 0 : i32
    return %c0_i32, %c0_i32_0, %c0_i32_1 : i32, i32, i32
  }
  func.func @transform_2(%arg0: i32) -> (i32, i32) {
    %c0_i32 = arith.constant 0 : i32
    %c0_i32_0 = arith.constant 0 : i32
    %c0_i32_1 = arith.constant 0 : i32
    return %c0_i32, %c0_i32_0 : i32, i32
  }
  func.func @transform_3(%arg0: i32) -> (i32, i32) {
    %c0_i32 = arith.constant 0 : i32
    %c0_i32_0 = arith.constant 0 : i32
    %c0_i32_1 = arith.constant 0 : i32
    return %c0_i32, %c0_i32_0 : i32, i32
  }
  func.func @transform_4(%arg0: i32) -> (i32, i32, i32) {
    %c0_i32 = arith.constant 0 : i32
    %c0_i32_0 = arith.constant 0 : i32
    %c0_i32_1 = arith.constant 0 : i32
    return %arg0, %c0_i32, %c0_i32_0 : i32, i32, i32
  }
}

module attributes {stable_mosaic.version = 11 : i64} {
  func.func @_ddualgcn_trunk_kernel(%arg0: i32, %arg1: memref<1xf32, #tpu.memory_space<smem>>, %arg2: memref<1x8x256xbf16, #tpu.memory_space<vmem>>, %arg3: memref<1x8x4xbf16, #tpu.memory_space<vmem>>, %arg4: memref<4x256xbf16, #tpu.memory_space<vmem>>, %arg5: memref<6x8xbf16, #tpu.memory_space<vmem>>, %arg6: memref<6x1xf32, #tpu.memory_space<vmem>>, %arg7: memref<6x1xf32, #tpu.memory_space<vmem>>, %arg8: memref<2x2xbf16, #tpu.memory_space<vmem>>, %arg9: memref<1x2xf32, #tpu.memory_space<vmem>>, %arg10: memref<4x4xbf16, #tpu.memory_space<vmem>>, %arg11: memref<4x1xf32, #tpu.memory_space<vmem>>, %arg12: memref<8x4xbf16, #tpu.memory_space<vmem>>, %arg13: memref<8x1xf32, #tpu.memory_space<vmem>>, %arg14: memref<8x1xf32, #tpu.memory_space<vmem>>, %arg15: memref<8x8xbf16, #tpu.memory_space<vmem>>, %arg16: memref<8x8xbf16, #tpu.memory_space<vmem>>, %arg17: memref<8x1xf32, #tpu.memory_space<vmem>>, %arg18: memref<8x1xf32, #tpu.memory_space<vmem>>, %arg19: memref<1x8x256xbf16, #tpu.memory_space<vmem>>) attributes {dimension_semantics = [#tpu.dimension_semantics<parallel>], iteration_bounds = array<i64: 2>, scalar_prefetch = 0 : i64, scratch_operands = 0 : i64, tpu.core_type = #tpu.core_type<tc>, window_params = [{transform_indices = @transform_0, window_bounds = array<i64: 1>}, {transform_indices = @transform_1, window_bounds = array<i64: 1, 8, 256>}, {transform_indices = @transform_2, window_bounds = array<i64: 1, 8, 4>}, {pipeline_mode = #tpu.pipeline_mode<synchronous>, transform_indices = @transform_3, window_bounds = array<i64: 4, 256>}, {pipeline_mode = #tpu.pipeline_mode<synchronous>, transform_indices = @transform_4, window_bounds = array<i64: 6, 8>}, {pipeline_mode = #tpu.pipeline_mode<synchronous>, transform_indices = @transform_5, window_bounds = array<i64: 6, 1>}, {pipeline_mode = #tpu.pipeline_mode<synchronous>, transform_indices = @transform_6, window_bounds = array<i64: 6, 1>}, {pipeline_mode = #tpu.pipeline_mode<synchronous>, transform_indices = @transform_7, window_bounds = array<i64: 2, 2>}, {pipeline_mode = #tpu.pipeline_mode<synchronous>, transform_indices = @transform_8, window_bounds = array<i64: 1, 2>}, {pipeline_mode = #tpu.pipeline_mode<synchronous>, transform_indices = @transform_9, window_bounds = array<i64: 4, 4>}, {pipeline_mode = #tpu.pipeline_mode<synchronous>, transform_indices = @transform_10, window_bounds = array<i64: 4, 1>}, {pipeline_mode = #tpu.pipeline_mode<synchronous>, transform_indices = @transform_11, window_bounds = array<i64: 8, 4>}, {pipeline_mode = #tpu.pipeline_mode<synchronous>, transform_indices = @transform_12, window_bounds = array<i64: 8, 1>}, {pipeline_mode = #tpu.pipeline_mode<synchronous>, transform_indices = @transform_13, window_bounds = array<i64: 8, 1>}, {pipeline_mode = #tpu.pipeline_mode<synchronous>, transform_indices = @transform_14, window_bounds = array<i64: 8, 8>}, {pipeline_mode = #tpu.pipeline_mode<synchronous>, transform_indices = @transform_15, window_bounds = array<i64: 8, 8>}, {pipeline_mode = #tpu.pipeline_mode<synchronous>, transform_indices = @transform_16, window_bounds = array<i64: 8, 1>}, {pipeline_mode = #tpu.pipeline_mode<synchronous>, transform_indices = @transform_17, window_bounds = array<i64: 8, 1>}, {transform_indices = @transform_18, window_bounds = array<i64: 1, 8, 256>}]} {
    %c0 = arith.constant 0 : index
    %c0_0 = arith.constant 0 : index
    %c0_1 = arith.constant 0 : index
    %0 = vector.load %arg2[%c0, %c0_0, %c0_1] : memref<1x8x256xbf16, #tpu.memory_space<vmem>>, vector<1x8x256xbf16>
    %1 = vector.shape_cast %0 : vector<1x8x256xbf16> to vector<8x256xbf16>
    %2 = arith.extf %1 : vector<8x256xbf16> to vector<8x256xf32>
    %c0_2 = arith.constant 0 : index
    %c0_3 = arith.constant 0 : index
    %3 = vector.load %arg5[%c0_2, %c0_3] : memref<6x8xbf16, #tpu.memory_space<vmem>>, vector<6x8xbf16>
    %cst = arith.constant dense<0.000000e+00> : vector<6x256xf32>
    %4 = tpu.matmul %3, %1, %cst {dimension_numbers = #tpu.dot_dimension_numbers<[1], [0], [0], [1], [0, 0, 1, 1], [], []>} : vector<6x8xbf16>, vector<8x256xbf16>, vector<6x256xf32> -> vector<6x256xf32>
    %c0_4 = arith.constant 0 : index
    %c0_5 = arith.constant 0 : index
    %5 = vector.load %arg6[%c0_4, %c0_5] : memref<6x1xf32, #tpu.memory_space<vmem>>, vector<6x1xf32>
    %6 = vector.broadcast %5 : vector<6x1xf32> to vector<6x256xf32>
    %7 = arith.mulf %4, %6 : vector<6x256xf32>
    %c0_6 = arith.constant 0 : index
    %c0_7 = arith.constant 0 : index
    %8 = vector.load %arg7[%c0_6, %c0_7] : memref<6x1xf32, #tpu.memory_space<vmem>>, vector<6x1xf32>
    %9 = vector.broadcast %8 : vector<6x1xf32> to vector<6x256xf32>
    %10 = arith.addf %7, %9 : vector<6x256xf32>
    %cst_8 = arith.constant 0.000000e+00 : f32
    %11 = vector.broadcast %cst_8 : f32 to vector<6x256xf32>
    %12 = arith.cmpf oge, %10, %11 : vector<6x256xf32>
    %cst_9 = arith.constant 0.00999999977 : f32
    %13 = vector.broadcast %cst_9 : f32 to vector<6x256xf32>
    %14 = arith.mulf %13, %10 : vector<6x256xf32>
    %15 = arith.select %12, %10, %14 : vector<6x256xi1>, vector<6x256xf32>
    %16 = vector.extract_strided_slice %15 {offsets = [0, 0], sizes = [4, 256], strides = [1, 1]} : vector<6x256xf32> to vector<4x256xf32>
    %17 = vector.extract_strided_slice %15 {offsets = [4, 0], sizes = [2, 256], strides = [1, 1]} : vector<6x256xf32> to vector<2x256xf32>
    %18 = arith.truncf %16 : vector<4x256xf32> to vector<4x256xbf16>
    %19 = arith.truncf %17 : vector<2x256xf32> to vector<2x256xbf16>
    %cst_10 = arith.constant dense<0.000000e+00> : vector<4x2xf32>
    %20 = tpu.matmul %18, %19, %cst_10 {dimension_numbers = #tpu.dot_dimension_numbers<[1], [1], [0], [0], [0, 0, 1, 0], [], []>} : vector<4x256xbf16>, vector<2x256xbf16>, vector<4x2xf32> -> vector<4x2xf32>
    %21 = arith.truncf %20 : vector<4x2xf32> to vector<4x2xbf16>
    %c0_11 = arith.constant 0 : index
    %c0_12 = arith.constant 0 : index
    %22 = vector.load %arg8[%c0_11, %c0_12] : memref<2x2xbf16, #tpu.memory_space<vmem>>, vector<2x2xbf16>
    %cst_13 = arith.constant dense<0.000000e+00> : vector<4x2xf32>
    %23 = tpu.matmul %21, %22, %cst_13 {dimension_numbers = #tpu.dot_dimension_numbers<[1], [1], [0], [0], [0, 0, 1, 0], [], []>} : vector<4x2xbf16>, vector<2x2xbf16>, vector<4x2xf32> -> vector<4x2xf32>
    %c0_14 = arith.constant 0 : index
    %c0_15 = arith.constant 0 : index
    %24 = vector.load %arg9[%c0_14, %c0_15] : memref<1x2xf32, #tpu.memory_space<vmem>>, vector<1x2xf32>
    %25 = vector.broadcast %24 : vector<1x2xf32> to vector<4x2xf32>
    %26 = arith.addf %23, %25 : vector<4x2xf32>
    %27 = arith.addf %26, %20 : vector<4x2xf32>
    %c0_16 = arith.constant 0 : index
    %c0_17 = arith.constant 0 : index
    %28 = vector.load %arg10[%c0_16, %c0_17] : memref<4x4xbf16, #tpu.memory_space<vmem>>, vector<4x4xbf16>
    %29 = arith.truncf %27 : vector<4x2xf32> to vector<4x2xbf16>
    %cst_18 = arith.constant dense<0.000000e+00> : vector<4x2xf32>
    %30 = tpu.matmul %28, %29, %cst_18 {dimension_numbers = #tpu.dot_dimension_numbers<[1], [0], [0], [1], [0, 0, 1, 1], [], []>} : vector<4x4xbf16>, vector<4x2xbf16>, vector<4x2xf32> -> vector<4x2xf32>
    %c0_19 = arith.constant 0 : index
    %c0_20 = arith.constant 0 : index
    %31 = vector.load %arg11[%c0_19, %c0_20] : memref<4x1xf32, #tpu.memory_space<vmem>>, vector<4x1xf32>
    %32 = vector.broadcast %31 : vector<4x1xf32> to vector<4x2xf32>
    %33 = arith.addf %30, %32 : vector<4x2xf32>
    %34 = arith.truncf %33 : vector<4x2xf32> to vector<4x2xbf16>
    %35 = arith.truncf %17 : vector<2x256xf32> to vector<2x256xbf16>
    %cst_21 = arith.constant dense<0.000000e+00> : vector<4x256xf32>
    %36 = tpu.matmul %34, %35, %cst_21 {dimension_numbers = #tpu.dot_dimension_numbers<[1], [0], [0], [1], [0, 0, 1, 1], [], []>} : vector<4x2xbf16>, vector<2x256xbf16>, vector<4x256xf32> -> vector<4x256xf32>
    %c0_22 = arith.constant 0 : index
    %c0_23 = arith.constant 0 : index
    %37 = vector.load %arg12[%c0_22, %c0_23] : memref<8x4xbf16, #tpu.memory_space<vmem>>, vector<8x4xbf16>
    %38 = arith.truncf %36 : vector<4x256xf32> to vector<4x256xbf16>
    %cst_24 = arith.constant dense<0.000000e+00> : vector<8x256xf32>
    %39 = tpu.matmul %37, %38, %cst_24 {dimension_numbers = #tpu.dot_dimension_numbers<[1], [0], [0], [1], [0, 0, 1, 1], [], []>} : vector<8x4xbf16>, vector<4x256xbf16>, vector<8x256xf32> -> vector<8x256xf32>
    %c0_25 = arith.constant 0 : index
    %c0_26 = arith.constant 0 : index
    %40 = vector.load %arg13[%c0_25, %c0_26] : memref<8x1xf32, #tpu.memory_space<vmem>>, vector<8x1xf32>
    %41 = vector.broadcast %40 : vector<8x1xf32> to vector<8x256xf32>
    %42 = arith.mulf %39, %41 : vector<8x256xf32>
    %c0_27 = arith.constant 0 : index
    %c0_28 = arith.constant 0 : index
    %43 = vector.load %arg14[%c0_27, %c0_28] : memref<8x1xf32, #tpu.memory_space<vmem>>, vector<8x1xf32>
    %44 = vector.broadcast %43 : vector<8x1xf32> to vector<8x256xf32>
    %45 = arith.addf %42, %44 : vector<8x256xf32>
    %cst_29 = arith.constant 0.000000e+00 : f32
    %46 = vector.broadcast %cst_29 : f32 to vector<8x256xf32>
    %47 = arith.cmpf oge, %45, %46 : vector<8x256xf32>
    %cst_30 = arith.constant 0.00999999977 : f32
    %48 = vector.broadcast %cst_30 : f32 to vector<8x256xf32>
    %49 = arith.mulf %48, %45 : vector<8x256xf32>
    %50 = arith.select %47, %45, %49 : vector<8x256xi1>, vector<8x256xf32>
    %c0_31 = arith.constant 0 : index
    %51 = memref.load %arg1[%c0_31] : memref<1xf32, #tpu.memory_space<smem>>
    %52 = vector.broadcast %51 : f32 to vector<8x256xf32>
    %53 = arith.mulf %52, %50 : vector<8x256xf32>
    %54 = arith.addf %53, %2 : vector<8x256xf32>
    %c0_32 = arith.constant 0 : index
    %c0_33 = arith.constant 0 : index
    %c0_34 = arith.constant 0 : index
    %55 = vector.load %arg3[%c0_32, %c0_33, %c0_34] : memref<1x8x4xbf16, #tpu.memory_space<vmem>>, vector<1x8x4xbf16>
    %56 = vector.shape_cast %55 : vector<1x8x4xbf16> to vector<8x4xbf16>
    %c0_35 = arith.constant 0 : index
    %c0_36 = arith.constant 0 : index
    %57 = vector.load %arg4[%c0_35, %c0_36] : memref<4x256xbf16, #tpu.memory_space<vmem>>, vector<4x256xbf16>
    %cst_37 = arith.constant dense<0.000000e+00> : vector<8x256xf32>
    %58 = tpu.matmul %56, %57, %cst_37 {dimension_numbers = #tpu.dot_dimension_numbers<[1], [0], [0], [1], [0, 0, 1, 1], [], []>} : vector<8x4xbf16>, vector<4x256xbf16>, vector<8x256xf32> -> vector<8x256xf32>
    %59 = arith.mulf %2, %58 : vector<8x256xf32>
    %60 = arith.addf %59, %2 : vector<8x256xf32>
    %c0_38 = arith.constant 0 : index
    %c0_39 = arith.constant 0 : index
    %61 = vector.load %arg15[%c0_38, %c0_39] : memref<8x8xbf16, #tpu.memory_space<vmem>>, vector<8x8xbf16>
    %62 = arith.truncf %60 : vector<8x256xf32> to vector<8x256xbf16>
    %cst_40 = arith.constant dense<0.000000e+00> : vector<8x256xf32>
    %63 = tpu.matmul %61, %62, %cst_40 {dimension_numbers = #tpu.dot_dimension_numbers<[1], [0], [0], [1], [0, 0, 1, 1], [], []>} : vector<8x8xbf16>, vector<8x256xbf16>, vector<8x256xf32> -> vector<8x256xf32>
    %c0_41 = arith.constant 0 : index
    %c0_42 = arith.constant 0 : index
    %64 = vector.load %arg16[%c0_41, %c0_42] : memref<8x8xbf16, #tpu.memory_space<vmem>>, vector<8x8xbf16>
    %65 = arith.truncf %54 : vector<8x256xf32> to vector<8x256xbf16>
    %cst_43 = arith.constant dense<0.000000e+00> : vector<8x256xf32>
    %66 = tpu.matmul %64, %65, %cst_43 {dimension_numbers = #tpu.dot_dimension_numbers<[1], [0], [0], [1], [0, 0, 1, 1], [], []>} : vector<8x8xbf16>, vector<8x256xbf16>, vector<8x256xf32> -> vector<8x256xf32>
    %67 = arith.addf %63, %66 : vector<8x256xf32>
    %c0_44 = arith.constant 0 : index
    %c0_45 = arith.constant 0 : index
    %68 = vector.load %arg17[%c0_44, %c0_45] : memref<8x1xf32, #tpu.memory_space<vmem>>, vector<8x1xf32>
    %69 = vector.broadcast %68 : vector<8x1xf32> to vector<8x256xf32>
    %70 = arith.mulf %67, %69 : vector<8x256xf32>
    %c0_46 = arith.constant 0 : index
    %c0_47 = arith.constant 0 : index
    %71 = vector.load %arg18[%c0_46, %c0_47] : memref<8x1xf32, #tpu.memory_space<vmem>>, vector<8x1xf32>
    %72 = vector.broadcast %71 : vector<8x1xf32> to vector<8x256xf32>
    %73 = arith.addf %70, %72 : vector<8x256xf32>
    %cst_48 = arith.constant 0.000000e+00 : f32
    %74 = vector.broadcast %cst_48 : f32 to vector<8x256xf32>
    %75 = arith.cmpf oge, %73, %74 : vector<8x256xf32>
    %cst_49 = arith.constant 0.00999999977 : f32
    %76 = vector.broadcast %cst_49 : f32 to vector<8x256xf32>
    %77 = arith.mulf %76, %73 : vector<8x256xf32>
    %78 = arith.select %75, %73, %77 : vector<8x256xi1>, vector<8x256xf32>
    %79 = arith.truncf %78 : vector<8x256xf32> to vector<8x256xbf16>
    %c0_50 = arith.constant 0 : index
    %c0_51 = arith.constant 0 : index
    %c0_52 = arith.constant 0 : index
    %80 = vector.load %arg19[%c0_50, %c0_51, %c0_52] : memref<1x8x256xbf16, #tpu.memory_space<vmem>>, vector<1x8x256xbf16>
    %81 = vector.shape_cast %80 : vector<1x8x256xbf16> to vector<8x256xbf16>
    %82 = vector.shape_cast %79 : vector<8x256xbf16> to vector<1x8x256xbf16>
    tpu.vector_store %arg19[%c0_50, %c0_51, %c0_52], %82 {strides = array<i32>} : memref<1x8x256xbf16, #tpu.memory_space<vmem>>, vector<1x8x256xbf16>,
    return
  }
  func.func @transform_0(%arg0: i32) -> i32 {
    %c0_i32 = arith.constant 0 : i32
    %c0_i32_0 = arith.constant 0 : i32
    return %c0_i32 : i32
  }
  func.func @transform_1(%arg0: i32) -> (i32, i32, i32) {
    %c0_i32 = arith.constant 0 : i32
    %c0_i32_0 = arith.constant 0 : i32
    %c0_i32_1 = arith.constant 0 : i32
    return %arg0, %c0_i32, %c0_i32_0 : i32, i32, i32
  }
  func.func @transform_2(%arg0: i32) -> (i32, i32, i32) {
    %c0_i32 = arith.constant 0 : i32
    %c0_i32_0 = arith.constant 0 : i32
    %c0_i32_1 = arith.constant 0 : i32
    return %arg0, %c0_i32, %c0_i32_0 : i32, i32, i32
  }
  func.func @transform_3(%arg0: i32) -> (i32, i32) {
    %c0_i32 = arith.constant 0 : i32
    %c0_i32_0 = arith.constant 0 : i32
    %c0_i32_1 = arith.constant 0 : i32
    return %c0_i32, %c0_i32_0 : i32, i32
  }
  func.func @transform_4(%arg0: i32) -> (i32, i32) {
    %c0_i32 = arith.constant 0 : i32
    %c0_i32_0 = arith.constant 0 : i32
    %c0_i32_1 = arith.constant 0 : i32
    return %c0_i32, %c0_i32_0 : i32, i32
  }
  func.func @transform_5(%arg0: i32) -> (i32, i32) {
    %c0_i32 = arith.constant 0 : i32
    %c0_i32_0 = arith.constant 0 : i32
    %c0_i32_1 = arith.constant 0 : i32
    return %c0_i32, %c0_i32_0 : i32, i32
  }
  func.func @transform_6(%arg0: i32) -> (i32, i32) {
    %c0_i32 = arith.constant 0 : i32
    %c0_i32_0 = arith.constant 0 : i32
    %c0_i32_1 = arith.constant 0 : i32
    return %c0_i32, %c0_i32_0 : i32, i32
  }
  func.func @transform_7(%arg0: i32) -> (i32, i32) {
    %c0_i32 = arith.constant 0 : i32
    %c0_i32_0 = arith.constant 0 : i32
    %c0_i32_1 = arith.constant 0 : i32
    return %c0_i32, %c0_i32_0 : i32, i32
  }
  func.func @transform_8(%arg0: i32) -> (i32, i32) {
    %c0_i32 = arith.constant 0 : i32
    %c0_i32_0 = arith.constant 0 : i32
    %c0_i32_1 = arith.constant 0 : i32
    return %c0_i32, %c0_i32_0 : i32, i32
  }
  func.func @transform_9(%arg0: i32) -> (i32, i32) {
    %c0_i32 = arith.constant 0 : i32
    %c0_i32_0 = arith.constant 0 : i32
    %c0_i32_1 = arith.constant 0 : i32
    return %c0_i32, %c0_i32_0 : i32, i32
  }
  func.func @transform_10(%arg0: i32) -> (i32, i32) {
    %c0_i32 = arith.constant 0 : i32
    %c0_i32_0 = arith.constant 0 : i32
    %c0_i32_1 = arith.constant 0 : i32
    return %c0_i32, %c0_i32_0 : i32, i32
  }
  func.func @transform_11(%arg0: i32) -> (i32, i32) {
    %c0_i32 = arith.constant 0 : i32
    %c0_i32_0 = arith.constant 0 : i32
    %c0_i32_1 = arith.constant 0 : i32
    return %c0_i32, %c0_i32_0 : i32, i32
  }
  func.func @transform_12(%arg0: i32) -> (i32, i32) {
    %c0_i32 = arith.constant 0 : i32
    %c0_i32_0 = arith.constant 0 : i32
    %c0_i32_1 = arith.constant 0 : i32
    return %c0_i32, %c0_i32_0 : i32, i32
  }
  func.func @transform_13(%arg0: i32) -> (i32, i32) {
    %c0_i32 = arith.constant 0 : i32
    %c0_i32_0 = arith.constant 0 : i32
    %c0_i32_1 = arith.constant 0 : i32
    return %c0_i32, %c0_i32_0 : i32, i32
  }
  func.func @transform_14(%arg0: i32) -> (i32, i32) {
    %c0_i32 = arith.constant 0 : i32
    %c0_i32_0 = arith.constant 0 : i32
    %c0_i32_1 = arith.constant 0 : i32
    return %c0_i32, %c0_i32_0 : i32, i32
  }
  func.func @transform_15(%arg0: i32) -> (i32, i32) {
    %c0_i32 = arith.constant 0 : i32
    %c0_i32_0 = arith.constant 0 : i32
    %c0_i32_1 = arith.constant 0 : i32
    return %c0_i32, %c0_i32_0 : i32, i32
  }
  func.func @transform_16(%arg0: i32) -> (i32, i32) {
    %c0_i32 = arith.constant 0 : i32
    %c0_i32_0 = arith.constant 0 : i32
    %c0_i32_1 = arith.constant 0 : i32
    return %c0_i32, %c0_i32_0 : i32, i32
  }
  func.func @transform_17(%arg0: i32) -> (i32, i32) {
    %c0_i32 = arith.constant 0 : i32
    %c0_i32_0 = arith.constant 0 : i32
    %c0_i32_1 = arith.constant 0 : i32
    return %c0_i32, %c0_i32_0 : i32, i32
  }
  func.func @transform_18(%arg0: i32) -> (i32, i32, i32) {
    %c0_i32 = arith.constant 0 : i32
    %c0_i32_0 = arith.constant 0 : i32
    %c0_i32_1 = arith.constant 0 : i32
    return %arg0, %c0_i32, %c0_i32_0 : i32, i32, i32
  }
}

module attributes {stable_mosaic.version = 11 : i64} {
  func.func @_spatial_gcn_kernel(%arg0: i32, %arg1: memref<1xf32, #tpu.memory_space<smem>>, %arg2: memref<1x8x4xbf16, #tpu.memory_space<vmem>>, %arg3: memref<4x8xbf16, #tpu.memory_space<vmem>>, %arg4: memref<4x1xf32, #tpu.memory_space<vmem>>, %arg5: memref<4x8xbf16, #tpu.memory_space<vmem>>, %arg6: memref<4x1xf32, #tpu.memory_space<vmem>>, %arg7: memref<4x8xbf16, #tpu.memory_space<vmem>>, %arg8: memref<4x1xf32, #tpu.memory_space<vmem>>, %arg9: memref<4x4xbf16, #tpu.memory_space<vmem>>, %arg10: memref<4x1xf32, #tpu.memory_space<vmem>>, %arg11: memref<8x4xbf16, #tpu.memory_space<vmem>>, %arg12: memref<8x1xf32, #tpu.memory_space<vmem>>, %arg13: memref<1x8x4xbf16, #tpu.memory_space<vmem>>) attributes {dimension_semantics = [#tpu.dimension_semantics<parallel>], iteration_bounds = array<i64: 2>, scalar_prefetch = 0 : i64, scratch_operands = 0 : i64, tpu.core_type = #tpu.core_type<tc>, window_params = [{transform_indices = @transform_0, window_bounds = array<i64: 1>}, {transform_indices = @transform_1, window_bounds = array<i64: 1, 8, 4>}, {pipeline_mode = #tpu.pipeline_mode<synchronous>, transform_indices = @transform_2, window_bounds = array<i64: 4, 8>}, {pipeline_mode = #tpu.pipeline_mode<synchronous>, transform_indices = @transform_3, window_bounds = array<i64: 4, 1>}, {pipeline_mode = #tpu.pipeline_mode<synchronous>, transform_indices = @transform_4, window_bounds = array<i64: 4, 8>}, {pipeline_mode = #tpu.pipeline_mode<synchronous>, transform_indices = @transform_5, window_bounds = array<i64: 4, 1>}, {pipeline_mode = #tpu.pipeline_mode<synchronous>, transform_indices = @transform_6, window_bounds = array<i64: 4, 8>}, {pipeline_mode = #tpu.pipeline_mode<synchronous>, transform_indices = @transform_7, window_bounds = array<i64: 4, 1>}, {pipeline_mode = #tpu.pipeline_mode<synchronous>, transform_indices = @transform_8, window_bounds = array<i64: 4, 4>}, {pipeline_mode = #tpu.pipeline_mode<synchronous>, transform_indices = @transform_9, window_bounds = array<i64: 4, 1>}, {pipeline_mode = #tpu.pipeline_mode<synchronous>, transform_indices = @transform_10, window_bounds = array<i64: 8, 4>}, {pipeline_mode = #tpu.pipeline_mode<synchronous>, transform_indices = @transform_11, window_bounds = array<i64: 8, 1>}, {transform_indices = @transform_12, window_bounds = array<i64: 1, 8, 4>}]} {
    %c0 = arith.constant 0 : index
    %c0_0 = arith.constant 0 : index
    %c0_1 = arith.constant 0 : index
    %0 = vector.load %arg2[%c0, %c0_0, %c0_1] : memref<1x8x4xbf16, #tpu.memory_space<vmem>>, vector<1x8x4xbf16>
    %1 = vector.shape_cast %0 : vector<1x8x4xbf16> to vector<8x4xbf16>
    %2 = arith.extf %1 : vector<8x4xbf16> to vector<8x4xf32>
    %c0_2 = arith.constant 0 : index
    %c0_3 = arith.constant 0 : index
    %3 = vector.load %arg3[%c0_2, %c0_3] : memref<4x8xbf16, #tpu.memory_space<vmem>>, vector<4x8xbf16>
    %cst = arith.constant dense<0.000000e+00> : vector<4x4xf32>
    %4 = tpu.matmul %3, %1, %cst {dimension_numbers = #tpu.dot_dimension_numbers<[1], [0], [0], [1], [0, 0, 1, 1], [], []>} : vector<4x8xbf16>, vector<8x4xbf16>, vector<4x4xf32> -> vector<4x4xf32>
    %c0_4 = arith.constant 0 : index
    %c0_5 = arith.constant 0 : index
    %5 = vector.load %arg4[%c0_4, %c0_5] : memref<4x1xf32, #tpu.memory_space<vmem>>, vector<4x1xf32>
    %6 = vector.broadcast %5 : vector<4x1xf32> to vector<4x4xf32>
    %7 = arith.addf %4, %6 : vector<4x4xf32>
    %c0_6 = arith.constant 0 : index
    %c0_7 = arith.constant 0 : index
    %8 = vector.load %arg5[%c0_6, %c0_7] : memref<4x8xbf16, #tpu.memory_space<vmem>>, vector<4x8xbf16>
    %cst_8 = arith.constant dense<0.000000e+00> : vector<4x4xf32>
    %9 = tpu.matmul %8, %1, %cst_8 {dimension_numbers = #tpu.dot_dimension_numbers<[1], [0], [0], [1], [0, 0, 1, 1], [], []>} : vector<4x8xbf16>, vector<8x4xbf16>, vector<4x4xf32> -> vector<4x4xf32>
    %c0_9 = arith.constant 0 : index
    %c0_10 = arith.constant 0 : index
    %10 = vector.load %arg6[%c0_9, %c0_10] : memref<4x1xf32, #tpu.memory_space<vmem>>, vector<4x1xf32>
    %11 = vector.broadcast %10 : vector<4x1xf32> to vector<4x4xf32>
    %12 = arith.addf %9, %11 : vector<4x4xf32>
    %c0_11 = arith.constant 0 : index
    %c0_12 = arith.constant 0 : index
    %13 = vector.load %arg7[%c0_11, %c0_12] : memref<4x8xbf16, #tpu.memory_space<vmem>>, vector<4x8xbf16>
    %cst_13 = arith.constant dense<0.000000e+00> : vector<4x4xf32>
    %14 = tpu.matmul %13, %1, %cst_13 {dimension_numbers = #tpu.dot_dimension_numbers<[1], [0], [0], [1], [0, 0, 1, 1], [], []>} : vector<4x8xbf16>, vector<8x4xbf16>, vector<4x4xf32> -> vector<4x4xf32>
    %c0_14 = arith.constant 0 : index
    %c0_15 = arith.constant 0 : index
    %15 = vector.load %arg8[%c0_14, %c0_15] : memref<4x1xf32, #tpu.memory_space<vmem>>, vector<4x1xf32>
    %16 = vector.broadcast %15 : vector<4x1xf32> to vector<4x4xf32>
    %17 = arith.addf %14, %16 : vector<4x4xf32>
    %18 = arith.truncf %12 : vector<4x4xf32> to vector<4x4xbf16>
    %19 = arith.truncf %17 : vector<4x4xf32> to vector<4x4xbf16>
    %cst_16 = arith.constant dense<0.000000e+00> : vector<4x4xf32>
    %20 = tpu.matmul %18, %19, %cst_16 {dimension_numbers = #tpu.dot_dimension_numbers<[1], [1], [0], [0], [0, 0, 1, 0], [], []>} : vector<4x4xbf16>, vector<4x4xbf16>, vector<4x4xf32> -> vector<4x4xf32>
    %cst_17 = arith.constant dense<0xFF800000> : vector<4xf32>
    %21 = vector.multi_reduction <maximumf>, %20, %cst_17 [0] : vector<4x4xf32> to vector<4xf32>
    %22 = vector.shape_cast %21 : vector<4xf32> to vector<1x4xf32>
    %23 = vector.broadcast %22 : vector<1x4xf32> to vector<4x4xf32>
    %24 = arith.subf %20, %23 : vector<4x4xf32>
    %25 = math.exp %24 : vector<4x4xf32>
    %cst_18 = arith.constant dense<0.000000e+00> : vector<4xf32>
    %26 = vector.multi_reduction <add>, %25, %cst_18 [0] : vector<4x4xf32> to vector<4xf32>
    %27 = vector.shape_cast %26 : vector<4xf32> to vector<1x4xf32>
    %28 = tpu.reciprocal %27 {approx = true} : vector<1x4xf32> -> vector<1x4xf32>
    %29 = vector.broadcast %28 : vector<1x4xf32> to vector<4x4xf32>
    %30 = arith.mulf %25, %29 : vector<4x4xf32>
    %31 = arith.truncf %30 : vector<4x4xf32> to vector<4x4xbf16>
    %32 = arith.truncf %7 : vector<4x4xf32> to vector<4x4xbf16>
    %cst_19 = arith.constant dense<0.000000e+00> : vector<4x4xf32>
    %33 = tpu.matmul %31, %32, %cst_19 {dimension_numbers = #tpu.dot_dimension_numbers<[1], [0], [0], [1], [0, 0, 1, 1], [], []>} : vector<4x4xbf16>, vector<4x4xbf16>, vector<4x4xf32> -> vector<4x4xf32>
    %c0_20 = arith.constant 0 : index
    %c0_21 = arith.constant 0 : index
    %34 = vector.load %arg9[%c0_20, %c0_21] : memref<4x4xbf16, #tpu.memory_space<vmem>>, vector<4x4xbf16>
    %35 = arith.truncf %33 : vector<4x4xf32> to vector<4x4xbf16>
    %cst_22 = arith.constant dense<0.000000e+00> : vector<4x4xf32>
    %36 = tpu.matmul %34, %35, %cst_22 {dimension_numbers = #tpu.dot_dimension_numbers<[1], [0], [0], [1], [0, 0, 1, 1], [], []>} : vector<4x4xbf16>, vector<4x4xbf16>, vector<4x4xf32> -> vector<4x4xf32>
    %c0_23 = arith.constant 0 : index
    %c0_24 = arith.constant 0 : index
    %37 = vector.load %arg10[%c0_23, %c0_24] : memref<4x1xf32, #tpu.memory_space<vmem>>, vector<4x1xf32>
    %38 = vector.broadcast %37 : vector<4x1xf32> to vector<4x4xf32>
    %39 = arith.addf %36, %38 : vector<4x4xf32>
    %c0_25 = arith.constant 0 : index
    %c0_26 = arith.constant 0 : index
    %40 = vector.load %arg11[%c0_25, %c0_26] : memref<8x4xbf16, #tpu.memory_space<vmem>>, vector<8x4xbf16>
    %41 = arith.truncf %39 : vector<4x4xf32> to vector<4x4xbf16>
    %cst_27 = arith.constant dense<0.000000e+00> : vector<8x4xf32>
    %42 = tpu.matmul %40, %41, %cst_27 {dimension_numbers = #tpu.dot_dimension_numbers<[1], [0], [0], [1], [0, 0, 1, 1], [], []>} : vector<8x4xbf16>, vector<4x4xbf16>, vector<8x4xf32> -> vector<8x4xf32>
    %c0_28 = arith.constant 0 : index
    %c0_29 = arith.constant 0 : index
    %43 = vector.load %arg12[%c0_28, %c0_29] : memref<8x1xf32, #tpu.memory_space<vmem>>, vector<8x1xf32>
    %44 = vector.broadcast %43 : vector<8x1xf32> to vector<8x4xf32>
    %45 = arith.addf %42, %44 : vector<8x4xf32>
    %cst_30 = arith.constant 0.000000e+00 : f32
    %46 = vector.broadcast %cst_30 : f32 to vector<8x4xf32>
    %47 = arith.cmpf oge, %45, %46 : vector<8x4xf32>
    %cst_31 = arith.constant 0.00999999977 : f32
    %48 = vector.broadcast %cst_31 : f32 to vector<8x4xf32>
    %49 = arith.mulf %48, %45 : vector<8x4xf32>
    %50 = arith.select %47, %45, %49 : vector<8x4xi1>, vector<8x4xf32>
    %c0_32 = arith.constant 0 : index
    %51 = memref.load %arg1[%c0_32] : memref<1xf32, #tpu.memory_space<smem>>
    %52 = vector.broadcast %51 : f32 to vector<8x4xf32>
    %53 = arith.mulf %52, %50 : vector<8x4xf32>
    %54 = arith.addf %53, %2 : vector<8x4xf32>
    %55 = arith.truncf %54 : vector<8x4xf32> to vector<8x4xbf16>
    %c0_33 = arith.constant 0 : index
    %c0_34 = arith.constant 0 : index
    %c0_35 = arith.constant 0 : index
    %56 = vector.load %arg13[%c0_33, %c0_34, %c0_35] : memref<1x8x4xbf16, #tpu.memory_space<vmem>>, vector<1x8x4xbf16>
    %57 = vector.shape_cast %56 : vector<1x8x4xbf16> to vector<8x4xbf16>
    %58 = vector.shape_cast %55 : vector<8x4xbf16> to vector<1x8x4xbf16>
    tpu.vector_store %arg13[%c0_33, %c0_34, %c0_35], %58 {strides = array<i32>} : memref<1x8x4xbf16, #tpu.memory_space<vmem>>, vector<1x8x4xbf16>,
    return
  }
  func.func @transform_0(%arg0: i32) -> i32 {
    %c0_i32 = arith.constant 0 : i32
    %c0_i32_0 = arith.constant 0 : i32
    return %c0_i32 : i32
  }
  func.func @transform_1(%arg0: i32) -> (i32, i32, i32) {
    %c0_i32 = arith.constant 0 : i32
    %c0_i32_0 = arith.constant 0 : i32
    %c0_i32_1 = arith.constant 0 : i32
    return %arg0, %c0_i32, %c0_i32_0 : i32, i32, i32
  }
  func.func @transform_2(%arg0: i32) -> (i32, i32) {
    %c0_i32 = arith.constant 0 : i32
    %c0_i32_0 = arith.constant 0 : i32
    %c0_i32_1 = arith.constant 0 : i32
    return %c0_i32, %c0_i32_0 : i32, i32
  }
  func.func @transform_3(%arg0: i32) -> (i32, i32) {
    %c0_i32 = arith.constant 0 : i32
    %c0_i32_0 = arith.constant 0 : i32
    %c0_i32_1 = arith.constant 0 : i32
    return %c0_i32, %c0_i32_0 : i32, i32
  }
  func.func @transform_4(%arg0: i32) -> (i32, i32) {
    %c0_i32 = arith.constant 0 : i32
    %c0_i32_0 = arith.constant 0 : i32
    %c0_i32_1 = arith.constant 0 : i32
    return %c0_i32, %c0_i32_0 : i32, i32
  }
  func.func @transform_5(%arg0: i32) -> (i32, i32) {
    %c0_i32 = arith.constant 0 : i32
    %c0_i32_0 = arith.constant 0 : i32
    %c0_i32_1 = arith.constant 0 : i32
    return %c0_i32, %c0_i32_0 : i32, i32
  }
  func.func @transform_6(%arg0: i32) -> (i32, i32) {
    %c0_i32 = arith.constant 0 : i32
    %c0_i32_0 = arith.constant 0 : i32
    %c0_i32_1 = arith.constant 0 : i32
    return %c0_i32, %c0_i32_0 : i32, i32
  }
  func.func @transform_7(%arg0: i32) -> (i32, i32) {
    %c0_i32 = arith.constant 0 : i32
    %c0_i32_0 = arith.constant 0 : i32
    %c0_i32_1 = arith.constant 0 : i32
    return %c0_i32, %c0_i32_0 : i32, i32
  }
  func.func @transform_8(%arg0: i32) -> (i32, i32) {
    %c0_i32 = arith.constant 0 : i32
    %c0_i32_0 = arith.constant 0 : i32
    %c0_i32_1 = arith.constant 0 : i32
    return %c0_i32, %c0_i32_0 : i32, i32
  }
  func.func @transform_9(%arg0: i32) -> (i32, i32) {
    %c0_i32 = arith.constant 0 : i32
    %c0_i32_0 = arith.constant 0 : i32
    %c0_i32_1 = arith.constant 0 : i32
    return %c0_i32, %c0_i32_0 : i32, i32
  }
  func.func @transform_10(%arg0: i32) -> (i32, i32) {
    %c0_i32 = arith.constant 0 : i32
    %c0_i32_0 = arith.constant 0 : i32
    %c0_i32_1 = arith.constant 0 : i32
    return %c0_i32, %c0_i32_0 : i32, i32
  }
  func.func @transform_11(%arg0: i32) -> (i32, i32) {
    %c0_i32 = arith.constant 0 : i32
    %c0_i32_0 = arith.constant 0 : i32
    %c0_i32_1 = arith.constant 0 : i32
    return %c0_i32, %c0_i32_0 : i32, i32
  }
  func.func @transform_12(%arg0: i32) -> (i32, i32, i32) {
    %c0_i32 = arith.constant 0 : i32
    %c0_i32_0 = arith.constant 0 : i32
    %c0_i32_1 = arith.constant 0 : i32
    return %arg0, %c0_i32, %c0_i32_0 : i32, i32, i32
  }
}

module attributes {stable_mosaic.version = 11 : i64} {
  func.func @_conv3x3_kernel(%arg0: i32, %arg1: i32, %arg2: memref<1x8x512xbf16, #tpu.memory_space<vmem>>, %arg3: memref<9x8x8xbf16, #tpu.memory_space<vmem>>, %arg4: memref<1x8x512xbf16, #tpu.memory_space<vmem>>, %arg5: memref<9x8x8xbf16, #tpu.memory_space<vmem>>, %arg6: memref<8x1xf32, #tpu.memory_space<vmem>>, %arg7: memref<8x1xf32, #tpu.memory_space<vmem>>, %arg8: memref<1x8x384xf32, #tpu.memory_space<vmem>>) attributes {dimension_semantics = [#tpu.dimension_semantics<parallel>, #tpu.dimension_semantics<parallel>], iteration_bounds = array<i64: 2, 1>, scalar_prefetch = 0 : i64, scratch_operands = 0 : i64, tpu.core_type = #tpu.core_type<tc>, window_params = [{transform_indices = @transform_0, window_bounds = array<i64: 1, 8, 512>}, {transform_indices = @transform_1, window_bounds = array<i64: 9, 8, 8>}, {transform_indices = @transform_2, window_bounds = array<i64: 1, 8, 512>}, {transform_indices = @transform_3, window_bounds = array<i64: 9, 8, 8>}, {transform_indices = @transform_4, window_bounds = array<i64: 8, 1>}, {transform_indices = @transform_5, window_bounds = array<i64: 8, 1>}, {transform_indices = @transform_6, window_bounds = array<i64: 1, 8, 384>}]} {
    %c0 = arith.constant 0 : index
    %c0_0 = arith.constant 0 : index
    %c0_1 = arith.constant 0 : index
    %0 = vector.load %arg2[%c0, %c0_0, %c0_1] : memref<1x8x512xbf16, #tpu.memory_space<vmem>>, vector<1x8x512xbf16>
    %1 = vector.shape_cast %0 : vector<1x8x512xbf16> to vector<8x512xbf16>
    %c0_2 = arith.constant 0 : index
    %c0_3 = arith.constant 0 : index
    %c0_4 = arith.constant 0 : index
    %2 = vector.load %arg3[%c0_2, %c0_3, %c0_4] : memref<9x8x8xbf16, #tpu.memory_space<vmem>>, vector<1x8x8xbf16>
    %3 = vector.shape_cast %2 : vector<1x8x8xbf16> to vector<8x8xbf16>
    %4 = vector.extract_strided_slice %1 {offsets = [0, 0], sizes = [8, 384], strides = [1, 1]} : vector<8x512xbf16> to vector<8x384xbf16>
    %cst = arith.constant dense<0.000000e+00> : vector<8x384xf32>
    %5 = tpu.matmul %3, %4, %cst {dimension_numbers = #tpu.dot_dimension_numbers<[1], [0], [0], [1], [0, 0, 1, 1], [], []>} : vector<8x8xbf16>, vector<8x384xbf16>, vector<8x384xf32> -> vector<8x384xf32>
    %c1 = arith.constant 1 : index
    %c0_5 = arith.constant 0 : index
    %c0_6 = arith.constant 0 : index
    %6 = vector.load %arg3[%c1, %c0_5, %c0_6] : memref<9x8x8xbf16, #tpu.memory_space<vmem>>, vector<1x8x8xbf16>
    %7 = vector.shape_cast %6 : vector<1x8x8xbf16> to vector<8x8xbf16>
    %8 = vector.extract_strided_slice %1 {offsets = [0, 1], sizes = [8, 384], strides = [1, 1]} : vector<8x512xbf16> to vector<8x384xbf16>
    %cst_7 = arith.constant dense<0.000000e+00> : vector<8x384xf32>
    %9 = tpu.matmul %7, %8, %cst_7 {dimension_numbers = #tpu.dot_dimension_numbers<[1], [0], [0], [1], [0, 0, 1, 1], [], []>} : vector<8x8xbf16>, vector<8x384xbf16>, vector<8x384xf32> -> vector<8x384xf32>
    %10 = arith.addf %5, %9 : vector<8x384xf32>
    %c2 = arith.constant 2 : index
    %c0_8 = arith.constant 0 : index
    %c0_9 = arith.constant 0 : index
    %11 = vector.load %arg3[%c2, %c0_8, %c0_9] : memref<9x8x8xbf16, #tpu.memory_space<vmem>>, vector<1x8x8xbf16>
    %12 = vector.shape_cast %11 : vector<1x8x8xbf16> to vector<8x8xbf16>
    %13 = vector.extract_strided_slice %1 {offsets = [0, 2], sizes = [8, 384], strides = [1, 1]} : vector<8x512xbf16> to vector<8x384xbf16>
    %cst_10 = arith.constant dense<0.000000e+00> : vector<8x384xf32>
    %14 = tpu.matmul %12, %13, %cst_10 {dimension_numbers = #tpu.dot_dimension_numbers<[1], [0], [0], [1], [0, 0, 1, 1], [], []>} : vector<8x8xbf16>, vector<8x384xbf16>, vector<8x384xf32> -> vector<8x384xf32>
    %15 = arith.addf %10, %14 : vector<8x384xf32>
    %c3 = arith.constant 3 : index
    %c0_11 = arith.constant 0 : index
    %c0_12 = arith.constant 0 : index
    %16 = vector.load %arg3[%c3, %c0_11, %c0_12] : memref<9x8x8xbf16, #tpu.memory_space<vmem>>, vector<1x8x8xbf16>
    %17 = vector.shape_cast %16 : vector<1x8x8xbf16> to vector<8x8xbf16>
    %18 = vector.extract_strided_slice %1 {offsets = [0, 18], sizes = [8, 384], strides = [1, 1]} : vector<8x512xbf16> to vector<8x384xbf16>
    %cst_13 = arith.constant dense<0.000000e+00> : vector<8x384xf32>
    %19 = tpu.matmul %17, %18, %cst_13 {dimension_numbers = #tpu.dot_dimension_numbers<[1], [0], [0], [1], [0, 0, 1, 1], [], []>} : vector<8x8xbf16>, vector<8x384xbf16>, vector<8x384xf32> -> vector<8x384xf32>
    %20 = arith.addf %15, %19 : vector<8x384xf32>
    %c4 = arith.constant 4 : index
    %c0_14 = arith.constant 0 : index
    %c0_15 = arith.constant 0 : index
    %21 = vector.load %arg3[%c4, %c0_14, %c0_15] : memref<9x8x8xbf16, #tpu.memory_space<vmem>>, vector<1x8x8xbf16>
    %22 = vector.shape_cast %21 : vector<1x8x8xbf16> to vector<8x8xbf16>
    %23 = vector.extract_strided_slice %1 {offsets = [0, 19], sizes = [8, 384], strides = [1, 1]} : vector<8x512xbf16> to vector<8x384xbf16>
    %cst_16 = arith.constant dense<0.000000e+00> : vector<8x384xf32>
    %24 = tpu.matmul %22, %23, %cst_16 {dimension_numbers = #tpu.dot_dimension_numbers<[1], [0], [0], [1], [0, 0, 1, 1], [], []>} : vector<8x8xbf16>, vector<8x384xbf16>, vector<8x384xf32> -> vector<8x384xf32>
    %25 = arith.addf %20, %24 : vector<8x384xf32>
    %c5 = arith.constant 5 : index
    %c0_17 = arith.constant 0 : index
    %c0_18 = arith.constant 0 : index
    %26 = vector.load %arg3[%c5, %c0_17, %c0_18] : memref<9x8x8xbf16, #tpu.memory_space<vmem>>, vector<1x8x8xbf16>
    %27 = vector.shape_cast %26 : vector<1x8x8xbf16> to vector<8x8xbf16>
    %28 = vector.extract_strided_slice %1 {offsets = [0, 20], sizes = [8, 384], strides = [1, 1]} : vector<8x512xbf16> to vector<8x384xbf16>
    %cst_19 = arith.constant dense<0.000000e+00> : vector<8x384xf32>
    %29 = tpu.matmul %27, %28, %cst_19 {dimension_numbers = #tpu.dot_dimension_numbers<[1], [0], [0], [1], [0, 0, 1, 1], [], []>} : vector<8x8xbf16>, vector<8x384xbf16>, vector<8x384xf32> -> vector<8x384xf32>
    %30 = arith.addf %25, %29 : vector<8x384xf32>
    %c6 = arith.constant 6 : index
    %c0_20 = arith.constant 0 : index
    %c0_21 = arith.constant 0 : index
    %31 = vector.load %arg3[%c6, %c0_20, %c0_21] : memref<9x8x8xbf16, #tpu.memory_space<vmem>>, vector<1x8x8xbf16>
    %32 = vector.shape_cast %31 : vector<1x8x8xbf16> to vector<8x8xbf16>
    %33 = vector.extract_strided_slice %1 {offsets = [0, 36], sizes = [8, 384], strides = [1, 1]} : vector<8x512xbf16> to vector<8x384xbf16>
    %cst_22 = arith.constant dense<0.000000e+00> : vector<8x384xf32>
    %34 = tpu.matmul %32, %33, %cst_22 {dimension_numbers = #tpu.dot_dimension_numbers<[1], [0], [0], [1], [0, 0, 1, 1], [], []>} : vector<8x8xbf16>, vector<8x384xbf16>, vector<8x384xf32> -> vector<8x384xf32>
    %35 = arith.addf %30, %34 : vector<8x384xf32>
    %c7 = arith.constant 7 : index
    %c0_23 = arith.constant 0 : index
    %c0_24 = arith.constant 0 : index
    %36 = vector.load %arg3[%c7, %c0_23, %c0_24] : memref<9x8x8xbf16, #tpu.memory_space<vmem>>, vector<1x8x8xbf16>
    %37 = vector.shape_cast %36 : vector<1x8x8xbf16> to vector<8x8xbf16>
    %38 = vector.extract_strided_slice %1 {offsets = [0, 37], sizes = [8, 384], strides = [1, 1]} : vector<8x512xbf16> to vector<8x384xbf16>
    %cst_25 = arith.constant dense<0.000000e+00> : vector<8x384xf32>
    %39 = tpu.matmul %37, %38, %cst_25 {dimension_numbers = #tpu.dot_dimension_numbers<[1], [0], [0], [1], [0, 0, 1, 1], [], []>} : vector<8x8xbf16>, vector<8x384xbf16>, vector<8x384xf32> -> vector<8x384xf32>
    %40 = arith.addf %35, %39 : vector<8x384xf32>
    %c8 = arith.constant 8 : index
    %c0_26 = arith.constant 0 : index
    %c0_27 = arith.constant 0 : index
    %41 = vector.load %arg3[%c8, %c0_26, %c0_27] : memref<9x8x8xbf16, #tpu.memory_space<vmem>>, vector<1x8x8xbf16>
    %42 = vector.shape_cast %41 : vector<1x8x8xbf16> to vector<8x8xbf16>
    %43 = vector.extract_strided_slice %1 {offsets = [0, 38], sizes = [8, 384], strides = [1, 1]} : vector<8x512xbf16> to vector<8x384xbf16>
    %cst_28 = arith.constant dense<0.000000e+00> : vector<8x384xf32>
    %44 = tpu.matmul %42, %43, %cst_28 {dimension_numbers = #tpu.dot_dimension_numbers<[1], [0], [0], [1], [0, 0, 1, 1], [], []>} : vector<8x8xbf16>, vector<8x384xbf16>, vector<8x384xf32> -> vector<8x384xf32>
    %45 = arith.addf %40, %44 : vector<8x384xf32>
    %c0_29 = arith.constant 0 : index
    %c0_30 = arith.constant 0 : index
    %c0_31 = arith.constant 0 : index
    %46 = vector.load %arg4[%c0_29, %c0_30, %c0_31] : memref<1x8x512xbf16, #tpu.memory_space<vmem>>, vector<1x8x512xbf16>
    %47 = vector.shape_cast %46 : vector<1x8x512xbf16> to vector<8x512xbf16>
    %c0_32 = arith.constant 0 : index
    %c0_33 = arith.constant 0 : index
    %c0_34 = arith.constant 0 : index
    %48 = vector.load %arg5[%c0_32, %c0_33, %c0_34] : memref<9x8x8xbf16, #tpu.memory_space<vmem>>, vector<1x8x8xbf16>
    %49 = vector.shape_cast %48 : vector<1x8x8xbf16> to vector<8x8xbf16>
    %50 = vector.extract_strided_slice %47 {offsets = [0, 0], sizes = [8, 384], strides = [1, 1]} : vector<8x512xbf16> to vector<8x384xbf16>
    %cst_35 = arith.constant dense<0.000000e+00> : vector<8x384xf32>
    %51 = tpu.matmul %49, %50, %cst_35 {dimension_numbers = #tpu.dot_dimension_numbers<[1], [0], [0], [1], [0, 0, 1, 1], [], []>} : vector<8x8xbf16>, vector<8x384xbf16>, vector<8x384xf32> -> vector<8x384xf32>
    %52 = arith.addf %45, %51 : vector<8x384xf32>
    %c1_36 = arith.constant 1 : index
    %c0_37 = arith.constant 0 : index
    %c0_38 = arith.constant 0 : index
    %53 = vector.load %arg5[%c1_36, %c0_37, %c0_38] : memref<9x8x8xbf16, #tpu.memory_space<vmem>>, vector<1x8x8xbf16>
    %54 = vector.shape_cast %53 : vector<1x8x8xbf16> to vector<8x8xbf16>
    %55 = vector.extract_strided_slice %47 {offsets = [0, 1], sizes = [8, 384], strides = [1, 1]} : vector<8x512xbf16> to vector<8x384xbf16>
    %cst_39 = arith.constant dense<0.000000e+00> : vector<8x384xf32>
    %56 = tpu.matmul %54, %55, %cst_39 {dimension_numbers = #tpu.dot_dimension_numbers<[1], [0], [0], [1], [0, 0, 1, 1], [], []>} : vector<8x8xbf16>, vector<8x384xbf16>, vector<8x384xf32> -> vector<8x384xf32>
    %57 = arith.addf %52, %56 : vector<8x384xf32>
    %c2_40 = arith.constant 2 : index
    %c0_41 = arith.constant 0 : index
    %c0_42 = arith.constant 0 : index
    %58 = vector.load %arg5[%c2_40, %c0_41, %c0_42] : memref<9x8x8xbf16, #tpu.memory_space<vmem>>, vector<1x8x8xbf16>
    %59 = vector.shape_cast %58 : vector<1x8x8xbf16> to vector<8x8xbf16>
    %60 = vector.extract_strided_slice %47 {offsets = [0, 2], sizes = [8, 384], strides = [1, 1]} : vector<8x512xbf16> to vector<8x384xbf16>
    %cst_43 = arith.constant dense<0.000000e+00> : vector<8x384xf32>
    %61 = tpu.matmul %59, %60, %cst_43 {dimension_numbers = #tpu.dot_dimension_numbers<[1], [0], [0], [1], [0, 0, 1, 1], [], []>} : vector<8x8xbf16>, vector<8x384xbf16>, vector<8x384xf32> -> vector<8x384xf32>
    %62 = arith.addf %57, %61 : vector<8x384xf32>
    %c3_44 = arith.constant 3 : index
    %c0_45 = arith.constant 0 : index
    %c0_46 = arith.constant 0 : index
    %63 = vector.load %arg5[%c3_44, %c0_45, %c0_46] : memref<9x8x8xbf16, #tpu.memory_space<vmem>>, vector<1x8x8xbf16>
    %64 = vector.shape_cast %63 : vector<1x8x8xbf16> to vector<8x8xbf16>
    %65 = vector.extract_strided_slice %47 {offsets = [0, 18], sizes = [8, 384], strides = [1, 1]} : vector<8x512xbf16> to vector<8x384xbf16>
    %cst_47 = arith.constant dense<0.000000e+00> : vector<8x384xf32>
    %66 = tpu.matmul %64, %65, %cst_47 {dimension_numbers = #tpu.dot_dimension_numbers<[1], [0], [0], [1], [0, 0, 1, 1], [], []>} : vector<8x8xbf16>, vector<8x384xbf16>, vector<8x384xf32> -> vector<8x384xf32>
    %67 = arith.addf %62, %66 : vector<8x384xf32>
    %c4_48 = arith.constant 4 : index
    %c0_49 = arith.constant 0 : index
    %c0_50 = arith.constant 0 : index
    %68 = vector.load %arg5[%c4_48, %c0_49, %c0_50] : memref<9x8x8xbf16, #tpu.memory_space<vmem>>, vector<1x8x8xbf16>
    %69 = vector.shape_cast %68 : vector<1x8x8xbf16> to vector<8x8xbf16>
    %70 = vector.extract_strided_slice %47 {offsets = [0, 19], sizes = [8, 384], strides = [1, 1]} : vector<8x512xbf16> to vector<8x384xbf16>
    %cst_51 = arith.constant dense<0.000000e+00> : vector<8x384xf32>
    %71 = tpu.matmul %69, %70, %cst_51 {dimension_numbers = #tpu.dot_dimension_numbers<[1], [0], [0], [1], [0, 0, 1, 1], [], []>} : vector<8x8xbf16>, vector<8x384xbf16>, vector<8x384xf32> -> vector<8x384xf32>
    %72 = arith.addf %67, %71 : vector<8x384xf32>
    %c5_52 = arith.constant 5 : index
    %c0_53 = arith.constant 0 : index
    %c0_54 = arith.constant 0 : index
    %73 = vector.load %arg5[%c5_52, %c0_53, %c0_54] : memref<9x8x8xbf16, #tpu.memory_space<vmem>>, vector<1x8x8xbf16>
    %74 = vector.shape_cast %73 : vector<1x8x8xbf16> to vector<8x8xbf16>
    %75 = vector.extract_strided_slice %47 {offsets = [0, 20], sizes = [8, 384], strides = [1, 1]} : vector<8x512xbf16> to vector<8x384xbf16>
    %cst_55 = arith.constant dense<0.000000e+00> : vector<8x384xf32>
    %76 = tpu.matmul %74, %75, %cst_55 {dimension_numbers = #tpu.dot_dimension_numbers<[1], [0], [0], [1], [0, 0, 1, 1], [], []>} : vector<8x8xbf16>, vector<8x384xbf16>, vector<8x384xf32> -> vector<8x384xf32>
    %77 = arith.addf %72, %76 : vector<8x384xf32>
    %c6_56 = arith.constant 6 : index
    %c0_57 = arith.constant 0 : index
    %c0_58 = arith.constant 0 : index
    %78 = vector.load %arg5[%c6_56, %c0_57, %c0_58] : memref<9x8x8xbf16, #tpu.memory_space<vmem>>, vector<1x8x8xbf16>
    %79 = vector.shape_cast %78 : vector<1x8x8xbf16> to vector<8x8xbf16>
    %80 = vector.extract_strided_slice %47 {offsets = [0, 36], sizes = [8, 384], strides = [1, 1]} : vector<8x512xbf16> to vector<8x384xbf16>
    %cst_59 = arith.constant dense<0.000000e+00> : vector<8x384xf32>
    %81 = tpu.matmul %79, %80, %cst_59 {dimension_numbers = #tpu.dot_dimension_numbers<[1], [0], [0], [1], [0, 0, 1, 1], [], []>} : vector<8x8xbf16>, vector<8x384xbf16>, vector<8x384xf32> -> vector<8x384xf32>
    %82 = arith.addf %77, %81 : vector<8x384xf32>
    %c7_60 = arith.constant 7 : index
    %c0_61 = arith.constant 0 : index
    %c0_62 = arith.constant 0 : index
    %83 = vector.load %arg5[%c7_60, %c0_61, %c0_62] : memref<9x8x8xbf16, #tpu.memory_space<vmem>>, vector<1x8x8xbf16>
    %84 = vector.shape_cast %83 : vector<1x8x8xbf16> to vector<8x8xbf16>
    %85 = vector.extract_strided_slice %47 {offsets = [0, 37], sizes = [8, 384], strides = [1, 1]} : vector<8x512xbf16> to vector<8x384xbf16>
    %cst_63 = arith.constant dense<0.000000e+00> : vector<8x384xf32>
    %86 = tpu.matmul %84, %85, %cst_63 {dimension_numbers = #tpu.dot_dimension_numbers<[1], [0], [0], [1], [0, 0, 1, 1], [], []>} : vector<8x8xbf16>, vector<8x384xbf16>, vector<8x384xf32> -> vector<8x384xf32>
    %87 = arith.addf %82, %86 : vector<8x384xf32>
    %c8_64 = arith.constant 8 : index
    %c0_65 = arith.constant 0 : index
    %c0_66 = arith.constant 0 : index
    %88 = vector.load %arg5[%c8_64, %c0_65, %c0_66] : memref<9x8x8xbf16, #tpu.memory_space<vmem>>, vector<1x8x8xbf16>
    %89 = vector.shape_cast %88 : vector<1x8x8xbf16> to vector<8x8xbf16>
    %90 = vector.extract_strided_slice %47 {offsets = [0, 38], sizes = [8, 384], strides = [1, 1]} : vector<8x512xbf16> to vector<8x384xbf16>
    %cst_67 = arith.constant dense<0.000000e+00> : vector<8x384xf32>
    %91 = tpu.matmul %89, %90, %cst_67 {dimension_numbers = #tpu.dot_dimension_numbers<[1], [0], [0], [1], [0, 0, 1, 1], [], []>} : vector<8x8xbf16>, vector<8x384xbf16>, vector<8x384xf32> -> vector<8x384xf32>
    %92 = arith.addf %87, %91 : vector<8x384xf32>
    %c0_68 = arith.constant 0 : index
    %c0_69 = arith.constant 0 : index
    %93 = vector.load %arg6[%c0_68, %c0_69] : memref<8x1xf32, #tpu.memory_space<vmem>>, vector<8x1xf32>
    %94 = vector.broadcast %93 : vector<8x1xf32> to vector<8x384xf32>
    %95 = arith.mulf %92, %94 : vector<8x384xf32>
    %c0_70 = arith.constant 0 : index
    %c0_71 = arith.constant 0 : index
    %96 = vector.load %arg7[%c0_70, %c0_71] : memref<8x1xf32, #tpu.memory_space<vmem>>, vector<8x1xf32>
    %97 = vector.broadcast %96 : vector<8x1xf32> to vector<8x384xf32>
    %98 = arith.addf %95, %97 : vector<8x384xf32>
    %cst_72 = arith.constant 0.000000e+00 : f32
    %99 = vector.broadcast %cst_72 : f32 to vector<8x384xf32>
    %100 = arith.cmpf oge, %98, %99 : vector<8x384xf32>
    %cst_73 = arith.constant 0.00999999977 : f32
    %101 = vector.broadcast %cst_73 : f32 to vector<8x384xf32>
    %102 = arith.mulf %101, %98 : vector<8x384xf32>
    %103 = arith.select %100, %98, %102 : vector<8x384xi1>, vector<8x384xf32>
    %c0_74 = arith.constant 0 : index
    %c0_75 = arith.constant 0 : index
    %c0_76 = arith.constant 0 : index
    %104 = vector.load %arg8[%c0_74, %c0_75, %c0_76] : memref<1x8x384xf32, #tpu.memory_space<vmem>>, vector<1x8x384xf32>
    %105 = vector.shape_cast %104 : vector<1x8x384xf32> to vector<8x384xf32>
    %106 = vector.shape_cast %103 : vector<8x384xf32> to vector<1x8x384xf32>
    tpu.vector_store %arg8[%c0_74, %c0_75, %c0_76], %106 {strides = array<i32>} : memref<1x8x384xf32, #tpu.memory_space<vmem>>, vector<1x8x384xf32>,
    return
  }
  func.func @transform_0(%arg0: i32, %arg1: i32) -> (i32, i32, i32) {
    %c0_i32 = arith.constant 0 : i32
    %c0_i32_0 = arith.constant 0 : i32
    %c0_i32_1 = arith.constant 0 : i32
    return %arg0, %c0_i32, %c0_i32_0 : i32, i32, i32
  }
  func.func @transform_1(%arg0: i32, %arg1: i32) -> (i32, i32, i32) {
    %c0_i32 = arith.constant 0 : i32
    %c0_i32_0 = arith.constant 0 : i32
    %c0_i32_1 = arith.constant 0 : i32
    return %c0_i32, %arg1, %c0_i32_0 : i32, i32, i32
  }
  func.func @transform_2(%arg0: i32, %arg1: i32) -> (i32, i32, i32) {
    %c0_i32 = arith.constant 0 : i32
    %c0_i32_0 = arith.constant 0 : i32
    %c0_i32_1 = arith.constant 0 : i32
    return %arg0, %c0_i32, %c0_i32_0 : i32, i32, i32
  }
  func.func @transform_3(%arg0: i32, %arg1: i32) -> (i32, i32, i32) {
    %c0_i32 = arith.constant 0 : i32
    %c0_i32_0 = arith.constant 0 : i32
    %c0_i32_1 = arith.constant 0 : i32
    return %c0_i32, %arg1, %c0_i32_0 : i32, i32, i32
  }
  func.func @transform_4(%arg0: i32, %arg1: i32) -> (i32, i32) {
    %c0_i32 = arith.constant 0 : i32
    %c0_i32_0 = arith.constant 0 : i32
    return %arg1, %c0_i32 : i32, i32
  }
  func.func @transform_5(%arg0: i32, %arg1: i32) -> (i32, i32) {
    %c0_i32 = arith.constant 0 : i32
    %c0_i32_0 = arith.constant 0 : i32
    return %arg1, %c0_i32 : i32, i32
  }
  func.func @transform_6(%arg0: i32, %arg1: i32) -> (i32, i32, i32) {
    %c0_i32 = arith.constant 0 : i32
    %c0_i32_0 = arith.constant 0 : i32
    return %arg0, %arg1, %c0_i32 : i32, i32, i32
  }
}

</mosaic_0001>

<bundles_post_ra>
// kernel: ddualgcn_head.8
= control target key start
LH: loop header
LB: loop body
LE: loop exit
PB: predicated region body
PF: predicated region fallthrough
CT: control target
= control target key end

     0   :  { %s1659_s15 = smov 0   ;;  %s1661_s16 = smov 0   ;;  %s1834_s0 = inlined_call_operand.vmem [shape: bf16[2,8,512], index: 0, kind: input, shape index: {}]   ;;  %s1835_s1 = inlined_call_operand.vmem [shape: bf16[9,8,8], index: 1, kind: input, shape index: {}]   ;;  %s1836_s2 = inlined_call_operand.vmem [shape: f32[8,1], index: 2, kind: input, shape index: {}]   ;;  %s1837_s3 = inlined_call_operand.vmem [shape: f32[8,1], index: 3, kind: input, shape index: {}]   ;;  %s1838_s4 = inlined_call_operand.vmem [shape: bf16[2,8,384], index: 4, kind: output, shape index: {}]  }
   0x1   :  { %s1663_s17 = smov 0  }
   0x2 LB: > { %s26_s18 = sadd.s32 1, %s1617_s16  ;;  %p1435_p0 = scmp.ge.s32.totalorder %s1621_s17, 1  ;;  %s1621_s17 = sphi %s1663_s17, %s14_s17   ;;  %s1617_s16 = sphi %s1661_s16, %s1840_s16   ;;  %s1613_s15 = sphi %s1659_s15, %s1839_s15  }
   0x3   : > { %p28_p1 = scmp.ge.s32.totalorder %s26_s18, 2  ;;  %p203_p2 = scmp.lt.s32.totalorder %s1621_s17, 3 }
   0x5   : > { %s1842_s18 = smov (%p28_p1, %s26_s18), 0  ;;  %p204_p3 = pnand %p1435_p0, %p203_p2 }
   0x6   : > { %p245_p4 = scmp.lt.s32.totalorder (!%p204_p3), %s1613_s15, 1  ;;  %s1626_s23 = smov (!%p204_p3), 127  }
   0x7   : > { %207 = sbr.rel (%p204_p3) target bundleno = 413 (0x19d), region = 36  ;;  %s1627_s24 = smov (!%p204_p3), 126  }
   0x8   : > { %s1628_s25 = smov (!%p204_p3), 110   ;;  %s1629_s26 = smov (!%p204_p3), 109  }
   0x9   : > { %s1630_s27 = smov (!%p204_p3), 108   ;;  %s1631_s28 = smov (!%p204_p3), 92  }
   0xa   : > { %s1632_s29 = smov (!%p204_p3), 91   ;;  %s1633_s30 = smov (!%p204_p3), 90  }
   0xc   : > { %v1623_v0 = vmov 0.0   ;;  %s1844_s15 = smov (!%p245_p4, %s1613_s15), 1  ;;  %v1624_v1 = vmov 0   ;;  %vm1625_vm0 = vmmov 0   ;;  %v1257_v8 = vld [vmem:[%s1836_s2] sm:$0xff]  ;;  %vm295_vm1 = vcmask 1039360  }
   0xd   : > { %1503 = vmatprep.subr.bf16.mxu1 %v1623_v0  ;;  %345 = vmatprep.mubr.bf16.mxu0 %v1624_v1  ;;  %s1482_s19 = sshll.u32 %s1844_s15, 4  ;;  %v1266_v9 = vld [vmem:[%s1837_s3] sm:$0xff]  ;;  %vm303_vm2 = vcmask 1043456   ;;  %vm299_vm3 = vcmask 64512   ;;  %vm497_vm4 = vcmask 1031168   ;;  %vm607_vm5 = vcmask 900096  }
   0xe   : > { %1505 = vmatprep.mubr.msk.bf16.mxu1 %vm1625_vm0, %v1623_v0  ;;  %1593 = vset.pattern.permute.xlu0 %v1624_v1  ;;  %s249_s22 = scalar_lea.vmem %s1834_s0, %s1482_s19  ;;  %v1439_v19 = vld [vmem:[%s1835_s1 + $0x4] sm:$0xf]  ;;  %v274_v29 = vld [vmem:[%s1835_s1] sm:$0xf]  ;;  %v1450_v39 = vld [vmem:[%s1835_s1 + $0x8] sm:$0xf] }
   0xf   : > { %1594 = vset.pattern.permute.xlu1 %v1624_v1  ;;  %v273_v2 = vld [vmem:[%s249_s22 + $0x8] sm:$0xff]  ;;  %v272_v3 = vld [vmem:[%s249_s22] sm:$0xff]  ;;  %vm717_vm6 = vcmask 891904   ;;  %vm827_vm7 = vcmask 883712   ;;  %v1458_v59 = vld [vmem:[%s1835_s1 + $0x10] sm:$0xf] }
  0x10   : > { %v1689_v4 = vcombine.low %v273_v2, %v273_v2  ;;  %v1691_v5 = vcombine.low %v272_v3, %v272_v3  ;;  %v1443_v6 = vcombine.high %v273_v2, %v273_v2  ;;  %v1441_v7 = vcombine.high %v272_v3, %v272_v3  ;;  %v1454_v49 = vld [vmem:[%s1835_s1 + $0xc] sm:$0xf]  ;;  %s1557_s5 = smul.u32 12, %s1844_s15 }
  0x11   : > { %vm937_vm8 = vcmask 752640   ;;  %vm1047_vm9 = vcmask 744448   ;;  %vm1157_vm10 = vcmask 736256  }
  0x12   : > { %291 = vrot.lane.b32.xlu1 %v1689_v4, %s1626_s23  ;;  %287 = vrot.lane.b32.xlu0 %v1691_v5, %s1626_s23  ;;  %v398_v21 = vsel %vm303_vm2, %v1691_v5, 0  ;;  %v404_v23 = vsel %vm303_vm2, %v1689_v4, 0  ;;  %s270_s8 = scalar_lea.vmem %s1838_s4, %s1557_s5 }
  0x16   : > { %293 = vrot.lane.b32.xlu1 %v1443_v6, %s1626_s23  ;;  %289 = vrot.lane.b32.xlu0 %v1441_v7, %s1626_s23 }
  0x1a   : > { %489 = vrot.lane.b32.xlu0 %v1691_v5, %s1627_s24  ;;  %491 = vrot.lane.b32.xlu1 %v1441_v7, %s1627_s24 }
  0x1e   : > { %493 = vrot.lane.b32.xlu0 %v1689_v4, %s1627_s24  ;;  %495 = vrot.lane.b32.xlu1 %v1443_v6, %s1627_s24 }
  0x22   : > { %599 = vrot.lane.b32.xlu0 %v1691_v5, %s1628_s25  ;;  %601 = vrot.lane.b32.xlu1 %v1441_v7, %s1628_s25 }
  0x26   : > { %603 = vrot.lane.b32.xlu0 %v1689_v4, %s1628_s25  ;;  %605 = vrot.lane.b32.xlu1 %v1443_v6, %s1628_s25 }
  0x2a   : > { %709 = vrot.lane.b32.xlu0 %v1691_v5, %s1629_s26  ;;  %711 = vrot.lane.b32.xlu1 %v1441_v7, %s1629_s26 }
  0x2e   : > { %713 = vrot.lane.b32.xlu0 %v1689_v4, %s1629_s26  ;;  %715 = vrot.lane.b32.xlu1 %v1443_v6, %s1629_s26 }
  0x32   : > { %819 = vrot.lane.b32.xlu0 %v1691_v5, %s1630_s27  ;;  %821 = vrot.lane.b32.xlu1 %v1441_v7, %s1630_s27 }
  0x36   : > { %823 = vrot.lane.b32.xlu0 %v1689_v4, %s1630_s27  ;;  %825 = vrot.lane.b32.xlu1 %v1443_v6, %s1630_s27 }
  0x3a   : > { %929 = vrot.lane.b32.xlu0 %v1691_v5, %s1631_s28  ;;  %931 = vrot.lane.b32.xlu1 %v1441_v7, %s1631_s28 }
  0x3e   : > { %933 = vrot.lane.b32.xlu0 %v1689_v4, %s1631_s28  ;;  %935 = vrot.lane.b32.xlu1 %v1443_v6, %s1631_s28 }
  0x42   : > { %1039 = vrot.lane.b32.xlu0 %v1691_v5, %s1632_s29  ;;  %1041 = vrot.lane.b32.xlu1 %v1441_v7, %s1632_s29 }
  0x46   : > { %1043 = vrot.lane.b32.xlu0 %v1689_v4, %s1632_s29  ;;  %1045 = vrot.lane.b32.xlu1 %v1443_v6, %s1632_s29 }
  0x4a   : > { %1149 = vrot.lane.b32.xlu0 %v1691_v5, %s1633_s30  ;;  %1151 = vrot.lane.b32.xlu1 %v1441_v7, %s1633_s30 }
  0x4e   : > { %1153 = vrot.lane.b32.xlu0 %v1689_v4, %s1633_s30  ;;  %1155 = vrot.lane.b32.xlu1 %v1443_v6, %s1633_s30 }
  0x52   : > { %1260 = vperm.xlu0 %1593, %v1257_v8   ;;  %1269 = vperm.xlu1 %1594, %v1266_v9  }
  0x84   : > { %v292_v10 = vpop.permute.xlu1 %291  ;;  %v288_v11 = vpop.permute.xlu0 %287 }
  0x88   : > { %v294_v12 = vpop.permute.xlu1 %293  ;;  %v290_v13 = vpop.permute.xlu0 %289 }
  0x89   : > { %v297_v14 = vsel %vm295_vm1, %v290_v13, %v292_v10  ;;  %v296_v15 = vsel %vm295_vm1, %v288_v11, %v290_v13  ;;  %v298_v16 = vsel %vm295_vm1, %v292_v10, %v294_v12 }
  0x8a   : > { %1444 = vmatprep.subr.msk.bf16.mxu0 %vm303_vm2, %v297_v14  ;;  %v305_v17 = vsel %vm303_vm2, %v296_v15, 0  ;;  %v311_v18 = vsel %vm303_vm2, %v298_v16, 0 }
  0x8b   : > { %328 = vmatpush1.bf16.msra.mxu0 %v305_v17  ;;  %1504 = vmatpush3.bf16.msra.mxu1 %v311_v18  ;;  %v1466_v17 = vld [vmem:[%s1835_s1 + $0x18] sm:$0xf] }
  0x8c   : > { %1447 = vmatprep.subr.msk.bf16.mxu0 %vm303_vm2, %v1441_v7  ;;  %v490_v20 = vpop.permute.xlu0 %489  ;;  %1509 = vmatprep.subr.bf16.mxu1 %v1623_v0  ;;  %v492_v22 = vpop.permute.xlu1 %491  ;;  %v1462_v7 = vld [vmem:[%s1835_s1 + $0x14] sm:$0xf] }
  0x8d   : > { %v498_v26 = vsel %vm497_vm4, %v490_v20, %v492_v22 }
  0x8e   : > { %1445 = vmatmul.mubr.msk.bf16.vlgmr.msra.gmra.mxu0 %vm299_vm3, %v1439_v19  ;;  %1506 = vmatmul.mubr.msk.bf16.vlgmr.msra.gmra.mxu1 %vm299_vm3, %v1439_v19  ;;  %v505_v30 = vsel %vm303_vm2, %v498_v26, 0 }
  0x8f   : > { %421 = vmatpush1.bf16.msra.mxu0 %v398_v21  ;;  %1510 = vmatpush3.bf16.msra.mxu1 %v404_v23 }
  0x90   : > { %v494_v24 = vpop.permute.xlu0 %493  ;;  %v496_v25 = vpop.permute.xlu1 %495  ;;  %438 = vmatprep.mubr.bf16.mxu0 %v1624_v1  ;;  %1511 = vmatprep.mubr.msk.bf16.mxu1 %vm1625_vm0, %v1623_v0 }
  0x91   : > { %v499_v27 = vsel %vm497_vm4, %v492_v22, %v494_v24  ;;  %v500_v28 = vsel %vm497_vm4, %v494_v24, %v496_v25  ;;  %1515 = vmatprep.subr.bf16.mxu1 %v1623_v0 }
  0x92   : > { %1451 = vmatprep.subr.msk.bf16.mxu0 %vm303_vm2, %v499_v27  ;;  %v511_v31 = vsel %vm303_vm2, %v500_v28, 0  ;;  %v1470_v27 = vld [vmem:[%s1835_s1 + $0x1c] sm:$0xf] }
  0x94   : > { %v600_v32 = vpop.permute.xlu0 %599  ;;  %v602_v33 = vpop.permute.xlu1 %601 }
  0x95   : > { %v608_v36 = vsel %vm607_vm5, %v600_v32, %v602_v33 }
  0x96   : > { %1512 = vmatmul.mubr.msk.bf16.vlgmr.msra.gmra.mxu1 %vm299_vm3, %v274_v29  ;;  %1448 = vmatmul.mubr.msk.bf16.vlgmr.msra.gmra.mxu0 %vm299_vm3, %v274_v29  ;;  %v615_v40 = vsel %vm303_vm2, %v608_v36, 0 }
  0x97   : > { %528 = vmatpush1.bf16.msra.mxu0 %v505_v30  ;;  %1516 = vmatpush3.bf16.msra.mxu1 %v511_v31  ;;  %v1474_v30 = vld [vmem:[%s1835_s1 + $0x20] sm:$0xf] }
  0x98   : > { %v604_v34 = vpop.permute.xlu0 %603  ;;  %v606_v35 = vpop.permute.xlu1 %605  ;;  %545 = vmatprep.mubr.bf16.mxu0 %v1624_v1  ;;  %1517 = vmatprep.mubr.msk.bf16.mxu1 %vm1625_vm0, %v1623_v0 }
  0x99   : > { %v609_v37 = vsel %vm607_vm5, %v602_v33, %v604_v34  ;;  %v610_v38 = vsel %vm607_vm5, %v604_v34, %v606_v35  ;;  %1521 = vmatprep.subr.bf16.mxu1 %v1623_v0 }
  0x9a   : > { %1455 = vmatprep.subr.msk.bf16.mxu0 %vm303_vm2, %v609_v37  ;;  %v621_v41 = vsel %vm303_vm2, %v610_v38, 0 }
  0x9c   : > { %v710_v42 = vpop.permute.xlu0 %709  ;;  %v712_v43 = vpop.permute.xlu1 %711 }
  0x9d   : > { %v718_v46 = vsel %vm717_vm6, %v710_v42, %v712_v43 }
  0x9e   : > { %1518 = vmatmul.mubr.msk.bf16.vlgmr.msra.gmra.mxu1 %vm299_vm3, %v1450_v39  ;;  %1452 = vmatmul.mubr.msk.bf16.vlgmr.msra.gmra.mxu0 %vm299_vm3, %v1450_v39  ;;  %v725_v50 = vsel %vm303_vm2, %v718_v46, 0 }
  0x9f   : > { %638 = vmatpush1.bf16.msra.mxu0 %v615_v40  ;;  %1522 = vmatpush3.bf16.msra.mxu1 %v621_v41 }
  0xa0   : > { %v714_v44 = vpop.permute.xlu0 %713  ;;  %v716_v45 = vpop.permute.xlu1 %715  ;;  %655 = vmatprep.mubr.bf16.mxu0 %v1624_v1  ;;  %1523 = vmatprep.mubr.msk.bf16.mxu1 %vm1625_vm0, %v1623_v0 }
  0xa1   : > { %v719_v47 = vsel %vm717_vm6, %v712_v43, %v714_v44  ;;  %v720_v48 = vsel %vm717_vm6, %v714_v44, %v716_v45  ;;  %1527 = vmatprep.subr.bf16.mxu1 %v1623_v0 }
  0xa2   : > { %1459 = vmatprep.subr.msk.bf16.mxu0 %vm303_vm2, %v719_v47  ;;  %v731_v51 = vsel %vm303_vm2, %v720_v48, 0 }
  0xa4   : > { %v820_v52 = vpop.permute.xlu0 %819  ;;  %v822_v53 = vpop.permute.xlu1 %821 }
  0xa5   : > { %v828_v56 = vsel %vm827_vm7, %v820_v52, %v822_v53 }
  0xa6   : > { %1524 = vmatmul.mubr.msk.bf16.vlgmr.msra.gmra.mxu1 %vm299_vm3, %v1454_v49  ;;  %1456 = vmatmul.mubr.msk.bf16.vlgmr.msra.gmra.mxu0 %vm299_vm3, %v1454_v49  ;;  %v835_v60 = vsel %vm303_vm2, %v828_v56, 0 }
  0xa7   : > { %748 = vmatpush1.bf16.msra.mxu0 %v725_v50  ;;  %1528 = vmatpush3.bf16.msra.mxu1 %v731_v51 }
  0xa8   : > { %v824_v54 = vpop.permute.xlu0 %823  ;;  %v826_v55 = vpop.permute.xlu1 %825  ;;  %765 = vmatprep.mubr.bf16.mxu0 %v1624_v1  ;;  %1529 = vmatprep.mubr.msk.bf16.mxu1 %vm1625_vm0, %v1623_v0 }
  0xa9   : > { %v829_v57 = vsel %vm827_vm7, %v822_v53, %v824_v54  ;;  %v830_v58 = vsel %vm827_vm7, %v824_v54, %v826_v55  ;;  %1533 = vmatprep.subr.bf16.mxu1 %v1623_v0 }
  0xaa   : > { %1463 = vmatprep.subr.msk.bf16.mxu0 %vm303_vm2, %v829_v57  ;;  %v841_v61 = vsel %vm303_vm2, %v830_v58, 0 }
  0xac   : > { %v930_v62 = vpop.permute.xlu0 %929  ;;  %v932_v63 = vpop.permute.xlu1 %931 }
  0xad   : > { %v938_v4 = vsel %vm937_vm8, %v930_v62, %v932_v63 }
  0xae   : > { %1530 = vmatmul.mubr.msk.bf16.vlgmr.msra.gmra.mxu1 %vm299_vm3, %v1458_v59  ;;  %1460 = vmatmul.mubr.msk.bf16.vlgmr.msra.gmra.mxu0 %vm299_vm3, %v1458_v59  ;;  %v945_v8 = vsel %vm303_vm2, %v938_v4, 0 }
  0xaf   : > { %858 = vmatpush1.bf16.msra.mxu0 %v835_v60  ;;  %1534 = vmatpush3.bf16.msra.mxu1 %v841_v61 }
  0xb0   : > { %v934_v2 = vpop.permute.xlu0 %933  ;;  %v936_v3 = vpop.permute.xlu1 %935  ;;  %875 = vmatprep.mubr.bf16.mxu0 %v1624_v1  ;;  %1535 = vmatprep.mubr.msk.bf16.mxu1 %vm1625_vm0, %v1623_v0 }
  0xb1   : > { %v939_v5 = vsel %vm937_vm8, %v932_v63, %v934_v2  ;;  %v940_v6 = vsel %vm937_vm8, %v934_v2, %v936_v3  ;;  %1539 = vmatprep.subr.bf16.mxu1 %v1623_v0 }
  0xb2   : > { %1467 = vmatprep.subr.msk.bf16.mxu0 %vm303_vm2, %v939_v5  ;;  %v951_v9 = vsel %vm303_vm2, %v940_v6, 0 }
  0xb4   : > { %v1040_v10 = vpop.permute.xlu0 %1039  ;;  %v1042_v11 = vpop.permute.xlu1 %1041 }
  0xb5   : > { %v1048_v14 = vsel %vm1047_vm9, %v1040_v10, %v1042_v11 }
  0xb6   : > { %1536 = vmatmul.mubr.msk.bf16.vlgmr.msra.gmra.mxu1 %vm299_vm3, %v1462_v7  ;;  %1464 = vmatmul.mubr.msk.bf16.vlgmr.msra.gmra.mxu0 %vm299_vm3, %v1462_v7  ;;  %v1055_v18 = vsel %vm303_vm2, %v1048_v14, 0 }
  0xb7   : > { %968 = vmatpush1.bf16.msra.mxu0 %v945_v8  ;;  %1540 = vmatpush3.bf16.msra.mxu1 %v951_v9 }
  0xb8   : > { %v1044_v12 = vpop.permute.xlu0 %1043  ;;  %v1046_v13 = vpop.permute.xlu1 %1045  ;;  %985 = vmatprep.mubr.bf16.mxu0 %v1624_v1  ;;  %1541 = vmatprep.mubr.msk.bf16.mxu1 %vm1625_vm0, %v1623_v0 }
  0xb9   : > { %v1049_v15 = vsel %vm1047_vm9, %v1042_v11, %v1044_v12  ;;  %v1050_v16 = vsel %vm1047_vm9, %v1044_v12, %v1046_v13  ;;  %1545 = vmatprep.subr.bf16.mxu1 %v1623_v0 }
  0xba   : > { %1471 = vmatprep.subr.msk.bf16.mxu0 %vm303_vm2, %v1049_v15  ;;  %v1061_v19 = vsel %vm303_vm2, %v1050_v16, 0 }
  0xbc   : > { %v1150_v20 = vpop.permute.xlu0 %1149  ;;  %v1152_v21 = vpop.permute.xlu1 %1151 }
  0xbd   : > { %v1158_v24 = vsel %vm1157_vm10, %v1150_v20, %v1152_v21 }
  0xbe   : > { %1542 = vmatmul.mubr.msk.bf16.vlgmr.msra.gmra.mxu1 %vm299_vm3, %v1466_v17  ;;  %1468 = vmatmul.mubr.msk.bf16.vlgmr.msra.gmra.mxu0 %vm299_vm3, %v1466_v17  ;;  %v1165_v28 = vsel %vm303_vm2, %v1158_v24, 0 }
  0xbf   : > { %1078 = vmatpush1.bf16.msra.mxu0 %v1055_v18  ;;  %1546 = vmatpush3.bf16.msra.mxu1 %v1061_v19 }
  0xc0   : > { %v1154_v22 = vpop.permute.xlu0 %1153  ;;  %v1156_v23 = vpop.permute.xlu1 %1155  ;;  %1095 = vmatprep.mubr.bf16.mxu0 %v1624_v1  ;;  %1547 = vmatprep.mubr.msk.bf16.mxu1 %vm1625_vm0, %v1623_v0 }
  0xc1   : > { %v1159_v25 = vsel %vm1157_vm10, %v1152_v21, %v1154_v22  ;;  %v1160_v26 = vsel %vm1157_vm10, %v1154_v22, %v1156_v23  ;;  %1551 = vmatprep.subr.bf16.mxu1 %v1623_v0 }
  0xc2   : > { %1475 = vmatprep.subr.msk.bf16.mxu0 %vm303_vm2, %v1159_v25  ;;  %v1171_v29 = vsel %vm303_vm2, %v1160_v26, 0 }
  0xc6   : > { %1472 = vmatmul.mubr.msk.bf16.vlgmr.msra.gmra.mxu0 %vm299_vm3, %v1470_v27  ;;  %1548 = vmatmul.mubr.msk.bf16.vlgmr.msra.gmra.mxu1 %vm299_vm3, %v1470_v27 }
  0xc7   : > { %1188 = vmatpush1.bf16.msra.mxu0 %v1165_v28  ;;  %1552 = vmatpush3.bf16.msra.mxu1 %v1171_v29 }
  0xc8   : > { %1205 = vmatprep.mubr.bf16.mxu0 %v1624_v1  ;;  %1553 = vmatprep.mubr.msk.bf16.mxu1 %vm1625_vm0, %v1623_v0 }
  0xce   : > { %1476 = vmatmul.mubr.msk.bf16.vlgmr.msra.gmra.mxu0 %vm299_vm3, %v1474_v30  ;;  %1554 = vmatmul.mubr.msk.bf16.vlgmr.msra.gmra.mxu1 %vm299_vm3, %v1474_v30 }
 0x14e   : > { %v347_v31 = vpop.f32.mrf.mxu0  ;;  %v388_v32 = vpop.f32.mrf.mxu1 }
 0x150   : > { %v349_v33 = vpop.f32.mrf.mxu0  ;;  %v1507_v34 = vpop.f32.mrf.mxu1 }
 0x152   : > { %v351_v35 = vpop.f32.mrf.mxu0  ;;  %v391_v36 = vpop.f32.mrf.mxu1 }
 0x154   : > { %v352_v37 = vpop.f32.mrf.mxu0  ;;  %v1508_v38 = vpop.f32.mrf.mxu1 }
 0x156   : > { %v440_v1 = vpop.f32.mrf.mxu0  ;;  %v481_v39 = vpop.f32.mrf.mxu1 }
 0x157   : > { %v441_v19 = vadd.f32 %v440_v1, %v347_v31  ;;  %v482_v20 = vadd.f32 %v481_v39, %v388_v32 }
 0x158   : > { %v442_v40 = vpop.f32.mrf.mxu0  ;;  %v1513_v0 = vpop.f32.mrf.mxu1 }
 0x159   : > { %v443_v23 = vadd.f32 %v442_v40, %v349_v33 }
 0x15a   : > { %v444_v41 = vpop.f32.mrf.mxu0  ;;  %v484_v42 = vpop.f32.mrf.mxu1 }
 0x15c   : > { %v445_v43 = vpop.f32.mrf.mxu0  ;;  %v1514_v44 = vpop.f32.mrf.mxu1 }
 0x15e   : > { %v547_v45 = vpop.f32.mrf.mxu0  ;;  %v588_v46 = vpop.f32.mrf.mxu1 }
 0x15f   : > { %v594_v24 = vadd.f32 %v547_v45, %v441_v19  ;;  %v596_v25 = vadd.f32 %v588_v46, %v482_v20 }
 0x160   : > { %v549_v47 = vpop.f32.mrf.mxu0  ;;  %v1519_v48 = vpop.f32.mrf.mxu1 }
 0x161   : > { %v595_v28 = vadd.f32 %v549_v47, %v443_v23 }
 0x162   : > { %v551_v49 = vpop.f32.mrf.mxu0  ;;  %v591_v50 = vpop.f32.mrf.mxu1 }
 0x163   : > { %v1261_v49 = vpop.permute.xlu0 %1260 }
 0x164   : > { %v552_v51 = vpop.f32.mrf.mxu0  ;;  %v1520_v52 = vpop.f32.mrf.mxu1 }
 0x166   : > { %v657_v53 = vpop.f32.mrf.mxu0  ;;  %v698_v54 = vpop.f32.mrf.mxu1 }
 0x167   : > { %v704_v29 = vadd.f32 %v657_v53, %v594_v24  ;;  %v706_v30 = vadd.f32 %v698_v54, %v596_v25 }
 0x168   : > { %v659_v55 = vpop.f32.mrf.mxu0  ;;  %v1525_v56 = vpop.f32.mrf.mxu1 }
 0x169   : > { %v705_v36 = vadd.f32 %v659_v55, %v595_v28  ;;  %v1270_v55 = vpop.permute.xlu1 %1269 }
 0x16a   : > { %v661_v57 = vpop.f32.mrf.mxu0  ;;  %v701_v58 = vpop.f32.mrf.mxu1 }
 0x16c   : > { %v662_v59 = vpop.f32.mrf.mxu0  ;;  %v1526_v60 = vpop.f32.mrf.mxu1 }
 0x16e   : > { %v767_v61 = vpop.f32.mrf.mxu0  ;;  %v808_v62 = vpop.f32.mrf.mxu1 }
 0x16f   : > { %v814_v37 = vadd.f32 %v767_v61, %v704_v29  ;;  %v816_v38 = vadd.f32 %v808_v62, %v706_v30 }
 0x170   : > { %v769_v63 = vpop.f32.mrf.mxu0  ;;  %v1531_v2 = vpop.f32.mrf.mxu1 }
 0x171   : > { %v815_v42 = vadd.f32 %v769_v63, %v705_v36 }
 0x172   : > { %v771_v3 = vpop.f32.mrf.mxu0  ;;  %v811_v4 = vpop.f32.mrf.mxu1 }
 0x174   : > { %v772_v5 = vpop.f32.mrf.mxu0  ;;  %v1532_v6 = vpop.f32.mrf.mxu1 }
 0x176   : > { %v877_v7 = vpop.f32.mrf.mxu0  ;;  %v918_v8 = vpop.f32.mrf.mxu1 }
 0x177   : > { %v924_v31 = vadd.f32 %v877_v7, %v814_v37  ;;  %v926_v32 = vadd.f32 %v918_v8, %v816_v38 }
 0x178   : > { %v879_v9 = vpop.f32.mrf.mxu0  ;;  %v1537_v10 = vpop.f32.mrf.mxu1 }
 0x179   : > { %v925_v33 = vadd.f32 %v879_v9, %v815_v42 }
 0x17a   : > { %v881_v11 = vpop.f32.mrf.mxu0  ;;  %v921_v12 = vpop.f32.mrf.mxu1 }
 0x17c   : > { %v882_v13 = vpop.f32.mrf.mxu0  ;;  %v1538_v14 = vpop.f32.mrf.mxu1 }
 0x17e   : > { %v987_v15 = vpop.f32.mrf.mxu0  ;;  %v1028_v16 = vpop.f32.mrf.mxu1 }
 0x17f   : > { %v1034_v40 = vadd.f32 %v987_v15, %v924_v31  ;;  %v1036_v43 = vadd.f32 %v1028_v16, %v926_v32 }
 0x180   : > { %v989_v17 = vpop.f32.mrf.mxu0  ;;  %v1543_v18 = vpop.f32.mrf.mxu1 }
 0x181   : > { %v1035_v46 = vadd.f32 %v989_v17, %v925_v33 }
 0x182   : > { %v991_v21 = vpop.f32.mrf.mxu0  ;;  %v1031_v22 = vpop.f32.mrf.mxu1 }
 0x184   : > { %v992_v26 = vpop.f32.mrf.mxu0  ;;  %v1544_v27 = vpop.f32.mrf.mxu1 }
 0x186   : > { %v1097_v34 = vpop.f32.mrf.mxu0  ;;  %v1138_v35 = vpop.f32.mrf.mxu1 }
 0x187   : > { %v1144_v47 = vadd.f32 %v1097_v34, %v1034_v40  ;;  %v1146_v48 = vadd.f32 %v1138_v35, %v1036_v43 }
 0x188   : > { %v1099_v0 = vpop.f32.mrf.mxu0  ;;  %v1549_v41 = vpop.f32.mrf.mxu1 }
 0x189   : > { %v1145_v52 = vadd.f32 %v1099_v0, %v1035_v46 }
 0x18a   : > { %v1101_v1 = vpop.f32.mrf.mxu0  ;;  %v1141_v39 = vpop.f32.mrf.mxu1 }
 0x18c   : > { %v1102_v44 = vpop.f32.mrf.mxu0  ;;  %v1550_v45 = vpop.f32.mrf.mxu1 }
 0x18e   : > { %v1207_v50 = vpop.f32.mrf.mxu0  ;;  %v1248_v51 = vpop.f32.mrf.mxu1 }
 0x18f   : > { %v1254_v53 = vadd.f32 %v1207_v50, %v1144_v47  ;;  %v1256_v54 = vadd.f32 %v1248_v51, %v1146_v48 }
 0x190   : > { %v1555_v56 = vpop.f32.mrf.mxu1  ;;  %v1209_v57 = vpop.f32.mrf.mxu0 }
 0x191   : > { %v1263_v58 = vmul.f32 %v1261_v49, %v1254_v53  ;;  %v1265_v59 = vmul.f32 %v1261_v49, %v1256_v54  ;;  %v1255_v60 = vadd.f32 %v1209_v57, %v1145_v52 }
 0x192   : > { %v1211_v61 = vpop.f32.mrf.mxu0  ;;  %v1251_v62 = vpop.f32.mrf.mxu1 }
 0x193   : > { %v1264_v63 = vmul.f32 %v1261_v49, %v1255_v60  ;;  %v1272_v2 = vadd.f32 %v1270_v55, %v1263_v58  ;;  %v1274_v3 = vadd.f32 %v1270_v55, %v1265_v59 }
 0x194   : > { %v1212_v4 = vpop.f32.mrf.mxu0  ;;  %v1556_v5 = vpop.f32.mrf.mxu1 }
 0x195   : > { %v1273_v6 = vadd.f32 %v1270_v55, %v1264_v63  ;;  %vm1277_vm11 = vcmp.ge.f32.partialorder %v1274_v3, 0.0  ;;  %v1278_v7 = vmul.f32 0.01, %v1272_v2  ;;  %vm1275_vm12 = vcmp.ge.f32.partialorder %v1272_v2, 0.0 }
 0x196   : > { %v1280_v8 = vmul.f32 0.01, %v1274_v3 }
 0x197   : > { %vm1276_vm13 = vcmp.ge.f32.partialorder %v1273_v6, 0.0  ;;  %v1279_v9 = vmul.f32 0.01, %v1273_v6  ;;  %v1281_v11 = vsel %vm1275_vm12, %v1272_v2, %v1278_v7 }
 0x198   : > { %v1283_v10 = vsel %vm1277_vm11, %v1274_v3, %v1280_v8 }
 0x199   : > { %v1282_v12 = vsel %vm1276_vm13, %v1273_v6, %v1279_v9  ;;  %v1484_v13 = vpack.c.bf16 %v1283_v10, %v1283_v10 }
 0x19a   : > { %v1483_v14 = vpack.c.bf16 %v1282_v12, %v1281_v11 }
 0x19b   : > { %1298 = vst [vmem:[%s270_s8 + $0x8] sm:$0xf] %v1484_v13 }
 0x19c   : > { %1297 = vst [vmem:[%s270_s8] sm:$0xff] %v1483_v14 }
 0x19d PF: > { %s14_s17 = sadd.s32 1, %s1621_s17   ;;  %s1839_s15 = smov %s1617_s16 }
 0x19e   : > { %p11_p5 = scmp.ge.s32.totalorder %s14_s17, 4   ;;  %s1840_s16 = smov %s1842_s18 }
 0x1a0   :  { %13 = sbr.rel (!%p11_p5) target bundleno = 2 (0x2), region = 83 }

// kernel: ddualgcn_head.9
= control target key start
LH: loop header
LB: loop body
LE: loop exit
PB: predicated region body
PF: predicated region fallthrough
CT: control target
= control target key end

     0   :  { %s1396_s15 = smov 0   ;;  %s1956_s0 = inlined_call_operand.vmem [shape: bf16[2,8,4,256], index: 0, kind: input, shape index: {}]   ;;  %s1957_s1 = inlined_call_operand.vmem [shape: f32[9,8,1], index: 1, kind: input, shape index: {}]   ;;  %s1958_s2 = inlined_call_operand.vmem [shape: f32[8,1], index: 2, kind: input, shape index: {}]   ;;  %s1959_s3 = inlined_call_operand.vmem [shape: f32[8,1], index: 3, kind: input, shape index: {}]   ;;  %s1960_s4 = inlined_call_operand.vmem [shape: bf16[2,8,128], index: 4, kind: output, shape index: {}]  }
   0x1 LB: > { %s1247_s16 = sadd.s32 4294967295, %s1363_s15   ;;  %p1251_p0 = scmp.ge.s32.totalorder %s1363_s15, 1  ;;  %s1363_s15 = sphi %s1396_s15, %s14_s15  }
   0x2   : > { %p162_p1 = scmp.lt.s32.totalorder %s1363_s15, 3 }
   0x4   : > { %p163_p2 = pnand %p1251_p0, %p162_p1 }
   0x5   : > { %p187_p3 = scmp.lt.s32.totalorder (!%p163_p2), %s1247_s16, 1  ;;  %s1368_s19 = smov (!%p163_p2), 127  }
   0x6   : > { %166 = sbr.rel (%p163_p2) target bundleno = 358 (0x166), region = 36  ;;  %s1369_s20 = smov (!%p163_p2), 119  }
   0x7   : > { %s1370_s21 = smov (!%p163_p2), 118  }
   0xb   : > { %v1292_v0 = vld [vmem:[%s1957_s1 + $0x30] sm:$0xff]  ;;  %v1365_v2 = vmov 0   ;;  %v1293_v3 = vld [vmem:[%s1957_s1 + $0x38] sm:$0xff]  ;;  %v1283_v4 = vld [vmem:[%s1957_s1 + $0x28] sm:$0xff]  ;;  %s1962_s16 = smov (!%p187_p3, %s1247_s16), 1  ;;  %v220_v14 = vlaneseq  ;;  %vm409_vm0 = vcmask 1039360  }
   0xc   : > { %v1264_v1 = vld [vmem:[%s1957_s1 + $0x10] sm:$0xff]  ;;  %1356 = vset.pattern.permute.xlu1 %v1365_v2  ;;  %1355 = vset.pattern.permute.xlu0 %v1365_v2  ;;  %v1255_v5 = vld [vmem:[%s1957_s1 + $0x8] sm:$0xff]  ;;  %v1302_v6 = vld [vmem:[%s1957_s1 + $0x40] sm:$0xff]  ;;  %v1366_v12 = vmov 839922192   ;;  %s1313_s13 = sshll.u32 %s1962_s16, 5 }
   0xd   : > { %716 = vperm.xlu1 %1356, %v1292_v0   ;;  %339 = vperm.xlu0 %1355, %v1264_v1   ;;  %v1265_v7 = vld [vmem:[%s1957_s1 + $0x18] sm:$0xff]  ;;  %v212_v8 = vld [vmem:[%s1957_s1] sm:$0xff]  ;;  %v218_v13 = vunpack.c.l.s4 %v1366_v12  ;;  %v1367_v15 = vmov 1985246804   ;;  %v221_v18 = vshrl.u32 %v220_v14, 7  ;;  %s1447_s18 = scalar_lea.vmem %s1956_s0, %s1313_s13  ;;  %vm786_vm1 = vcmask 973824  }
   0xe   : > { %v1065_v9 = vld [vmem:[%s1959_s3] sm:$0xff]  ;;  %v225_v16 = vunpack.c.l.s4 %v1367_v15  ;;  %v1339_v26 = vld [vmem:[%s1447_s18 + $0x10] sm:$0xff]   ;;  %v1338_v39 = vld [vmem:[%s1447_s18 + $0x8] sm:$0xff]   ;;  %vm999_vm2 = vcmask 965632   ;;  %vm1171_vm4 = vcmask 1041409   ;;  %vm1174_vm9 = vcmask 1042434  }
   0xf   : > { %v1274_v10 = vld [vmem:[%s1957_s1 + $0x20] sm:$0xff]  ;;  %v219_v17 = vunpack.c.0.s8 %v218_v13  ;;  %v1467_v32 = vunpack.c.l.bf16 %v1339_v26  ;;  %v1491_v44 = vunpack.c.l.bf16 %v1338_v39  ;;  %v1513_v55 = vunpack.c.h.bf16 %v1338_v39  ;;  %v1340_v63 = vld [vmem:[%s1447_s18 + $0x18] sm:$0xff]   ;;  %s1254_s22 = sshll.u32 %s1962_s16, 2 }
  0x10   : > { %v1024_v11 = vld [vmem:[%s1958_s2] sm:$0xff]  ;;  %v226_v19 = vunpack.c.0.s8 %v225_v16  ;;  %v1528_v0 = vunpack.c.h.bf16 %v1339_v26  ;;  %vm1177_vm12 = vcmask 1043459   ;;  %vm1180_vm14 = vcmask 1044484   ;;  %s195_s25 = scalar_lea.vmem %s1960_s4, %s1254_s22 }
  0x11   : > { %815 = vperm.xlu1 %1356, %v1293_v3   ;;  %602 = vperm.xlu0 %1355, %v1283_v4   ;;  %v1323_v20 = vld [vmem:[%s1447_s18] sm:$0xff]   ;;  %v1450_v21 = vsub.s32 %v219_v17, %v221_v18  ;;  %vm1183_vm15 = vcmask 1045509  }
  0x12   : > { %v1452_v22 = vsub.s32 %v226_v19, %v221_v18  ;;  %v1454_v23 = vunpack.c.l.bf16 %v1323_v20  ;;  %v1517_v59 = vunpack.c.h.bf16 %v1323_v20 }
  0x15   : > { %257 = vperm.xlu1 %1356, %v1255_v5   ;;  %929 = vperm.xlu0 %1355, %v1302_v6   ;;  %v1540_v6 = vunpack.c.l.bf16 %v1340_v63 }
  0x19   : > { %438 = vperm.xlu1 %1356, %v1265_v7   ;;  %215 = vperm.xlu0 %1355, %v212_v8  }
  0x1d   : > { %1068 = vperm.xlu1 %1356, %v1065_v9   ;;  %520 = vperm.xlu0 %1355, %v1274_v10   ;;  %v1549_v10 = vunpack.c.h.bf16 %v1340_v63 }
  0x21   : > { %1027 = vperm.xlu0 %1355, %v1024_v11  }
  0x88   : > { %v717_v24 = vpop.permute.xlu1 %716  ;;  %v340_v25 = vpop.permute.xlu0 %339 }
  0x89   : > { %v1458_v27 = vrot.slane %v717_v24, %v1450_v21  ;;  %v347_v28 = vrot.slane %v340_v25, %v1450_v21  ;;  %v1462_v29 = vrot.slane %v340_v25, %v1452_v22  ;;  %v1476_v36 = vrot.slane %v717_v24, %v1452_v22 }
  0x8b   : > { %v369_v30 = vmul.f32 %v1454_v23, %v347_v28  ;;  %v746_v31 = vmul.f32 %v1454_v23, %v1458_v27  ;;  %v373_v35 = vmul.f32 %v1467_v32, %v1462_v29  ;;  %v356_v45 = vrot.slane %v347_v28, 2 }
  0x8c   : > { %v1469_v33 = vpop.permute.xlu1 %815  ;;  %v603_v34 = vpop.permute.xlu0 %602  ;;  %v750_v49 = vmul.f32 %v1467_v32, %v1476_v36  ;;  %v357_v56 = vrot.slane %v347_v28, 3  ;;  %v355_v60 = vrot.slane %v347_v28, 1  ;;  %v358_v1 = vrot.slane %v1462_v29, 1 }
  0x8d   : > { %385 = vrot.lane.b32.xlu1 %v369_v30, %s1368_s19  ;;  %762 = vrot.lane.b32.xlu0 %v746_v31, %s1369_s20  ;;  %v371_v54 = vmul.f32 %v1491_v44, %v356_v45  ;;  %v1532_v2 = vrot.slane %v603_v34, %v1450_v21  ;;  %v1537_v4 = vrot.slane %v1469_v33, %v1450_v21  ;;  %v359_v7 = vrot.slane %v1462_v29, 2 }
  0x8e   : > { %v372_v3 = vmul.f32 %v1513_v55, %v357_v56  ;;  %v370_v5 = vmul.f32 %v1517_v59, %v355_v60  ;;  %v1544_v8 = vrot.slane %v603_v34, %v1452_v22  ;;  %v374_v9 = vmul.f32 %v1528_v0, %v358_v1 }
  0x8f   : > { %v360_v11 = vrot.slane %v1462_v29, 3  ;;  %v732_v12 = vrot.slane %v1458_v27, 1  ;;  %v634_v13 = vmul.f32 %v1491_v44, %v1532_v2  ;;  %v734_v14 = vrot.slane %v1458_v27, 3 }
  0x90   : > { %v258_v37 = vpop.permute.xlu1 %257  ;;  %v930_v38 = vpop.permute.xlu0 %929  ;;  %v375_v15 = vmul.f32 %v1540_v6, %v359_v7  ;;  %v733_v16 = vrot.slane %v1458_v27, 2  ;;  %v1560_v17 = vmul.f32 %v1517_v59, %v1537_v4  ;;  %v737_v18 = vrot.slane %v1476_v36, 3 }
  0x91   : > { %v1480_v40 = vrot.slane %v258_v37, %v1450_v21  ;;  %v1483_v41 = vrot.slane %v258_v37, %v1452_v22  ;;  %v1486_v42 = vrot.slane %v930_v38, %v1452_v22  ;;  %393 = vrot.lane.b32.xlu1 %v373_v35, %s1368_s19  ;;  %v1494_v46 = vrot.slane %v930_v38, %v1450_v21 }
  0x92   : > { %v1567_v20 = vmul.f32 %v1540_v6, %v1544_v8  ;;  %v376_v24 = vmul.f32 %v1549_v10, %v360_v11  ;;  %v747_v25 = vmul.f32 %v1517_v59, %v732_v12  ;;  %v1286_v26 = vrot.slane %v634_v13, 10 }
  0x93   : > { %v963_v43 = vmul.f32 %v1467_v32, %v1486_v42  ;;  %v959_v58 = vmul.f32 %v1454_v23, %v1494_v46  ;;  %v945_v19 = vrot.slane %v1494_v46, 1  ;;  %v749_v27 = vmul.f32 %v1513_v55, %v734_v14 }
  0x94   : > { %v439_v47 = vpop.permute.xlu1 %438  ;;  %v216_v48 = vpop.permute.xlu0 %215  ;;  %v748_v28 = vmul.f32 %v1491_v44, %v733_v16  ;;  %v1295_v29 = vrot.slane %v1560_v17, 9  ;;  %v753_v30 = vmul.f32 %v1549_v10, %v737_v18  ;;  %v273_v31 = vrot.slane %v1480_v40, 7 }
  0x95   : > { %v1499_v50 = vrot.slane %v439_v47, %v1450_v21  ;;  %v1502_v51 = vrot.slane %v439_v47, %v1452_v22  ;;  %v1505_v52 = vrot.slane %v216_v48, %v1450_v21  ;;  %v1508_v53 = vrot.slane %v216_v48, %v1452_v22  ;;  %983 = vrot.lane.b32.xlu0 %v963_v43, %s1370_s21 }
  0x96   : > { %770 = vrot.lane.b32.xlu1 %v750_v49, %s1369_s20  ;;  %v960_v34 = vmul.f32 %v1517_v59, %v945_v19  ;;  %v1290_v35 = vrot.slane %v1567_v20, 10  ;;  %v619_v37 = vrot.slane %v1532_v2, 7  ;;  %v735_v39 = vrot.slane %v1476_v36, 1 }
  0x97   : > { %v454_v38 = vrot.slane %v1499_v50, 6  ;;  %v618_v43 = vrot.slane %v1532_v2, 6  ;;  %v245_v45 = vmul.f32 %v1454_v23, %v1505_v52  ;;  %v287_v47 = vmul.f32 %v1454_v23, %v273_v31 }
  0x98   : > { %v521_v57 = vpop.permute.xlu0 %520  ;;  %v249_v49 = vmul.f32 %v1467_v32, %v1508_v53  ;;  %v457_v56 = vrot.slane %v1502_v51, 6  ;;  %v274_v60 = vrot.slane %v1480_v40, 1  ;;  %v1599_v63 = vmul.f32 %v1491_v44, %v1499_v50 }
  0x99   : > { %v1520_v61 = vrot.slane %v521_v57, %v1450_v21  ;;  %v1523_v62 = vrot.slane %v521_v57, %v1452_v22  ;;  %389 = vrot.lane.b32.xlu0 %v371_v54, %s1368_s19  ;;  %v1589_v48 = vmul.f32 %v1454_v23, %v454_v38  ;;  %v276_v54 = vrot.slane %v1483_v41, 7 }
  0x9a   : > { %975 = vrot.lane.b32.xlu1 %v959_v58, %s1370_s21  ;;  %v1256_v57 = vrot.slane %v287_v47, 9  ;;  %v232_v58 = vrot.slane %v1505_v52, 2  ;;  %v736_v1 = vrot.slane %v1476_v36, 2  ;;  %v233_v7 = vrot.slane %v1505_v52, 3 }
  0x9b   : > { %v289_v13 = vmul.f32 %v1491_v44, %v274_v60  ;;  %v633_v14 = vmul.f32 %v1517_v59, %v619_v37  ;;  %v275_v17 = vrot.slane %v1480_v40, 2  ;;  %v456_v19 = vrot.slane %v1499_v50, 1 }
  0x9c   : > { %v1610_v11 = vadd.f32 %v1256_v57, %v245_v45  ;;  %v247_v12 = vmul.f32 %v1491_v44, %v232_v58  ;;  %v248_v16 = vmul.f32 %v1513_v55, %v233_v7  ;;  %v455_v31 = vrot.slane %v1499_v50, 7 }
  0x9d   : > { %391 = vrot.lane.b32.xlu0 %v372_v3, %s1368_s19  ;;  %v291_v3 = vmul.f32 %v1467_v32, %v276_v54  ;;  %v1258_v18 = vrot.slane %v289_v13, 9  ;;  %v234_v37 = vrot.slane %v1508_v53, 1  ;;  %v1631_v45 = vmul.f32 %v1513_v55, %v456_v19 }
  0x9e   : > { %387 = vrot.lane.b32.xlu1 %v370_v5, %s1368_s19  ;;  %v1605_v5 = vmul.f32 %v1467_v32, %v457_v56  ;;  %v292_v50 = vmul.f32 %v1528_v0, %v1483_v41  ;;  %v751_v54 = vmul.f32 %v1528_v0, %v735_v39  ;;  %v458_v56 = vrot.slane %v1502_v51, 7 }
  0x9f   : > { %v1628_v38 = vadd.f32 %v1258_v18, %v247_v12  ;;  %v235_v57 = vrot.slane %v1508_v53, 2  ;;  %v622_v58 = vrot.slane %v1544_v8, 7  ;;  %v277_v7 = vrot.slane %v1483_v41, 1 }
  0xa0   : > { %v1652_v12 = vmul.f32 %v1528_v0, %v458_v56  ;;  %v1657_v13 = vmul.f32 %v1540_v6, %v1502_v51  ;;  %v459_v18 = vrot.slane %v1502_v51, 1  ;;  %v632_v19 = vmul.f32 %v1454_v23, %v618_v43 }
  0xa1   : > { %395 = vrot.lane.b32.xlu0 %v374_v9, %s1368_s19  ;;  %v621_v9 = vrot.slane %v1544_v8, 6  ;;  %v251_v39 = vmul.f32 %v1540_v6, %v235_v57  ;;  %v537_v43 = vrot.slane %v1520_v61, 6  ;;  %v539_v20 = vrot.slane %v1523_v62, 5 }
  0xa2   : > { %397 = vrot.lane.b32.xlu1 %v375_v15, %s1368_s19  ;;  %v1260_v15 = vrot.slane %v291_v3, 9  ;;  %v1261_v3 = vrot.slane %v292_v50, 9 }
  0xa3   : > { %v1696_v56 = vmul.f32 %v1467_v32, %v539_v20  ;;  %v833_v20 = vrot.slane %v1537_v4, 2 }
  0xa5   : > { %399 = vrot.lane.b32.xlu0 %v376_v24, %s1368_s19  ;;  %v231_v24 = vrot.slane %v1505_v52, 1 }
  0xa6   : > { %764 = vrot.lane.b32.xlu1 %v747_v25, %s1369_s20  ;;  %v288_v25 = vmul.f32 %v1517_v59, %v1480_v40 }
  0xa7   : > { %v246_v52 = vmul.f32 %v1517_v59, %v231_v24 }
  0xa8   : > { %v1257_v40 = vrot.slane %v288_v25, 9  ;;  %v538_v25 = vrot.slane %v1520_v61, 7 }
  0xa9   : > { %668 = vrot.lane.b32.xlu0 %v1286_v26, %s1368_s19  ;;  %v1622_v26 = vadd.f32 %v1260_v15, %v249_v49  ;;  %v250_v49 = vmul.f32 %v1528_v0, %v234_v37 }
  0xaa   : > { %768 = vrot.lane.b32.xlu1 %v749_v27, %s1369_s20  ;;  %v290_v27 = vmul.f32 %v1513_v55, %v275_v17  ;;  %v278_v17 = vrot.slane %v1483_v41, 2  ;;  %v541_v41 = vrot.slane %v1523_v62, 7  ;;  %v1678_v51 = vmul.f32 %v1491_v44, %v538_v25 }
  0xab   : > { %v1660_v15 = vadd.f32 %v1261_v3, %v250_v49  ;;  %v1690_v49 = vmul.f32 %v1517_v59, %v537_v43  ;;  %v1704_v3 = vmul.f32 %v1549_v10, %v1523_v62 }
  0xac   : > { %v1259_v47 = vrot.slane %v290_v27, 9  ;;  %v294_v27 = vmul.f32 %v1549_v10, %v278_v17  ;;  %v623_v17 = vrot.slane %v1544_v8, 1  ;;  %v947_v8 = vrot.slane %v1494_v46, 3 }
  0xad   : > { %766 = vrot.lane.b32.xlu0 %v748_v28, %s1369_s20  ;;  %v1635_v28 = vmul.f32 %v1517_v59, %v455_v31  ;;  %v1673_v31 = vmul.f32 %v1549_v10, %v459_v18  ;;  %v1709_v59 = vmul.f32 %v1513_v55, %v1520_v61  ;;  %v831_v18 = vrot.slane %v1537_v4, 7 }
  0xae   : > { %977 = vrot.lane.b32.xlu1 %v960_v34, %s1370_s21  ;;  %v1641_v34 = vadd.f32 %v1257_v40, %v246_v52  ;;  %v1647_v60 = vadd.f32 %v1259_v47, %v248_v16  ;;  %v293_v16 = vmul.f32 %v1540_v6, %v277_v7  ;;  %v1263_v52 = vrot.slane %v294_v27, 9 }
  0xaf   : > { %v1687_v40 = vmul.f32 %v1540_v6, %v541_v41  ;;  %v1284_v47 = vrot.slane %v632_v19, 10  ;;  %v830_v7 = vrot.slane %v1469_v33, %v1452_v22  ;;  %v832_v41 = vrot.slane %v1537_v4, 1 }
  0xb0   : > { %v948_v4 = vrot.slane %v1486_v42, 1 }
  0xb1   : > { %879 = vrot.lane.b32.xlu0 %v1295_v29, %s1369_s20  ;;  %v236_v29 = vrot.slane %v1508_v53, 3  ;;  %v1262_v53 = vrot.slane %v293_v16, 9  ;;  %v637_v16 = vmul.f32 %v1528_v0, %v622_v58  ;;  %v850_v36 = vmul.f32 %v1528_v0, %v830_v7 }
  0xb2   : > { %776 = vrot.lane.b32.xlu1 %v753_v30, %s1369_s20  ;;  %v1285_v30 = vrot.slane %v633_v14, 10  ;;  %v536_v14 = vrot.slane %v1520_v61, 5  ;;  %v834_v25 = vrot.slane %v830_v7, 7 }
  0xb3   : > { %v252_v24 = vmul.f32 %v1549_v10, %v236_v29  ;;  %v1684_v37 = vadd.f32 %v1262_v53, %v251_v39  ;;  %v946_v39 = vrot.slane %v1494_v46, 2  ;;  %v1289_v61 = vrot.slane %v637_v16, 10 }
  0xb4   : > { %v1693_v50 = vmul.f32 %v1454_v23, %v536_v14  ;;  %v1299_v58 = vrot.slane %v850_v36, 9  ;;  %v962_v53 = vmul.f32 %v1513_v55, %v947_v8  ;;  %v849_v14 = vmul.f32 %v1467_v32, %v834_v25  ;;  %v1761_v36 = vpop.permute.xlu1 %1068 }
  0xb5   : > { %676 = vrot.lane.b32.xlu0 %v1290_v35, %s1368_s19  ;;  %v636_v35 = vmul.f32 %v1467_v32, %v621_v9  ;;  %v1699_v57 = vadd.f32 %v1263_v52, %v252_v24  ;;  %v540_v9 = vrot.slane %v1523_v62, 6  ;;  %v961_v33 = vmul.f32 %v1491_v44, %v946_v39 }
  0xb6   : > { %666 = vrot.lane.b32.xlu1 %v1285_v30, %s1368_s19  ;;  %v620_v30 = vrot.slane %v1532_v2, 1  ;;  %v845_v24 = vmul.f32 %v1454_v23, %v831_v18  ;;  %v835_v46 = vrot.slane %v830_v7, 1  ;;  %v847_v2 = vmul.f32 %v1491_v44, %v832_v41 }
  0xb7   : > { %v1718_v29 = vmul.f32 %v1528_v0, %v540_v9  ;;  %v1288_v62 = vrot.slane %v636_v35, 10  ;;  %v1298_v35 = vrot.slane %v849_v14, 9  ;;  %v848_v32 = vmul.f32 %v1513_v55, %v833_v20 }
  0xb8   : > { %v635_v27 = vmul.f32 %v1513_v55, %v620_v30  ;;  %v1294_v43 = vrot.slane %v845_v24, 9  ;;  %v851_v52 = vmul.f32 %v1540_v6, %v835_v46  ;;  %v1296_v9 = vrot.slane %v847_v2, 9 }
  0xb9   : > { %772 = vrot.lane.b32.xlu0 %v751_v54, %s1369_s20  ;;  %v752_v54 = vmul.f32 %v1540_v6, %v736_v1  ;;  %v639_v1 = vmul.f32 %v1549_v10, %v623_v17  ;;  %v1297_v44 = vrot.slane %v848_v32, 9  ;;  %v964_v16 = vmul.f32 %v1528_v0, %v948_v4 }
  0xba   : > { %664 = vrot.lane.b32.xlu1 %v1284_v47, %s1368_s19  ;;  %v1287_v23 = vrot.slane %v635_v27, 10  ;;  %v836_v47 = vrot.slane %v830_v7, 2  ;;  %v949_v7 = vrot.slane %v1486_v42, 2  ;;  %v950_v55 = vrot.slane %v1486_v42, 3 }
  0xbb   : > { %v1291_v19 = vrot.slane %v639_v1, 10  ;;  %v1266_v42 = vrot.slane %v1589_v48, 10  ;;  %v1270_v25 = vrot.slane %v1605_v5, 10  ;;  %v1268_v5 = vrot.slane %v1599_v63, 10 }
  0xbc   : > { %v852_v39 = vmul.f32 %v1549_v10, %v836_v47  ;;  %v965_v17 = vmul.f32 %v1540_v6, %v949_v7  ;;  %v1277_v32 = vrot.slane %v1678_v51, 11  ;;  %v1267_v63 = vrot.slane %v1635_v28, 10 }
  0xbd   : > { %774 = vrot.lane.b32.xlu0 %v752_v54, %s1369_s20  ;;  %v1300_v54 = vrot.slane %v851_v52, 9  ;;  %v1278_v51 = vrot.slane %v1709_v59, 11 }
  0xbe   : > { %672 = vrot.lane.b32.xlu1 %v1288_v62, %s1368_s19  ;;  %v1301_v62 = vrot.slane %v852_v39, 9 }
  0xc1   : > { %979 = vrot.lane.b32.xlu0 %v961_v33, %s1370_s21  ;;  %v966_v33 = vmul.f32 %v1549_v10, %v950_v55 }
  0xc2   : > { %674 = vrot.lane.b32.xlu1 %v1289_v61, %s1368_s19  ;;  %v1763_v61 = vpop.permute.xlu0 %1027 }
  0xc5   : > { %887 = vrot.lane.b32.xlu0 %v1299_v58, %s1369_s20 }
  0xc6   : > { %678 = vrot.lane.b32.xlu1 %v1291_v19, %s1368_s19  ;;  %v1275_v19 = vrot.slane %v1693_v50, 11 }
  0xc9   : > { %981 = vrot.lane.b32.xlu0 %v962_v53, %s1370_s21 }
  0xca   : > { %877 = vrot.lane.b32.xlu1 %v1294_v43, %s1369_s20  ;;  %v1279_v43 = vrot.slane %v1696_v56, 11 }
  0xcd   : > { %670 = vrot.lane.b32.xlu0 %v1287_v23, %s1368_s19 }
  0xce   : > { %885 = vrot.lane.b32.xlu1 %v1298_v35, %s1369_s20 }
  0xd1   : > { %881 = vrot.lane.b32.xlu0 %v1296_v9, %s1369_s20 }
  0xd2   : > { %889 = vrot.lane.b32.xlu1 %v1300_v54, %s1369_s20  ;;  %v1269_v54 = vrot.slane %v1631_v45, 10 }
  0xd5   : > { %883 = vrot.lane.b32.xlu0 %v1297_v44, %s1369_s20 }
  0xd6   : > { %891 = vrot.lane.b32.xlu1 %v1301_v62, %s1369_s20 }
  0xd9   : > { %985 = vrot.lane.b32.xlu0 %v964_v16, %s1370_s21 }
  0xda   : > { %987 = vrot.lane.b32.xlu1 %v965_v17, %s1370_s21 }
  0xdd   : > { %989 = vrot.lane.b32.xlu0 %v966_v33, %s1370_s21 }
  0xff   : > { %v386_v1 = vpop.permute.xlu1 %385  ;;  %v1768_v58 = vpop.permute.xlu0 %762 }
 0x100   : > { %v401_v18 = vrot.slane %v386_v1, 4 }
 0x102   : > { %v410_v0 = vsel %vm409_vm0, %v386_v1, %v401_v18  ;;  %v1271_v1 = vrot.slane %v1652_v12, 10 }
 0x103   : > { %v426_v6 = vadd.f32 %v410_v0, %v1610_v11  ;;  %v394_v8 = vpop.permute.xlu1 %393 }
 0x104   : > { %v405_v30 = vrot.slane %v394_v8, 4 }
 0x105   : > { %v508_v10 = vadd.f32 %v1266_v42, %v426_v6 }
 0x106   : > { %v414_v24 = vsel %vm409_vm0, %v394_v8, %v405_v30 }
 0x107   : > { %v430_v53 = vadd.f32 %v414_v24, %v1622_v26  ;;  %v1774_v27 = vpop.permute.xlu0 %983  ;;  %v1776_v41 = vadd.f32 %v1275_v19, %v508_v10  ;;  %v1280_v19 = vrot.slane %v1718_v29, 11  ;;  %v1273_v24 = vrot.slane %v1673_v31, 10 }
 0x108   : > { %v1778_v48 = vpop.permute.xlu1 %770 }
 0x109   : > { %v512_v11 = vadd.f32 %v1270_v25, %v430_v53 }
 0x10b   : > { %v390_v14 = vpop.permute.xlu0 %389  ;;  %v1781_v46 = vadd.f32 %v1279_v43, %v512_v11 }
 0x10c   : > { %v403_v23 = vrot.slane %v390_v14, 4  ;;  %v1783_v50 = vpop.permute.xlu1 %975 }
 0x10e   : > { %v412_v2 = vsel %vm409_vm0, %v390_v14, %v403_v23  ;;  %v1282_v14 = vrot.slane %v1704_v3, 11 }
 0x10f   : > { %v428_v26 = vadd.f32 %v412_v2, %v1628_v38  ;;  %v392_v20 = vpop.permute.xlu0 %391 }
 0x110   : > { %v404_v35 = vrot.slane %v392_v20, 4  ;;  %v388_v52 = vpop.permute.xlu1 %387 }
 0x111   : > { %v510_v47 = vadd.f32 %v1268_v5, %v428_v26  ;;  %v402_v9 = vrot.slane %v388_v52, 4 }
 0x112   : > { %v413_v56 = vsel %vm409_vm0, %v392_v20, %v404_v35 }
 0x113   : > { %v429_v39 = vadd.f32 %v413_v56, %v1647_v60  ;;  %v411_v44 = vsel %vm409_vm0, %v388_v52, %v402_v9  ;;  %v396_v4 = vpop.permute.xlu0 %395  ;;  %v1793_v62 = vadd.f32 %v1277_v32, %v510_v47  ;;  %v1276_v60 = vrot.slane %v1690_v49, 11 }
 0x114   : > { %v427_v38 = vadd.f32 %v411_v44, %v1641_v34  ;;  %v406_v7 = vrot.slane %v396_v4, 4  ;;  %v398_v16 = vpop.permute.xlu1 %397  ;;  %v1272_v34 = vrot.slane %v1657_v13, 10  ;;  %v778_v32 = vrot.slane %v1768_v58, 4 }
 0x115   : > { %v511_v55 = vadd.f32 %v1269_v54, %v429_v39  ;;  %v407_v17 = vrot.slane %v398_v16, 4  ;;  %v1834_v44 = vrot.slane %v1763_v61, %v1450_v21 }
 0x116   : > { %v509_v33 = vadd.f32 %v1267_v63, %v427_v38  ;;  %v415_v45 = vsel %vm409_vm0, %v396_v4, %v406_v7 }
 0x117   : > { %v431_v18 = vadd.f32 %v415_v45, %v1660_v15  ;;  %v416_v0 = vsel %vm409_vm0, %v398_v16, %v407_v17  ;;  %v400_v28 = vpop.permute.xlu0 %399  ;;  %v1803_v42 = vadd.f32 %v1278_v51, %v511_v55  ;;  %v1281_v15 = vrot.slane %v1687_v40, 11 }
 0x118   : > { %v432_v6 = vadd.f32 %v416_v0, %v1684_v37  ;;  %v408_v8 = vrot.slane %v400_v28, 4  ;;  %v765_v59 = vpop.permute.xlu1 %764  ;;  %v591_v30 = vadd.f32 %v1276_v60, %v509_v33  ;;  %v1842_v16 = vrot.slane %v1761_v36, %v1450_v21 }
 0x119   : > { %v513_v10 = vadd.f32 %v1271_v1, %v431_v18  ;;  %v779_v26 = vrot.slane %v765_v59, 4  ;;  %v787_v33 = vsel %vm786_vm1, %v1768_v58, %v778_v32  ;;  %v782_v45 = vrot.slane %v1778_v48, 4 }
 0x11a   : > { %v514_v49 = vadd.f32 %v1272_v34, %v432_v6  ;;  %v417_v12 = vsel %vm409_vm0, %v400_v28, %v408_v8  ;;  %v1043_v18 = vrot.slane %v1834_v44, 1  ;;  %v1084_v6 = vrot.slane %v1842_v16, 1 }
 0x11b   : > { %v433_v25 = vadd.f32 %v417_v12, %v1699_v57  ;;  %v669_v53 = vpop.permute.xlu0 %668  ;;  %v1812_v11 = vadd.f32 %v1280_v19, %v513_v10  ;;  %v788_v56 = vsel %vm786_vm1, %v765_v59, %v779_v26  ;;  %v791_v58 = vsel %vm786_vm1, %v1778_v48, %v782_v45 }
 0x11c   : > { %v1814_v13 = vpop.permute.xlu1 %768  ;;  %v1816_v37 = vadd.f32 %v1281_v15, %v514_v49  ;;  %v682_v10 = vrot.slane %v669_v53, 4  ;;  %v1863_v12 = vrot.slane %v1761_v36, %v1452_v22  ;;  %v1085_v48 = vrot.slane %v1842_v16, 2 }
 0x11d   : > { %v515_v43 = vadd.f32 %v1273_v24, %v433_v25  ;;  %v995_v24 = vrot.slane %v1774_v27, 4 }
 0x11f   : > { %v1819_v29 = vpop.permute.xlu0 %766  ;;  %v1821_v23 = vadd.f32 %v1282_v14, %v515_v43  ;;  %v1086_v43 = vrot.slane %v1842_v16, 3  ;;  %v690_v14 = vsel %vm409_vm0, %v669_v53, %v682_v10 }
 0x120   : > { %v978_v2 = vpop.permute.xlu1 %977 }
 0x121   : > { %v992_v54 = vrot.slane %v978_v2, 4 }
 0x123   : > { %v880_v40 = vpop.permute.xlu0 %879  ;;  %v1001_v60 = vsel %vm999_vm2, %v978_v2, %v992_v54  ;;  %v1044_v2 = vrot.slane %v1834_v44, 2 }
 0x124   : > { %v1823_v5 = vpop.permute.xlu1 %776  ;;  %v894_v35 = vrot.slane %v880_v40, 4 }
 0x126   : > { %v902_v63 = vsel %vm786_vm1, %v880_v40, %v894_v35  ;;  %v991_v40 = vrot.slane %v1783_v50, 4 }
 0x127   : > { %v1825_v31 = vpop.permute.xlu0 %676 }
 0x128   : > { %v667_v57 = vpop.permute.xlu1 %666 }
 0x129   : > { %v681_v20 = vrot.slane %v667_v57, 4 }
 0x12b   : > { %v689_v52 = vsel %vm409_vm0, %v667_v57, %v681_v20  ;;  %v1828_v47 = vpop.permute.xlu0 %772  ;;  %v781_v57 = vrot.slane %v1814_v13, 4  ;;  %v1087_v20 = vrot.slane %v1863_v12, 1 }
 0x12c   : > { %v705_v3 = vadd.f32 %v689_v52, %v591_v30  ;;  %v665_v9 = vpop.permute.xlu1 %664  ;;  %v1859_v30 = vrot.slane %v1763_v61, %v1452_v22  ;;  %v686_v61 = vrot.slane %v1825_v31, 4  ;;  %v1045_v22 = vrot.slane %v1834_v44, 3 }
 0x12d   : > { %v680_v39 = vrot.slane %v665_v9, 4  ;;  %v1004_v52 = vsel %vm999_vm2, %v1774_v27, %v995_v24 }
 0x12e   : > { %v804_v4 = vadd.f32 %v788_v56, %v705_v3  ;;  %v1046_v36 = vrot.slane %v1859_v30, 1  ;;  %v1047_v35 = vrot.slane %v1859_v30, 2  ;;  %v785_v3 = vrot.slane %v1823_v5, 4 }
 0x12f   : > { %v688_v38 = vsel %vm409_vm0, %v665_v9, %v680_v39  ;;  %v1838_v7 = vpop.permute.xlu0 %774  ;;  %v706_v56 = vadd.f32 %v690_v14, %v1793_v62  ;;  %v694_v54 = vsel %vm409_vm0, %v1825_v31, %v686_v61 }
 0x130   : > { %v918_v55 = vadd.f32 %v902_v63, %v804_v4  ;;  %v704_v17 = vadd.f32 %v688_v38, %v1776_v41  ;;  %v673_v51 = vpop.permute.xlu1 %672  ;;  %v783_v63 = vrot.slane %v1828_v47, 4  ;;  %v784_v38 = vrot.slane %v1838_v7, 4 }
 0x131   : > { %v684_v1 = vrot.slane %v673_v51, 4  ;;  %v794_v31 = vsel %vm786_vm1, %v1823_v5, %v785_v3 }
 0x132   : > { %v1017_v0 = vadd.f32 %v1001_v60, %v918_v55  ;;  %v803_v28 = vadd.f32 %v787_v33, %v704_v17  ;;  %v790_v55 = vsel %vm786_vm1, %v1814_v13, %v781_v57  ;;  %v792_v13 = vsel %vm786_vm1, %v1828_v47, %v783_v63 }
 0x133   : > { %v692_v21 = vsel %vm409_vm0, %v673_v51, %v684_v1  ;;  %v1851_v34 = vpop.permute.xlu0 %979 }
 0x134   : > { %v1058_v41 = vmul.f32 %v1043_v18, %v1017_v0  ;;  %v708_v8 = vadd.f32 %v692_v21, %v1781_v46  ;;  %v675_v59 = vpop.permute.xlu1 %674  ;;  %v780_v46 = vrot.slane %v1819_v29, 4  ;;  %v710_v18 = vadd.f32 %v694_v54, %v1816_v37 }
 0x135   : > { %v685_v9 = vrot.slane %v675_v59, 4 }
 0x136   : > { %v1099_v19 = vadd.f32 %v1084_v6, %v1058_v41  ;;  %v807_v49 = vadd.f32 %v791_v58, %v708_v8  ;;  %v789_v53 = vsel %vm786_vm1, %v1819_v29, %v780_v46  ;;  %v1000_v29 = vsel %vm999_vm2, %v1783_v50, %v991_v40 }
 0x137   : > { %v1865_v15 = vpop.permute.xlu0 %887  ;;  %v805_v17 = vadd.f32 %v789_v53, %v706_v56  ;;  %v693_v33 = vsel %vm409_vm0, %v675_v59, %v685_v9  ;;  %v993_v50 = vrot.slane %v1851_v34, 4  ;;  %v793_v6 = vsel %vm786_vm1, %v1838_v7, %v784_v38 }
 0x138   : > { %v679_v25 = vpop.permute.xlu1 %678  ;;  %v1115_v39 = vmul.f32 0.01, %v1099_v19  ;;  %vm1107_vm3 = vcmp.ge.f32.partialorder %v1099_v19, 0.0  ;;  %v709_v8 = vadd.f32 %v693_v33, %v1812_v11  ;;  %v809_v7 = vadd.f32 %v793_v6, %v710_v18 }
 0x139   : > { %v687_v27 = vrot.slane %v679_v25, 4 }
 0x13a   : > { %v1123_v0 = vsel %vm1107_vm3, %v1099_v19, %v1115_v39  ;;  %v808_v3 = vadd.f32 %v792_v13, %v709_v8 }
 0x13b   : > { %v1878_v26 = vpop.permute.xlu0 %981  ;;  %v695_v41 = vsel %vm409_vm0, %v679_v25, %v687_v27  ;;  %v1315_v10 = vpack.c.bf16 %v1123_v0, %v1123_v0  ;;  %v1002_v25 = vsel %vm999_vm2, %v1851_v34, %v993_v50 }
 0x13c   : > { %v878_v32 = vpop.permute.xlu1 %877  ;;  %v711_v11 = vadd.f32 %v695_v41, %v1821_v23  ;;  %v994_v61 = vrot.slane %v1878_v26, 4 }
 0x13d   : > { %v893_v4 = vrot.slane %v878_v32, 4  ;;  %v1163_v54 = vunpack.c.l.b16 %v1315_v10 }
 0x13f   : > { %v901_v62 = vsel %vm786_vm1, %v878_v32, %v893_v4  ;;  %v671_v51 = vpop.permute.xlu0 %670  ;;  %v1003_v4 = vsel %vm999_vm2, %v1878_v26, %v994_v61  ;;  %v1048_v61 = vrot.slane %v1859_v30, 3 }
 0x140   : > { %v917_v45 = vadd.f32 %v901_v62, %v803_v28  ;;  %v683_v60 = vrot.slane %v671_v51, 4  ;;  %v886_v1 = vpop.permute.xlu1 %885  ;;  %v898_v28 = vrot.slane %v1865_v15, 4 }
 0x141   : > { %v897_v21 = vrot.slane %v886_v1, 4 }
 0x142   : > { %v1016_v5 = vadd.f32 %v1000_v29, %v917_v45  ;;  %v691_v59 = vsel %vm409_vm0, %v671_v51, %v683_v60  ;;  %v1170_v60 = vrot.slane %v1163_v54, 7  ;;  %vm1186_vm0 = vcmask 1046534  }
 0x143   : > { %v905_v37 = vsel %vm786_vm1, %v886_v1, %v897_v21  ;;  %v882_v58 = vpop.permute.xlu0 %881  ;;  %v707_v40 = vadd.f32 %v691_v59, %v1803_v42 }
 0x144   : > { %v1057_v19 = vmul.f32 %v1834_v44, %v1016_v5  ;;  %v921_v47 = vadd.f32 %v905_v37, %v807_v49  ;;  %v895_v24 = vrot.slane %v882_v58, 4  ;;  %v890_v46 = vpop.permute.xlu1 %889  ;;  %v906_v49 = vsel %vm786_vm1, %v1865_v15, %v898_v28 }
 0x145   : > { %v899_v32 = vrot.slane %v890_v46, 4  ;;  %v806_v29 = vadd.f32 %v790_v55, %v707_v40  ;;  %v810_v15 = vadd.f32 %v794_v31, %v711_v11  ;;  %v922_v13 = vadd.f32 %v906_v49, %v808_v3 }
 0x146   : > { %v1098_v14 = vadd.f32 %v1842_v16, %v1057_v19  ;;  %v1020_v57 = vadd.f32 %v1004_v52, %v921_v47  ;;  %v903_v53 = vsel %vm786_vm1, %v882_v58, %v895_v24 }
 0x147   : > { %v919_v9 = vadd.f32 %v903_v53, %v805_v17  ;;  %v884_v56 = vpop.permute.xlu0 %883  ;;  %v907_v51 = vsel %vm786_vm1, %v890_v46, %v899_v32 }
 0x148   : > { %vm1106_vm5 = vcmp.ge.f32.partialorder %v1098_v14, 0.0  ;;  %v1114_v34 = vmul.f32 0.01, %v1098_v14  ;;  %v1061_v23 = vmul.f32 %v1859_v30, %v1020_v57  ;;  %v892_v39 = vpop.permute.xlu1 %891  ;;  %v896_v52 = vrot.slane %v884_v56, 4 }
 0x149   : > { %v1018_v42 = vadd.f32 %v1002_v25, %v919_v9  ;;  %v900_v63 = vrot.slane %v892_v39, 4  ;;  %v1088_v25 = vrot.slane %v1863_v12, 2 }
 0x14a   : > { %v1122_v38 = vsel %vm1106_vm5, %v1098_v14, %v1114_v34  ;;  %v1102_v27 = vadd.f32 %v1863_v12, %v1061_v23  ;;  %v904_v33 = vsel %vm786_vm1, %v884_v56, %v896_v52 }
 0x14b   : > { %v1314_v17 = vpack.c.bf16 %v1122_v38, %v1122_v38  ;;  %v1059_v62 = vmul.f32 %v1044_v2, %v1018_v42  ;;  %v986_v45 = vpop.permute.xlu0 %985  ;;  %v920_v26 = vadd.f32 %v904_v33, %v806_v29  ;;  %v908_v18 = vsel %vm786_vm1, %v892_v39, %v900_v63 }
 0x14c   : > { %v1118_v1 = vmul.f32 0.01, %v1102_v27  ;;  %v988_v0 = vpop.permute.xlu1 %987  ;;  %v996_v31 = vrot.slane %v986_v45, 4  ;;  %vm1110_vm6 = vcmp.ge.f32.partialorder %v1102_v27, 0.0  ;;  %v923_v2 = vadd.f32 %v907_v51, %v809_v7 }
 0x14d   : > { %v1162_v50 = vunpack.c.l.b16 %v1314_v17  ;;  %v1100_v55 = vadd.f32 %v1085_v48, %v1059_v62  ;;  %v997_v21 = vrot.slane %v988_v0, 4  ;;  %v1019_v6 = vadd.f32 %v1003_v4, %v920_v26 }
 0x14e   : > { %v924_v8 = vadd.f32 %v908_v18, %v810_v15  ;;  %v1005_v37 = vsel %vm999_vm2, %v986_v45, %v996_v31  ;;  %v1126_v10 = vsel %vm1110_vm6, %v1102_v27, %v1118_v1  ;;  %vm1189_vm1 = vcmask 1047559  }
 0x14f   : > { %v1172_v41 = vsel %vm1171_vm4, %v1170_v60, %v1162_v50  ;;  %vm1108_vm7 = vcmp.ge.f32.partialorder %v1100_v55, 0.0  ;;  %v1116_v5 = vmul.f32 0.01, %v1100_v55  ;;  %v990_v28 = vpop.permute.xlu0 %989  ;;  %v1060_v59 = vmul.f32 %v1045_v22, %v1019_v6 }
 0x150   : > { %v1006_v58 = vsel %vm999_vm2, %v988_v0, %v997_v21  ;;  %v998_v48 = vrot.slane %v990_v28, 4  ;;  %v1021_v47 = vadd.f32 %v1005_v37, %v922_v13  ;;  %v1318_v40 = vpack.c.bf16 %v1126_v10, %v1126_v10 }
 0x151   : > { %v1124_v19 = vsel %vm1108_vm7, %v1100_v55, %v1116_v5  ;;  %v1022_v24 = vadd.f32 %v1006_v58, %v923_v2  ;;  %v1101_v7 = vadd.f32 %v1086_v43, %v1060_v59 }
 0x152   : > { %v1316_v46 = vpack.c.bf16 %v1124_v19, %v1124_v19  ;;  %v1007_v11 = vsel %vm999_vm2, %v990_v28, %v998_v48  ;;  %v1062_v44 = vmul.f32 %v1046_v36, %v1021_v47  ;;  %v1089_v36 = vrot.slane %v1863_v12, 3 }
 0x153   : > { %v1063_v22 = vmul.f32 %v1047_v35, %v1022_v24  ;;  %v1023_v14 = vadd.f32 %v1007_v11, %v924_v8  ;;  %vm1109_vm8 = vcmp.ge.f32.partialorder %v1101_v7, 0.0  ;;  %v1117_v53 = vmul.f32 0.01, %v1101_v7 }
 0x154   : > { %v1164_v57 = vunpack.c.l.b16 %v1316_v46  ;;  %v1103_v16 = vadd.f32 %v1087_v20, %v1062_v44  ;;  %v1166_v30 = vunpack.c.l.b16 %v1318_v40 }
 0x155   : > { %v1104_v43 = vadd.f32 %v1088_v25, %v1063_v22  ;;  %v1064_v3 = vmul.f32 %v1048_v61, %v1023_v14  ;;  %v1125_v9 = vsel %vm1109_vm8, %v1101_v7, %v1117_v53 }
 0x156   : > { %v1173_v49 = vrot.slane %v1164_v57, 6  ;;  %v1317_v32 = vpack.c.bf16 %v1125_v9, %v1125_v9  ;;  %vm1111_vm10 = vcmp.ge.f32.partialorder %v1103_v16, 0.0  ;;  %v1119_v35 = vmul.f32 0.01, %v1103_v16 }
 0x157   : > { %vm1112_vm11 = vcmp.ge.f32.partialorder %v1104_v43, 0.0  ;;  %v1120_v54 = vmul.f32 0.01, %v1104_v43  ;;  %v1105_v34 = vadd.f32 %v1089_v36, %v1064_v3  ;;  %v1179_v12 = vrot.slane %v1166_v30, 4 }
 0x158   : > { %v1175_v56 = vsel %vm1174_vm9, %v1173_v49, %v1172_v41  ;;  %v1165_v23 = vunpack.c.l.b16 %v1317_v32  ;;  %v1127_v39 = vsel %vm1111_vm10, %v1103_v16, %v1119_v35 }
 0x159   : > { %v1319_v4 = vpack.c.bf16 %v1127_v39, %v1127_v39  ;;  %v1128_v42 = vsel %vm1112_vm11, %v1104_v43, %v1120_v54  ;;  %vm1113_vm13 = vcmp.ge.f32.partialorder %v1105_v34, 0.0  ;;  %v1121_v20 = vmul.f32 0.01, %v1105_v34 }
 0x15a   : > { %v1176_v52 = vrot.slane %v1165_v23, 5  ;;  %v1320_v63 = vpack.c.bf16 %v1128_v42, %v1128_v42 }
 0x15b   : > { %v1167_v38 = vunpack.c.l.b16 %v1319_v4  ;;  %v1129_v27 = vsel %vm1113_vm13, %v1105_v34, %v1121_v20 }
 0x15c   : > { %v1178_v29 = vsel %vm1177_vm12, %v1176_v52, %v1175_v56  ;;  %v1168_v15 = vunpack.c.l.b16 %v1320_v63  ;;  %v1321_v17 = vpack.c.bf16 %v1129_v27, %v1129_v27 }
 0x15d   : > { %v1181_v62 = vsel %vm1180_vm14, %v1179_v12, %v1178_v29  ;;  %v1182_v51 = vrot.slane %v1167_v38, 3 }
 0x15e   : > { %v1185_v33 = vrot.slane %v1168_v15, 2  ;;  %v1169_v45 = vunpack.c.l.b16 %v1321_v17 }
 0x15f   : > { %v1184_v60 = vsel %vm1183_vm15, %v1182_v51, %v1181_v62 }
 0x160   : > { %v1187_v1 = vsel %vm1186_vm0, %v1185_v33, %v1184_v60  ;;  %v1188_v26 = vrot.slane %v1169_v45, 1 }
 0x162   : > { %v1190_v18 = vsel %vm1189_vm1, %v1188_v26, %v1187_v1 }
 0x163   : > { %v1191_v0 = vpack.c.b16 %v1190_v18, %v1190_v18 }
 0x165   : > { %1193 = vst [vmem:[%s195_s25] sm:$0xf] %v1191_v0 }
 0x166 PF: > { %s14_s15 = sadd.s32 1, %s1363_s15  }
 0x167   : > { %p11_p4 = scmp.ge.s32.totalorder %s14_s15, 4  }
 0x169   :  { %13 = sbr.rel (!%p11_p4) target bundleno = 1 (0x1), region = 74 }

// kernel: ddualgcn_head.10
= control target key start
LH: loop header
LB: loop body
LE: loop exit
PB: predicated region body
PF: predicated region fallthrough
CT: control target
= control target key end

     0   :  { %s1396_s15 = smov 0   ;;  %s1956_s0 = inlined_call_operand.vmem [shape: bf16[2,8,4,256], index: 0, kind: input, shape index: {}]   ;;  %s1957_s1 = inlined_call_operand.vmem [shape: f32[9,8,1], index: 1, kind: input, shape index: {}]   ;;  %s1958_s2 = inlined_call_operand.vmem [shape: f32[8,1], index: 2, kind: input, shape index: {}]   ;;  %s1959_s3 = inlined_call_operand.vmem [shape: f32[8,1], index: 3, kind: input, shape index: {}]   ;;  %s1960_s4 = inlined_call_operand.vmem [shape: bf16[2,8,128], index: 4, kind: output, shape index: {}]  }
   0x1 LB: > { %s1247_s16 = sadd.s32 4294967295, %s1363_s15   ;;  %p1251_p0 = scmp.ge.s32.totalorder %s1363_s15, 1  ;;  %s1363_s15 = sphi %s1396_s15, %s14_s15  }
   0x2   : > { %p162_p1 = scmp.lt.s32.totalorder %s1363_s15, 3 }
   0x4   : > { %p163_p2 = pnand %p1251_p0, %p162_p1 }
   0x5   : > { %p187_p3 = scmp.lt.s32.totalorder (!%p163_p2), %s1247_s16, 1  ;;  %s1368_s19 = smov (!%p163_p2), 127  }
   0x6   : > { %166 = sbr.rel (%p163_p2) target bundleno = 358 (0x166), region = 36  ;;  %s1369_s20 = smov (!%p163_p2), 123  }
   0x7   : > { %s1370_s21 = smov (!%p163_p2), 122  }
   0xb   : > { %v1292_v0 = vld [vmem:[%s1957_s1 + $0x30] sm:$0xff]  ;;  %v1365_v2 = vmov 0   ;;  %v1293_v3 = vld [vmem:[%s1957_s1 + $0x38] sm:$0xff]  ;;  %v1283_v4 = vld [vmem:[%s1957_s1 + $0x28] sm:$0xff]  ;;  %s1962_s16 = smov (!%p187_p3, %s1247_s16), 1  ;;  %v220_v14 = vlaneseq  ;;  %vm409_vm0 = vcmask 1039360  }
   0xc   : > { %v1264_v1 = vld [vmem:[%s1957_s1 + $0x10] sm:$0xff]  ;;  %1356 = vset.pattern.permute.xlu1 %v1365_v2  ;;  %1355 = vset.pattern.permute.xlu0 %v1365_v2  ;;  %v1255_v5 = vld [vmem:[%s1957_s1 + $0x8] sm:$0xff]  ;;  %v1302_v6 = vld [vmem:[%s1957_s1 + $0x40] sm:$0xff]  ;;  %v1366_v12 = vmov 839922192   ;;  %s1313_s13 = sshll.u32 %s1962_s16, 5 }
   0xd   : > { %716 = vperm.xlu1 %1356, %v1292_v0   ;;  %339 = vperm.xlu0 %1355, %v1264_v1   ;;  %v1265_v7 = vld [vmem:[%s1957_s1 + $0x18] sm:$0xff]  ;;  %v212_v8 = vld [vmem:[%s1957_s1] sm:$0xff]  ;;  %v218_v13 = vunpack.c.l.s4 %v1366_v12  ;;  %v1367_v15 = vmov 1985246804   ;;  %v221_v18 = vshrl.u32 %v220_v14, 7  ;;  %s1447_s18 = scalar_lea.vmem %s1956_s0, %s1313_s13  ;;  %vm786_vm1 = vcmask 1006592  }
   0xe   : > { %v1065_v9 = vld [vmem:[%s1959_s3] sm:$0xff]  ;;  %v225_v16 = vunpack.c.l.s4 %v1367_v15  ;;  %v1339_v26 = vld [vmem:[%s1447_s18 + $0x10] sm:$0xff]   ;;  %v1338_v39 = vld [vmem:[%s1447_s18 + $0x8] sm:$0xff]   ;;  %vm999_vm2 = vcmask 998400   ;;  %vm1171_vm4 = vcmask 1041409   ;;  %vm1174_vm9 = vcmask 1042434  }
   0xf   : > { %v1274_v10 = vld [vmem:[%s1957_s1 + $0x20] sm:$0xff]  ;;  %v219_v17 = vunpack.c.0.s8 %v218_v13  ;;  %v1467_v32 = vunpack.c.l.bf16 %v1339_v26  ;;  %v1491_v44 = vunpack.c.l.bf16 %v1338_v39  ;;  %v1513_v55 = vunpack.c.h.bf16 %v1338_v39  ;;  %v1340_v63 = vld [vmem:[%s1447_s18 + $0x18] sm:$0xff]   ;;  %s1254_s22 = sshll.u32 %s1962_s16, 2 }
  0x10   : > { %v1024_v11 = vld [vmem:[%s1958_s2] sm:$0xff]  ;;  %v226_v19 = vunpack.c.0.s8 %v225_v16  ;;  %v1528_v0 = vunpack.c.h.bf16 %v1339_v26  ;;  %vm1177_vm12 = vcmask 1043459   ;;  %vm1180_vm14 = vcmask 1044484   ;;  %s195_s25 = scalar_lea.vmem %s1960_s4, %s1254_s22 }
  0x11   : > { %815 = vperm.xlu1 %1356, %v1293_v3   ;;  %602 = vperm.xlu0 %1355, %v1283_v4   ;;  %v1323_v20 = vld [vmem:[%s1447_s18] sm:$0xff]   ;;  %v1450_v21 = vsub.s32 %v219_v17, %v221_v18  ;;  %vm1183_vm15 = vcmask 1045509  }
  0x12   : > { %v1452_v22 = vsub.s32 %v226_v19, %v221_v18  ;;  %v1454_v23 = vunpack.c.l.bf16 %v1323_v20  ;;  %v1517_v59 = vunpack.c.h.bf16 %v1323_v20 }
  0x15   : > { %257 = vperm.xlu1 %1356, %v1255_v5   ;;  %929 = vperm.xlu0 %1355, %v1302_v6   ;;  %v1540_v6 = vunpack.c.l.bf16 %v1340_v63 }
  0x19   : > { %438 = vperm.xlu1 %1356, %v1265_v7   ;;  %215 = vperm.xlu0 %1355, %v212_v8  }
  0x1d   : > { %1068 = vperm.xlu1 %1356, %v1065_v9   ;;  %520 = vperm.xlu0 %1355, %v1274_v10   ;;  %v1549_v10 = vunpack.c.h.bf16 %v1340_v63 }
  0x21   : > { %1027 = vperm.xlu0 %1355, %v1024_v11  }
  0x88   : > { %v717_v24 = vpop.permute.xlu1 %716  ;;  %v340_v25 = vpop.permute.xlu0 %339 }
  0x89   : > { %v1458_v27 = vrot.slane %v717_v24, %v1450_v21  ;;  %v347_v28 = vrot.slane %v340_v25, %v1450_v21  ;;  %v1462_v29 = vrot.slane %v340_v25, %v1452_v22  ;;  %v1476_v36 = vrot.slane %v717_v24, %v1452_v22 }
  0x8b   : > { %v369_v30 = vmul.f32 %v1454_v23, %v347_v28  ;;  %v746_v31 = vmul.f32 %v1454_v23, %v1458_v27  ;;  %v373_v35 = vmul.f32 %v1467_v32, %v1462_v29  ;;  %v356_v45 = vrot.slane %v347_v28, 2 }
  0x8c   : > { %v1469_v33 = vpop.permute.xlu1 %815  ;;  %v603_v34 = vpop.permute.xlu0 %602  ;;  %v750_v49 = vmul.f32 %v1467_v32, %v1476_v36  ;;  %v357_v56 = vrot.slane %v347_v28, 3  ;;  %v355_v60 = vrot.slane %v347_v28, 1  ;;  %v358_v1 = vrot.slane %v1462_v29, 1 }
  0x8d   : > { %385 = vrot.lane.b32.xlu1 %v369_v30, %s1368_s19  ;;  %762 = vrot.lane.b32.xlu0 %v746_v31, %s1369_s20  ;;  %v371_v54 = vmul.f32 %v1491_v44, %v356_v45  ;;  %v1532_v2 = vrot.slane %v603_v34, %v1450_v21  ;;  %v1537_v4 = vrot.slane %v1469_v33, %v1450_v21  ;;  %v359_v7 = vrot.slane %v1462_v29, 2 }
  0x8e   : > { %v372_v3 = vmul.f32 %v1513_v55, %v357_v56  ;;  %v370_v5 = vmul.f32 %v1517_v59, %v355_v60  ;;  %v1544_v8 = vrot.slane %v603_v34, %v1452_v22  ;;  %v374_v9 = vmul.f32 %v1528_v0, %v358_v1 }
  0x8f   : > { %v360_v11 = vrot.slane %v1462_v29, 3  ;;  %v732_v12 = vrot.slane %v1458_v27, 1  ;;  %v634_v13 = vmul.f32 %v1491_v44, %v1532_v2  ;;  %v734_v14 = vrot.slane %v1458_v27, 3 }
  0x90   : > { %v258_v37 = vpop.permute.xlu1 %257  ;;  %v930_v38 = vpop.permute.xlu0 %929  ;;  %v375_v15 = vmul.f32 %v1540_v6, %v359_v7  ;;  %v733_v16 = vrot.slane %v1458_v27, 2  ;;  %v1560_v17 = vmul.f32 %v1517_v59, %v1537_v4  ;;  %v737_v18 = vrot.slane %v1476_v36, 3 }
  0x91   : > { %v1480_v40 = vrot.slane %v258_v37, %v1450_v21  ;;  %v1483_v41 = vrot.slane %v258_v37, %v1452_v22  ;;  %v1486_v42 = vrot.slane %v930_v38, %v1452_v22  ;;  %393 = vrot.lane.b32.xlu1 %v373_v35, %s1368_s19  ;;  %v1494_v46 = vrot.slane %v930_v38, %v1450_v21 }
  0x92   : > { %v1567_v20 = vmul.f32 %v1540_v6, %v1544_v8  ;;  %v376_v24 = vmul.f32 %v1549_v10, %v360_v11  ;;  %v747_v25 = vmul.f32 %v1517_v59, %v732_v12  ;;  %v1286_v26 = vrot.slane %v634_v13, 10 }
  0x93   : > { %v963_v43 = vmul.f32 %v1467_v32, %v1486_v42  ;;  %v959_v58 = vmul.f32 %v1454_v23, %v1494_v46  ;;  %v945_v19 = vrot.slane %v1494_v46, 1  ;;  %v749_v27 = vmul.f32 %v1513_v55, %v734_v14 }
  0x94   : > { %v439_v47 = vpop.permute.xlu1 %438  ;;  %v216_v48 = vpop.permute.xlu0 %215  ;;  %v748_v28 = vmul.f32 %v1491_v44, %v733_v16  ;;  %v1295_v29 = vrot.slane %v1560_v17, 9  ;;  %v753_v30 = vmul.f32 %v1549_v10, %v737_v18  ;;  %v273_v31 = vrot.slane %v1480_v40, 7 }
  0x95   : > { %v1499_v50 = vrot.slane %v439_v47, %v1450_v21  ;;  %v1502_v51 = vrot.slane %v439_v47, %v1452_v22  ;;  %v1505_v52 = vrot.slane %v216_v48, %v1450_v21  ;;  %v1508_v53 = vrot.slane %v216_v48, %v1452_v22  ;;  %983 = vrot.lane.b32.xlu0 %v963_v43, %s1370_s21 }
  0x96   : > { %770 = vrot.lane.b32.xlu1 %v750_v49, %s1369_s20  ;;  %v960_v34 = vmul.f32 %v1517_v59, %v945_v19  ;;  %v1290_v35 = vrot.slane %v1567_v20, 10  ;;  %v619_v37 = vrot.slane %v1532_v2, 7  ;;  %v735_v39 = vrot.slane %v1476_v36, 1 }
  0x97   : > { %v454_v38 = vrot.slane %v1499_v50, 6  ;;  %v618_v43 = vrot.slane %v1532_v2, 6  ;;  %v245_v45 = vmul.f32 %v1454_v23, %v1505_v52  ;;  %v287_v47 = vmul.f32 %v1454_v23, %v273_v31 }
  0x98   : > { %v521_v57 = vpop.permute.xlu0 %520  ;;  %v249_v49 = vmul.f32 %v1467_v32, %v1508_v53  ;;  %v457_v56 = vrot.slane %v1502_v51, 6  ;;  %v274_v60 = vrot.slane %v1480_v40, 1  ;;  %v1599_v63 = vmul.f32 %v1491_v44, %v1499_v50 }
  0x99   : > { %v1520_v61 = vrot.slane %v521_v57, %v1450_v21  ;;  %v1523_v62 = vrot.slane %v521_v57, %v1452_v22  ;;  %389 = vrot.lane.b32.xlu0 %v371_v54, %s1368_s19  ;;  %v1589_v48 = vmul.f32 %v1454_v23, %v454_v38  ;;  %v276_v54 = vrot.slane %v1483_v41, 7 }
  0x9a   : > { %975 = vrot.lane.b32.xlu1 %v959_v58, %s1370_s21  ;;  %v1256_v57 = vrot.slane %v287_v47, 9  ;;  %v232_v58 = vrot.slane %v1505_v52, 2  ;;  %v736_v1 = vrot.slane %v1476_v36, 2  ;;  %v233_v7 = vrot.slane %v1505_v52, 3 }
  0x9b   : > { %v289_v13 = vmul.f32 %v1491_v44, %v274_v60  ;;  %v633_v14 = vmul.f32 %v1517_v59, %v619_v37  ;;  %v275_v17 = vrot.slane %v1480_v40, 2  ;;  %v456_v19 = vrot.slane %v1499_v50, 1 }
  0x9c   : > { %v1610_v11 = vadd.f32 %v1256_v57, %v245_v45  ;;  %v247_v12 = vmul.f32 %v1491_v44, %v232_v58  ;;  %v248_v16 = vmul.f32 %v1513_v55, %v233_v7  ;;  %v455_v31 = vrot.slane %v1499_v50, 7 }
  0x9d   : > { %391 = vrot.lane.b32.xlu0 %v372_v3, %s1368_s19  ;;  %v291_v3 = vmul.f32 %v1467_v32, %v276_v54  ;;  %v1258_v18 = vrot.slane %v289_v13, 9  ;;  %v234_v37 = vrot.slane %v1508_v53, 1  ;;  %v1631_v45 = vmul.f32 %v1513_v55, %v456_v19 }
  0x9e   : > { %387 = vrot.lane.b32.xlu1 %v370_v5, %s1368_s19  ;;  %v1605_v5 = vmul.f32 %v1467_v32, %v457_v56  ;;  %v292_v50 = vmul.f32 %v1528_v0, %v1483_v41  ;;  %v751_v54 = vmul.f32 %v1528_v0, %v735_v39  ;;  %v458_v56 = vrot.slane %v1502_v51, 7 }
  0x9f   : > { %v1628_v38 = vadd.f32 %v1258_v18, %v247_v12  ;;  %v235_v57 = vrot.slane %v1508_v53, 2  ;;  %v622_v58 = vrot.slane %v1544_v8, 7  ;;  %v277_v7 = vrot.slane %v1483_v41, 1 }
  0xa0   : > { %v1652_v12 = vmul.f32 %v1528_v0, %v458_v56  ;;  %v1657_v13 = vmul.f32 %v1540_v6, %v1502_v51  ;;  %v459_v18 = vrot.slane %v1502_v51, 1  ;;  %v632_v19 = vmul.f32 %v1454_v23, %v618_v43 }
  0xa1   : > { %395 = vrot.lane.b32.xlu0 %v374_v9, %s1368_s19  ;;  %v621_v9 = vrot.slane %v1544_v8, 6  ;;  %v251_v39 = vmul.f32 %v1540_v6, %v235_v57  ;;  %v537_v43 = vrot.slane %v1520_v61, 6  ;;  %v539_v20 = vrot.slane %v1523_v62, 5 }
  0xa2   : > { %397 = vrot.lane.b32.xlu1 %v375_v15, %s1368_s19  ;;  %v1260_v15 = vrot.slane %v291_v3, 9  ;;  %v1261_v3 = vrot.slane %v292_v50, 9 }
  0xa3   : > { %v1696_v56 = vmul.f32 %v1467_v32, %v539_v20  ;;  %v833_v20 = vrot.slane %v1537_v4, 2 }
  0xa5   : > { %399 = vrot.lane.b32.xlu0 %v376_v24, %s1368_s19  ;;  %v231_v24 = vrot.slane %v1505_v52, 1 }
  0xa6   : > { %764 = vrot.lane.b32.xlu1 %v747_v25, %s1369_s20  ;;  %v288_v25 = vmul.f32 %v1517_v59, %v1480_v40 }
  0xa7   : > { %v246_v52 = vmul.f32 %v1517_v59, %v231_v24 }
  0xa8   : > { %v1257_v40 = vrot.slane %v288_v25, 9  ;;  %v538_v25 = vrot.slane %v1520_v61, 7 }
  0xa9   : > { %668 = vrot.lane.b32.xlu0 %v1286_v26, %s1368_s19  ;;  %v1622_v26 = vadd.f32 %v1260_v15, %v249_v49  ;;  %v250_v49 = vmul.f32 %v1528_v0, %v234_v37 }
  0xaa   : > { %768 = vrot.lane.b32.xlu1 %v749_v27, %s1369_s20  ;;  %v290_v27 = vmul.f32 %v1513_v55, %v275_v17  ;;  %v278_v17 = vrot.slane %v1483_v41, 2  ;;  %v541_v41 = vrot.slane %v1523_v62, 7  ;;  %v1678_v51 = vmul.f32 %v1491_v44, %v538_v25 }
  0xab   : > { %v1660_v15 = vadd.f32 %v1261_v3, %v250_v49  ;;  %v1690_v49 = vmul.f32 %v1517_v59, %v537_v43  ;;  %v1704_v3 = vmul.f32 %v1549_v10, %v1523_v62 }
  0xac   : > { %v1259_v47 = vrot.slane %v290_v27, 9  ;;  %v294_v27 = vmul.f32 %v1549_v10, %v278_v17  ;;  %v623_v17 = vrot.slane %v1544_v8, 1  ;;  %v947_v8 = vrot.slane %v1494_v46, 3 }
  0xad   : > { %766 = vrot.lane.b32.xlu0 %v748_v28, %s1369_s20  ;;  %v1635_v28 = vmul.f32 %v1517_v59, %v455_v31  ;;  %v1673_v31 = vmul.f32 %v1549_v10, %v459_v18  ;;  %v1709_v59 = vmul.f32 %v1513_v55, %v1520_v61  ;;  %v831_v18 = vrot.slane %v1537_v4, 7 }
  0xae   : > { %977 = vrot.lane.b32.xlu1 %v960_v34, %s1370_s21  ;;  %v1641_v34 = vadd.f32 %v1257_v40, %v246_v52  ;;  %v1647_v60 = vadd.f32 %v1259_v47, %v248_v16  ;;  %v293_v16 = vmul.f32 %v1540_v6, %v277_v7  ;;  %v1263_v52 = vrot.slane %v294_v27, 9 }
  0xaf   : > { %v1687_v40 = vmul.f32 %v1540_v6, %v541_v41  ;;  %v1284_v47 = vrot.slane %v632_v19, 10  ;;  %v830_v7 = vrot.slane %v1469_v33, %v1452_v22  ;;  %v832_v41 = vrot.slane %v1537_v4, 1 }
  0xb0   : > { %v948_v4 = vrot.slane %v1486_v42, 1 }
  0xb1   : > { %879 = vrot.lane.b32.xlu0 %v1295_v29, %s1369_s20  ;;  %v236_v29 = vrot.slane %v1508_v53, 3  ;;  %v1262_v53 = vrot.slane %v293_v16, 9  ;;  %v637_v16 = vmul.f32 %v1528_v0, %v622_v58  ;;  %v850_v36 = vmul.f32 %v1528_v0, %v830_v7 }
  0xb2   : > { %776 = vrot.lane.b32.xlu1 %v753_v30, %s1369_s20  ;;  %v1285_v30 = vrot.slane %v633_v14, 10  ;;  %v536_v14 = vrot.slane %v1520_v61, 5  ;;  %v834_v25 = vrot.slane %v830_v7, 7 }
  0xb3   : > { %v252_v24 = vmul.f32 %v1549_v10, %v236_v29  ;;  %v1684_v37 = vadd.f32 %v1262_v53, %v251_v39  ;;  %v946_v39 = vrot.slane %v1494_v46, 2  ;;  %v1289_v61 = vrot.slane %v637_v16, 10 }
  0xb4   : > { %v1693_v50 = vmul.f32 %v1454_v23, %v536_v14  ;;  %v1299_v58 = vrot.slane %v850_v36, 9  ;;  %v962_v53 = vmul.f32 %v1513_v55, %v947_v8  ;;  %v849_v14 = vmul.f32 %v1467_v32, %v834_v25  ;;  %v1761_v36 = vpop.permute.xlu1 %1068 }
  0xb5   : > { %676 = vrot.lane.b32.xlu0 %v1290_v35, %s1368_s19  ;;  %v636_v35 = vmul.f32 %v1467_v32, %v621_v9  ;;  %v1699_v57 = vadd.f32 %v1263_v52, %v252_v24  ;;  %v540_v9 = vrot.slane %v1523_v62, 6  ;;  %v961_v33 = vmul.f32 %v1491_v44, %v946_v39 }
  0xb6   : > { %666 = vrot.lane.b32.xlu1 %v1285_v30, %s1368_s19  ;;  %v620_v30 = vrot.slane %v1532_v2, 1  ;;  %v845_v24 = vmul.f32 %v1454_v23, %v831_v18  ;;  %v835_v46 = vrot.slane %v830_v7, 1  ;;  %v847_v2 = vmul.f32 %v1491_v44, %v832_v41 }
  0xb7   : > { %v1718_v29 = vmul.f32 %v1528_v0, %v540_v9  ;;  %v1288_v62 = vrot.slane %v636_v35, 10  ;;  %v1298_v35 = vrot.slane %v849_v14, 9  ;;  %v848_v32 = vmul.f32 %v1513_v55, %v833_v20 }
  0xb8   : > { %v635_v27 = vmul.f32 %v1513_v55, %v620_v30  ;;  %v1294_v43 = vrot.slane %v845_v24, 9  ;;  %v851_v52 = vmul.f32 %v1540_v6, %v835_v46  ;;  %v1296_v9 = vrot.slane %v847_v2, 9 }
  0xb9   : > { %772 = vrot.lane.b32.xlu0 %v751_v54, %s1369_s20  ;;  %v752_v54 = vmul.f32 %v1540_v6, %v736_v1  ;;  %v639_v1 = vmul.f32 %v1549_v10, %v623_v17  ;;  %v1297_v44 = vrot.slane %v848_v32, 9  ;;  %v964_v16 = vmul.f32 %v1528_v0, %v948_v4 }
  0xba   : > { %664 = vrot.lane.b32.xlu1 %v1284_v47, %s1368_s19  ;;  %v1287_v23 = vrot.slane %v635_v27, 10  ;;  %v836_v47 = vrot.slane %v830_v7, 2  ;;  %v949_v7 = vrot.slane %v1486_v42, 2  ;;  %v950_v55 = vrot.slane %v1486_v42, 3 }
  0xbb   : > { %v1291_v19 = vrot.slane %v639_v1, 10  ;;  %v1266_v42 = vrot.slane %v1589_v48, 10  ;;  %v1270_v25 = vrot.slane %v1605_v5, 10  ;;  %v1268_v5 = vrot.slane %v1599_v63, 10 }
  0xbc   : > { %v852_v39 = vmul.f32 %v1549_v10, %v836_v47  ;;  %v965_v17 = vmul.f32 %v1540_v6, %v949_v7  ;;  %v1277_v32 = vrot.slane %v1678_v51, 11  ;;  %v1267_v63 = vrot.slane %v1635_v28, 10 }
  0xbd   : > { %774 = vrot.lane.b32.xlu0 %v752_v54, %s1369_s20  ;;  %v1300_v54 = vrot.slane %v851_v52, 9  ;;  %v1278_v51 = vrot.slane %v1709_v59, 11 }
  0xbe   : > { %672 = vrot.lane.b32.xlu1 %v1288_v62, %s1368_s19  ;;  %v1301_v62 = vrot.slane %v852_v39, 9 }
  0xc1   : > { %979 = vrot.lane.b32.xlu0 %v961_v33, %s1370_s21  ;;  %v966_v33 = vmul.f32 %v1549_v10, %v950_v55 }
  0xc2   : > { %674 = vrot.lane.b32.xlu1 %v1289_v61, %s1368_s19  ;;  %v1763_v61 = vpop.permute.xlu0 %1027 }
  0xc5   : > { %887 = vrot.lane.b32.xlu0 %v1299_v58, %s1369_s20 }
  0xc6   : > { %678 = vrot.lane.b32.xlu1 %v1291_v19, %s1368_s19  ;;  %v1275_v19 = vrot.slane %v1693_v50, 11 }
  0xc9   : > { %981 = vrot.lane.b32.xlu0 %v962_v53, %s1370_s21 }
  0xca   : > { %877 = vrot.lane.b32.xlu1 %v1294_v43, %s1369_s20  ;;  %v1279_v43 = vrot.slane %v1696_v56, 11 }
  0xcd   : > { %670 = vrot.lane.b32.xlu0 %v1287_v23, %s1368_s19 }
  0xce   : > { %885 = vrot.lane.b32.xlu1 %v1298_v35, %s1369_s20 }
  0xd1   : > { %881 = vrot.lane.b32.xlu0 %v1296_v9, %s1369_s20 }
  0xd2   : > { %889 = vrot.lane.b32.xlu1 %v1300_v54, %s1369_s20  ;;  %v1269_v54 = vrot.slane %v1631_v45, 10 }
  0xd5   : > { %883 = vrot.lane.b32.xlu0 %v1297_v44, %s1369_s20 }
  0xd6   : > { %891 = vrot.lane.b32.xlu1 %v1301_v62, %s1369_s20 }
  0xd9   : > { %985 = vrot.lane.b32.xlu0 %v964_v16, %s1370_s21 }
  0xda   : > { %987 = vrot.lane.b32.xlu1 %v965_v17, %s1370_s21 }
  0xdd   : > { %989 = vrot.lane.b32.xlu0 %v966_v33, %s1370_s21 }
  0xff   : > { %v386_v1 = vpop.permute.xlu1 %385  ;;  %v1768_v58 = vpop.permute.xlu0 %762 }
 0x100   : > { %v401_v18 = vrot.slane %v386_v1, 4 }
 0x102   : > { %v410_v0 = vsel %vm409_vm0, %v386_v1, %v401_v18  ;;  %v1271_v1 = vrot.slane %v1652_v12, 10 }
 0x103   : > { %v426_v6 = vadd.f32 %v410_v0, %v1610_v11  ;;  %v394_v8 = vpop.permute.xlu1 %393 }
 0x104   : > { %v405_v30 = vrot.slane %v394_v8, 4 }
 0x105   : > { %v508_v10 = vadd.f32 %v1266_v42, %v426_v6 }
 0x106   : > { %v414_v24 = vsel %vm409_vm0, %v394_v8, %v405_v30 }
 0x107   : > { %v430_v53 = vadd.f32 %v414_v24, %v1622_v26  ;;  %v1774_v27 = vpop.permute.xlu0 %983  ;;  %v1776_v41 = vadd.f32 %v1275_v19, %v508_v10  ;;  %v1280_v19 = vrot.slane %v1718_v29, 11  ;;  %v1273_v24 = vrot.slane %v1673_v31, 10 }
 0x108   : > { %v1778_v48 = vpop.permute.xlu1 %770 }
 0x109   : > { %v512_v11 = vadd.f32 %v1270_v25, %v430_v53 }
 0x10b   : > { %v390_v14 = vpop.permute.xlu0 %389  ;;  %v1781_v46 = vadd.f32 %v1279_v43, %v512_v11 }
 0x10c   : > { %v403_v23 = vrot.slane %v390_v14, 4  ;;  %v1783_v50 = vpop.permute.xlu1 %975 }
 0x10e   : > { %v412_v2 = vsel %vm409_vm0, %v390_v14, %v403_v23  ;;  %v1282_v14 = vrot.slane %v1704_v3, 11 }
 0x10f   : > { %v428_v26 = vadd.f32 %v412_v2, %v1628_v38  ;;  %v392_v20 = vpop.permute.xlu0 %391 }
 0x110   : > { %v404_v35 = vrot.slane %v392_v20, 4  ;;  %v388_v52 = vpop.permute.xlu1 %387 }
 0x111   : > { %v510_v47 = vadd.f32 %v1268_v5, %v428_v26  ;;  %v402_v9 = vrot.slane %v388_v52, 4 }
 0x112   : > { %v413_v56 = vsel %vm409_vm0, %v392_v20, %v404_v35 }
 0x113   : > { %v429_v39 = vadd.f32 %v413_v56, %v1647_v60  ;;  %v411_v44 = vsel %vm409_vm0, %v388_v52, %v402_v9  ;;  %v396_v4 = vpop.permute.xlu0 %395  ;;  %v1793_v62 = vadd.f32 %v1277_v32, %v510_v47  ;;  %v1276_v60 = vrot.slane %v1690_v49, 11 }
 0x114   : > { %v427_v38 = vadd.f32 %v411_v44, %v1641_v34  ;;  %v406_v7 = vrot.slane %v396_v4, 4  ;;  %v398_v16 = vpop.permute.xlu1 %397  ;;  %v1272_v34 = vrot.slane %v1657_v13, 10  ;;  %v778_v32 = vrot.slane %v1768_v58, 4 }
 0x115   : > { %v511_v55 = vadd.f32 %v1269_v54, %v429_v39  ;;  %v407_v17 = vrot.slane %v398_v16, 4  ;;  %v1834_v44 = vrot.slane %v1763_v61, %v1450_v21 }
 0x116   : > { %v509_v33 = vadd.f32 %v1267_v63, %v427_v38  ;;  %v415_v45 = vsel %vm409_vm0, %v396_v4, %v406_v7 }
 0x117   : > { %v431_v18 = vadd.f32 %v415_v45, %v1660_v15  ;;  %v416_v0 = vsel %vm409_vm0, %v398_v16, %v407_v17  ;;  %v400_v28 = vpop.permute.xlu0 %399  ;;  %v1803_v42 = vadd.f32 %v1278_v51, %v511_v55  ;;  %v1281_v15 = vrot.slane %v1687_v40, 11 }
 0x118   : > { %v432_v6 = vadd.f32 %v416_v0, %v1684_v37  ;;  %v408_v8 = vrot.slane %v400_v28, 4  ;;  %v765_v59 = vpop.permute.xlu1 %764  ;;  %v591_v30 = vadd.f32 %v1276_v60, %v509_v33  ;;  %v1842_v16 = vrot.slane %v1761_v36, %v1450_v21 }
 0x119   : > { %v513_v10 = vadd.f32 %v1271_v1, %v431_v18  ;;  %v779_v26 = vrot.slane %v765_v59, 4  ;;  %v787_v33 = vsel %vm786_vm1, %v1768_v58, %v778_v32  ;;  %v782_v45 = vrot.slane %v1778_v48, 4 }
 0x11a   : > { %v514_v49 = vadd.f32 %v1272_v34, %v432_v6  ;;  %v417_v12 = vsel %vm409_vm0, %v400_v28, %v408_v8  ;;  %v1043_v18 = vrot.slane %v1834_v44, 1  ;;  %v1084_v6 = vrot.slane %v1842_v16, 1 }
 0x11b   : > { %v433_v25 = vadd.f32 %v417_v12, %v1699_v57  ;;  %v669_v53 = vpop.permute.xlu0 %668  ;;  %v1812_v11 = vadd.f32 %v1280_v19, %v513_v10  ;;  %v788_v56 = vsel %vm786_vm1, %v765_v59, %v779_v26  ;;  %v791_v58 = vsel %vm786_vm1, %v1778_v48, %v782_v45 }
 0x11c   : > { %v1814_v13 = vpop.permute.xlu1 %768  ;;  %v1816_v37 = vadd.f32 %v1281_v15, %v514_v49  ;;  %v682_v10 = vrot.slane %v669_v53, 4  ;;  %v1863_v12 = vrot.slane %v1761_v36, %v1452_v22  ;;  %v1085_v48 = vrot.slane %v1842_v16, 2 }
 0x11d   : > { %v515_v43 = vadd.f32 %v1273_v24, %v433_v25  ;;  %v995_v24 = vrot.slane %v1774_v27, 4 }
 0x11f   : > { %v1819_v29 = vpop.permute.xlu0 %766  ;;  %v1821_v23 = vadd.f32 %v1282_v14, %v515_v43  ;;  %v1086_v43 = vrot.slane %v1842_v16, 3  ;;  %v690_v14 = vsel %vm409_vm0, %v669_v53, %v682_v10 }
 0x120   : > { %v978_v2 = vpop.permute.xlu1 %977 }
 0x121   : > { %v992_v54 = vrot.slane %v978_v2, 4 }
 0x123   : > { %v880_v40 = vpop.permute.xlu0 %879  ;;  %v1001_v60 = vsel %vm999_vm2, %v978_v2, %v992_v54  ;;  %v1044_v2 = vrot.slane %v1834_v44, 2 }
 0x124   : > { %v1823_v5 = vpop.permute.xlu1 %776  ;;  %v894_v35 = vrot.slane %v880_v40, 4 }
 0x126   : > { %v902_v63 = vsel %vm786_vm1, %v880_v40, %v894_v35  ;;  %v991_v40 = vrot.slane %v1783_v50, 4 }
 0x127   : > { %v1825_v31 = vpop.permute.xlu0 %676 }
 0x128   : > { %v667_v57 = vpop.permute.xlu1 %666 }
 0x129   : > { %v681_v20 = vrot.slane %v667_v57, 4 }
 0x12b   : > { %v689_v52 = vsel %vm409_vm0, %v667_v57, %v681_v20  ;;  %v1828_v47 = vpop.permute.xlu0 %772  ;;  %v781_v57 = vrot.slane %v1814_v13, 4  ;;  %v1087_v20 = vrot.slane %v1863_v12, 1 }
 0x12c   : > { %v705_v3 = vadd.f32 %v689_v52, %v591_v30  ;;  %v665_v9 = vpop.permute.xlu1 %664  ;;  %v1859_v30 = vrot.slane %v1763_v61, %v1452_v22  ;;  %v686_v61 = vrot.slane %v1825_v31, 4  ;;  %v1045_v22 = vrot.slane %v1834_v44, 3 }
 0x12d   : > { %v680_v39 = vrot.slane %v665_v9, 4  ;;  %v1004_v52 = vsel %vm999_vm2, %v1774_v27, %v995_v24 }
 0x12e   : > { %v804_v4 = vadd.f32 %v788_v56, %v705_v3  ;;  %v1046_v36 = vrot.slane %v1859_v30, 1  ;;  %v1047_v35 = vrot.slane %v1859_v30, 2  ;;  %v785_v3 = vrot.slane %v1823_v5, 4 }
 0x12f   : > { %v688_v38 = vsel %vm409_vm0, %v665_v9, %v680_v39  ;;  %v1838_v7 = vpop.permute.xlu0 %774  ;;  %v706_v56 = vadd.f32 %v690_v14, %v1793_v62  ;;  %v694_v54 = vsel %vm409_vm0, %v1825_v31, %v686_v61 }
 0x130   : > { %v918_v55 = vadd.f32 %v902_v63, %v804_v4  ;;  %v704_v17 = vadd.f32 %v688_v38, %v1776_v41  ;;  %v673_v51 = vpop.permute.xlu1 %672  ;;  %v783_v63 = vrot.slane %v1828_v47, 4  ;;  %v784_v38 = vrot.slane %v1838_v7, 4 }
 0x131   : > { %v684_v1 = vrot.slane %v673_v51, 4  ;;  %v794_v31 = vsel %vm786_vm1, %v1823_v5, %v785_v3 }
 0x132   : > { %v1017_v0 = vadd.f32 %v1001_v60, %v918_v55  ;;  %v803_v28 = vadd.f32 %v787_v33, %v704_v17  ;;  %v790_v55 = vsel %vm786_vm1, %v1814_v13, %v781_v57  ;;  %v792_v13 = vsel %vm786_vm1, %v1828_v47, %v783_v63 }
 0x133   : > { %v692_v21 = vsel %vm409_vm0, %v673_v51, %v684_v1  ;;  %v1851_v34 = vpop.permute.xlu0 %979 }
 0x134   : > { %v1058_v41 = vmul.f32 %v1043_v18, %v1017_v0  ;;  %v708_v8 = vadd.f32 %v692_v21, %v1781_v46  ;;  %v675_v59 = vpop.permute.xlu1 %674  ;;  %v780_v46 = vrot.slane %v1819_v29, 4  ;;  %v710_v18 = vadd.f32 %v694_v54, %v1816_v37 }
 0x135   : > { %v685_v9 = vrot.slane %v675_v59, 4 }
 0x136   : > { %v1099_v19 = vadd.f32 %v1084_v6, %v1058_v41  ;;  %v807_v49 = vadd.f32 %v791_v58, %v708_v8  ;;  %v789_v53 = vsel %vm786_vm1, %v1819_v29, %v780_v46  ;;  %v1000_v29 = vsel %vm999_vm2, %v1783_v50, %v991_v40 }
 0x137   : > { %v1865_v15 = vpop.permute.xlu0 %887  ;;  %v805_v17 = vadd.f32 %v789_v53, %v706_v56  ;;  %v693_v33 = vsel %vm409_vm0, %v675_v59, %v685_v9  ;;  %v993_v50 = vrot.slane %v1851_v34, 4  ;;  %v793_v6 = vsel %vm786_vm1, %v1838_v7, %v784_v38 }
 0x138   : > { %v679_v25 = vpop.permute.xlu1 %678  ;;  %v1115_v39 = vmul.f32 0.01, %v1099_v19  ;;  %vm1107_vm3 = vcmp.ge.f32.partialorder %v1099_v19, 0.0  ;;  %v709_v8 = vadd.f32 %v693_v33, %v1812_v11  ;;  %v809_v7 = vadd.f32 %v793_v6, %v710_v18 }
 0x139   : > { %v687_v27 = vrot.slane %v679_v25, 4 }
 0x13a   : > { %v1123_v0 = vsel %vm1107_vm3, %v1099_v19, %v1115_v39  ;;  %v808_v3 = vadd.f32 %v792_v13, %v709_v8 }
 0x13b   : > { %v1878_v26 = vpop.permute.xlu0 %981  ;;  %v695_v41 = vsel %vm409_vm0, %v679_v25, %v687_v27  ;;  %v1315_v10 = vpack.c.bf16 %v1123_v0, %v1123_v0  ;;  %v1002_v25 = vsel %vm999_vm2, %v1851_v34, %v993_v50 }
 0x13c   : > { %v878_v32 = vpop.permute.xlu1 %877  ;;  %v711_v11 = vadd.f32 %v695_v41, %v1821_v23  ;;  %v994_v61 = vrot.slane %v1878_v26, 4 }
 0x13d   : > { %v893_v4 = vrot.slane %v878_v32, 4  ;;  %v1163_v54 = vunpack.c.l.b16 %v1315_v10 }
 0x13f   : > { %v901_v62 = vsel %vm786_vm1, %v878_v32, %v893_v4  ;;  %v671_v51 = vpop.permute.xlu0 %670  ;;  %v1003_v4 = vsel %vm999_vm2, %v1878_v26, %v994_v61  ;;  %v1048_v61 = vrot.slane %v1859_v30, 3 }
 0x140   : > { %v917_v45 = vadd.f32 %v901_v62, %v803_v28  ;;  %v683_v60 = vrot.slane %v671_v51, 4  ;;  %v886_v1 = vpop.permute.xlu1 %885  ;;  %v898_v28 = vrot.slane %v1865_v15, 4 }
 0x141   : > { %v897_v21 = vrot.slane %v886_v1, 4 }
 0x142   : > { %v1016_v5 = vadd.f32 %v1000_v29, %v917_v45  ;;  %v691_v59 = vsel %vm409_vm0, %v671_v51, %v683_v60  ;;  %v1170_v60 = vrot.slane %v1163_v54, 7  ;;  %vm1186_vm0 = vcmask 1046534  }
 0x143   : > { %v905_v37 = vsel %vm786_vm1, %v886_v1, %v897_v21  ;;  %v882_v58 = vpop.permute.xlu0 %881  ;;  %v707_v40 = vadd.f32 %v691_v59, %v1803_v42 }
 0x144   : > { %v1057_v19 = vmul.f32 %v1834_v44, %v1016_v5  ;;  %v921_v47 = vadd.f32 %v905_v37, %v807_v49  ;;  %v895_v24 = vrot.slane %v882_v58, 4  ;;  %v890_v46 = vpop.permute.xlu1 %889  ;;  %v906_v49 = vsel %vm786_vm1, %v1865_v15, %v898_v28 }
 0x145   : > { %v899_v32 = vrot.slane %v890_v46, 4  ;;  %v806_v29 = vadd.f32 %v790_v55, %v707_v40  ;;  %v810_v15 = vadd.f32 %v794_v31, %v711_v11  ;;  %v922_v13 = vadd.f32 %v906_v49, %v808_v3 }
 0x146   : > { %v1098_v14 = vadd.f32 %v1842_v16, %v1057_v19  ;;  %v1020_v57 = vadd.f32 %v1004_v52, %v921_v47  ;;  %v903_v53 = vsel %vm786_vm1, %v882_v58, %v895_v24 }
 0x147   : > { %v919_v9 = vadd.f32 %v903_v53, %v805_v17  ;;  %v884_v56 = vpop.permute.xlu0 %883  ;;  %v907_v51 = vsel %vm786_vm1, %v890_v46, %v899_v32 }
 0x148   : > { %vm1106_vm5 = vcmp.ge.f32.partialorder %v1098_v14, 0.0  ;;  %v1114_v34 = vmul.f32 0.01, %v1098_v14  ;;  %v1061_v23 = vmul.f32 %v1859_v30, %v1020_v57  ;;  %v892_v39 = vpop.permute.xlu1 %891  ;;  %v896_v52 = vrot.slane %v884_v56, 4 }
 0x149   : > { %v1018_v42 = vadd.f32 %v1002_v25, %v919_v9  ;;  %v900_v63 = vrot.slane %v892_v39, 4  ;;  %v1088_v25 = vrot.slane %v1863_v12, 2 }
 0x14a   : > { %v1122_v38 = vsel %vm1106_vm5, %v1098_v14, %v1114_v34  ;;  %v1102_v27 = vadd.f32 %v1863_v12, %v1061_v23  ;;  %v904_v33 = vsel %vm786_vm1, %v884_v56, %v896_v52 }
 0x14b   : > { %v1314_v17 = vpack.c.bf16 %v1122_v38, %v1122_v38  ;;  %v1059_v62 = vmul.f32 %v1044_v2, %v1018_v42  ;;  %v986_v45 = vpop.permute.xlu0 %985  ;;  %v920_v26 = vadd.f32 %v904_v33, %v806_v29  ;;  %v908_v18 = vsel %vm786_vm1, %v892_v39, %v900_v63 }
 0x14c   : > { %v1118_v1 = vmul.f32 0.01, %v1102_v27  ;;  %v988_v0 = vpop.permute.xlu1 %987  ;;  %v996_v31 = vrot.slane %v986_v45, 4  ;;  %vm1110_vm6 = vcmp.ge.f32.partialorder %v1102_v27, 0.0  ;;  %v923_v2 = vadd.f32 %v907_v51, %v809_v7 }
 0x14d   : > { %v1162_v50 = vunpack.c.l.b16 %v1314_v17  ;;  %v1100_v55 = vadd.f32 %v1085_v48, %v1059_v62  ;;  %v997_v21 = vrot.slane %v988_v0, 4  ;;  %v1019_v6 = vadd.f32 %v1003_v4, %v920_v26 }
 0x14e   : > { %v924_v8 = vadd.f32 %v908_v18, %v810_v15  ;;  %v1005_v37 = vsel %vm999_vm2, %v986_v45, %v996_v31  ;;  %v1126_v10 = vsel %vm1110_vm6, %v1102_v27, %v1118_v1  ;;  %vm1189_vm1 = vcmask 1047559  }
 0x14f   : > { %v1172_v41 = vsel %vm1171_vm4, %v1170_v60, %v1162_v50  ;;  %vm1108_vm7 = vcmp.ge.f32.partialorder %v1100_v55, 0.0  ;;  %v1116_v5 = vmul.f32 0.01, %v1100_v55  ;;  %v990_v28 = vpop.permute.xlu0 %989  ;;  %v1060_v59 = vmul.f32 %v1045_v22, %v1019_v6 }
 0x150   : > { %v1006_v58 = vsel %vm999_vm2, %v988_v0, %v997_v21  ;;  %v998_v48 = vrot.slane %v990_v28, 4  ;;  %v1021_v47 = vadd.f32 %v1005_v37, %v922_v13  ;;  %v1318_v40 = vpack.c.bf16 %v1126_v10, %v1126_v10 }
 0x151   : > { %v1124_v19 = vsel %vm1108_vm7, %v1100_v55, %v1116_v5  ;;  %v1022_v24 = vadd.f32 %v1006_v58, %v923_v2  ;;  %v1101_v7 = vadd.f32 %v1086_v43, %v1060_v59 }
 0x152   : > { %v1316_v46 = vpack.c.bf16 %v1124_v19, %v1124_v19  ;;  %v1007_v11 = vsel %vm999_vm2, %v990_v28, %v998_v48  ;;  %v1062_v44 = vmul.f32 %v1046_v36, %v1021_v47  ;;  %v1089_v36 = vrot.slane %v1863_v12, 3 }
 0x153   : > { %v1063_v22 = vmul.f32 %v1047_v35, %v1022_v24  ;;  %v1023_v14 = vadd.f32 %v1007_v11, %v924_v8  ;;  %vm1109_vm8 = vcmp.ge.f32.partialorder %v1101_v7, 0.0  ;;  %v1117_v53 = vmul.f32 0.01, %v1101_v7 }
 0x154   : > { %v1164_v57 = vunpack.c.l.b16 %v1316_v46  ;;  %v1103_v16 = vadd.f32 %v1087_v20, %v1062_v44  ;;  %v1166_v30 = vunpack.c.l.b16 %v1318_v40 }
 0x155   : > { %v1104_v43 = vadd.f32 %v1088_v25, %v1063_v22  ;;  %v1064_v3 = vmul.f32 %v1048_v61, %v1023_v14  ;;  %v1125_v9 = vsel %vm1109_vm8, %v1101_v7, %v1117_v53 }
 0x156   : > { %v1173_v49 = vrot.slane %v1164_v57, 6  ;;  %v1317_v32 = vpack.c.bf16 %v1125_v9, %v1125_v9  ;;  %vm1111_vm10 = vcmp.ge.f32.partialorder %v1103_v16, 0.0  ;;  %v1119_v35 = vmul.f32 0.01, %v1103_v16 }
 0x157   : > { %vm1112_vm11 = vcmp.ge.f32.partialorder %v1104_v43, 0.0  ;;  %v1120_v54 = vmul.f32 0.01, %v1104_v43  ;;  %v1105_v34 = vadd.f32 %v1089_v36, %v1064_v3  ;;  %v1179_v12 = vrot.slane %v1166_v30, 4 }
 0x158   : > { %v1175_v56 = vsel %vm1174_vm9, %v1173_v49, %v1172_v41  ;;  %v1165_v23 = vunpack.c.l.b16 %v1317_v32  ;;  %v1127_v39 = vsel %vm1111_vm10, %v1103_v16, %v1119_v35 }
 0x159   : > { %v1319_v4 = vpack.c.bf16 %v1127_v39, %v1127_v39  ;;  %v1128_v42 = vsel %vm1112_vm11, %v1104_v43, %v1120_v54  ;;  %vm1113_vm13 = vcmp.ge.f32.partialorder %v1105_v34, 0.0  ;;  %v1121_v20 = vmul.f32 0.01, %v1105_v34 }
 0x15a   : > { %v1176_v52 = vrot.slane %v1165_v23, 5  ;;  %v1320_v63 = vpack.c.bf16 %v1128_v42, %v1128_v42 }
 0x15b   : > { %v1167_v38 = vunpack.c.l.b16 %v1319_v4  ;;  %v1129_v27 = vsel %vm1113_vm13, %v1105_v34, %v1121_v20 }
 0x15c   : > { %v1178_v29 = vsel %vm1177_vm12, %v1176_v52, %v1175_v56  ;;  %v1168_v15 = vunpack.c.l.b16 %v1320_v63  ;;  %v1321_v17 = vpack.c.bf16 %v1129_v27, %v1129_v27 }
 0x15d   : > { %v1181_v62 = vsel %vm1180_vm14, %v1179_v12, %v1178_v29  ;;  %v1182_v51 = vrot.slane %v1167_v38, 3 }
 0x15e   : > { %v1185_v33 = vrot.slane %v1168_v15, 2  ;;  %v1169_v45 = vunpack.c.l.b16 %v1321_v17 }
 0x15f   : > { %v1184_v60 = vsel %vm1183_vm15, %v1182_v51, %v1181_v62 }
 0x160   : > { %v1187_v1 = vsel %vm1186_vm0, %v1185_v33, %v1184_v60  ;;  %v1188_v26 = vrot.slane %v1169_v45, 1 }
 0x162   : > { %v1190_v18 = vsel %vm1189_vm1, %v1188_v26, %v1187_v1 }
 0x163   : > { %v1191_v0 = vpack.c.b16 %v1190_v18, %v1190_v18 }
 0x165   : > { %1193 = vst [vmem:[%s195_s25] sm:$0xf] %v1191_v0 }
 0x166 PF: > { %s14_s15 = sadd.s32 1, %s1363_s15  }
 0x167   : > { %p11_p4 = scmp.ge.s32.totalorder %s14_s15, 4  }
 0x169   :  { %13 = sbr.rel (!%p11_p4) target bundleno = 1 (0x1), region = 74 }

// kernel: ddualgcn_head.11
= control target key start
LH: loop header
LB: loop body
LE: loop exit
PB: predicated region body
PF: predicated region fallthrough
CT: control target
= control target key end

     0   :  { %s1396_s15 = smov 0   ;;  %s1956_s0 = inlined_call_operand.vmem [shape: bf16[2,8,4,256], index: 0, kind: input, shape index: {}]   ;;  %s1957_s1 = inlined_call_operand.vmem [shape: f32[9,8,1], index: 1, kind: input, shape index: {}]   ;;  %s1958_s2 = inlined_call_operand.vmem [shape: f32[8,1], index: 2, kind: input, shape index: {}]   ;;  %s1959_s3 = inlined_call_operand.vmem [shape: f32[8,1], index: 3, kind: input, shape index: {}]   ;;  %s1960_s4 = inlined_call_operand.vmem [shape: bf16[2,8,128], index: 4, kind: output, shape index: {}]  }
   0x1 LB: > { %s1247_s16 = sadd.s32 4294967295, %s1363_s15   ;;  %p1251_p0 = scmp.ge.s32.totalorder %s1363_s15, 1  ;;  %s1363_s15 = sphi %s1396_s15, %s14_s15  }
   0x2   : > { %p162_p1 = scmp.lt.s32.totalorder %s1363_s15, 3 }
   0x4   : > { %p163_p2 = pnand %p1251_p0, %p162_p1 }
   0x5   : > { %p187_p3 = scmp.lt.s32.totalorder (!%p163_p2), %s1247_s16, 1  ;;  %s1368_s19 = smov (!%p163_p2), 127  }
   0x6   : > { %166 = sbr.rel (%p163_p2) target bundleno = 358 (0x166), region = 36  ;;  %s1369_s20 = smov (!%p163_p2), 125  }
   0x7   : > { %s1370_s21 = smov (!%p163_p2), 124  }
   0xb   : > { %v1292_v0 = vld [vmem:[%s1957_s1 + $0x30] sm:$0xff]  ;;  %v1365_v2 = vmov 0   ;;  %v1293_v3 = vld [vmem:[%s1957_s1 + $0x38] sm:$0xff]  ;;  %v1283_v4 = vld [vmem:[%s1957_s1 + $0x28] sm:$0xff]  ;;  %s1962_s16 = smov (!%p187_p3, %s1247_s16), 1  ;;  %v220_v14 = vlaneseq  ;;  %vm409_vm0 = vcmask 1039360  }
   0xc   : > { %v1264_v1 = vld [vmem:[%s1957_s1 + $0x10] sm:$0xff]  ;;  %1356 = vset.pattern.permute.xlu1 %v1365_v2  ;;  %1355 = vset.pattern.permute.xlu0 %v1365_v2  ;;  %v1255_v5 = vld [vmem:[%s1957_s1 + $0x8] sm:$0xff]  ;;  %v1302_v6 = vld [vmem:[%s1957_s1 + $0x40] sm:$0xff]  ;;  %v1366_v12 = vmov 839922192   ;;  %s1313_s13 = sshll.u32 %s1962_s16, 5 }
   0xd   : > { %716 = vperm.xlu1 %1356, %v1292_v0   ;;  %339 = vperm.xlu0 %1355, %v1264_v1   ;;  %v1265_v7 = vld [vmem:[%s1957_s1 + $0x18] sm:$0xff]  ;;  %v212_v8 = vld [vmem:[%s1957_s1] sm:$0xff]  ;;  %v218_v13 = vunpack.c.l.s4 %v1366_v12  ;;  %v1367_v15 = vmov 1985246804   ;;  %v221_v18 = vshrl.u32 %v220_v14, 7  ;;  %s1447_s18 = scalar_lea.vmem %s1956_s0, %s1313_s13  ;;  %vm786_vm1 = vcmask 1022976  }
   0xe   : > { %v1065_v9 = vld [vmem:[%s1959_s3] sm:$0xff]  ;;  %v225_v16 = vunpack.c.l.s4 %v1367_v15  ;;  %v1339_v26 = vld [vmem:[%s1447_s18 + $0x10] sm:$0xff]   ;;  %v1338_v39 = vld [vmem:[%s1447_s18 + $0x8] sm:$0xff]   ;;  %vm999_vm2 = vcmask 1014784   ;;  %vm1171_vm4 = vcmask 1041409   ;;  %vm1174_vm9 = vcmask 1042434  }
   0xf   : > { %v1274_v10 = vld [vmem:[%s1957_s1 + $0x20] sm:$0xff]  ;;  %v219_v17 = vunpack.c.0.s8 %v218_v13  ;;  %v1467_v32 = vunpack.c.l.bf16 %v1339_v26  ;;  %v1491_v44 = vunpack.c.l.bf16 %v1338_v39  ;;  %v1513_v55 = vunpack.c.h.bf16 %v1338_v39  ;;  %v1340_v63 = vld [vmem:[%s1447_s18 + $0x18] sm:$0xff]   ;;  %s1254_s22 = sshll.u32 %s1962_s16, 2 }
  0x10   : > { %v1024_v11 = vld [vmem:[%s1958_s2] sm:$0xff]  ;;  %v226_v19 = vunpack.c.0.s8 %v225_v16  ;;  %v1528_v0 = vunpack.c.h.bf16 %v1339_v26  ;;  %vm1177_vm12 = vcmask 1043459   ;;  %vm1180_vm14 = vcmask 1044484   ;;  %s195_s25 = scalar_lea.vmem %s1960_s4, %s1254_s22 }
  0x11   : > { %815 = vperm.xlu1 %1356, %v1293_v3   ;;  %602 = vperm.xlu0 %1355, %v1283_v4   ;;  %v1323_v20 = vld [vmem:[%s1447_s18] sm:$0xff]   ;;  %v1450_v21 = vsub.s32 %v219_v17, %v221_v18  ;;  %vm1183_vm15 = vcmask 1045509  }
  0x12   : > { %v1452_v22 = vsub.s32 %v226_v19, %v221_v18  ;;  %v1454_v23 = vunpack.c.l.bf16 %v1323_v20  ;;  %v1517_v59 = vunpack.c.h.bf16 %v1323_v20 }
  0x15   : > { %257 = vperm.xlu1 %1356, %v1255_v5   ;;  %929 = vperm.xlu0 %1355, %v1302_v6   ;;  %v1540_v6 = vunpack.c.l.bf16 %v1340_v63 }
  0x19   : > { %438 = vperm.xlu1 %1356, %v1265_v7   ;;  %215 = vperm.xlu0 %1355, %v212_v8  }
  0x1d   : > { %1068 = vperm.xlu1 %1356, %v1065_v9   ;;  %520 = vperm.xlu0 %1355, %v1274_v10   ;;  %v1549_v10 = vunpack.c.h.bf16 %v1340_v63 }
  0x21   : > { %1027 = vperm.xlu0 %1355, %v1024_v11  }
  0x88   : > { %v717_v24 = vpop.permute.xlu1 %716  ;;  %v340_v25 = vpop.permute.xlu0 %339 }
  0x89   : > { %v1458_v27 = vrot.slane %v717_v24, %v1450_v21  ;;  %v347_v28 = vrot.slane %v340_v25, %v1450_v21  ;;  %v1462_v29 = vrot.slane %v340_v25, %v1452_v22  ;;  %v1476_v36 = vrot.slane %v717_v24, %v1452_v22 }
  0x8b   : > { %v369_v30 = vmul.f32 %v1454_v23, %v347_v28  ;;  %v746_v31 = vmul.f32 %v1454_v23, %v1458_v27  ;;  %v373_v35 = vmul.f32 %v1467_v32, %v1462_v29  ;;  %v356_v45 = vrot.slane %v347_v28, 2 }
  0x8c   : > { %v1469_v33 = vpop.permute.xlu1 %815  ;;  %v603_v34 = vpop.permute.xlu0 %602  ;;  %v750_v49 = vmul.f32 %v1467_v32, %v1476_v36  ;;  %v357_v56 = vrot.slane %v347_v28, 3  ;;  %v355_v60 = vrot.slane %v347_v28, 1  ;;  %v358_v1 = vrot.slane %v1462_v29, 1 }
  0x8d   : > { %385 = vrot.lane.b32.xlu1 %v369_v30, %s1368_s19  ;;  %762 = vrot.lane.b32.xlu0 %v746_v31, %s1369_s20  ;;  %v371_v54 = vmul.f32 %v1491_v44, %v356_v45  ;;  %v1532_v2 = vrot.slane %v603_v34, %v1450_v21  ;;  %v1537_v4 = vrot.slane %v1469_v33, %v1450_v21  ;;  %v359_v7 = vrot.slane %v1462_v29, 2 }
  0x8e   : > { %v372_v3 = vmul.f32 %v1513_v55, %v357_v56  ;;  %v370_v5 = vmul.f32 %v1517_v59, %v355_v60  ;;  %v1544_v8 = vrot.slane %v603_v34, %v1452_v22  ;;  %v374_v9 = vmul.f32 %v1528_v0, %v358_v1 }
  0x8f   : > { %v360_v11 = vrot.slane %v1462_v29, 3  ;;  %v732_v12 = vrot.slane %v1458_v27, 1  ;;  %v634_v13 = vmul.f32 %v1491_v44, %v1532_v2  ;;  %v734_v14 = vrot.slane %v1458_v27, 3 }
  0x90   : > { %v258_v37 = vpop.permute.xlu1 %257  ;;  %v930_v38 = vpop.permute.xlu0 %929  ;;  %v375_v15 = vmul.f32 %v1540_v6, %v359_v7  ;;  %v733_v16 = vrot.slane %v1458_v27, 2  ;;  %v1560_v17 = vmul.f32 %v1517_v59, %v1537_v4  ;;  %v737_v18 = vrot.slane %v1476_v36, 3 }
  0x91   : > { %v1480_v40 = vrot.slane %v258_v37, %v1450_v21  ;;  %v1483_v41 = vrot.slane %v258_v37, %v1452_v22  ;;  %v1486_v42 = vrot.slane %v930_v38, %v1452_v22  ;;  %393 = vrot.lane.b32.xlu1 %v373_v35, %s1368_s19  ;;  %v1494_v46 = vrot.slane %v930_v38, %v1450_v21 }
  0x92   : > { %v1567_v20 = vmul.f32 %v1540_v6, %v1544_v8  ;;  %v376_v24 = vmul.f32 %v1549_v10, %v360_v11  ;;  %v747_v25 = vmul.f32 %v1517_v59, %v732_v12  ;;  %v1286_v26 = vrot.slane %v634_v13, 10 }
  0x93   : > { %v963_v43 = vmul.f32 %v1467_v32, %v1486_v42  ;;  %v959_v58 = vmul.f32 %v1454_v23, %v1494_v46  ;;  %v945_v19 = vrot.slane %v1494_v46, 1  ;;  %v749_v27 = vmul.f32 %v1513_v55, %v734_v14 }
  0x94   : > { %v439_v47 = vpop.permute.xlu1 %438  ;;  %v216_v48 = vpop.permute.xlu0 %215  ;;  %v748_v28 = vmul.f32 %v1491_v44, %v733_v16  ;;  %v1295_v29 = vrot.slane %v1560_v17, 9  ;;  %v753_v30 = vmul.f32 %v1549_v10, %v737_v18  ;;  %v273_v31 = vrot.slane %v1480_v40, 7 }
  0x95   : > { %v1499_v50 = vrot.slane %v439_v47, %v1450_v21  ;;  %v1502_v51 = vrot.slane %v439_v47, %v1452_v22  ;;  %v1505_v52 = vrot.slane %v216_v48, %v1450_v21  ;;  %v1508_v53 = vrot.slane %v216_v48, %v1452_v22  ;;  %983 = vrot.lane.b32.xlu0 %v963_v43, %s1370_s21 }
  0x96   : > { %770 = vrot.lane.b32.xlu1 %v750_v49, %s1369_s20  ;;  %v960_v34 = vmul.f32 %v1517_v59, %v945_v19  ;;  %v1290_v35 = vrot.slane %v1567_v20, 10  ;;  %v619_v37 = vrot.slane %v1532_v2, 7  ;;  %v735_v39 = vrot.slane %v1476_v36, 1 }
  0x97   : > { %v454_v38 = vrot.slane %v1499_v50, 6  ;;  %v618_v43 = vrot.slane %v1532_v2, 6  ;;  %v245_v45 = vmul.f32 %v1454_v23, %v1505_v52  ;;  %v287_v47 = vmul.f32 %v1454_v23, %v273_v31 }
  0x98   : > { %v521_v57 = vpop.permute.xlu0 %520  ;;  %v249_v49 = vmul.f32 %v1467_v32, %v1508_v53  ;;  %v457_v56 = vrot.slane %v1502_v51, 6  ;;  %v274_v60 = vrot.slane %v1480_v40, 1  ;;  %v1599_v63 = vmul.f32 %v1491_v44, %v1499_v50 }
  0x99   : > { %v1520_v61 = vrot.slane %v521_v57, %v1450_v21  ;;  %v1523_v62 = vrot.slane %v521_v57, %v1452_v22  ;;  %389 = vrot.lane.b32.xlu0 %v371_v54, %s1368_s19  ;;  %v1589_v48 = vmul.f32 %v1454_v23, %v454_v38  ;;  %v276_v54 = vrot.slane %v1483_v41, 7 }
  0x9a   : > { %975 = vrot.lane.b32.xlu1 %v959_v58, %s1370_s21  ;;  %v1256_v57 = vrot.slane %v287_v47, 9  ;;  %v232_v58 = vrot.slane %v1505_v52, 2  ;;  %v736_v1 = vrot.slane %v1476_v36, 2  ;;  %v233_v7 = vrot.slane %v1505_v52, 3 }
  0x9b   : > { %v289_v13 = vmul.f32 %v1491_v44, %v274_v60  ;;  %v633_v14 = vmul.f32 %v1517_v59, %v619_v37  ;;  %v275_v17 = vrot.slane %v1480_v40, 2  ;;  %v456_v19 = vrot.slane %v1499_v50, 1 }
  0x9c   : > { %v1610_v11 = vadd.f32 %v1256_v57, %v245_v45  ;;  %v247_v12 = vmul.f32 %v1491_v44, %v232_v58  ;;  %v248_v16 = vmul.f32 %v1513_v55, %v233_v7  ;;  %v455_v31 = vrot.slane %v1499_v50, 7 }
  0x9d   : > { %391 = vrot.lane.b32.xlu0 %v372_v3, %s1368_s19  ;;  %v291_v3 = vmul.f32 %v1467_v32, %v276_v54  ;;  %v1258_v18 = vrot.slane %v289_v13, 9  ;;  %v234_v37 = vrot.slane %v1508_v53, 1  ;;  %v1631_v45 = vmul.f32 %v1513_v55, %v456_v19 }
  0x9e   : > { %387 = vrot.lane.b32.xlu1 %v370_v5, %s1368_s19  ;;  %v1605_v5 = vmul.f32 %v1467_v32, %v457_v56  ;;  %v292_v50 = vmul.f32 %v1528_v0, %v1483_v41  ;;  %v751_v54 = vmul.f32 %v1528_v0, %v735_v39  ;;  %v458_v56 = vrot.slane %v1502_v51, 7 }
  0x9f   : > { %v1628_v38 = vadd.f32 %v1258_v18, %v247_v12  ;;  %v235_v57 = vrot.slane %v1508_v53, 2  ;;  %v622_v58 = vrot.slane %v1544_v8, 7  ;;  %v277_v7 = vrot.slane %v1483_v41, 1 }
  0xa0   : > { %v1652_v12 = vmul.f32 %v1528_v0, %v458_v56  ;;  %v1657_v13 = vmul.f32 %v1540_v6, %v1502_v51  ;;  %v459_v18 = vrot.slane %v1502_v51, 1  ;;  %v632_v19 = vmul.f32 %v1454_v23, %v618_v43 }
  0xa1   : > { %395 = vrot.lane.b32.xlu0 %v374_v9, %s1368_s19  ;;  %v621_v9 = vrot.slane %v1544_v8, 6  ;;  %v251_v39 = vmul.f32 %v1540_v6, %v235_v57  ;;  %v537_v43 = vrot.slane %v1520_v61, 6  ;;  %v539_v20 = vrot.slane %v1523_v62, 5 }
  0xa2   : > { %397 = vrot.lane.b32.xlu1 %v375_v15, %s1368_s19  ;;  %v1260_v15 = vrot.slane %v291_v3, 9  ;;  %v1261_v3 = vrot.slane %v292_v50, 9 }
  0xa3   : > { %v1696_v56 = vmul.f32 %v1467_v32, %v539_v20  ;;  %v833_v20 = vrot.slane %v1537_v4, 2 }
  0xa5   : > { %399 = vrot.lane.b32.xlu0 %v376_v24, %s1368_s19  ;;  %v231_v24 = vrot.slane %v1505_v52, 1 }
  0xa6   : > { %764 = vrot.lane.b32.xlu1 %v747_v25, %s1369_s20  ;;  %v288_v25 = vmul.f32 %v1517_v59, %v1480_v40 }
  0xa7   : > { %v246_v52 = vmul.f32 %v1517_v59, %v231_v24 }
  0xa8   : > { %v1257_v40 = vrot.slane %v288_v25, 9  ;;  %v538_v25 = vrot.slane %v1520_v61, 7 }
  0xa9   : > { %668 = vrot.lane.b32.xlu0 %v1286_v26, %s1368_s19  ;;  %v1622_v26 = vadd.f32 %v1260_v15, %v249_v49  ;;  %v250_v49 = vmul.f32 %v1528_v0, %v234_v37 }
  0xaa   : > { %768 = vrot.lane.b32.xlu1 %v749_v27, %s1369_s20  ;;  %v290_v27 = vmul.f32 %v1513_v55, %v275_v17  ;;  %v278_v17 = vrot.slane %v1483_v41, 2  ;;  %v541_v41 = vrot.slane %v1523_v62, 7  ;;  %v1678_v51 = vmul.f32 %v1491_v44, %v538_v25 }
  0xab   : > { %v1660_v15 = vadd.f32 %v1261_v3, %v250_v49  ;;  %v1690_v49 = vmul.f32 %v1517_v59, %v537_v43  ;;  %v1704_v3 = vmul.f32 %v1549_v10, %v1523_v62 }
  0xac   : > { %v1259_v47 = vrot.slane %v290_v27, 9  ;;  %v294_v27 = vmul.f32 %v1549_v10, %v278_v17  ;;  %v623_v17 = vrot.slane %v1544_v8, 1  ;;  %v947_v8 = vrot.slane %v1494_v46, 3 }
  0xad   : > { %766 = vrot.lane.b32.xlu0 %v748_v28, %s1369_s20  ;;  %v1635_v28 = vmul.f32 %v1517_v59, %v455_v31  ;;  %v1673_v31 = vmul.f32 %v1549_v10, %v459_v18  ;;  %v1709_v59 = vmul.f32 %v1513_v55, %v1520_v61  ;;  %v831_v18 = vrot.slane %v1537_v4, 7 }
  0xae   : > { %977 = vrot.lane.b32.xlu1 %v960_v34, %s1370_s21  ;;  %v1641_v34 = vadd.f32 %v1257_v40, %v246_v52  ;;  %v1647_v60 = vadd.f32 %v1259_v47, %v248_v16  ;;  %v293_v16 = vmul.f32 %v1540_v6, %v277_v7  ;;  %v1263_v52 = vrot.slane %v294_v27, 9 }
  0xaf   : > { %v1687_v40 = vmul.f32 %v1540_v6, %v541_v41  ;;  %v1284_v47 = vrot.slane %v632_v19, 10  ;;  %v830_v7 = vrot.slane %v1469_v33, %v1452_v22  ;;  %v832_v41 = vrot.slane %v1537_v4, 1 }
  0xb0   : > { %v948_v4 = vrot.slane %v1486_v42, 1 }
  0xb1   : > { %879 = vrot.lane.b32.xlu0 %v1295_v29, %s1369_s20  ;;  %v236_v29 = vrot.slane %v1508_v53, 3  ;;  %v1262_v53 = vrot.slane %v293_v16, 9  ;;  %v637_v16 = vmul.f32 %v1528_v0, %v622_v58  ;;  %v850_v36 = vmul.f32 %v1528_v0, %v830_v7 }
  0xb2   : > { %776 = vrot.lane.b32.xlu1 %v753_v30, %s1369_s20  ;;  %v1285_v30 = vrot.slane %v633_v14, 10  ;;  %v536_v14 = vrot.slane %v1520_v61, 5  ;;  %v834_v25 = vrot.slane %v830_v7, 7 }
  0xb3   : > { %v252_v24 = vmul.f32 %v1549_v10, %v236_v29  ;;  %v1684_v37 = vadd.f32 %v1262_v53, %v251_v39  ;;  %v946_v39 = vrot.slane %v1494_v46, 2  ;;  %v1289_v61 = vrot.slane %v637_v16, 10 }
  0xb4   : > { %v1693_v50 = vmul.f32 %v1454_v23, %v536_v14  ;;  %v1299_v58 = vrot.slane %v850_v36, 9  ;;  %v962_v53 = vmul.f32 %v1513_v55, %v947_v8  ;;  %v849_v14 = vmul.f32 %v1467_v32, %v834_v25  ;;  %v1761_v36 = vpop.permute.xlu1 %1068 }
  0xb5   : > { %676 = vrot.lane.b32.xlu0 %v1290_v35, %s1368_s19  ;;  %v636_v35 = vmul.f32 %v1467_v32, %v621_v9  ;;  %v1699_v57 = vadd.f32 %v1263_v52, %v252_v24  ;;  %v540_v9 = vrot.slane %v1523_v62, 6  ;;  %v961_v33 = vmul.f32 %v1491_v44, %v946_v39 }
  0xb6   : > { %666 = vrot.lane.b32.xlu1 %v1285_v30, %s1368_s19  ;;  %v620_v30 = vrot.slane %v1532_v2, 1  ;;  %v845_v24 = vmul.f32 %v1454_v23, %v831_v18  ;;  %v835_v46 = vrot.slane %v830_v7, 1  ;;  %v847_v2 = vmul.f32 %v1491_v44, %v832_v41 }
  0xb7   : > { %v1718_v29 = vmul.f32 %v1528_v0, %v540_v9  ;;  %v1288_v62 = vrot.slane %v636_v35, 10  ;;  %v1298_v35 = vrot.slane %v849_v14, 9  ;;  %v848_v32 = vmul.f32 %v1513_v55, %v833_v20 }
  0xb8   : > { %v635_v27 = vmul.f32 %v1513_v55, %v620_v30  ;;  %v1294_v43 = vrot.slane %v845_v24, 9  ;;  %v851_v52 = vmul.f32 %v1540_v6, %v835_v46  ;;  %v1296_v9 = vrot.slane %v847_v2, 9 }
  0xb9   : > { %772 = vrot.lane.b32.xlu0 %v751_v54, %s1369_s20  ;;  %v752_v54 = vmul.f32 %v1540_v6, %v736_v1  ;;  %v639_v1 = vmul.f32 %v1549_v10, %v623_v17  ;;  %v1297_v44 = vrot.slane %v848_v32, 9  ;;  %v964_v16 = vmul.f32 %v1528_v0, %v948_v4 }
  0xba   : > { %664 = vrot.lane.b32.xlu1 %v1284_v47, %s1368_s19  ;;  %v1287_v23 = vrot.slane %v635_v27, 10  ;;  %v836_v47 = vrot.slane %v830_v7, 2  ;;  %v949_v7 = vrot.slane %v1486_v42, 2  ;;  %v950_v55 = vrot.slane %v1486_v42, 3 }
  0xbb   : > { %v1291_v19 = vrot.slane %v639_v1, 10  ;;  %v1266_v42 = vrot.slane %v1589_v48, 10  ;;  %v1270_v25 = vrot.slane %v1605_v5, 10  ;;  %v1268_v5 = vrot.slane %v1599_v63, 10 }
  0xbc   : > { %v852_v39 = vmul.f32 %v1549_v10, %v836_v47  ;;  %v965_v17 = vmul.f32 %v1540_v6, %v949_v7  ;;  %v1277_v32 = vrot.slane %v1678_v51, 11  ;;  %v1267_v63 = vrot.slane %v1635_v28, 10 }
  0xbd   : > { %774 = vrot.lane.b32.xlu0 %v752_v54, %s1369_s20  ;;  %v1300_v54 = vrot.slane %v851_v52, 9  ;;  %v1278_v51 = vrot.slane %v1709_v59, 11 }
  0xbe   : > { %672 = vrot.lane.b32.xlu1 %v1288_v62, %s1368_s19  ;;  %v1301_v62 = vrot.slane %v852_v39, 9 }
  0xc1   : > { %979 = vrot.lane.b32.xlu0 %v961_v33, %s1370_s21  ;;  %v966_v33 = vmul.f32 %v1549_v10, %v950_v55 }
  0xc2   : > { %674 = vrot.lane.b32.xlu1 %v1289_v61, %s1368_s19  ;;  %v1763_v61 = vpop.permute.xlu0 %1027 }
  0xc5   : > { %887 = vrot.lane.b32.xlu0 %v1299_v58, %s1369_s20 }
  0xc6   : > { %678 = vrot.lane.b32.xlu1 %v1291_v19, %s1368_s19  ;;  %v1275_v19 = vrot.slane %v1693_v50, 11 }
  0xc9   : > { %981 = vrot.lane.b32.xlu0 %v962_v53, %s1370_s21 }
  0xca   : > { %877 = vrot.lane.b32.xlu1 %v1294_v43, %s1369_s20  ;;  %v1279_v43 = vrot.slane %v1696_v56, 11 }
  0xcd   : > { %670 = vrot.lane.b32.xlu0 %v1287_v23, %s1368_s19 }
  0xce   : > { %885 = vrot.lane.b32.xlu1 %v1298_v35, %s1369_s20 }
  0xd1   : > { %881 = vrot.lane.b32.xlu0 %v1296_v9, %s1369_s20 }
  0xd2   : > { %889 = vrot.lane.b32.xlu1 %v1300_v54, %s1369_s20  ;;  %v1269_v54 = vrot.slane %v1631_v45, 10 }
  0xd5   : > { %883 = vrot.lane.b32.xlu0 %v1297_v44, %s1369_s20 }
  0xd6   : > { %891 = vrot.lane.b32.xlu1 %v1301_v62, %s1369_s20 }
  0xd9   : > { %985 = vrot.lane.b32.xlu0 %v964_v16, %s1370_s21 }
  0xda   : > { %987 = vrot.lane.b32.xlu1 %v965_v17, %s1370_s21 }
  0xdd   : > { %989 = vrot.lane.b32.xlu0 %v966_v33, %s1370_s21 }
  0xff   : > { %v386_v1 = vpop.permute.xlu1 %385  ;;  %v1768_v58 = vpop.permute.xlu0 %762 }
 0x100   : > { %v401_v18 = vrot.slane %v386_v1, 4 }
 0x102   : > { %v410_v0 = vsel %vm409_vm0, %v386_v1, %v401_v18  ;;  %v1271_v1 = vrot.slane %v1652_v12, 10 }
 0x103   : > { %v426_v6 = vadd.f32 %v410_v0, %v1610_v11  ;;  %v394_v8 = vpop.permute.xlu1 %393 }
 0x104   : > { %v405_v30 = vrot.slane %v394_v8, 4 }
 0x105   : > { %v508_v10 = vadd.f32 %v1266_v42, %v426_v6 }
 0x106   : > { %v414_v24 = vsel %vm409_vm0, %v394_v8, %v405_v30 }
 0x107   : > { %v430_v53 = vadd.f32 %v414_v24, %v1622_v26  ;;  %v1774_v27 = vpop.permute.xlu0 %983  ;;  %v1776_v41 = vadd.f32 %v1275_v19, %v508_v10  ;;  %v1280_v19 = vrot.slane %v1718_v29, 11  ;;  %v1273_v24 = vrot.slane %v1673_v31, 10 }
 0x108   : > { %v1778_v48 = vpop.permute.xlu1 %770 }
 0x109   : > { %v512_v11 = vadd.f32 %v1270_v25, %v430_v53 }
 0x10b   : > { %v390_v14 = vpop.permute.xlu0 %389  ;;  %v1781_v46 = vadd.f32 %v1279_v43, %v512_v11 }
 0x10c   : > { %v403_v23 = vrot.slane %v390_v14, 4  ;;  %v1783_v50 = vpop.permute.xlu1 %975 }
 0x10e   : > { %v412_v2 = vsel %vm409_vm0, %v390_v14, %v403_v23  ;;  %v1282_v14 = vrot.slane %v1704_v3, 11 }
 0x10f   : > { %v428_v26 = vadd.f32 %v412_v2, %v1628_v38  ;;  %v392_v20 = vpop.permute.xlu0 %391 }
 0x110   : > { %v404_v35 = vrot.slane %v392_v20, 4  ;;  %v388_v52 = vpop.permute.xlu1 %387 }
 0x111   : > { %v510_v47 = vadd.f32 %v1268_v5, %v428_v26  ;;  %v402_v9 = vrot.slane %v388_v52, 4 }
 0x112   : > { %v413_v56 = vsel %vm409_vm0, %v392_v20, %v404_v35 }
 0x113   : > { %v429_v39 = vadd.f32 %v413_v56, %v1647_v60  ;;  %v411_v44 = vsel %vm409_vm0, %v388_v52, %v402_v9  ;;  %v396_v4 = vpop.permute.xlu0 %395  ;;  %v1793_v62 = vadd.f32 %v1277_v32, %v510_v47  ;;  %v1276_v60 = vrot.slane %v1690_v49, 11 }
 0x114   : > { %v427_v38 = vadd.f32 %v411_v44, %v1641_v34  ;;  %v406_v7 = vrot.slane %v396_v4, 4  ;;  %v398_v16 = vpop.permute.xlu1 %397  ;;  %v1272_v34 = vrot.slane %v1657_v13, 10  ;;  %v778_v32 = vrot.slane %v1768_v58, 4 }
 0x115   : > { %v511_v55 = vadd.f32 %v1269_v54, %v429_v39  ;;  %v407_v17 = vrot.slane %v398_v16, 4  ;;  %v1834_v44 = vrot.slane %v1763_v61, %v1450_v21 }
 0x116   : > { %v509_v33 = vadd.f32 %v1267_v63, %v427_v38  ;;  %v415_v45 = vsel %vm409_vm0, %v396_v4, %v406_v7 }
 0x117   : > { %v431_v18 = vadd.f32 %v415_v45, %v1660_v15  ;;  %v416_v0 = vsel %vm409_vm0, %v398_v16, %v407_v17  ;;  %v400_v28 = vpop.permute.xlu0 %399  ;;  %v1803_v42 = vadd.f32 %v1278_v51, %v511_v55  ;;  %v1281_v15 = vrot.slane %v1687_v40, 11 }
 0x118   : > { %v432_v6 = vadd.f32 %v416_v0, %v1684_v37  ;;  %v408_v8 = vrot.slane %v400_v28, 4  ;;  %v765_v59 = vpop.permute.xlu1 %764  ;;  %v591_v30 = vadd.f32 %v1276_v60, %v509_v33  ;;  %v1842_v16 = vrot.slane %v1761_v36, %v1450_v21 }
 0x119   : > { %v513_v10 = vadd.f32 %v1271_v1, %v431_v18  ;;  %v779_v26 = vrot.slane %v765_v59, 4  ;;  %v787_v33 = vsel %vm786_vm1, %v1768_v58, %v778_v32  ;;  %v782_v45 = vrot.slane %v1778_v48, 4 }
 0x11a   : > { %v514_v49 = vadd.f32 %v1272_v34, %v432_v6  ;;  %v417_v12 = vsel %vm409_vm0, %v400_v28, %v408_v8  ;;  %v1043_v18 = vrot.slane %v1834_v44, 1  ;;  %v1084_v6 = vrot.slane %v1842_v16, 1 }
 0x11b   : > { %v433_v25 = vadd.f32 %v417_v12, %v1699_v57  ;;  %v669_v53 = vpop.permute.xlu0 %668  ;;  %v1812_v11 = vadd.f32 %v1280_v19, %v513_v10  ;;  %v788_v56 = vsel %vm786_vm1, %v765_v59, %v779_v26  ;;  %v791_v58 = vsel %vm786_vm1, %v1778_v48, %v782_v45 }
 0x11c   : > { %v1814_v13 = vpop.permute.xlu1 %768  ;;  %v1816_v37 = vadd.f32 %v1281_v15, %v514_v49  ;;  %v682_v10 = vrot.slane %v669_v53, 4  ;;  %v1863_v12 = vrot.slane %v1761_v36, %v1452_v22  ;;  %v1085_v48 = vrot.slane %v1842_v16, 2 }
 0x11d   : > { %v515_v43 = vadd.f32 %v1273_v24, %v433_v25  ;;  %v995_v24 = vrot.slane %v1774_v27, 4 }
 0x11f   : > { %v1819_v29 = vpop.permute.xlu0 %766  ;;  %v1821_v23 = vadd.f32 %v1282_v14, %v515_v43  ;;  %v1086_v43 = vrot.slane %v1842_v16, 3  ;;  %v690_v14 = vsel %vm409_vm0, %v669_v53, %v682_v10 }
 0x120   : > { %v978_v2 = vpop.permute.xlu1 %977 }
 0x121   : > { %v992_v54 = vrot.slane %v978_v2, 4 }
 0x123   : > { %v880_v40 = vpop.permute.xlu0 %879  ;;  %v1001_v60 = vsel %vm999_vm2, %v978_v2, %v992_v54  ;;  %v1044_v2 = vrot.slane %v1834_v44, 2 }
 0x124   : > { %v1823_v5 = vpop.permute.xlu1 %776  ;;  %v894_v35 = vrot.slane %v880_v40, 4 }
 0x126   : > { %v902_v63 = vsel %vm786_vm1, %v880_v40, %v894_v35  ;;  %v991_v40 = vrot.slane %v1783_v50, 4 }
 0x127   : > { %v1825_v31 = vpop.permute.xlu0 %676 }
 0x128   : > { %v667_v57 = vpop.permute.xlu1 %666 }
 0x129   : > { %v681_v20 = vrot.slane %v667_v57, 4 }
 0x12b   : > { %v689_v52 = vsel %vm409_vm0, %v667_v57, %v681_v20  ;;  %v1828_v47 = vpop.permute.xlu0 %772  ;;  %v781_v57 = vrot.slane %v1814_v13, 4  ;;  %v1087_v20 = vrot.slane %v1863_v12, 1 }
 0x12c   : > { %v705_v3 = vadd.f32 %v689_v52, %v591_v30  ;;  %v665_v9 = vpop.permute.xlu1 %664  ;;  %v1859_v30 = vrot.slane %v1763_v61, %v1452_v22  ;;  %v686_v61 = vrot.slane %v1825_v31, 4  ;;  %v1045_v22 = vrot.slane %v1834_v44, 3 }
 0x12d   : > { %v680_v39 = vrot.slane %v665_v9, 4  ;;  %v1004_v52 = vsel %vm999_vm2, %v1774_v27, %v995_v24 }
 0x12e   : > { %v804_v4 = vadd.f32 %v788_v56, %v705_v3  ;;  %v1046_v36 = vrot.slane %v1859_v30, 1  ;;  %v1047_v35 = vrot.slane %v1859_v30, 2  ;;  %v785_v3 = vrot.slane %v1823_v5, 4 }
 0x12f   : > { %v688_v38 = vsel %vm409_vm0, %v665_v9, %v680_v39  ;;  %v1838_v7 = vpop.permute.xlu0 %774  ;;  %v706_v56 = vadd.f32 %v690_v14, %v1793_v62  ;;  %v694_v54 = vsel %vm409_vm0, %v1825_v31, %v686_v61 }
 0x130   : > { %v918_v55 = vadd.f32 %v902_v63, %v804_v4  ;;  %v704_v17 = vadd.f32 %v688_v38, %v1776_v41  ;;  %v673_v51 = vpop.permute.xlu1 %672  ;;  %v783_v63 = vrot.slane %v1828_v47, 4  ;;  %v784_v38 = vrot.slane %v1838_v7, 4 }
 0x131   : > { %v684_v1 = vrot.slane %v673_v51, 4  ;;  %v794_v31 = vsel %vm786_vm1, %v1823_v5, %v785_v3 }
 0x132   : > { %v1017_v0 = vadd.f32 %v1001_v60, %v918_v55  ;;  %v803_v28 = vadd.f32 %v787_v33, %v704_v17  ;;  %v790_v55 = vsel %vm786_vm1, %v1814_v13, %v781_v57  ;;  %v792_v13 = vsel %vm786_vm1, %v1828_v47, %v783_v63 }
 0x133   : > { %v692_v21 = vsel %vm409_vm0, %v673_v51, %v684_v1  ;;  %v1851_v34 = vpop.permute.xlu0 %979 }
 0x134   : > { %v1058_v41 = vmul.f32 %v1043_v18, %v1017_v0  ;;  %v708_v8 = vadd.f32 %v692_v21, %v1781_v46  ;;  %v675_v59 = vpop.permute.xlu1 %674  ;;  %v780_v46 = vrot.slane %v1819_v29, 4  ;;  %v710_v18 = vadd.f32 %v694_v54, %v1816_v37 }
 0x135   : > { %v685_v9 = vrot.slane %v675_v59, 4 }
 0x136   : > { %v1099_v19 = vadd.f32 %v1084_v6, %v1058_v41  ;;  %v807_v49 = vadd.f32 %v791_v58, %v708_v8  ;;  %v789_v53 = vsel %vm786_vm1, %v1819_v29, %v780_v46  ;;  %v1000_v29 = vsel %vm999_vm2, %v1783_v50, %v991_v40 }
 0x137   : > { %v1865_v15 = vpop.permute.xlu0 %887  ;;  %v805_v17 = vadd.f32 %v789_v53, %v706_v56  ;;  %v693_v33 = vsel %vm409_vm0, %v675_v59, %v685_v9  ;;  %v993_v50 = vrot.slane %v1851_v34, 4  ;;  %v793_v6 = vsel %vm786_vm1, %v1838_v7, %v784_v38 }
 0x138   : > { %v679_v25 = vpop.permute.xlu1 %678  ;;  %v1115_v39 = vmul.f32 0.01, %v1099_v19  ;;  %vm1107_vm3 = vcmp.ge.f32.partialorder %v1099_v19, 0.0  ;;  %v709_v8 = vadd.f32 %v693_v33, %v1812_v11  ;;  %v809_v7 = vadd.f32 %v793_v6, %v710_v18 }
 0x139   : > { %v687_v27 = vrot.slane %v679_v25, 4 }
 0x13a   : > { %v1123_v0 = vsel %vm1107_vm3, %v1099_v19, %v1115_v39  ;;  %v808_v3 = vadd.f32 %v792_v13, %v709_v8 }
 0x13b   : > { %v1878_v26 = vpop.permute.xlu0 %981  ;;  %v695_v41 = vsel %vm409_vm0, %v679_v25, %v687_v27  ;;  %v1315_v10 = vpack.c.bf16 %v1123_v0, %v1123_v0  ;;  %v1002_v25 = vsel %vm999_vm2, %v1851_v34, %v993_v50 }
 0x13c   : > { %v878_v32 = vpop.permute.xlu1 %877  ;;  %v711_v11 = vadd.f32 %v695_v41, %v1821_v23  ;;  %v994_v61 = vrot.slane %v1878_v26, 4 }
 0x13d   : > { %v893_v4 = vrot.slane %v878_v32, 4  ;;  %v1163_v54 = vunpack.c.l.b16 %v1315_v10 }
 0x13f   : > { %v901_v62 = vsel %vm786_vm1, %v878_v32, %v893_v4  ;;  %v671_v51 = vpop.permute.xlu0 %670  ;;  %v1003_v4 = vsel %vm999_vm2, %v1878_v26, %v994_v61  ;;  %v1048_v61 = vrot.slane %v1859_v30, 3 }
 0x140   : > { %v917_v45 = vadd.f32 %v901_v62, %v803_v28  ;;  %v683_v60 = vrot.slane %v671_v51, 4  ;;  %v886_v1 = vpop.permute.xlu1 %885  ;;  %v898_v28 = vrot.slane %v1865_v15, 4 }
 0x141   : > { %v897_v21 = vrot.slane %v886_v1, 4 }
 0x142   : > { %v1016_v5 = vadd.f32 %v1000_v29, %v917_v45  ;;  %v691_v59 = vsel %vm409_vm0, %v671_v51, %v683_v60  ;;  %v1170_v60 = vrot.slane %v1163_v54, 7  ;;  %vm1186_vm0 = vcmask 1046534  }
 0x143   : > { %v905_v37 = vsel %vm786_vm1, %v886_v1, %v897_v21  ;;  %v882_v58 = vpop.permute.xlu0 %881  ;;  %v707_v40 = vadd.f32 %v691_v59, %v1803_v42 }
 0x144   : > { %v1057_v19 = vmul.f32 %v1834_v44, %v1016_v5  ;;  %v921_v47 = vadd.f32 %v905_v37, %v807_v49  ;;  %v895_v24 = vrot.slane %v882_v58, 4  ;;  %v890_v46 = vpop.permute.xlu1 %889  ;;  %v906_v49 = vsel %vm786_vm1, %v1865_v15, %v898_v28 }
 0x145   : > { %v899_v32 = vrot.slane %v890_v46, 4  ;;  %v806_v29 = vadd.f32 %v790_v55, %v707_v40  ;;  %v810_v15 = vadd.f32 %v794_v31, %v711_v11  ;;  %v922_v13 = vadd.f32 %v906_v49, %v808_v3 }
 0x146   : > { %v1098_v14 = vadd.f32 %v1842_v16, %v1057_v19  ;;  %v1020_v57 = vadd.f32 %v1004_v52, %v921_v47  ;;  %v903_v53 = vsel %vm786_vm1, %v882_v58, %v895_v24 }
 0x147   : > { %v919_v9 = vadd.f32 %v903_v53, %v805_v17  ;;  %v884_v56 = vpop.permute.xlu0 %883  ;;  %v907_v51 = vsel %vm786_vm1, %v890_v46, %v899_v32 }
 0x148   : > { %vm1106_vm5 = vcmp.ge.f32.partialorder %v1098_v14, 0.0  ;;  %v1114_v34 = vmul.f32 0.01, %v1098_v14  ;;  %v1061_v23 = vmul.f32 %v1859_v30, %v1020_v57  ;;  %v892_v39 = vpop.permute.xlu1 %891  ;;  %v896_v52 = vrot.slane %v884_v56, 4 }
 0x149   : > { %v1018_v42 = vadd.f32 %v1002_v25, %v919_v9  ;;  %v900_v63 = vrot.slane %v892_v39, 4  ;;  %v1088_v25 = vrot.slane %v1863_v12, 2 }
 0x14a   : > { %v1122_v38 = vsel %vm1106_vm5, %v1098_v14, %v1114_v34  ;;  %v1102_v27 = vadd.f32 %v1863_v12, %v1061_v23  ;;  %v904_v33 = vsel %vm786_vm1, %v884_v56, %v896_v52 }
 0x14b   : > { %v1314_v17 = vpack.c.bf16 %v1122_v38, %v1122_v38  ;;  %v1059_v62 = vmul.f32 %v1044_v2, %v1018_v42  ;;  %v986_v45 = vpop.permute.xlu0 %985  ;;  %v920_v26 = vadd.f32 %v904_v33, %v806_v29  ;;  %v908_v18 = vsel %vm786_vm1, %v892_v39, %v900_v63 }
 0x14c   : > { %v1118_v1 = vmul.f32 0.01, %v1102_v27  ;;  %v988_v0 = vpop.permute.xlu1 %987  ;;  %v996_v31 = vrot.slane %v986_v45, 4  ;;  %vm1110_vm6 = vcmp.ge.f32.partialorder %v1102_v27, 0.0  ;;  %v923_v2 = vadd.f32 %v907_v51, %v809_v7 }
 0x14d   : > { %v1162_v50 = vunpack.c.l.b16 %v1314_v17  ;;  %v1100_v55 = vadd.f32 %v1085_v48, %v1059_v62  ;;  %v997_v21 = vrot.slane %v988_v0, 4  ;;  %v1019_v6 = vadd.f32 %v1003_v4, %v920_v26 }
 0x14e   : > { %v924_v8 = vadd.f32 %v908_v18, %v810_v15  ;;  %v1005_v37 = vsel %vm999_vm2, %v986_v45, %v996_v31  ;;  %v1126_v10 = vsel %vm1110_vm6, %v1102_v27, %v1118_v1  ;;  %vm1189_vm1 = vcmask 1047559  }
 0x14f   : > { %v1172_v41 = vsel %vm1171_vm4, %v1170_v60, %v1162_v50  ;;  %vm1108_vm7 = vcmp.ge.f32.partialorder %v1100_v55, 0.0  ;;  %v1116_v5 = vmul.f32 0.01, %v1100_v55  ;;  %v990_v28 = vpop.permute.xlu0 %989  ;;  %v1060_v59 = vmul.f32 %v1045_v22, %v1019_v6 }
 0x150   : > { %v1006_v58 = vsel %vm999_vm2, %v988_v0, %v997_v21  ;;  %v998_v48 = vrot.slane %v990_v28, 4  ;;  %v1021_v47 = vadd.f32 %v1005_v37, %v922_v13  ;;  %v1318_v40 = vpack.c.bf16 %v1126_v10, %v1126_v10 }
 0x151   : > { %v1124_v19 = vsel %vm1108_vm7, %v1100_v55, %v1116_v5  ;;  %v1022_v24 = vadd.f32 %v1006_v58, %v923_v2  ;;  %v1101_v7 = vadd.f32 %v1086_v43, %v1060_v59 }
 0x152   : > { %v1316_v46 = vpack.c.bf16 %v1124_v19, %v1124_v19  ;;  %v1007_v11 = vsel %vm999_vm2, %v990_v28, %v998_v48  ;;  %v1062_v44 = vmul.f32 %v1046_v36, %v1021_v47  ;;  %v1089_v36 = vrot.slane %v1863_v12, 3 }
 0x153   : > { %v1063_v22 = vmul.f32 %v1047_v35, %v1022_v24  ;;  %v1023_v14 = vadd.f32 %v1007_v11, %v924_v8  ;;  %vm1109_vm8 = vcmp.ge.f32.partialorder %v1101_v7, 0.0  ;;  %v1117_v53 = vmul.f32 0.01, %v1101_v7 }
 0x154   : > { %v1164_v57 = vunpack.c.l.b16 %v1316_v46  ;;  %v1103_v16 = vadd.f32 %v1087_v20, %v1062_v44  ;;  %v1166_v30 = vunpack.c.l.b16 %v1318_v40 }
 0x155   : > { %v1104_v43 = vadd.f32 %v1088_v25, %v1063_v22  ;;  %v1064_v3 = vmul.f32 %v1048_v61, %v1023_v14  ;;  %v1125_v9 = vsel %vm1109_vm8, %v1101_v7, %v1117_v53 }
 0x156   : > { %v1173_v49 = vrot.slane %v1164_v57, 6  ;;  %v1317_v32 = vpack.c.bf16 %v1125_v9, %v1125_v9  ;;  %vm1111_vm10 = vcmp.ge.f32.partialorder %v1103_v16, 0.0  ;;  %v1119_v35 = vmul.f32 0.01, %v1103_v16 }
 0x157   : > { %vm1112_vm11 = vcmp.ge.f32.partialorder %v1104_v43, 0.0  ;;  %v1120_v54 = vmul.f32 0.01, %v1104_v43  ;;  %v1105_v34 = vadd.f32 %v1089_v36, %v1064_v3  ;;  %v1179_v12 = vrot.slane %v1166_v30, 4 }
 0x158   : > { %v1175_v56 = vsel %vm1174_vm9, %v1173_v49, %v1172_v41  ;;  %v1165_v23 = vunpack.c.l.b16 %v1317_v32  ;;  %v1127_v39 = vsel %vm1111_vm10, %v1103_v16, %v1119_v35 }
 0x159   : > { %v1319_v4 = vpack.c.bf16 %v1127_v39, %v1127_v39  ;;  %v1128_v42 = vsel %vm1112_vm11, %v1104_v43, %v1120_v54  ;;  %vm1113_vm13 = vcmp.ge.f32.partialorder %v1105_v34, 0.0  ;;  %v1121_v20 = vmul.f32 0.01, %v1105_v34 }
 0x15a   : > { %v1176_v52 = vrot.slane %v1165_v23, 5  ;;  %v1320_v63 = vpack.c.bf16 %v1128_v42, %v1128_v42 }
 0x15b   : > { %v1167_v38 = vunpack.c.l.b16 %v1319_v4  ;;  %v1129_v27 = vsel %vm1113_vm13, %v1105_v34, %v1121_v20 }
 0x15c   : > { %v1178_v29 = vsel %vm1177_vm12, %v1176_v52, %v1175_v56  ;;  %v1168_v15 = vunpack.c.l.b16 %v1320_v63  ;;  %v1321_v17 = vpack.c.bf16 %v1129_v27, %v1129_v27 }
 0x15d   : > { %v1181_v62 = vsel %vm1180_vm14, %v1179_v12, %v1178_v29  ;;  %v1182_v51 = vrot.slane %v1167_v38, 3 }
 0x15e   : > { %v1185_v33 = vrot.slane %v1168_v15, 2  ;;  %v1169_v45 = vunpack.c.l.b16 %v1321_v17 }
 0x15f   : > { %v1184_v60 = vsel %vm1183_vm15, %v1182_v51, %v1181_v62 }
 0x160   : > { %v1187_v1 = vsel %vm1186_vm0, %v1185_v33, %v1184_v60  ;;  %v1188_v26 = vrot.slane %v1169_v45, 1 }
 0x162   : > { %v1190_v18 = vsel %vm1189_vm1, %v1188_v26, %v1187_v1 }
 0x163   : > { %v1191_v0 = vpack.c.b16 %v1190_v18, %v1190_v18 }
 0x165   : > { %1193 = vst [vmem:[%s195_s25] sm:$0xf] %v1191_v0 }
 0x166 PF: > { %s14_s15 = sadd.s32 1, %s1363_s15  }
 0x167   : > { %p11_p4 = scmp.ge.s32.totalorder %s14_s15, 4  }
 0x169   :  { %13 = sbr.rel (!%p11_p4) target bundleno = 1 (0x1), region = 74 }

// kernel: ddualgcn_head.13
= control target key start
LH: loop header
LB: loop body
LE: loop exit
PB: predicated region body
PF: predicated region fallthrough
CT: control target
= control target key end

     0   :  { %s1415_s30 = smov 0   ;;  %s1524_s0 = inlined_call_operand.<no memory space> [shape: f32[1], index: 0, kind: input, shape index: {}]   ;;  %s1525_s1 = inlined_call_operand.vmem [shape: bf16[2,8,256], index: 1, kind: input, shape index: {}]   ;;  %s1526_s2 = inlined_call_operand.vmem [shape: bf16[2,8,4], index: 2, kind: input, shape index: {}]   ;;  %s1527_s3 = inlined_call_operand.vmem [shape: bf16[4,256], index: 3, kind: input, shape index: {}]   ;;  %s1528_s4 = inlined_call_operand.vmem [shape: bf16[6,8], index: 4, kind: input, shape index: {}]   ;;  %s1529_s5 = inlined_call_operand.vmem [shape: f32[6,1], index: 5, kind: input, shape index: {}]   ;;  %s1530_s6 = inlined_call_operand.vmem [shape: f32[6,1], index: 6, kind: input, shape index: {}]   ;;  %s1531_s7 = inlined_call_operand.vmem [shape: bf16[2,2], index: 7, kind: input, shape index: {}]   ;;  %s1532_s8 = inlined_call_operand.vmem [shape: f32[1,2], index: 8, kind: input, shape index: {}]   ;;  %s1533_s9 = inlined_call_operand.vmem [shape: bf16[4,4], index: 9, kind: input, shape index: {}]   ;;  %s1534_s10 = inlined_call_operand.vmem [shape: f32[4,1], index: 10, kind: input, shape index: {}]   ;;  %s1535_s11 = inlined_call_operand.vmem [shape: bf16[8,4], index: 11, kind: input, shape index: {}]   ;;  %s1536_s12 = inlined_call_operand.vmem [shape: f32[8,1], index: 12, kind: input, shape index: {}]   ;;  %s1537_s13 = inlined_call_operand.vmem [shape: f32[8,1], index: 13, kind: input, shape index: {}]   ;;  %s1538_s14 = inlined_call_operand.vmem [shape: bf16[8,8], index: 14, kind: input, shape index: {}]   ;;  %s1539_s15 = inlined_call_operand.vmem [shape: bf16[8,8], index: 15, kind: input, shape index: {}]   ;;  %s1540_s16 = inlined_call_operand.vmem [shape: f32[8,1], index: 16, kind: input, shape index: {}]   ;;  %s1541_s17 = inlined_call_operand.vmem [shape: f32[8,1], index: 17, kind: input, shape index: {}]   ;;  %s1542_s18 = inlined_call_operand.vmem [shape: bf16[2,8,256], index: 18, kind: output, shape index: {}]  }
   0x1   :  { %1543 = sst [smem:[#allocation3_spill]] %s1524_s0 }
   0x2   :  { %1544 = sst [smem:[#allocation4_spill]] %s1525_s1 }
   0x3   :  { %1545 = sst [smem:[#allocation5_spill]] %s1526_s2 }
   0x4   :  { %s1546_s29 = sld [smem:[#allocation3_spill]] }
   0xa   :  { %23 = sst [smem:[#allocation2]] %s1546_s29 }
   0xb LB: > { %s1241_s0 = sadd.s32 4294967295, %s1312_s30   ;;  %p1245_p0 = scmp.ge.s32.totalorder %s1312_s30, 1  ;;  %s1312_s30 = sphi %s1415_s30, %s29_s30  }
   0xc   : > { %p522_p1 = scmp.lt.s32.totalorder %s1312_s30, 3 }
   0xe   : > { %p523_p2 = pnand %p1245_p0, %p522_p1 }
   0xf   : > { %p580_p3 = scmp.lt.s32.totalorder (!%p523_p2), %s1241_s0, 1  ;;  %s1547_s24 = sld [smem:[#allocation4_spill]] (!%p523_p2) }
  0x10   : > { %526 = sbr.rel (%p523_p2) target bundleno = 1460 (0x5b4), region = 92  ;;  %s966_s1 = sld [smem:[#allocation2]] (!%p523_p2) }
  0x15   : > { %v1314_v0 = vmov 0   ;;  %v656_v1 = vld [vmem:[%s1529_s5] sm:$0x3f]  ;;  %s1550_s0 = smov (!%p580_p3, %s1241_s0), 1  ;;  %vm608_vm0 = vcmask 1043456   ;;  %vm604_vm1 = vcmask 64512  }
  0x16   : > { %647 = vmatprep.mubr.bf16.mxu0 %v1314_v0  ;;  %1302 = vset.pattern.permute.xlu0 %v1314_v0  ;;  %v664_v2 = vld [vmem:[%s1530_s6] sm:$0x3f]  ;;  %s1272_s22 = sshll.u32 %s1550_s0, 3  ;;  %vm735_vm2 = vcmask 15360   ;;  %v1315_v11 = vmov 0.0   ;;  %vm843_vm5 = vcmask 1040384  }
  0x17   : > { %659 = vperm.xlu0 %1302, %v656_v1   ;;  %1303 = vset.pattern.permute.xlu1 %v1314_v0  ;;  %s584_s25 = scalar_lea.vmem %s1547_s24, %s1272_s22  ;;  %v952_v6 = vld [vmem:[%s1537_s13] sm:$0xff]  ;;  %vm1316_vm6 = vmmov 0   ;;  %vm795_vm7 = vcmask 1041408   ;;  %vm791_vm8 = vcmask 31744   ;;  %s1248_s2 = sshll.u32 %s1550_s0, 2 }
  0x18   : > { %v1440_v3 = vld [vmem:[%s584_s25] sm:$0xff]  ;;  %s1548_s25 = sld [smem:[#allocation5_spill]]  ;;  %s593_s24 = scalar_lea.vmem %s1542_s18, %s1272_s22 }
  0x19   : > { %v1252_v4 = vcombine.high %v1440_v3, %v1440_v3  ;;  %v1251_v5 = vcombine.low %v1440_v3, %v1440_v3  ;;  %v598_v8 = vld [vmem:[%s1528_s4] sm:$0x7] }
  0x1a   : > { %v1151_v9 = vld [vmem:[%s1541_s17] sm:$0xff] }
  0x1b   : > { %667 = vperm.xlu0 %1302, %v664_v2   ;;  %1253 = vmatprep.subr.msk.bf16.mxu0 %vm608_vm0, %v1252_v4  ;;  %v610_v7 = vsel %vm608_vm0, %v1251_v5, 0  ;;  %v727_v10 = vld [vmem:[%s1531_s7] sm:$0x1] }
  0x1c   : > { %630 = vmatpush1.bf16.msra.mxu0 %v610_v7  ;;  %v740_v12 = vsel %vm735_vm2, %v727_v10, 0  ;;  %v785_v37 = vld [vmem:[%s1534_s10] sm:$0xf] }
  0x1d   : > { %1279 = vmatprep.subr.bf16.mxu0 %v1315_v11  ;;  %788 = vperm.xlu1 %1303, %v785_v37   ;;  %v944_v38 = vld [vmem:[%s1536_s12] sm:$0xff] }
  0x1e   : > { %v1143_v39 = vld [vmem:[%s1540_s16] sm:$0xff]  ;;  %s588_s26 = scalar_lea.vmem %s1548_s25, %s1248_s2 }
  0x1f   : > { %955 = vperm.xlu0 %1302, %v952_v6   ;;  %1254 = vmatmul.mubr.msk.bf16.vlgmr.msra.gmra.mxu0 %vm604_vm1, %v598_v8  ;;  %v1255_v40 = vld [vmem:[%s1532_s8] ss:$0 sm:$0xff]  ;;  %v596_v8 = vunpack.c.l.bf16 %v1440_v3 }
  0x20   : > { %1280 = vmatpush3.bf16.xpose.msra.mxu0 %v740_v12  ;;  %1281 = vmatprep.mubr.msk.bf16.mxu0 %vm1316_vm6, %v1315_v11  ;;  %v783_v49 = vld [vmem:[%s1533_s9] sm:$0x3] }
  0x21   : > { %947 = vperm.xlu1 %1303, %v944_v38   ;;  %v1262_v57 = vld.sshfl [vmem:[%s1527_s3] sm:$0x33 pattern:$0x76325410] }
  0x22   : > { %v982_v58 = vcombine.high %v1262_v57, %v1262_v57  ;;  %v987_v59 = vsel %vm795_vm7, %v1262_v57, 0  ;;  %v972_v60 = vld [vmem:[%s588_s26] sm:$0xf] }
  0x23   : > { %1154 = vperm.xlu0 %1302, %v1151_v9   ;;  %v891_v6 = vld [vmem:[%s1535_s11] sm:$0xf]  ;;  %v597_v9 = vunpack.c.h.bf16 %v1440_v3 }
  0x25   : > { %1146 = vperm.xlu1 %1303, %v1143_v39  }
  0x92   : > { %v660_v13 = vpop.permute.xlu0 %659 }
  0x96   : > { %v668_v16 = vpop.permute.xlu0 %667 }
  0x98   : > { %v789_v50 = vpop.permute.xlu1 %788 }
  0x9c   : > { %v948_v3 = vpop.permute.xlu1 %947 }
  0xdf   : > { %v649_v14 = vpop.f32.mrf.mxu0 }
  0xe0   : > { %v662_v15 = vmul.f32 %v660_v13, %v649_v14 }
  0xe1   : > { %v651_v17 = vpop.f32.mrf.mxu0 }
  0xe2   : > { %v670_v18 = vadd.f32 %v668_v16, %v662_v15  ;;  %v663_v19 = vmul.f32 %v660_v13, %v651_v17 }
  0xe3   : > { %v653_v20 = vpop.f32.mrf.mxu0 }
  0xe4   : > { %v674_v21 = vmul.f32 0.01, %v670_v18  ;;  %v671_v22 = vadd.f32 %v668_v16, %v663_v19  ;;  %vm672_vm3 = vcmp.ge.f32.partialorder %v670_v18, 0.0 }
  0xe5   : > { %v654_v23 = vpop.f32.mrf.mxu0 }
  0xe6   : > { %vm673_vm4 = vcmp.ge.f32.partialorder %v671_v22, 0.0  ;;  %v675_v24 = vmul.f32 0.01, %v671_v22  ;;  %v676_v25 = vsel %vm672_vm3, %v670_v18, %v674_v21 }
  0xe7   : > { %v678_v26 = vpack.c.bf16 %v676_v25, %v676_v25 }
  0xe8   : > { %v677_v27 = vsel %vm673_vm4, %v671_v22, %v675_v24  ;;  %v956_v22 = vpop.permute.xlu0 %955 }
  0xe9   : > { %v679_v28 = vpack.c.bf16 %v677_v27, %v677_v27  ;;  %v682_v29 = vrot.slane %v678_v26, 2 }
  0xeb   : > { %718 = vmatprep.mubr.bf16.mxu1 %v679_v28  ;;  %v683_v30 = vrot.slane %v679_v28, 2  ;;  %v845_v31 = vsel %vm843_vm5, %v682_v29, 0 }
  0xed   : > { %700 = vmatprep.subr.bf16.mxu1 %v683_v30  ;;  %1258 = vmatprep.subr.msk.bf16.mxu0 %vm843_vm5, %v683_v30 }
  0xee   : > { %701 = vmatpush1.bf16.xpose.msra.mxu1 %v682_v29  ;;  %v967_v29 = vstv %s966_s1 }
  0xef   : > { %1285 = vmatprep.subr.bf16.mxu1 %v1315_v11 }
  0xf5   : > { %719 = vmatmul.mubr.bf16.vlgmr.msra.gmra.mxu1 %v678_v26 }
  0xf6   : > { %1287 = vmatprep.mubr.msk.bf16.mxu1 %vm1316_vm6, %v1315_v11 }
 0x1b5   : > { %v720_v32 = vpop.f32.mrf.mxu1 }
 0x1b6   : > { %v726_v33 = vpack.c.bf16 %v720_v32, %v720_v32 }
 0x1b7   : > { %v722_v34 = vpop.f32.mrf.mxu1 }
 0x1b8   : > { %1282 = vmatmul.mubr.msk.bf16.vlgmr.msra.gmra.mxu0 %vm735_vm2, %v726_v33 }
 0x1b9   : > { %865 = vmatpush1.bf16.msra.mxu0 %v845_v31  ;;  %v723_v35 = vpop.f32.mrf.mxu1  ;;  %882 = vmatprep.mubr.bf16.mxu0 %v1314_v0 }
 0x1ba   : > { %1263 = vmatprep.subr.msk.bf16.mxu0 %vm795_vm7, %v982_v58 }
 0x1bb   : > { %v724_v36 = vpop.f32.mrf.mxu1 }
 0x278   : > { %v776_v41 = vpop.f32.mrf.mxu0 }
 0x279   : > { %v777_v42 = vadd.f32 %v1255_v40, %v776_v41  ;;  %v1040_v41 = vld [vmem:[%s1539_s15] sm:$0xf] }
 0x27a   : > { %v1283_v43 = vpop.f32.mrf.mxu0 }
 0x27b   : > { %v782_v44 = vadd.f32 %v777_v42, %v720_v32 }
 0x27c   : > { %v779_v45 = vpop.f32.mrf.mxu0 }
 0x27d   : > { %v784_v46 = vpack.c.bf16 %v782_v44, %v782_v44 }
 0x27e   : > { %v1284_v47 = vpop.f32.mrf.mxu0 }
 0x27f   : > { %v797_v48 = vsel %vm795_vm7, %v784_v46, 0 }
 0x280   : > { %1286 = vmatpush3.bf16.msra.mxu1 %v797_v48  ;;  %v1147_v48 = vpop.permute.xlu1 %1146 }
 0x283   : > { %1288 = vmatmul.mubr.msk.bf16.vlgmr.msra.gmra.mxu1 %vm791_vm8, %v783_v49 }
 0x284   : > { %935 = vmatprep.mubr.bf16.mxu1 %v1314_v0 }
 0x343   : > { %v833_v51 = vpop.f32.mrf.mxu1 }
 0x344   : > { %v834_v52 = vadd.f32 %v833_v51, %v789_v50 }
 0x345   : > { %v1289_v53 = vpop.f32.mrf.mxu1 }
 0x346   : > { %v839_v54 = vpack.c.bf16 %v834_v52, %v834_v52  ;;  %v1155_v52 = vpop.permute.xlu0 %1154 }
 0x347   : > { %v836_v55 = vpop.f32.mrf.mxu1 }
 0x348   : > { %1259 = vmatmul.mubr.msk.bf16.vlgmr.msra.gmra.mxu0 %vm735_vm2, %v839_v54 }
 0x349   : > { %v1290_v56 = vpop.f32.mrf.mxu1  ;;  %1024 = vmatprep.mubr.bf16.mxu0 %v1314_v0  ;;  %1007 = vmatpush1.bf16.msra.mxu0 %v987_v59 }
 0x350   : > { %1264 = vmatmul.mubr.msk.bf16.vlgmr.msra.gmra.mxu0 %vm791_vm8, %v972_v60 }
 0x351   : > { %1134 = vmatprep.mubr.bf16.mxu0 %v1314_v0 }
 0x408   : > { %v884_v61 = vpop.f32.mrf.mxu0 }
 0x409   : > { %v892_v62 = vpack.c.bf16 %v884_v61, %v884_v61 }
 0x40a   : > { %v886_v63 = vpop.f32.mrf.mxu0 }
 0x40b   : > { %v893_v1 = vpack.c.bf16 %v886_v63, %v886_v63  ;;  %v898_v4 = vsel %vm795_vm7, %v892_v62, 0 }
 0x40c   : > { %v888_v2 = vpop.f32.mrf.mxu0 }
 0x40d   : > { %1260 = vmatprep.subr.msk.bf16.mxu1 %vm795_vm7, %v893_v1 }
 0x40e   : > { %v889_v5 = vpop.f32.mrf.mxu0  ;;  %918 = vmatpush1.bf16.msra.mxu1 %v898_v4 }
 0x410   : > { %v1026_v7 = vpop.f32.mrf.mxu0 }
 0x411   : > { %1261 = vmatmul.mubr.msk.bf16.vlgmr.msra.gmra.mxu1 %vm791_vm8, %v891_v6  ;;  %v1033_v11 = vmul.f32 %v1026_v7, %v596_v8 }
 0x412   : > { %1084 = vmatprep.mubr.bf16.mxu1 %v1314_v0  ;;  %v1028_v10 = vpop.f32.mrf.mxu0  ;;  %v1037_v0 = vld [vmem:[%s1538_s14] sm:$0xf] }
 0x413   : > { %v1034_v12 = vmul.f32 %v1028_v10, %v597_v9  ;;  %v1035_v14 = vadd.f32 %v1033_v11, %v596_v8 }
 0x414   : > { %v1030_v13 = vpop.f32.mrf.mxu0 }
 0x415   : > { %v1036_v15 = vadd.f32 %v1034_v12, %v597_v9  ;;  %v1038_v17 = vpack.c.bf16 %v1035_v14, %v1035_v14 }
 0x416   : > { %v1031_v16 = vpop.f32.mrf.mxu0 }
 0x417   : > { %v1039_v18 = vpack.c.bf16 %v1036_v15, %v1036_v15  ;;  %v1097_v19 = vsel %vm608_vm0, %v1038_v17, 0 }
 0x419   : > { %1267 = vmatprep.subr.msk.bf16.mxu0 %vm608_vm0, %v1039_v18 }
 0x41a   : > { %1117 = vmatpush1.bf16.msra.mxu0 %v1097_v19 }
 0x41d   : > { %1268 = vmatmul.mubr.msk.bf16.vlgmr.msra.gmra.mxu0 %vm604_vm1, %v1037_v0 }
 0x4d1   : > { %v937_v20 = vpop.f32.mrf.mxu1 }
 0x4d2   : > { %v950_v21 = vmul.f32 %v948_v3, %v937_v20 }
 0x4d3   : > { %v939_v23 = vpop.f32.mrf.mxu1 }
 0x4d4   : > { %v958_v24 = vadd.f32 %v956_v22, %v950_v21  ;;  %v951_v25 = vmul.f32 %v948_v3, %v939_v23 }
 0x4d5   : > { %v941_v26 = vpop.f32.mrf.mxu1 }
 0x4d6   : > { %vm960_vm9 = vcmp.ge.f32.partialorder %v958_v24, 0.0  ;;  %v962_v27 = vmul.f32 0.01, %v958_v24  ;;  %v959_v28 = vadd.f32 %v956_v22, %v951_v25 }
 0x4d7   : > { %v942_v30 = vpop.f32.mrf.mxu1 }
 0x4d8   : > { %v964_v31 = vsel %vm960_vm9, %v958_v24, %v962_v27  ;;  %vm961_vm10 = vcmp.ge.f32.partialorder %v959_v28, 0.0  ;;  %v963_v32 = vmul.f32 0.01, %v959_v28 }
 0x4d9   : > { %v968_v33 = vmul.f32 %v967_v29, %v964_v31 }
 0x4da   : > { %v965_v34 = vsel %vm961_vm10, %v959_v28, %v963_v32 }
 0x4db   : > { %v969_v35 = vmul.f32 %v967_v29, %v965_v34  ;;  %v970_v36 = vadd.f32 %v968_v33, %v596_v8 }
 0x4dd   : > { %v971_v37 = vadd.f32 %v969_v35, %v597_v9  ;;  %v1041_v38 = vpack.c.bf16 %v970_v36, %v970_v36  ;;  %v1136_v42 = vpop.f32.mrf.mxu0 }
 0x4df   : > { %v1042_v39 = vpack.c.bf16 %v971_v37, %v971_v37  ;;  %v1047_v40 = vsel %vm608_vm0, %v1041_v38, 0  ;;  %v1138_v43 = vpop.f32.mrf.mxu0 }
 0x4e1   : > { %1265 = vmatprep.subr.msk.bf16.mxu1 %vm608_vm0, %v1042_v39  ;;  %v1140_v44 = vpop.f32.mrf.mxu0 }
 0x4e2   : > { %1067 = vmatpush1.bf16.msra.mxu1 %v1047_v40 }
 0x4e3   : > { %v1141_v45 = vpop.f32.mrf.mxu0 }
 0x4e5   : > { %1266 = vmatmul.mubr.msk.bf16.vlgmr.msra.gmra.mxu1 %vm604_vm1, %v1040_v41 }
 0x5a5   : > { %v1086_v46 = vpop.f32.mrf.mxu1 }
 0x5a6   : > { %v1137_v47 = vadd.f32 %v1136_v42, %v1086_v46 }
 0x5a7   : > { %v1088_v49 = vpop.f32.mrf.mxu1 }
 0x5a8   : > { %v1149_v50 = vmul.f32 %v1147_v48, %v1137_v47  ;;  %v1139_v51 = vadd.f32 %v1138_v43, %v1088_v49 }
 0x5a9   : > { %v1090_v53 = vpop.f32.mrf.mxu1 }
 0x5aa   : > { %v1157_v54 = vadd.f32 %v1155_v52, %v1149_v50  ;;  %v1150_v55 = vmul.f32 %v1147_v48, %v1139_v51 }
 0x5ab   : > { %v1091_v56 = vpop.f32.mrf.mxu1 }
 0x5ac   : > { %v1161_v57 = vmul.f32 0.01, %v1157_v54  ;;  %v1158_v58 = vadd.f32 %v1155_v52, %v1150_v55  ;;  %vm1159_vm11 = vcmp.ge.f32.partialorder %v1157_v54, 0.0 }
 0x5ae   : > { %vm1160_vm12 = vcmp.ge.f32.partialorder %v1158_v58, 0.0  ;;  %v1162_v59 = vmul.f32 0.01, %v1158_v58  ;;  %v1163_v60 = vsel %vm1159_vm11, %v1157_v54, %v1161_v57 }
 0x5b0   : > { %v1164_v61 = vsel %vm1160_vm12, %v1158_v58, %v1162_v59 }
 0x5b1   : > { %v1274_v62 = vpack.c.bf16 %v1164_v61, %v1163_v60 }
 0x5b3   : > { %1173 = vst [vmem:[%s593_s24] sm:$0xff] %v1274_v62 }
 0x5b4 PF: > { %s29_s30 = sadd.s32 1, %s1312_s30  }
 0x5b5   : > { %p26_p4 = scmp.ge.s32.totalorder %s29_s30, 4  }
 0x5b7   :  { %28 = sbr.rel (!%p26_p4) target bundleno = 11 (0xb), region = 125 }

// kernel: ddualgcn_head.12
= control target key start
LH: loop header
LB: loop body
LE: loop exit
PB: predicated region body
PF: predicated region fallthrough
CT: control target
= control target key end

     0   :  { %s1024_s23 = smov 0   ;;  %s1114_s0 = inlined_call_operand.<no memory space> [shape: f32[1], index: 0, kind: input, shape index: {}]   ;;  %s1115_s1 = inlined_call_operand.vmem [shape: bf16[2,8,4], index: 1, kind: input, shape index: {}]   ;;  %s1116_s2 = inlined_call_operand.vmem [shape: bf16[4,8], index: 2, kind: input, shape index: {}]   ;;  %s1117_s3 = inlined_call_operand.vmem [shape: f32[4,1], index: 3, kind: input, shape index: {}]   ;;  %s1118_s4 = inlined_call_operand.vmem [shape: bf16[4,8], index: 4, kind: input, shape index: {}]   ;;  %s1119_s5 = inlined_call_operand.vmem [shape: f32[4,1], index: 5, kind: input, shape index: {}]   ;;  %s1120_s6 = inlined_call_operand.vmem [shape: bf16[4,8], index: 6, kind: input, shape index: {}]   ;;  %s1121_s7 = inlined_call_operand.vmem [shape: f32[4,1], index: 7, kind: input, shape index: {}]   ;;  %s1122_s8 = inlined_call_operand.vmem [shape: bf16[4,4], index: 8, kind: input, shape index: {}]   ;;  %s1123_s9 = inlined_call_operand.vmem [shape: f32[4,1], index: 9, kind: input, shape index: {}]   ;;  %s1124_s10 = inlined_call_operand.vmem [shape: bf16[8,4], index: 10, kind: input, shape index: {}]   ;;  %s1125_s11 = inlined_call_operand.vmem [shape: f32[8,1], index: 11, kind: input, shape index: {}]   ;;  %s1126_s12 = inlined_call_operand.vmem [shape: bf16[2,8,4], index: 12, kind: output, shape index: {}]  }
   0x1   :  { %17 = sst [smem:[#allocation2]] %s1114_s0 }
   0x2 LB: > { %s856_s24 = sadd.s32 4294967295, %s951_s23   ;;  %p860_p0 = scmp.ge.s32.totalorder %s951_s23, 1  ;;  %s951_s23 = sphi %s1024_s23, %s23_s23  }
   0x3   : > { %p362_p1 = scmp.lt.s32.totalorder %s951_s23, 3 }
   0x5   : > { %p363_p2 = pnand %p860_p0, %p362_p1 }
   0x6   : > { %p402_p3 = scmp.lt.s32.totalorder (!%p363_p2), %s856_s24, 1  ;;  %s797_s14 = sld [smem:[#allocation2]] (!%p363_p2) }
   0x7   : > { %366 = sbr.rel (%p363_p2) target bundleno = 1093 (0x445), region = 68 }
   0xc   : > { %v953_v0 = vmov 0.0   ;;  %vm954_vm0 = vmmov 0   ;;  %s1128_s24 = smov (!%p402_p3, %s856_s24), 1  ;;  %v519_v1 = vld [vmem:[%s1121_s7] sm:$0xf]  ;;  %v955_v3 = vmov 0  }
   0xd   : > { %886 = vmatprep.subr.bf16.mxu0 %v953_v0  ;;  %888 = vmatprep.mubr.msk.bf16.mxu0 %vm954_vm0, %v953_v0  ;;  %v414_v2 = vld [vmem:[%s1117_s3] sm:$0xf]  ;;  %s861_s28 = sshll.u32 %s1128_s24, 2  ;;  %vm424_vm1 = vcmask 1043456   ;;  %vm420_vm2 = vcmask 64512   ;;  %vm642_vm3 = vcmask 1041408  }
   0xe   : > { %892 = vmatprep.subr.bf16.mxu1 %v953_v0  ;;  %894 = vmatprep.mubr.msk.bf16.mxu1 %vm954_vm0, %v953_v0  ;;  %s405_s13 = scalar_lea.vmem %s1115_s1, %s861_s28  ;;  %v469_v5 = vld [vmem:[%s1119_s5] sm:$0xf]  ;;  %vm570_vm4 = vcmask 31744   ;;  %vm617_vm5 = vcmask 27648   ;;  %s409_s17 = scalar_lea.vmem %s1126_s12, %s861_s28 }
   0xf   : > { %940 = vset.pattern.permute.xlu1 %v955_v3  ;;  %939 = vset.pattern.permute.xlu0 %v955_v3  ;;  %v1052_v4 = vld [vmem:[%s405_s13] sm:$0xf] }
  0x10   : > { %522 = vperm.xlu0 %939, %v519_v1   ;;  %417 = vperm.xlu1 %940, %v414_v2   ;;  %v426_v6 = vsel %vm424_vm1, %v1052_v4, 0  ;;  %v413_v7 = vld [vmem:[%s1116_s2] sm:$0x3] }
  0x11   : > { %887 = vmatpush3.bf16.msra.mxu0 %v426_v6  ;;  %893 = vmatpush3.bf16.msra.mxu1 %v426_v6  ;;  %v468_v8 = vld [vmem:[%s1118_s4] sm:$0x3] }
  0x12   : > { %898 = vmatprep.subr.bf16.mxu0 %v953_v0  ;;  %v742_v9 = vld [vmem:[%s1125_s11] sm:$0xff]  ;;  %904 = vmatprep.subr.bf16.mxu1 %v953_v0 }
  0x13   : > { %v518_v10 = vld [vmem:[%s1120_s6] sm:$0x3] }
  0x14   : > { %472 = vperm.xlu0 %939, %v469_v5   ;;  %889 = vmatmul.mubr.msk.bf16.vlgmr.msra.gmra.mxu0 %vm420_vm2, %v413_v7  ;;  %v688_v11 = vld [vmem:[%s1123_s9] sm:$0xf] }
  0x15   : > { %895 = vmatmul.mubr.msk.bf16.vlgmr.msra.gmra.mxu1 %vm420_vm2, %v468_v8  ;;  %899 = vmatpush3.bf16.msra.mxu0 %v426_v6  ;;  %v686_v1 = vld [vmem:[%s1122_s8] sm:$0x3] }
  0x16   : > { %900 = vmatprep.mubr.msk.bf16.mxu0 %vm954_vm0, %v953_v0  ;;  %910 = vmatprep.subr.bf16.mxu0 %v953_v0 }
  0x17   : > { %906 = vmatprep.mubr.msk.bf16.mxu1 %vm954_vm0, %v953_v0  ;;  %691 = vperm.xlu1 %940, %v688_v11   ;;  %v740_v11 = vld [vmem:[%s1124_s10] sm:$0xf] }
  0x18   : > { %745 = vperm.xlu0 %939, %v742_v9  }
  0x1c   : > { %901 = vmatmul.mubr.msk.bf16.vlgmr.msra.gmra.mxu0 %vm420_vm2, %v518_v10 }
  0x1d   : > { %912 = vmatprep.mubr.msk.bf16.mxu0 %vm954_vm0, %v953_v0 }
  0x8b   : > { %v418_v12 = vpop.permute.xlu1 %417  ;;  %v523_v24 = vpop.permute.xlu0 %522 }
  0x8f   : > { %v473_v31 = vpop.permute.xlu0 %472 }
  0x92   : > { %v692_v3 = vpop.permute.xlu1 %691 }
  0xd4   : > { %v462_v13 = vpop.f32.mrf.mxu0 }
  0xd5   : > { %v512_v14 = vpop.f32.mrf.mxu1  ;;  %v463_v15 = vadd.f32 %v462_v13, %v418_v12  ;;  %v746_v12 = vpop.permute.xlu0 %745 }
  0xd6   : > { %v890_v16 = vpop.f32.mrf.mxu0  ;;  %v513_v33 = vadd.f32 %v512_v14, %v473_v31 }
  0xd7   : > { %v896_v17 = vpop.f32.mrf.mxu1  ;;  %v638_v18 = vpack.c.bf16 %v463_v15, %v463_v15 }
  0xd8   : > { %v465_v19 = vpop.f32.mrf.mxu0  ;;  %v568_v34 = vpack.c.bf16 %v513_v33, %v513_v33  ;;  %v798_v17 = vstv %s797_s14 }
  0xd9   : > { %v515_v20 = vpop.f32.mrf.mxu1  ;;  %v644_v21 = vsel %vm642_vm3, %v638_v18, 0  ;;  %v412_v18 = vunpack.c.l.bf16 %v1052_v4 }
  0xda   : > { %v891_v22 = vpop.f32.mrf.mxu0  ;;  %911 = vmatpush3.bf16.msra.mxu0 %v644_v21 }
  0xdb   : > { %v897_v23 = vpop.f32.mrf.mxu1  ;;  %922 = vmatprep.subr.bf16.mxu0 %v953_v0 }
  0xdc   : > { %v562_v25 = vpop.f32.mrf.mxu0 }
  0xdd   : > { %v563_v26 = vadd.f32 %v562_v25, %v523_v24 }
  0xde   : > { %v902_v27 = vpop.f32.mrf.mxu0 }
  0xdf   : > { %v569_v28 = vpack.c.bf16 %v563_v26, %v563_v26 }
  0xe0   : > { %v565_v29 = vpop.f32.mrf.mxu0 }
  0xe1   : > { %v575_v30 = vsel %vm570_vm4, %v569_v28, 0 }
  0xe2   : > { %v903_v32 = vpop.f32.mrf.mxu0  ;;  %905 = vmatpush3.bf16.xpose.msra.mxu1 %v575_v30 }
  0xe3   : > { %916 = vmatprep.subr.bf16.mxu1 %v953_v0 }
  0xe9   : > { %907 = vmatmul.mubr.msk.bf16.vlgmr.msra.gmra.mxu1 %vm570_vm4, %v568_v34 }
  0xea   : > { %918 = vmatprep.mubr.msk.bf16.mxu1 %vm954_vm0, %v953_v0 }
 0x1a9   : > { %v611_v35 = vpop.f32.mrf.mxu1 }
 0x1aa   : > { %v618_v36 = vsel %vm617_vm5, %v611_v35, -inf }
 0x1ab   : > { %v619_v37 = vrot.slane %v618_v36, 4  ;;  %v908_v38 = vpop.f32.mrf.mxu1 }
 0x1ad   : > { %v620_v39 = vmax.f32 %v618_v36, %v619_v37  ;;  %v614_v40 = vpop.f32.mrf.mxu1 }
 0x1af   : > { %v621_v41 = vrot.slane %v620_v39, 2  ;;  %v909_v42 = vpop.f32.mrf.mxu1 }
 0x1b1   : > { %v622_v43 = vmax.f32 %v620_v39, %v621_v41 }
 0x1b3   : > { %v623_v44 = vrot.slane %v622_v43, 1 }
 0x1b5   : > { %v624_v45 = vmax.f32 %v622_v43, %v623_v44 }
 0x1b7   : > { %v625_v46 = vsub.f32 %v611_v35, %v624_v45 }
 0x1b9   : > { %v626_v47 = vmul.f32 1.442695, %v625_v46 }
 0x1bb   : > { %941 = vpow2.f32 %v626_v47 }
 0x1c8   : > { %v942_v48 = vpop.eup %941 }
 0x1c9   : > { %v628_v49 = vsel %vm617_vm5, %v942_v48, 0.0 }
 0x1ca   : > { %v629_v50 = vrot.slane %v628_v49, 4 }
 0x1cc   : > { %v630_v51 = vadd.f32 %v629_v50, %v628_v49 }
 0x1ce   : > { %v631_v52 = vrot.slane %v630_v51, 2 }
 0x1d0   : > { %v632_v53 = vadd.f32 %v631_v52, %v630_v51 }
 0x1d2   : > { %v633_v54 = vrot.slane %v632_v53, 1 }
 0x1d4   : > { %v634_v55 = vadd.f32 %v633_v54, %v632_v53 }
 0x1d6   : > { %943 = vrcp.f32 %v634_v55 }
 0x1e3   : > { %v944_v56 = vpop.eup %943 }
 0x1e4   : > { %v636_v57 = vmul.f32 %v944_v56, %v942_v48 }
 0x1e6   : > { %v637_v58 = vpack.c.bf16 %v636_v57, %v636_v57 }
 0x1e8   : > { %913 = vmatmul.mubr.msk.bf16.vlgmr.msra.gmra.mxu0 %vm570_vm4, %v637_v58 }
 0x1e9   : > { %924 = vmatprep.mubr.msk.bf16.mxu0 %vm954_vm0, %v953_v0 }
 0x2a8   : > { %v680_v59 = vpop.f32.mrf.mxu0 }
 0x2a9   : > { %v687_v60 = vpack.c.bf16 %v680_v59, %v680_v59 }
 0x2aa   : > { %v914_v61 = vpop.f32.mrf.mxu0 }
 0x2ab   : > { %v698_v62 = vsel %vm642_vm3, %v687_v60, 0 }
 0x2ac   : > { %v683_v63 = vpop.f32.mrf.mxu0  ;;  %917 = vmatpush3.bf16.msra.mxu1 %v698_v62 }
 0x2ae   : > { %v915_v2 = vpop.f32.mrf.mxu0 }
 0x2af   : > { %919 = vmatmul.mubr.msk.bf16.vlgmr.msra.gmra.mxu1 %vm570_vm4, %v686_v1 }
 0x36f   : > { %v734_v5 = vpop.f32.mrf.mxu1 }
 0x370   : > { %v735_v6 = vadd.f32 %v734_v5, %v692_v3 }
 0x371   : > { %v920_v7 = vpop.f32.mrf.mxu1 }
 0x372   : > { %v741_v8 = vpack.c.bf16 %v735_v6, %v735_v6 }
 0x373   : > { %v737_v0 = vpop.f32.mrf.mxu1 }
 0x374   : > { %v752_v9 = vsel %vm642_vm3, %v741_v8, 0 }
 0x375   : > { %v921_v10 = vpop.f32.mrf.mxu1  ;;  %923 = vmatpush3.bf16.msra.mxu0 %v752_v9 }
 0x378   : > { %925 = vmatmul.mubr.msk.bf16.vlgmr.msra.gmra.mxu0 %vm570_vm4, %v740_v11 }
 0x438   : > { %v788_v13 = vpop.f32.mrf.mxu0 }
 0x439   : > { %v789_v14 = vadd.f32 %v788_v13, %v746_v12 }
 0x43a   : > { %v926_v15 = vpop.f32.mrf.mxu0 }
 0x43b   : > { %vm794_vm6 = vcmp.ge.f32.partialorder %v789_v14, 0.0  ;;  %v795_v16 = vmul.f32 0.01, %v789_v14 }
 0x43c   : > { %v791_v19 = vpop.f32.mrf.mxu0 }
 0x43d   : > { %v796_v20 = vsel %vm794_vm6, %v789_v14, %v795_v16 }
 0x43e   : > { %v799_v21 = vmul.f32 %v798_v17, %v796_v20  ;;  %v927_v22 = vpop.f32.mrf.mxu0 }
 0x440   : > { %v800_v23 = vadd.f32 %v799_v21, %v412_v18 }
 0x442   : > { %v801_v24 = vpack.c.bf16 %v800_v23, %v800_v23 }
 0x444   : > { %802 = vst.msk [vmem:[%s409_s17] sm:$0xf] %vm617_vm5, %v801_v24 }
 0x445 PF: > { %s23_s23 = sadd.s32 1, %s951_s23  }
 0x446   : > { %p20_p4 = scmp.ge.s32.totalorder %s23_s23, 4  }
 0x448   :  { %22 = sbr.rel (!%p20_p4) target bundleno = 2 (0x2), region = 98 }

// kernel: ddualgcn_head.15
= control target key start
LH: loop header
LB: loop body
LE: loop exit
PB: predicated region body
PF: predicated region fallthrough
CT: control target
= control target key end

     0   :  { %s2871_s21 = smov 0   ;;  %s2873_s22 = smov 0   ;;  %s3339_s0 = inlined_call_operand.vmem [shape: bf16[2,8,512], index: 0, kind: input, shape index: {}]   ;;  %s3340_s1 = inlined_call_operand.vmem [shape: bf16[9,8,8], index: 1, kind: input, shape index: {}]   ;;  %s3341_s2 = inlined_call_operand.vmem [shape: bf16[2,8,512], index: 2, kind: input, shape index: {}]   ;;  %s3342_s3 = inlined_call_operand.vmem [shape: bf16[9,8,8], index: 3, kind: input, shape index: {}]   ;;  %s3343_s4 = inlined_call_operand.vmem [shape: f32[8,1], index: 4, kind: input, shape index: {}]   ;;  %s3344_s5 = inlined_call_operand.vmem [shape: f32[8,1], index: 5, kind: input, shape index: {}]   ;;  %s3345_s6 = inlined_call_operand.vmem [shape: f32[2,8,384], index: 6, kind: output, shape index: {}]  }
   0x1   :  { %s2875_s23 = smov 0  }
   0x2 LB: > { %s28_s24 = sadd.s32 1, %s2819_s22  ;;  %p2523_p0 = scmp.ge.s32.totalorder %s2823_s23, 1  ;;  %s2823_s23 = sphi %s2875_s23, %s16_s23   ;;  %s2819_s22 = sphi %s2873_s22, %s3347_s22   ;;  %s2815_s21 = sphi %s2871_s21, %s3346_s21  }
   0x3   : > { %p30_p1 = scmp.ge.s32.totalorder %s28_s24, 2  ;;  %p272_p2 = scmp.lt.s32.totalorder %s2823_s23, 3 }
   0x5   : > { %s3349_s24 = smov (%p30_p1, %s28_s24), 0  ;;  %p273_p3 = pnand %p2523_p0, %p272_p2 }
   0x6   : > { %p327_p4 = scmp.lt.s32.totalorder (!%p273_p3), %s2815_s21, 1  ;;  %s2828_s29 = smov (!%p273_p3), 127  }
   0x7   : > { %276 = sbr.rel (%p273_p3) target bundleno = 483 (0x1e3), region = 44  ;;  %s2829_s30 = smov (!%p273_p3), 126  }
   0x8   : > { %s2830_s7 = smov (!%p273_p3), 110   ;;  %s2831_s8 = smov (!%p273_p3), 109  }
   0x9   : > { %s2832_s9 = smov (!%p273_p3), 108   ;;  %s2833_s10 = smov (!%p273_p3), 92  }
   0xa   : > { %s2834_s11 = smov (!%p273_p3), 91   ;;  %s2835_s15 = smov (!%p273_p3), 90  }
   0xc   : > { %v2825_v0 = vmov 0.0   ;;  %s3351_s21 = smov (!%p327_p4, %s2815_s21), 1  ;;  %v2826_v1 = vmov 0   ;;  %vm2827_vm0 = vmmov 0   ;;  %vm386_vm1 = vcmask 1039360  }
   0xd   : > { %2647 = vmatprep.subr.bf16.mxu1 %v2825_v0  ;;  %436 = vmatprep.mubr.bf16.mxu0 %v2826_v1  ;;  %s2609_s25 = sshll.u32 %s3351_s21, 4  ;;  %vm394_vm2 = vcmask 1043456   ;;  %v2529_v23 = vld [vmem:[%s3340_s1 + $0x4] sm:$0xf]  ;;  %vm390_vm3 = vcmask 64512   ;;  %vm588_vm4 = vcmask 1031168  }
   0xe   : > { %2649 = vmatprep.mubr.msk.bf16.mxu1 %vm2827_vm0, %v2825_v0  ;;  %2791 = vset.pattern.permute.xlu0 %v2826_v1  ;;  %s331_s28 = scalar_lea.vmem %s3339_s0, %s2609_s25  ;;  %s340_s14 = scalar_lea.vmem %s3341_s2, %s2609_s25  ;;  %v365_v33 = vld [vmem:[%s3340_s1] sm:$0xf]  ;;  %vm698_vm5 = vcmask 900096   ;;  %v2540_v43 = vld [vmem:[%s3340_s1 + $0x8] sm:$0xf]  ;;  %vm808_vm6 = vcmask 891904  }
   0xf   : > { %2792 = vset.pattern.permute.xlu1 %v2826_v1  ;;  %v364_v2 = vld [vmem:[%s331_s28 + $0x8] sm:$0xff]  ;;  %v363_v3 = vld [vmem:[%s331_s28] sm:$0xff]  ;;  %vm918_vm7 = vcmask 883712   ;;  %v2548_v63 = vld [vmem:[%s3340_s1 + $0x10] sm:$0xf]  ;;  %vm1028_vm8 = vcmask 752640  }
  0x10   : > { %v2903_v4 = vcombine.low %v364_v2, %v364_v2  ;;  %v2905_v5 = vcombine.low %v363_v3, %v363_v3  ;;  %v2533_v6 = vcombine.high %v364_v2, %v364_v2  ;;  %v2911_v7 = vcombine.high %v363_v3, %v363_v3  ;;  %v1348_v8 = vld [vmem:[%s340_s14] sm:$0xff]  ;;  %v1349_v11 = vld [vmem:[%s340_s14 + $0x8] sm:$0xff]  ;;  %s2755_s16 = smul.u32 24, %s3351_s21 }
  0x11   : > { %v2970_v9 = vcombine.low %v1348_v8, %v1348_v8  ;;  %v2972_v10 = vcombine.high %v1348_v8, %v1348_v8  ;;  %v2978_v12 = vcombine.low %v1349_v11, %v1349_v11  ;;  %v2980_v13 = vcombine.high %v1349_v11, %v1349_v11  ;;  %v2544_v53 = vld [vmem:[%s3340_s1 + $0xc] sm:$0xf] }
  0x12   : > { %382 = vrot.lane.b32.xlu1 %v2903_v4, %s2828_s29  ;;  %378 = vrot.lane.b32.xlu0 %v2905_v5, %s2828_s29  ;;  %v489_v25 = vsel %vm394_vm2, %v2905_v5, 0  ;;  %v495_v27 = vsel %vm394_vm2, %v2903_v4, 0  ;;  %vm1138_vm9 = vcmask 744448   ;;  %vm1248_vm10 = vcmask 736256   ;;  %s361_s19 = scalar_lea.vmem %s3345_s6, %s2755_s16 }
  0x16   : > { %384 = vrot.lane.b32.xlu1 %v2533_v6, %s2828_s29  ;;  %380 = vrot.lane.b32.xlu0 %v2911_v7, %s2828_s29 }
  0x1a   : > { %580 = vrot.lane.b32.xlu0 %v2905_v5, %s2829_s30  ;;  %582 = vrot.lane.b32.xlu1 %v2911_v7, %s2829_s30 }
  0x1e   : > { %584 = vrot.lane.b32.xlu0 %v2903_v4, %s2829_s30  ;;  %586 = vrot.lane.b32.xlu1 %v2533_v6, %s2829_s30 }
  0x22   : > { %690 = vrot.lane.b32.xlu0 %v2905_v5, %s2830_s7  ;;  %692 = vrot.lane.b32.xlu1 %v2911_v7, %s2830_s7 }
  0x26   : > { %694 = vrot.lane.b32.xlu0 %v2903_v4, %s2830_s7  ;;  %696 = vrot.lane.b32.xlu1 %v2533_v6, %s2830_s7 }
  0x2a   : > { %800 = vrot.lane.b32.xlu0 %v2905_v5, %s2831_s8  ;;  %802 = vrot.lane.b32.xlu1 %v2911_v7, %s2831_s8 }
  0x2e   : > { %804 = vrot.lane.b32.xlu0 %v2903_v4, %s2831_s8  ;;  %806 = vrot.lane.b32.xlu1 %v2533_v6, %s2831_s8 }
  0x32   : > { %910 = vrot.lane.b32.xlu0 %v2905_v5, %s2832_s9  ;;  %912 = vrot.lane.b32.xlu1 %v2911_v7, %s2832_s9 }
  0x36   : > { %914 = vrot.lane.b32.xlu0 %v2903_v4, %s2832_s9  ;;  %916 = vrot.lane.b32.xlu1 %v2533_v6, %s2832_s9 }
  0x3a   : > { %1020 = vrot.lane.b32.xlu0 %v2905_v5, %s2833_s10  ;;  %1022 = vrot.lane.b32.xlu1 %v2911_v7, %s2833_s10 }
  0x3e   : > { %1024 = vrot.lane.b32.xlu0 %v2903_v4, %s2833_s10  ;;  %1026 = vrot.lane.b32.xlu1 %v2533_v6, %s2833_s10 }
  0x42   : > { %1130 = vrot.lane.b32.xlu0 %v2905_v5, %s2834_s11  ;;  %1132 = vrot.lane.b32.xlu1 %v2911_v7, %s2834_s11 }
  0x46   : > { %1134 = vrot.lane.b32.xlu0 %v2903_v4, %s2834_s11  ;;  %1136 = vrot.lane.b32.xlu1 %v2533_v6, %s2834_s11 }
  0x4a   : > { %1240 = vrot.lane.b32.xlu0 %v2905_v5, %s2835_s15  ;;  %1242 = vrot.lane.b32.xlu1 %v2911_v7, %s2835_s15 }
  0x4e   : > { %1244 = vrot.lane.b32.xlu0 %v2903_v4, %s2835_s15  ;;  %1246 = vrot.lane.b32.xlu1 %v2533_v6, %s2835_s15 }
  0x52   : > { %1459 = vrot.lane.b32.xlu0 %v2970_v9, %s2828_s29  ;;  %1461 = vrot.lane.b32.xlu1 %v2972_v10, %s2828_s29 }
  0x56   : > { %1463 = vrot.lane.b32.xlu0 %v2978_v12, %s2828_s29  ;;  %1465 = vrot.lane.b32.xlu1 %v2980_v13, %s2828_s29 }
  0x5a   : > { %1568 = vrot.lane.b32.xlu0 %v2970_v9, %s2829_s30  ;;  %1570 = vrot.lane.b32.xlu1 %v2972_v10, %s2829_s30 }
  0x5e   : > { %1572 = vrot.lane.b32.xlu0 %v2978_v12, %s2829_s30  ;;  %1574 = vrot.lane.b32.xlu1 %v2980_v13, %s2829_s30 }
  0x62   : > { %1677 = vrot.lane.b32.xlu0 %v2970_v9, %s2830_s7  ;;  %1679 = vrot.lane.b32.xlu1 %v2972_v10, %s2830_s7 }
  0x66   : > { %1681 = vrot.lane.b32.xlu0 %v2978_v12, %s2830_s7  ;;  %1683 = vrot.lane.b32.xlu1 %v2980_v13, %s2830_s7 }
  0x6a   : > { %1786 = vrot.lane.b32.xlu0 %v2970_v9, %s2831_s8  ;;  %1788 = vrot.lane.b32.xlu1 %v2972_v10, %s2831_s8 }
  0x6e   : > { %1790 = vrot.lane.b32.xlu0 %v2978_v12, %s2831_s8  ;;  %1792 = vrot.lane.b32.xlu1 %v2980_v13, %s2831_s8 }
  0x72   : > { %1895 = vrot.lane.b32.xlu0 %v2970_v9, %s2832_s9  ;;  %1897 = vrot.lane.b32.xlu1 %v2972_v10, %s2832_s9 }
  0x76   : > { %1899 = vrot.lane.b32.xlu0 %v2978_v12, %s2832_s9  ;;  %1901 = vrot.lane.b32.xlu1 %v2980_v13, %s2832_s9 }
  0x7a   : > { %2004 = vrot.lane.b32.xlu0 %v2970_v9, %s2833_s10  ;;  %2006 = vrot.lane.b32.xlu1 %v2972_v10, %s2833_s10 }
  0x7e   : > { %2008 = vrot.lane.b32.xlu0 %v2978_v12, %s2833_s10  ;;  %2010 = vrot.lane.b32.xlu1 %v2980_v13, %s2833_s10 }
  0x82   : > { %2113 = vrot.lane.b32.xlu0 %v2970_v9, %s2834_s11  ;;  %2115 = vrot.lane.b32.xlu1 %v2972_v10, %s2834_s11 }
  0x84   : > { %v383_v14 = vpop.permute.xlu1 %382  ;;  %v379_v15 = vpop.permute.xlu0 %378 }
  0x86   : > { %2117 = vrot.lane.b32.xlu0 %v2978_v12, %s2834_s11  ;;  %2119 = vrot.lane.b32.xlu1 %v2980_v13, %s2834_s11 }
  0x88   : > { %v385_v16 = vpop.permute.xlu1 %384  ;;  %v381_v17 = vpop.permute.xlu0 %380 }
  0x89   : > { %v388_v18 = vsel %vm386_vm1, %v381_v17, %v383_v14  ;;  %v387_v19 = vsel %vm386_vm1, %v379_v15, %v381_v17  ;;  %v389_v20 = vsel %vm386_vm1, %v383_v14, %v385_v16  ;;  %v2552_v14 = vld [vmem:[%s3340_s1 + $0x14] sm:$0xf] }
  0x8a   : > { %2534 = vmatprep.subr.msk.bf16.mxu0 %vm394_vm2, %v388_v18  ;;  %v396_v21 = vsel %vm394_vm2, %v387_v19, 0  ;;  %v402_v22 = vsel %vm394_vm2, %v389_v20, 0  ;;  %2222 = vrot.lane.b32.xlu0 %v2970_v9, %s2835_s15 }
  0x8b   : > { %419 = vmatpush1.bf16.msra.mxu0 %v396_v21  ;;  %2648 = vmatpush3.bf16.msra.mxu1 %v402_v22 }
  0x8c   : > { %2537 = vmatprep.subr.msk.bf16.mxu0 %vm394_vm2, %v2911_v7  ;;  %v581_v24 = vpop.permute.xlu0 %580  ;;  %2653 = vmatprep.subr.bf16.mxu1 %v2825_v0  ;;  %v583_v26 = vpop.permute.xlu1 %582 }
  0x8d   : > { %2224 = vrot.lane.b32.xlu1 %v2972_v10, %s2835_s15  ;;  %v589_v30 = vsel %vm588_vm4, %v581_v24, %v583_v26  ;;  %v2556_v24 = vld [vmem:[%s3340_s1 + $0x18] sm:$0xf] }
  0x8e   : > { %2650 = vmatmul.mubr.msk.bf16.vlgmr.msra.gmra.mxu1 %vm390_vm3, %v2529_v23  ;;  %2535 = vmatmul.mubr.msk.bf16.vlgmr.msra.gmra.mxu0 %vm390_vm3, %v2529_v23  ;;  %v596_v34 = vsel %vm394_vm2, %v589_v30, 0 }
  0x8f   : > { %512 = vmatpush1.bf16.msra.mxu0 %v489_v25  ;;  %2654 = vmatpush3.bf16.msra.mxu1 %v495_v27 }
  0x90   : > { %v585_v28 = vpop.permute.xlu0 %584  ;;  %v587_v29 = vpop.permute.xlu1 %586  ;;  %529 = vmatprep.mubr.bf16.mxu0 %v2826_v1  ;;  %2655 = vmatprep.mubr.msk.bf16.mxu1 %vm2827_vm0, %v2825_v0 }
  0x91   : > { %v590_v31 = vsel %vm588_vm4, %v583_v26, %v585_v28  ;;  %v591_v32 = vsel %vm588_vm4, %v585_v28, %v587_v29  ;;  %2659 = vmatprep.subr.bf16.mxu1 %v2825_v0  ;;  %2226 = vrot.lane.b32.xlu0 %v2978_v12, %s2835_s15 }
  0x92   : > { %2541 = vmatprep.subr.msk.bf16.mxu0 %vm394_vm2, %v590_v31  ;;  %2228 = vrot.lane.b32.xlu1 %v2980_v13, %s2835_s15  ;;  %v602_v35 = vsel %vm394_vm2, %v591_v32, 0 }
  0x94   : > { %v691_v36 = vpop.permute.xlu0 %690  ;;  %v693_v37 = vpop.permute.xlu1 %692 }
  0x95   : > { %v699_v40 = vsel %vm698_vm5, %v691_v36, %v693_v37 }
  0x96   : > { %2656 = vmatmul.mubr.msk.bf16.vlgmr.msra.gmra.mxu1 %vm390_vm3, %v365_v33  ;;  %2538 = vmatmul.mubr.msk.bf16.vlgmr.msra.gmra.mxu0 %vm390_vm3, %v365_v33  ;;  %v706_v44 = vsel %vm394_vm2, %v699_v40, 0 }
  0x97   : > { %619 = vmatpush1.bf16.msra.mxu0 %v596_v34  ;;  %2660 = vmatpush3.bf16.msra.mxu1 %v602_v35  ;;  %v2560_v34 = vld [vmem:[%s3340_s1 + $0x1c] sm:$0xf] }
  0x98   : > { %v695_v38 = vpop.permute.xlu0 %694  ;;  %v697_v39 = vpop.permute.xlu1 %696  ;;  %636 = vmatprep.mubr.bf16.mxu0 %v2826_v1  ;;  %2661 = vmatprep.mubr.msk.bf16.mxu1 %vm2827_vm0, %v2825_v0 }
  0x99   : > { %v700_v41 = vsel %vm698_vm5, %v693_v37, %v695_v38  ;;  %v701_v42 = vsel %vm698_vm5, %v695_v38, %v697_v39  ;;  %2665 = vmatprep.subr.bf16.mxu1 %v2825_v0 }
  0x9a   : > { %2545 = vmatprep.subr.msk.bf16.mxu0 %vm394_vm2, %v700_v41  ;;  %v712_v45 = vsel %vm394_vm2, %v701_v42, 0  ;;  %v2564_v41 = vld [vmem:[%s3340_s1 + $0x20] sm:$0xf]  ;;  %v1363_v42 = vsel %vm394_vm2, %v2970_v9, 0 }
  0x9c   : > { %v801_v46 = vpop.permute.xlu0 %800  ;;  %v803_v47 = vpop.permute.xlu1 %802 }
  0x9d   : > { %v809_v50 = vsel %vm808_vm6, %v801_v46, %v803_v47 }
  0x9e   : > { %2662 = vmatmul.mubr.msk.bf16.vlgmr.msra.gmra.mxu1 %vm390_vm3, %v2540_v43  ;;  %2542 = vmatmul.mubr.msk.bf16.vlgmr.msra.gmra.mxu0 %vm390_vm3, %v2540_v43  ;;  %v816_v54 = vsel %vm394_vm2, %v809_v50, 0  ;;  %v1369_v43 = vsel %vm394_vm2, %v2978_v12, 0 }
  0x9f   : > { %729 = vmatpush1.bf16.msra.mxu0 %v706_v44  ;;  %2666 = vmatpush3.bf16.msra.mxu1 %v712_v45 }
  0xa0   : > { %v805_v48 = vpop.permute.xlu0 %804  ;;  %v807_v49 = vpop.permute.xlu1 %806  ;;  %746 = vmatprep.mubr.bf16.mxu0 %v2826_v1  ;;  %2667 = vmatprep.mubr.msk.bf16.mxu1 %vm2827_vm0, %v2825_v0 }
  0xa1   : > { %v810_v51 = vsel %vm808_vm6, %v803_v47, %v805_v48  ;;  %v811_v52 = vsel %vm808_vm6, %v805_v48, %v807_v49  ;;  %2671 = vmatprep.subr.bf16.mxu1 %v2825_v0  ;;  %v1350_v48 = vld [vmem:[%s3342_s3] sm:$0xf] }
  0xa2   : > { %2549 = vmatprep.subr.msk.bf16.mxu0 %vm394_vm2, %v810_v51  ;;  %v822_v55 = vsel %vm394_vm2, %v811_v52, 0 }
  0xa4   : > { %v911_v56 = vpop.permute.xlu0 %910  ;;  %v913_v57 = vpop.permute.xlu1 %912 }
  0xa5   : > { %v919_v60 = vsel %vm918_vm7, %v911_v56, %v913_v57 }
  0xa6   : > { %2668 = vmatmul.mubr.msk.bf16.vlgmr.msra.gmra.mxu1 %vm390_vm3, %v2544_v53  ;;  %2546 = vmatmul.mubr.msk.bf16.vlgmr.msra.gmra.mxu0 %vm390_vm3, %v2544_v53  ;;  %v926_v2 = vsel %vm394_vm2, %v919_v60, 0 }
  0xa7   : > { %839 = vmatpush1.bf16.msra.mxu0 %v816_v54  ;;  %2672 = vmatpush3.bf16.msra.mxu1 %v822_v55 }
  0xa8   : > { %v915_v58 = vpop.permute.xlu0 %914  ;;  %v917_v59 = vpop.permute.xlu1 %916  ;;  %856 = vmatprep.mubr.bf16.mxu0 %v2826_v1  ;;  %2673 = vmatprep.mubr.msk.bf16.mxu1 %vm2827_vm0, %v2825_v0 }
  0xa9   : > { %v920_v61 = vsel %vm918_vm7, %v913_v57, %v915_v58  ;;  %v921_v62 = vsel %vm918_vm7, %v915_v58, %v917_v59  ;;  %2677 = vmatprep.subr.bf16.mxu1 %v2825_v0  ;;  %v2574_v58 = vld [vmem:[%s3342_s3 + $0x4] sm:$0xf] }
  0xaa   : > { %2553 = vmatprep.subr.msk.bf16.mxu0 %vm394_vm2, %v920_v61  ;;  %v932_v3 = vsel %vm394_vm2, %v921_v62, 0 }
  0xac   : > { %v1021_v4 = vpop.permute.xlu0 %1020  ;;  %v1023_v5 = vpop.permute.xlu1 %1022 }
  0xad   : > { %v1029_v8 = vsel %vm1028_vm8, %v1021_v4, %v1023_v5 }
  0xae   : > { %2674 = vmatmul.mubr.msk.bf16.vlgmr.msra.gmra.mxu1 %vm390_vm3, %v2548_v63  ;;  %2550 = vmatmul.mubr.msk.bf16.vlgmr.msra.gmra.mxu0 %vm390_vm3, %v2548_v63  ;;  %v1036_v15 = vsel %vm394_vm2, %v1029_v8, 0  ;;  %v2329_v63 = vld [vmem:[%s3343_s4] sm:$0xff]  ;;  %v2579_v8 = vld [vmem:[%s3342_s3 + $0x8] sm:$0xf] }
  0xaf   : > { %949 = vmatpush1.bf16.msra.mxu0 %v926_v2  ;;  %2678 = vmatpush3.bf16.msra.mxu1 %v932_v3  ;;  %v2338_v3 = vld [vmem:[%s3344_s5] sm:$0xff] }
  0xb0   : > { %v1025_v6 = vpop.permute.xlu0 %1024  ;;  %v1027_v7 = vpop.permute.xlu1 %1026  ;;  %966 = vmatprep.mubr.bf16.mxu0 %v2826_v1  ;;  %2679 = vmatprep.mubr.msk.bf16.mxu1 %vm2827_vm0, %v2825_v0 }
  0xb1   : > { %v1030_v11 = vsel %vm1028_vm8, %v1023_v5, %v1025_v6  ;;  %v1031_v13 = vsel %vm1028_vm8, %v1025_v6, %v1027_v7  ;;  %2683 = vmatprep.subr.bf16.mxu1 %v2825_v0  ;;  %2332 = vperm.xlu0 %2791, %v2329_v63  }
  0xb2   : > { %2557 = vmatprep.subr.msk.bf16.mxu0 %vm394_vm2, %v1030_v11  ;;  %v1042_v16 = vsel %vm394_vm2, %v1031_v13, 0  ;;  %2341 = vperm.xlu1 %2792, %v2338_v3  }
  0xb4   : > { %v1131_v17 = vpop.permute.xlu0 %1130  ;;  %v1133_v18 = vpop.permute.xlu1 %1132 }
  0xb5   : > { %v1139_v21 = vsel %vm1138_vm9, %v1131_v17, %v1133_v18 }
  0xb6   : > { %2680 = vmatmul.mubr.msk.bf16.vlgmr.msra.gmra.mxu1 %vm390_vm3, %v2552_v14  ;;  %2554 = vmatmul.mubr.msk.bf16.vlgmr.msra.gmra.mxu0 %vm390_vm3, %v2552_v14  ;;  %v1146_v25 = vsel %vm394_vm2, %v1139_v21, 0  ;;  %v2583_v21 = vld [vmem:[%s3342_s3 + $0xc] sm:$0xf] }
  0xb7   : > { %1059 = vmatpush1.bf16.msra.mxu0 %v1036_v15  ;;  %2684 = vmatpush3.bf16.msra.mxu1 %v1042_v16 }
  0xb8   : > { %v1135_v19 = vpop.permute.xlu0 %1134  ;;  %v1137_v20 = vpop.permute.xlu1 %1136  ;;  %1076 = vmatprep.mubr.bf16.mxu0 %v2826_v1  ;;  %2685 = vmatprep.mubr.msk.bf16.mxu1 %vm2827_vm0, %v2825_v0 }
  0xb9   : > { %v1140_v22 = vsel %vm1138_vm9, %v1133_v18, %v1135_v19  ;;  %v1141_v23 = vsel %vm1138_vm9, %v1135_v19, %v1137_v20  ;;  %2689 = vmatprep.subr.bf16.mxu1 %v2825_v0 }
  0xba   : > { %2561 = vmatprep.subr.msk.bf16.mxu0 %vm394_vm2, %v1140_v22  ;;  %v1152_v26 = vsel %vm394_vm2, %v1141_v23, 0 }
  0xbc   : > { %v1241_v27 = vpop.permute.xlu0 %1240  ;;  %v1243_v28 = vpop.permute.xlu1 %1242 }
  0xbd   : > { %v1249_v31 = vsel %vm1248_vm10, %v1241_v27, %v1243_v28 }
  0xbe   : > { %2686 = vmatmul.mubr.msk.bf16.vlgmr.msra.gmra.mxu1 %vm390_vm3, %v2556_v24  ;;  %2558 = vmatmul.mubr.msk.bf16.vlgmr.msra.gmra.mxu0 %vm390_vm3, %v2556_v24  ;;  %v1256_v35 = vsel %vm394_vm2, %v1249_v31, 0  ;;  %v2587_v31 = vld [vmem:[%s3342_s3 + $0x10] sm:$0xf] }
  0xbf   : > { %1169 = vmatpush1.bf16.msra.mxu0 %v1146_v25  ;;  %2690 = vmatpush3.bf16.msra.mxu1 %v1152_v26 }
  0xc0   : > { %v1245_v29 = vpop.permute.xlu0 %1244  ;;  %v1247_v30 = vpop.permute.xlu1 %1246  ;;  %1186 = vmatprep.mubr.bf16.mxu0 %v2826_v1  ;;  %2691 = vmatprep.mubr.msk.bf16.mxu1 %vm2827_vm0, %v2825_v0 }
  0xc1   : > { %v1250_v32 = vsel %vm1248_vm10, %v1243_v28, %v1245_v29  ;;  %v1251_v33 = vsel %vm1248_vm10, %v1245_v29, %v1247_v30  ;;  %2695 = vmatprep.subr.bf16.mxu1 %v2825_v0 }
  0xc2   : > { %2565 = vmatprep.subr.msk.bf16.mxu0 %vm394_vm2, %v1250_v32  ;;  %v1262_v36 = vsel %vm394_vm2, %v1251_v33, 0 }
  0xc4   : > { %v1460_v37 = vpop.permute.xlu0 %1459  ;;  %v1462_v38 = vpop.permute.xlu1 %1461 }
  0xc5   : > { %v1467_v9 = vsel %vm386_vm1, %v1460_v37, %v1462_v38 }
  0xc6   : > { %2562 = vmatmul.mubr.msk.bf16.vlgmr.msra.gmra.mxu0 %vm390_vm3, %v2560_v34  ;;  %2692 = vmatmul.mubr.msk.bf16.vlgmr.msra.gmra.mxu1 %vm390_vm3, %v2560_v34  ;;  %v1474_v49 = vsel %vm394_vm2, %v1467_v9, 0  ;;  %v2595_v9 = vld [vmem:[%s3342_s3 + $0x18] sm:$0xf] }
  0xc7   : > { %1279 = vmatpush1.bf16.msra.mxu0 %v1256_v35  ;;  %2696 = vmatpush3.bf16.msra.mxu1 %v1262_v36 }
  0xc8   : > { %1296 = vmatprep.mubr.bf16.mxu0 %v2826_v1  ;;  %2697 = vmatprep.mubr.msk.bf16.mxu1 %vm2827_vm0, %v2825_v0  ;;  %v1464_v39 = vpop.permute.xlu0 %1463  ;;  %v1466_v40 = vpop.permute.xlu1 %1465 }
  0xc9   : > { %2571 = vmatprep.subr.msk.bf16.mxu0 %vm394_vm2, %v2972_v10  ;;  %2701 = vmatprep.subr.bf16.mxu1 %v2825_v0  ;;  %v1468_v46 = vsel %vm386_vm1, %v1462_v38, %v1464_v39  ;;  %v1469_v12 = vsel %vm386_vm1, %v1464_v39, %v1466_v40 }
  0xca   : > { %v1480_v50 = vsel %vm394_vm2, %v1469_v12, 0 }
  0xcc   : > { %v1569_v44 = vpop.permute.xlu0 %1568  ;;  %v1571_v45 = vpop.permute.xlu1 %1570 }
  0xcd   : > { %v1576_v56 = vsel %vm588_vm4, %v1569_v44, %v1571_v45 }
  0xce   : > { %2698 = vmatmul.mubr.msk.bf16.vlgmr.msra.gmra.mxu1 %vm390_vm3, %v2564_v41  ;;  %2566 = vmatmul.mubr.msk.bf16.vlgmr.msra.gmra.mxu0 %vm390_vm3, %v2564_v41  ;;  %v1583_v59 = vsel %vm394_vm2, %v1576_v56, 0  ;;  %v2591_v41 = vld [vmem:[%s3342_s3 + $0x14] sm:$0xf] }
  0xcf   : > { %1386 = vmatpush1.bf16.msra.mxu0 %v1363_v42  ;;  %2702 = vmatpush3.bf16.msra.mxu1 %v1369_v43 }
  0xd0   : > { %2576 = vmatprep.subr.msk.bf16.mxu0 %vm394_vm2, %v1468_v46  ;;  %1403 = vmatprep.mubr.bf16.mxu0 %v2826_v1  ;;  %v1573_v10 = vpop.permute.xlu0 %1572  ;;  %v1575_v47 = vpop.permute.xlu1 %1574 }
  0xd1   : > { %2703 = vmatprep.mubr.msk.bf16.mxu1 %vm2827_vm0, %v2825_v0  ;;  %2707 = vmatprep.subr.bf16.mxu1 %v2825_v0  ;;  %v1577_v53 = vsel %vm588_vm4, %v1571_v45, %v1573_v10  ;;  %v1578_v57 = vsel %vm588_vm4, %v1573_v10, %v1575_v47 }
  0xd2   : > { %v1589_v60 = vsel %vm394_vm2, %v1578_v57, 0  ;;  %v2603_v57 = vld [vmem:[%s3342_s3 + $0x20] sm:$0xf] }
  0xd4   : > { %v1678_v51 = vpop.permute.xlu0 %1677  ;;  %v1680_v52 = vpop.permute.xlu1 %1679 }
  0xd5   : > { %v1685_v6 = vsel %vm698_vm5, %v1678_v51, %v1680_v52 }
  0xd6   : > { %2704 = vmatmul.mubr.msk.bf16.vlgmr.msra.gmra.mxu1 %vm390_vm3, %v1350_v48  ;;  %2572 = vmatmul.mubr.msk.bf16.vlgmr.msra.gmra.mxu0 %vm390_vm3, %v1350_v48  ;;  %v1692_v11 = vsel %vm394_vm2, %v1685_v6, 0 }
  0xd7   : > { %1497 = vmatpush1.bf16.msra.mxu0 %v1474_v49  ;;  %2708 = vmatpush3.bf16.msra.mxu1 %v1480_v50 }
  0xd8   : > { %2580 = vmatprep.subr.msk.bf16.mxu0 %vm394_vm2, %v1577_v53  ;;  %1514 = vmatprep.mubr.bf16.mxu0 %v2826_v1  ;;  %v1682_v54 = vpop.permute.xlu0 %1681  ;;  %v1684_v55 = vpop.permute.xlu1 %1683 }
  0xd9   : > { %2709 = vmatprep.mubr.msk.bf16.mxu1 %vm2827_vm0, %v2825_v0  ;;  %2713 = vmatprep.subr.bf16.mxu1 %v2825_v0  ;;  %v1686_v2 = vsel %vm698_vm5, %v1680_v52, %v1682_v54  ;;  %v1687_v7 = vsel %vm698_vm5, %v1682_v54, %v1684_v55  ;;  %v2599_v54 = vld [vmem:[%s3342_s3 + $0x1c] sm:$0xf] }
  0xda   : > { %v1698_v13 = vsel %vm394_vm2, %v1687_v7, 0 }
  0xdc   : > { %v1787_v61 = vpop.permute.xlu0 %1786  ;;  %v1789_v62 = vpop.permute.xlu1 %1788 }
  0xdd   : > { %v1794_v19 = vsel %vm808_vm6, %v1787_v61, %v1789_v62 }
  0xde   : > { %2710 = vmatmul.mubr.msk.bf16.vlgmr.msra.gmra.mxu1 %vm390_vm3, %v2574_v58  ;;  %2577 = vmatmul.mubr.msk.bf16.vlgmr.msra.gmra.mxu0 %vm390_vm3, %v2574_v58  ;;  %v1801_v22 = vsel %vm394_vm2, %v1794_v19, 0 }
  0xdf   : > { %1606 = vmatpush1.bf16.msra.mxu0 %v1583_v59  ;;  %2714 = vmatpush3.bf16.msra.mxu1 %v1589_v60 }
  0xe0   : > { %2584 = vmatprep.subr.msk.bf16.mxu0 %vm394_vm2, %v1686_v2  ;;  %1623 = vmatprep.mubr.bf16.mxu0 %v2826_v1  ;;  %v1791_v4 = vpop.permute.xlu0 %1790  ;;  %v1793_v5 = vpop.permute.xlu1 %1792 }
  0xe1   : > { %2715 = vmatprep.mubr.msk.bf16.mxu1 %vm2827_vm0, %v2825_v0  ;;  %2719 = vmatprep.subr.bf16.mxu1 %v2825_v0  ;;  %v1795_v16 = vsel %vm808_vm6, %v1789_v62, %v1791_v4  ;;  %v1796_v20 = vsel %vm808_vm6, %v1791_v4, %v1793_v5 }
  0xe2   : > { %v1807_v23 = vsel %vm394_vm2, %v1796_v20, 0 }
  0xe4   : > { %v1896_v14 = vpop.permute.xlu0 %1895  ;;  %v1898_v15 = vpop.permute.xlu1 %1897 }
  0xe5   : > { %v1903_v29 = vsel %vm918_vm7, %v1896_v14, %v1898_v15 }
  0xe6   : > { %2716 = vmatmul.mubr.msk.bf16.vlgmr.msra.gmra.mxu1 %vm390_vm3, %v2579_v8  ;;  %2581 = vmatmul.mubr.msk.bf16.vlgmr.msra.gmra.mxu0 %vm390_vm3, %v2579_v8  ;;  %v1910_v32 = vsel %vm394_vm2, %v1903_v29, 0 }
  0xe7   : > { %1715 = vmatpush1.bf16.msra.mxu0 %v1692_v11  ;;  %2720 = vmatpush3.bf16.msra.mxu1 %v1698_v13 }
  0xe8   : > { %2588 = vmatprep.subr.msk.bf16.mxu0 %vm394_vm2, %v1795_v16  ;;  %1732 = vmatprep.mubr.bf16.mxu0 %v2826_v1  ;;  %v1900_v17 = vpop.permute.xlu0 %1899  ;;  %v1902_v18 = vpop.permute.xlu1 %1901 }
  0xe9   : > { %2721 = vmatprep.mubr.msk.bf16.mxu1 %vm2827_vm0, %v2825_v0  ;;  %2725 = vmatprep.subr.bf16.mxu1 %v2825_v0  ;;  %v1904_v26 = vsel %vm918_vm7, %v1898_v15, %v1900_v17  ;;  %v1905_v30 = vsel %vm918_vm7, %v1900_v17, %v1902_v18 }
  0xea   : > { %v1916_v33 = vsel %vm394_vm2, %v1905_v30, 0 }
  0xec   : > { %v2005_v24 = vpop.permute.xlu0 %2004  ;;  %v2007_v25 = vpop.permute.xlu1 %2006 }
  0xed   : > { %v2012_v38 = vsel %vm1028_vm8, %v2005_v24, %v2007_v25 }
  0xee   : > { %2722 = vmatmul.mubr.msk.bf16.vlgmr.msra.gmra.mxu1 %vm390_vm3, %v2583_v21  ;;  %2585 = vmatmul.mubr.msk.bf16.vlgmr.msra.gmra.mxu0 %vm390_vm3, %v2583_v21  ;;  %v2019_v42 = vsel %vm394_vm2, %v2012_v38, 0 }
  0xef   : > { %1824 = vmatpush1.bf16.msra.mxu0 %v1801_v22  ;;  %2726 = vmatpush3.bf16.msra.mxu1 %v1807_v23 }
  0xf0   : > { %2592 = vmatprep.subr.msk.bf16.mxu0 %vm394_vm2, %v1904_v26  ;;  %1841 = vmatprep.mubr.bf16.mxu0 %v2826_v1  ;;  %v2009_v27 = vpop.permute.xlu0 %2008  ;;  %v2011_v28 = vpop.permute.xlu1 %2010 }
  0xf1   : > { %2727 = vmatprep.mubr.msk.bf16.mxu1 %vm2827_vm0, %v2825_v0  ;;  %2731 = vmatprep.subr.bf16.mxu1 %v2825_v0  ;;  %v2013_v36 = vsel %vm1028_vm8, %v2007_v25, %v2009_v27  ;;  %v2014_v39 = vsel %vm1028_vm8, %v2009_v27, %v2011_v28 }
  0xf2   : > { %v2025_v43 = vsel %vm394_vm2, %v2014_v39, 0 }
  0xf4   : > { %v2114_v34 = vpop.permute.xlu0 %2113  ;;  %v2116_v35 = vpop.permute.xlu1 %2115 }
  0xf5   : > { %v2121_v10 = vsel %vm1138_vm9, %v2114_v34, %v2116_v35 }
  0xf6   : > { %2728 = vmatmul.mubr.msk.bf16.vlgmr.msra.gmra.mxu1 %vm390_vm3, %v2587_v31  ;;  %2589 = vmatmul.mubr.msk.bf16.vlgmr.msra.gmra.mxu0 %vm390_vm3, %v2587_v31  ;;  %v2128_v48 = vsel %vm394_vm2, %v2121_v10, 0 }
  0xf7   : > { %1933 = vmatpush1.bf16.msra.mxu0 %v1910_v32  ;;  %2732 = vmatpush3.bf16.msra.mxu1 %v1916_v33 }
  0xf8   : > { %2596 = vmatprep.subr.msk.bf16.mxu0 %vm394_vm2, %v2013_v36  ;;  %1950 = vmatprep.mubr.bf16.mxu0 %v2826_v1  ;;  %v2118_v37 = vpop.permute.xlu0 %2117  ;;  %v2120_v40 = vpop.permute.xlu1 %2119 }
  0xf9   : > { %2733 = vmatprep.mubr.msk.bf16.mxu1 %vm2827_vm0, %v2825_v0  ;;  %2737 = vmatprep.subr.bf16.mxu1 %v2825_v0  ;;  %v2122_v44 = vsel %vm1138_vm9, %v2116_v35, %v2118_v37  ;;  %v2123_v47 = vsel %vm1138_vm9, %v2118_v37, %v2120_v40 }
  0xfa   : > { %v2134_v49 = vsel %vm394_vm2, %v2123_v47, 0 }
  0xfc   : > { %v2223_v45 = vpop.permute.xlu0 %2222 }
  0xfe   : > { %2734 = vmatmul.mubr.msk.bf16.vlgmr.msra.gmra.mxu1 %vm390_vm3, %v2591_v41  ;;  %2593 = vmatmul.mubr.msk.bf16.vlgmr.msra.gmra.mxu0 %vm390_vm3, %v2591_v41 }
  0xff   : > { %2042 = vmatpush1.bf16.msra.mxu0 %v2019_v42  ;;  %2738 = vmatpush3.bf16.msra.mxu1 %v2025_v43  ;;  %v2225_v46 = vpop.permute.xlu1 %2224 }
 0x100   : > { %2600 = vmatprep.subr.msk.bf16.mxu0 %vm394_vm2, %v2122_v44  ;;  %2059 = vmatprep.mubr.bf16.mxu0 %v2826_v1  ;;  %v2230_v52 = vsel %vm1248_vm10, %v2223_v45, %v2225_v46 }
 0x101   : > { %2739 = vmatprep.mubr.msk.bf16.mxu1 %vm2827_vm0, %v2825_v0  ;;  %2743 = vmatprep.subr.bf16.mxu1 %v2825_v0  ;;  %v2237_v55 = vsel %vm394_vm2, %v2230_v52, 0 }
 0x103   : > { %v2227_v12 = vpop.permute.xlu0 %2226 }
 0x104   : > { %v2231_v50 = vsel %vm1248_vm10, %v2225_v46, %v2227_v12  ;;  %v2229_v51 = vpop.permute.xlu1 %2228 }
 0x105   : > { %v2232_v53 = vsel %vm1248_vm10, %v2227_v12, %v2229_v51 }
 0x106   : > { %2740 = vmatmul.mubr.msk.bf16.vlgmr.msra.gmra.mxu1 %vm390_vm3, %v2595_v9  ;;  %2597 = vmatmul.mubr.msk.bf16.vlgmr.msra.gmra.mxu0 %vm390_vm3, %v2595_v9  ;;  %v2243_v56 = vsel %vm394_vm2, %v2232_v53, 0 }
 0x107   : > { %2151 = vmatpush1.bf16.msra.mxu0 %v2128_v48  ;;  %2744 = vmatpush3.bf16.msra.mxu1 %v2134_v49 }
 0x108   : > { %2604 = vmatprep.subr.msk.bf16.mxu0 %vm394_vm2, %v2231_v50  ;;  %2168 = vmatprep.mubr.bf16.mxu0 %v2826_v1 }
 0x109   : > { %2745 = vmatprep.mubr.msk.bf16.mxu1 %vm2827_vm0, %v2825_v0  ;;  %2749 = vmatprep.subr.bf16.mxu1 %v2825_v0 }
 0x10e   : > { %2601 = vmatmul.mubr.msk.bf16.vlgmr.msra.gmra.mxu0 %vm390_vm3, %v2599_v54  ;;  %2746 = vmatmul.mubr.msk.bf16.vlgmr.msra.gmra.mxu1 %vm390_vm3, %v2599_v54 }
 0x10f   : > { %2260 = vmatpush1.bf16.msra.mxu0 %v2237_v55  ;;  %2750 = vmatpush3.bf16.msra.mxu1 %v2243_v56 }
 0x110   : > { %2277 = vmatprep.mubr.bf16.mxu0 %v2826_v1  ;;  %2751 = vmatprep.mubr.msk.bf16.mxu1 %vm2827_vm0, %v2825_v0 }
 0x116   : > { %2605 = vmatmul.mubr.msk.bf16.vlgmr.msra.gmra.mxu0 %vm390_vm3, %v2603_v57  ;;  %2752 = vmatmul.mubr.msk.bf16.vlgmr.msra.gmra.mxu1 %vm390_vm3, %v2603_v57 }
 0x14e   : > { %v438_v58 = vpop.f32.mrf.mxu0  ;;  %v479_v59 = vpop.f32.mrf.mxu1 }
 0x150   : > { %v440_v60 = vpop.f32.mrf.mxu0  ;;  %v2651_v61 = vpop.f32.mrf.mxu1 }
 0x152   : > { %v442_v62 = vpop.f32.mrf.mxu0  ;;  %v482_v63 = vpop.f32.mrf.mxu1 }
 0x154   : > { %v443_v2 = vpop.f32.mrf.mxu0  ;;  %v2652_v3 = vpop.f32.mrf.mxu1 }
 0x156   : > { %v531_v1 = vpop.f32.mrf.mxu0  ;;  %v572_v4 = vpop.f32.mrf.mxu1 }
 0x157   : > { %v532_v5 = vadd.f32 %v531_v1, %v438_v58  ;;  %v573_v0 = vadd.f32 %v572_v4, %v479_v59 }
 0x158   : > { %v533_v6 = vpop.f32.mrf.mxu0  ;;  %v2657_v7 = vpop.f32.mrf.mxu1 }
 0x159   : > { %v534_v8 = vadd.f32 %v533_v6, %v440_v60 }
 0x15a   : > { %v535_v11 = vpop.f32.mrf.mxu0  ;;  %v575_v13 = vpop.f32.mrf.mxu1 }
 0x15c   : > { %v536_v14 = vpop.f32.mrf.mxu0  ;;  %v2658_v15 = vpop.f32.mrf.mxu1 }
 0x15e   : > { %v638_v16 = vpop.f32.mrf.mxu0  ;;  %v679_v17 = vpop.f32.mrf.mxu1 }
 0x15f   : > { %v685_v18 = vadd.f32 %v638_v16, %v532_v5  ;;  %v687_v19 = vadd.f32 %v679_v17, %v573_v0 }
 0x160   : > { %v640_v20 = vpop.f32.mrf.mxu0  ;;  %v2663_v21 = vpop.f32.mrf.mxu1 }
 0x161   : > { %v686_v22 = vadd.f32 %v640_v20, %v534_v8 }
 0x162   : > { %v642_v23 = vpop.f32.mrf.mxu0  ;;  %v682_v24 = vpop.f32.mrf.mxu1 }
 0x164   : > { %v643_v25 = vpop.f32.mrf.mxu0  ;;  %v2664_v26 = vpop.f32.mrf.mxu1 }
 0x166   : > { %v748_v27 = vpop.f32.mrf.mxu0  ;;  %v789_v28 = vpop.f32.mrf.mxu1 }
 0x167   : > { %v795_v29 = vadd.f32 %v748_v27, %v685_v18  ;;  %v797_v30 = vadd.f32 %v789_v28, %v687_v19 }
 0x168   : > { %v750_v31 = vpop.f32.mrf.mxu0  ;;  %v2669_v32 = vpop.f32.mrf.mxu1 }
 0x169   : > { %v796_v33 = vadd.f32 %v750_v31, %v686_v22 }
 0x16a   : > { %v752_v34 = vpop.f32.mrf.mxu0  ;;  %v792_v35 = vpop.f32.mrf.mxu1 }
 0x16c   : > { %v753_v36 = vpop.f32.mrf.mxu0  ;;  %v2670_v37 = vpop.f32.mrf.mxu1 }
 0x16e   : > { %v858_v38 = vpop.f32.mrf.mxu0  ;;  %v899_v39 = vpop.f32.mrf.mxu1 }
 0x16f   : > { %v905_v40 = vadd.f32 %v858_v38, %v795_v29  ;;  %v907_v41 = vadd.f32 %v899_v39, %v797_v30 }
 0x170   : > { %v860_v42 = vpop.f32.mrf.mxu0  ;;  %v2675_v43 = vpop.f32.mrf.mxu1 }
 0x171   : > { %v906_v44 = vadd.f32 %v860_v42, %v796_v33 }
 0x172   : > { %v862_v45 = vpop.f32.mrf.mxu0  ;;  %v902_v46 = vpop.f32.mrf.mxu1 }
 0x174   : > { %v863_v10 = vpop.f32.mrf.mxu0  ;;  %v2676_v47 = vpop.f32.mrf.mxu1 }
 0x176   : > { %v968_v9 = vpop.f32.mrf.mxu0  ;;  %v1009_v12 = vpop.f32.mrf.mxu1 }
 0x177   : > { %v1015_v48 = vadd.f32 %v968_v9, %v905_v40  ;;  %v1017_v49 = vadd.f32 %v1009_v12, %v907_v41 }
 0x178   : > { %v970_v50 = vpop.f32.mrf.mxu0  ;;  %v2681_v51 = vpop.f32.mrf.mxu1 }
 0x179   : > { %v1016_v52 = vadd.f32 %v970_v50, %v906_v44 }
 0x17a   : > { %v972_v53 = vpop.f32.mrf.mxu0  ;;  %v1012_v54 = vpop.f32.mrf.mxu1 }
 0x17c   : > { %v973_v55 = vpop.f32.mrf.mxu0  ;;  %v2682_v56 = vpop.f32.mrf.mxu1 }
 0x17e   : > { %v1078_v57 = vpop.f32.mrf.mxu0  ;;  %v1119_v58 = vpop.f32.mrf.mxu1 }
 0x17f   : > { %v3314_v59 = vadd.f32 %v1078_v57, %v1015_v48  ;;  %v3316_v60 = vadd.f32 %v1119_v58, %v1017_v49 }
 0x180   : > { %v1080_v61 = vpop.f32.mrf.mxu0  ;;  %v2687_v62 = vpop.f32.mrf.mxu1 }
 0x181   : > { %v3318_v63 = vadd.f32 %v1080_v61, %v1016_v52 }
 0x182   : > { %v1082_v2 = vpop.f32.mrf.mxu0  ;;  %v1122_v3 = vpop.f32.mrf.mxu1 }
 0x184   : > { %v1083_v1 = vpop.f32.mrf.mxu0  ;;  %v2688_v4 = vpop.f32.mrf.mxu1 }
 0x186   : > { %v1188_v5 = vpop.f32.mrf.mxu0  ;;  %v1229_v0 = vpop.f32.mrf.mxu1 }
 0x188   : > { %v3320_v6 = vpop.f32.mrf.mxu0  ;;  %v2693_v7 = vpop.f32.mrf.mxu1 }
 0x18a   : > { %v1192_v8 = vpop.f32.mrf.mxu0  ;;  %v1232_v11 = vpop.f32.mrf.mxu1 }
 0x18b   : > { %v1235_v8 = vadd.f32 %v1188_v5, %v3314_v59  ;;  %v1237_v11 = vadd.f32 %v1229_v0, %v3316_v60 }
 0x18c   : > { %v1193_v13 = vpop.f32.mrf.mxu0  ;;  %v2694_v14 = vpop.f32.mrf.mxu1 }
 0x18e   : > { %v1298_v15 = vpop.f32.mrf.mxu0  ;;  %v1339_v16 = vpop.f32.mrf.mxu1 }
 0x190   : > { %v1300_v17 = vpop.f32.mrf.mxu0  ;;  %v2699_v18 = vpop.f32.mrf.mxu1 }
 0x191   : > { %v1236_v18 = vadd.f32 %v3320_v6, %v3318_v63 }
 0x192   : > { %v1302_v19 = vpop.f32.mrf.mxu0  ;;  %v1342_v20 = vpop.f32.mrf.mxu1 }
 0x193   : > { %v1345_v19 = vadd.f32 %v1298_v15, %v1235_v8  ;;  %v1347_v20 = vadd.f32 %v1339_v16, %v1237_v11 }
 0x194   : > { %v1303_v21 = vpop.f32.mrf.mxu0  ;;  %v2700_v22 = vpop.f32.mrf.mxu1 }
 0x196   : > { %v1405_v23 = vpop.f32.mrf.mxu0  ;;  %v1446_v24 = vpop.f32.mrf.mxu1 }
 0x198   : > { %v1407_v25 = vpop.f32.mrf.mxu0  ;;  %v2705_v26 = vpop.f32.mrf.mxu1 }
 0x199   : > { %v1346_v26 = vadd.f32 %v1300_v17, %v1236_v18 }
 0x19a   : > { %v1409_v27 = vpop.f32.mrf.mxu0  ;;  %v1449_v28 = vpop.f32.mrf.mxu1 }
 0x19b   : > { %v1452_v27 = vadd.f32 %v1405_v23, %v1345_v19  ;;  %v1454_v28 = vadd.f32 %v1446_v24, %v1347_v20 }
 0x19c   : > { %v1410_v29 = vpop.f32.mrf.mxu0  ;;  %v2706_v30 = vpop.f32.mrf.mxu1 }
 0x19e   : > { %v1516_v31 = vpop.f32.mrf.mxu0  ;;  %v1557_v32 = vpop.f32.mrf.mxu1 }
 0x1a0   : > { %v1518_v33 = vpop.f32.mrf.mxu0  ;;  %v2711_v34 = vpop.f32.mrf.mxu1 }
 0x1a1   : > { %v1453_v34 = vadd.f32 %v1407_v25, %v1346_v26 }
 0x1a2   : > { %v1520_v35 = vpop.f32.mrf.mxu0  ;;  %v1560_v36 = vpop.f32.mrf.mxu1 }
 0x1a3   : > { %v1563_v35 = vadd.f32 %v1516_v31, %v1452_v27  ;;  %v1565_v36 = vadd.f32 %v1557_v32, %v1454_v28  ;;  %v1564_v60 = vadd.f32 %v1518_v33, %v1453_v34 }
 0x1a4   : > { %v1521_v37 = vpop.f32.mrf.mxu0  ;;  %v2712_v38 = vpop.f32.mrf.mxu1 }
 0x1a6   : > { %v1625_v39 = vpop.f32.mrf.mxu0  ;;  %v1666_v40 = vpop.f32.mrf.mxu1 }
 0x1a7   : > { %v1672_v0 = vadd.f32 %v1625_v39, %v1563_v35  ;;  %v1674_v37 = vadd.f32 %v1666_v40, %v1565_v36 }
 0x1a8   : > { %v1627_v41 = vpop.f32.mrf.mxu0  ;;  %v2717_v42 = vpop.f32.mrf.mxu1 }
 0x1a9   : > { %v1673_v63 = vadd.f32 %v1627_v41, %v1564_v60 }
 0x1aa   : > { %v1629_v43 = vpop.f32.mrf.mxu0  ;;  %v1669_v44 = vpop.f32.mrf.mxu1 }
 0x1ac   : > { %v1630_v45 = vpop.f32.mrf.mxu0  ;;  %v2718_v46 = vpop.f32.mrf.mxu1 }
 0x1ae   : > { %v1734_v10 = vpop.f32.mrf.mxu0  ;;  %v1775_v47 = vpop.f32.mrf.mxu1 }
 0x1af   : > { %v1781_v6 = vadd.f32 %v1734_v10, %v1672_v0  ;;  %v1783_v15 = vadd.f32 %v1775_v47, %v1674_v37 }
 0x1b0   : > { %v1736_v9 = vpop.f32.mrf.mxu0  ;;  %v2723_v12 = vpop.f32.mrf.mxu1 }
 0x1b1   : > { %v1782_v17 = vadd.f32 %v1736_v9, %v1673_v63 }
 0x1b2   : > { %v1738_v48 = vpop.f32.mrf.mxu0  ;;  %v1778_v49 = vpop.f32.mrf.mxu1 }
 0x1b4   : > { %v1739_v50 = vpop.f32.mrf.mxu0  ;;  %v2724_v51 = vpop.f32.mrf.mxu1 }
 0x1b5   : > { %v2333_v50 = vpop.permute.xlu0 %2332 }
 0x1b6   : > { %v1843_v52 = vpop.f32.mrf.mxu0  ;;  %v1884_v53 = vpop.f32.mrf.mxu1 }
 0x1b7   : > { %v1890_v23 = vadd.f32 %v1843_v52, %v1781_v6  ;;  %v1892_v24 = vadd.f32 %v1884_v53, %v1783_v15 }
 0x1b8   : > { %v1845_v54 = vpop.f32.mrf.mxu0  ;;  %v2729_v55 = vpop.f32.mrf.mxu1 }
 0x1b9   : > { %v1891_v25 = vadd.f32 %v1845_v54, %v1782_v17  ;;  %v2342_v54 = vpop.permute.xlu1 %2341 }
 0x1ba   : > { %v1847_v56 = vpop.f32.mrf.mxu0  ;;  %v1887_v57 = vpop.f32.mrf.mxu1 }
 0x1bc   : > { %v1848_v58 = vpop.f32.mrf.mxu0  ;;  %v2730_v61 = vpop.f32.mrf.mxu1 }
 0x1be   : > { %v1952_v62 = vpop.f32.mrf.mxu0  ;;  %v1993_v2 = vpop.f32.mrf.mxu1 }
 0x1bf   : > { %v1999_v31 = vadd.f32 %v1952_v62, %v1890_v23  ;;  %v2001_v32 = vadd.f32 %v1993_v2, %v1892_v24 }
 0x1c0   : > { %v1954_v3 = vpop.f32.mrf.mxu0  ;;  %v2735_v1 = vpop.f32.mrf.mxu1 }
 0x1c1   : > { %v2000_v33 = vadd.f32 %v1954_v3, %v1891_v25 }
 0x1c2   : > { %v1956_v4 = vpop.f32.mrf.mxu0  ;;  %v1996_v7 = vpop.f32.mrf.mxu1 }
 0x1c4   : > { %v1957_v13 = vpop.f32.mrf.mxu0  ;;  %v2736_v14 = vpop.f32.mrf.mxu1 }
 0x1c6   : > { %v2061_v21 = vpop.f32.mrf.mxu0  ;;  %v2102_v22 = vpop.f32.mrf.mxu1 }
 0x1c7   : > { %v2108_v39 = vadd.f32 %v2061_v21, %v1999_v31  ;;  %v2110_v40 = vadd.f32 %v2102_v22, %v2001_v32 }
 0x1c8   : > { %v2063_v29 = vpop.f32.mrf.mxu0  ;;  %v2741_v30 = vpop.f32.mrf.mxu1 }
 0x1c9   : > { %v2109_v41 = vadd.f32 %v2063_v29, %v2000_v33 }
 0x1ca   : > { %v2065_v59 = vpop.f32.mrf.mxu0  ;;  %v2105_v5 = vpop.f32.mrf.mxu1 }
 0x1cc   : > { %v2066_v38 = vpop.f32.mrf.mxu0  ;;  %v2742_v42 = vpop.f32.mrf.mxu1 }
 0x1ce   : > { %v2170_v16 = vpop.f32.mrf.mxu0  ;;  %v2211_v43 = vpop.f32.mrf.mxu1 }
 0x1cf   : > { %v2217_v10 = vadd.f32 %v2170_v16, %v2108_v39  ;;  %v2219_v47 = vadd.f32 %v2211_v43, %v2110_v40 }
 0x1d0   : > { %v2172_v44 = vpop.f32.mrf.mxu0  ;;  %v2747_v45 = vpop.f32.mrf.mxu1 }
 0x1d1   : > { %v2218_v52 = vadd.f32 %v2172_v44, %v2109_v41 }
 0x1d2   : > { %v2174_v46 = vpop.f32.mrf.mxu0  ;;  %v2214_v12 = vpop.f32.mrf.mxu1 }
 0x1d4   : > { %v2175_v48 = vpop.f32.mrf.mxu0  ;;  %v2748_v49 = vpop.f32.mrf.mxu1 }
 0x1d6   : > { %v2279_v9 = vpop.f32.mrf.mxu0  ;;  %v2320_v51 = vpop.f32.mrf.mxu1 }
 0x1d7   : > { %v2326_v53 = vadd.f32 %v2279_v9, %v2217_v10  ;;  %v2328_v55 = vadd.f32 %v2320_v51, %v2219_v47 }
 0x1d8   : > { %v2753_v56 = vpop.f32.mrf.mxu1  ;;  %v2281_v57 = vpop.f32.mrf.mxu0 }
 0x1d9   : > { %v2335_v58 = vmul.f32 %v2333_v50, %v2326_v53  ;;  %v2337_v61 = vmul.f32 %v2333_v50, %v2328_v55  ;;  %v2327_v62 = vadd.f32 %v2281_v57, %v2218_v52 }
 0x1da   : > { %v2283_v2 = vpop.f32.mrf.mxu0  ;;  %v2323_v3 = vpop.f32.mrf.mxu1 }
 0x1db   : > { %v2336_v1 = vmul.f32 %v2333_v50, %v2327_v62  ;;  %v2344_v4 = vadd.f32 %v2342_v54, %v2335_v58  ;;  %v2346_v7 = vadd.f32 %v2342_v54, %v2337_v61 }
 0x1dc   : > { %v2284_v8 = vpop.f32.mrf.mxu0  ;;  %v2754_v11 = vpop.f32.mrf.mxu1 }
 0x1dd   : > { %v2345_v13 = vadd.f32 %v2342_v54, %v2336_v1  ;;  %vm2347_vm11 = vcmp.ge.f32.partialorder %v2344_v4, 0.0  ;;  %vm2349_vm12 = vcmp.ge.f32.partialorder %v2346_v7, 0.0  ;;  %v2350_v14 = vmul.f32 0.01, %v2344_v4 }
 0x1de   : > { %v2352_v18 = vmul.f32 0.01, %v2346_v7 }
 0x1df   : > { %vm2348_vm13 = vcmp.ge.f32.partialorder %v2345_v13, 0.0  ;;  %v2351_v19 = vmul.f32 0.01, %v2345_v13  ;;  %v2353_v20 = vsel %vm2347_vm11, %v2344_v4, %v2350_v14 }
 0x1e0   : > { %v2355_v21 = vsel %vm2349_vm12, %v2346_v7, %v2352_v18  ;;  %2356 = vst [vmem:[%s361_s19] sm:$0xff] %v2353_v20 }
 0x1e1   : > { %v2354_v22 = vsel %vm2348_vm13, %v2345_v13, %v2351_v19  ;;  %2358 = vst [vmem:[%s361_s19 + $0x10] sm:$0xff] %v2355_v21 }
 0x1e2   : > { %2357 = vst [vmem:[%s361_s19 + $0x8] sm:$0xff] %v2354_v22 }
 0x1e3 PF: > { %s16_s23 = sadd.s32 1, %s2823_s23   ;;  %s3346_s21 = smov %s2819_s22 }
 0x1e4   : > { %p13_p5 = scmp.ge.s32.totalorder %s16_s23, 4   ;;  %s3347_s22 = smov %s3349_s24 }
 0x1e6   :  { %15 = sbr.rel (!%p13_p5) target bundleno = 2 (0x2), region = 105 }

</bundles_post_ra>
